<compile_context>
chip_gen: v7x
topology: tpu7x:2x2x1
jax: 0.10.0
libtpu: 0.0.40
codegen_flags: <defaults>
</compile_context>

<pallas_src>
import math

import jax
import jax.numpy as jnp
from jax import lax
from jax.experimental import pallas as pl
from jax.experimental.pallas import tpu as pltpu

SQRT_HALF = 0.7071067811865476
_VMEM_LIMIT = 60 * 1024 * 1024  # <= physical VMEM on every generation


def _gelu_exact(x):
    # exact erf-based GELU, matching torch.nn.GELU() default (approximate='none')
    return 0.5 * x * (1.0 + lax.erf(x * SQRT_HALF))


def _tpu_has_two_tensorcores():
    """True on chips with 2 TensorCores sharing HBM (v7x-class)."""
    try:
        kind = jax.devices()[0].device_kind.lower()
    except Exception:
        return False
    return "7" in kind


# ----------------------------------------------------------------------------
# Shared kernel body: encoder (on the pre-pooled input) + sample + d_linear1.
# Operates on already-loaded values; returns mu, log_var, z, d1.
# ----------------------------------------------------------------------------
def _fused_core(x_mean, eps, w1, b1, w3, b3, w41, b41, w42, b42, wd1, bd1):
    B, S, L = eps.shape
    # e_linear1 (+ the avgpool, already folded into x_mean); bf16 MXU, f32 acc
    h1 = jnp.dot(x_mean.astype(jnp.bfloat16), w1,
                 preferred_element_type=jnp.float32) + b1
    # e_linear3 + GELU (bf16 weight, f32 acc)
    h3 = _gelu_exact(jnp.dot(h1.astype(jnp.bfloat16), w3,
                             preferred_element_type=jnp.float32) + b3)
    # e_linear4_1 / e_linear4_2 heads
    mu = jnp.dot(h3, w41, preferred_element_type=jnp.float32) + b41
    lv = jnp.dot(h3, w42, preferred_element_type=jnp.float32) + b42
    # reparameterization sample (unsqueeze + repeat_interleave over S)
    std = jnp.exp(0.5 * lv)
    z = mu[:, None, :] + std[:, None, :] * eps                 # (B, S, L)
    # d_linear1 + GELU as ONE (B*S, L) @ (L, N1) MXU dot
    d1 = _gelu_exact(jnp.dot(z.reshape(B * S, L), wd1,
                             preferred_element_type=jnp.float32) + bd1)
    return mu, lv, z, d1


# ----------------------------------------------------------------------------
# Fully-fused forward (encoder + sample + d_linear1 + d_linear2) in ONE
# pallas_call. Used on single-TensorCore chips (v5e / v6e).
# Output rec_flat is already sliced to the d_out (=6561) valid features so
# the wrapper does only a free reshape.
# ----------------------------------------------------------------------------
def ivae_fused_full_pallas(x_mean_pad, eps, w1_bf16, b1, w3_bf16, b3,
                           w41, b41, w42, b42, wd1, bd1,
                           wd2_bf16, bd2, d_out):
    B, DP = x_mean_pad.shape
    _, S, L = eps.shape

    def kernel(x_ref, eps_ref, w1_ref, b1_ref, w3_ref, b3_ref,
               w41_ref, b41_ref, w42_ref, b42_ref, wd1_ref, bd1_ref,
               wd2_ref, bd2_ref,
               mu_ref, lv_ref, z_ref, rec_ref):
        mu, lv, z, d1 = _fused_core(
            x_ref[...], eps_ref[...], w1_ref[...], b1_ref[...],
            w3_ref[...], b3_ref[...], w41_ref[...], b41_ref[...],
            w42_ref[...], b42_ref[...], wd1_ref[...], bd1_ref[...])
        mu_ref[...] = mu
        lv_ref[...] = lv
        z_ref[...] = z
        # d_linear2 (bf16 weight, f32 acc), then drop the padded columns so
        # the HBM write is only the valid 6561 features.
        d2 = jnp.dot(d1.astype(jnp.bfloat16), wd2_ref[...],
                     preferred_element_type=jnp.float32) + bd2_ref[...]
        rec_ref[...] = d2[:, :d_out]

    out_shapes = (
        jax.ShapeDtypeStruct((B, L), jnp.float32),          # z_mean
        jax.ShapeDtypeStruct((B, L), jnp.float32),          # z_log_var
        jax.ShapeDtypeStruct((B, S, L), jnp.float32),       # z
        jax.ShapeDtypeStruct((B * S, d_out), jnp.float32),  # recons (flat)
    )
    return pl.pallas_call(
        kernel, out_shape=out_shapes,
        compiler_params=pltpu.CompilerParams(vmem_limit_bytes=_VMEM_LIMIT),
    )(x_mean_pad, eps, w1_bf16, b1.reshape(1, -1), w3_bf16, b3.reshape(1, -1),
      w41, b41.reshape(1, -1), w42, b42.reshape(1, -1),
      wd1, bd1.reshape(1, -1), wd2_bf16, bd2.reshape(1, -1))


# ----------------------------------------------------------------------------
# Encoder + sample + d_linear1 only (used on 2-TensorCore chips, where
# d_linear2 runs as its own 2-way "parallel" kernel).
# ----------------------------------------------------------------------------
def ivae_fused_enc_pallas(x_mean_pad, eps, w1_bf16, b1, w3_bf16, b3,
                          w41, b41, w42, b42, wd1, bd1):
    B, DP = x_mean_pad.shape
    _, S, L = eps.shape
    N1 = w1_bf16.shape[1]

    def kernel(x_ref, eps_ref, w1_ref, b1_ref, w3_ref, b3_ref,
               w41_ref, b41_ref, w42_ref, b42_ref, wd1_ref, bd1_ref,
               mu_ref, lv_ref, z_ref, d1_ref):
        mu, lv, z, d1 = _fused_core(
            x_ref[...], eps_ref[...], w1_ref[...], b1_ref[...],
            w3_ref[...], b3_ref[...], w41_ref[...], b41_ref[...],
            w42_ref[...], b42_ref[...], wd1_ref[...], bd1_ref[...])
        mu_ref[...] = mu
        lv_ref[...] = lv
        z_ref[...] = z
        d1_ref[...] = d1

    out_shapes = (
        jax.ShapeDtypeStruct((B, L), jnp.float32),        # z_mean
        jax.ShapeDtypeStruct((B, L), jnp.float32),        # z_log_var
        jax.ShapeDtypeStruct((B, S, L), jnp.float32),     # z
        jax.ShapeDtypeStruct((B * S, N1), jnp.float32),   # d1 (post-GELU)
    )
    return pl.pallas_call(
        kernel, out_shape=out_shapes,
        compiler_params=pltpu.CompilerParams(vmem_limit_bytes=_VMEM_LIMIT),
    )(x_mean_pad, eps, w1_bf16, b1.reshape(1, -1), w3_bf16, b3.reshape(1, -1),
      w41, b41.reshape(1, -1), w42, b42.reshape(1, -1),
      wd1, bd1.reshape(1, -1))


# ----------------------------------------------------------------------------
# d_linear2 as its own kernel (v7x path only): y = d1 @ W + b, W (256, DP)
# in bf16, tiled 2-ways over N ("parallel" -> one lane-dense block per
# TensorCore).  No reduction grid axis, so results go straight to o_ref.
# ----------------------------------------------------------------------------
def d_linear2_pallas(d1, w_bf16, b):
    M, K = d1.shape
    Kw, N = w_bf16.shape
    assert K == Kw and b.shape == (N,)
    tn = N // 2 if (N % 2 == 0 and (N // 2) % 128 == 0) else N
    nblocks = N // tn

    def kernel(x_ref, w_ref, b_ref, o_ref):
        o_ref[...] = (jnp.dot(x_ref[...].astype(jnp.bfloat16), w_ref[...],
                              preferred_element_type=jnp.float32)
                      + b_ref[...]).astype(o_ref.dtype)

    return pl.pallas_call(
        kernel,
        out_shape=jax.ShapeDtypeStruct((M, N), jnp.float32),
        grid_spec=pltpu.PrefetchScalarGridSpec(
            num_scalar_prefetch=0,
            grid=(nblocks,),
            in_specs=[
                pl.BlockSpec((M, K), lambda j: (0, 0)),
                pl.BlockSpec((K, tn), lambda j: (0, j)),
                pl.BlockSpec((1, tn), lambda j: (0, j)),
            ],
            out_specs=pl.BlockSpec((M, tn), lambda j: (0, j)),
        ),
        compiler_params=pltpu.CompilerParams(
            dimension_semantics=("parallel",),
            vmem_limit_bytes=_VMEM_LIMIT),
    )(d1, w_bf16, b.reshape(1, N))


# ----------------------------------------------------------------------------
# Parameter init (deterministic, PyTorch nn.Linear-style uniform)
# ----------------------------------------------------------------------------
def init_linear(key, fan_in, fan_out):
    kw, kb = jax.random.split(key)
    bound = 1.0 / math.sqrt(fan_in)
    w = jax.random.uniform(kw, (fan_in, fan_out), jnp.float32, -bound, bound)
    b = jax.random.uniform(kb, (fan_out,), jnp.float32, -bound, bound)
    return w, b


if __name__ == "__main__":
    # SMALL shapes consistent with the module: batch=2, n_samples=8,
    # dim_latent=32, n_nodes1=256 (shrunk from 4096), spatial fixed at 81x81.
    B, S, H, W = 2, 8, 81, 81
    L = 32            # dim_latent
    N1 = 256          # n_nodes1
    D = H * W         # 6561
    DP = ((D + 127) // 128) * 128   # 6656, lane-padded feature dim

    root = jax.random.PRNGKey(0)
    kx, keps, kp = jax.random.split(root, 3)
    x = jax.random.normal(kx, (B, S, H, W), jnp.float32)
    # TODO(synk): torch.distributions.Normal(0,1) CUDA RNG replaced by explicit eps.
    eps = jax.random.normal(keps, (B, S, L), jnp.float32)

    ks = jax.random.split(kp, 6)
    w1, b1 = init_linear(ks[0], D, N1)     # e_linear1
    w3, b3 = init_linear(ks[1], N1, N1)    # e_linear3
    w41, b41 = init_linear(ks[2], N1, L)   # e_linear4_1
    w42, b42 = init_linear(ks[3], N1, L)   # e_linear4_2
    wd1, bd1 = init_linear(ks[4], L, N1)   # d_linear1
    wd2, bd2 = init_linear(ks[5], N1, D)   # d_linear2
    # (e_linear2 and maxpool exist in __init__ but are unused in forward.)

    # Lane-pad the 6561-feature dims to DP (zero pad => numerically benign);
    # store the large / medium weights in bf16 to cut HBM traffic.
    w1p_bf16 = jnp.pad(w1, ((0, DP - D), (0, 0))).astype(jnp.bfloat16)
    w3_bf16 = w3.astype(jnp.bfloat16)
    wd2p_bf16 = jnp.pad(wd2, ((0, 0), (0, DP - D))).astype(jnp.bfloat16)
    bd2p = jnp.pad(bd2, (0, DP - D))

    TWO_TC = _tpu_has_two_tensorcores()

    @jax.jit
    def ivae_forward(x, eps):
        # avgpool over n_samples commutes with the affine e_linear1:
        #   avgpool(e_linear1(x)) == e_linear1(mean_S(x)), so pool (and pad)
        # in the wrapper; the kernel input for x is only (B, DP).
        x_mean = jnp.mean(x.reshape(B, S, D), axis=1)            # (B, D)
        x_mean_pad = jnp.pad(x_mean, ((0, 0), (0, DP - D)))      # (B, DP)
        if not TWO_TC:
            # v5e / v6e: the whole forward in ONE pallas_call.
            z_mean, z_log_var, z, rec_flat = ivae_fused_full_pallas(
                x_mean_pad, eps, w1p_bf16, b1, w3_bf16, b3,
                w41, b41, w42, b42, wd1, bd1, wd2p_bf16, bd2p, D)
        else:
            # v7x: split the dominant wd2 stream across both TensorCores.
            z_mean, z_log_var, z, d1 = ivae_fused_enc_pallas(
                x_mean_pad, eps, w1p_bf16, b1, w3_bf16, b3,
                w41, b41, w42, b42, wd1, bd1)
            d2 = d_linear2_pallas(d1, wd2p_bf16, bd2p)
            rec_flat = d2[:, :D]
        recons = rec_flat.reshape(B, S, H, W)                    # Unflatten(2,(81,81))
        return recons, x, z, z_mean, z_log_var

    recons, x_out, z, z_mean, z_log_var = jax.block_until_ready(
        ivae_forward(x, eps))

    # pure-JAX reference (mirrors the PyTorch forward exactly, f32 weights)
    def ivae_ref(x, eps):
        hp = lax.Precision.HIGHEST
        x_flat = x.reshape(B, S, D)
        h1 = jnp.matmul(x_flat, w1, precision=hp) + b1
        x_pool = jnp.mean(h1, axis=1)
        h3 = jax.nn.gelu(jnp.matmul(x_pool, w3, precision=hp) + b3,
                         approximate=False)
        mu = jnp.matmul(h3, w41, precision=hp) + b41
        lv = jnp.matmul(h3, w42, precision=hp) + b42
        zz = mu[:, None, :] + jnp.exp(0.5 * lv)[:, None, :] * eps
        d1 = jax.nn.gelu(jnp.matmul(zz, wd1, precision=hp) + bd1,
                         approximate=False)
        d2 = jnp.matmul(d1, wd2, precision=hp) + bd2
        return d2.reshape(B, S, H, W), zz, mu, lv

    r_ref, z_ref, mu_ref, lv_ref = ivae_ref(x, eps)
    assert recons.shape == (B, S, H, W)
    assert z.shape == (B, S, L) and z_mean.shape == (B, L)
    assert jnp.allclose(z_mean, mu_ref, rtol=2e-2, atol=2e-2)
    assert jnp.allclose(z_log_var, lv_ref, rtol=2e-2, atol=2e-2)
    assert jnp.allclose(z, z_ref, rtol=2e-2, atol=2e-2)
    assert jnp.allclose(recons, r_ref, rtol=2e-2, atol=2e-2)

    print("KERNEL_OK")
</pallas_src>

<mosaic_0001>
module attributes {stable_mosaic.version = 11 : i64} {
  func.func @kernel(%arg0: memref<2x6656xf32, #tpu.memory_space<vmem>>, %arg1: memref<2x8x32xf32, #tpu.memory_space<vmem>>, %arg2: memref<6656x256xbf16, #tpu.memory_space<vmem>>, %arg3: memref<1x256xf32, #tpu.memory_space<vmem>>, %arg4: memref<256x256xbf16, #tpu.memory_space<vmem>>, %arg5: memref<1x256xf32, #tpu.memory_space<vmem>>, %arg6: memref<256x32xf32, #tpu.memory_space<vmem>>, %arg7: memref<1x32xf32, #tpu.memory_space<vmem>>, %arg8: memref<256x32xf32, #tpu.memory_space<vmem>>, %arg9: memref<1x32xf32, #tpu.memory_space<vmem>>, %arg10: memref<32x256xf32, #tpu.memory_space<vmem>>, %arg11: memref<1x256xf32, #tpu.memory_space<vmem>>, %arg12: memref<256x6656xbf16, #tpu.memory_space<vmem>>, %arg13: memref<1x6656xf32, #tpu.memory_space<vmem>>, %arg14: memref<2x32xf32, #tpu.memory_space<vmem>>, %arg15: memref<2x32xf32, #tpu.memory_space<vmem>>, %arg16: memref<2x8x32xf32, #tpu.memory_space<vmem>>, %arg17: memref<16x6561xf32, #tpu.memory_space<vmem>>) attributes {dimension_semantics = [], scalar_prefetch = 0 : i64, scratch_operands = 0 : i64, tpu.core_type = #tpu.core_type<tc>} {
    %c0 = arith.constant 0 : index
    %c0_0 = arith.constant 0 : index
    %0 = vector.load %arg0[%c0, %c0_0] : memref<2x6656xf32, #tpu.memory_space<vmem>>, vector<2x6656xf32>
    %c0_1 = arith.constant 0 : index
    %c0_2 = arith.constant 0 : index
    %c0_3 = arith.constant 0 : index
    %1 = vector.load %arg1[%c0_1, %c0_2, %c0_3] : memref<2x8x32xf32, #tpu.memory_space<vmem>>, vector<2x8x32xf32>
    %c0_4 = arith.constant 0 : index
    %c0_5 = arith.constant 0 : index
    %2 = vector.load %arg2[%c0_4, %c0_5] : memref<6656x256xbf16, #tpu.memory_space<vmem>>, vector<6656x256xbf16>
    %c0_6 = arith.constant 0 : index
    %c0_7 = arith.constant 0 : index
    %3 = vector.load %arg3[%c0_6, %c0_7] : memref<1x256xf32, #tpu.memory_space<vmem>>, vector<1x256xf32>
    %c0_8 = arith.constant 0 : index
    %c0_9 = arith.constant 0 : index
    %4 = vector.load %arg4[%c0_8, %c0_9] : memref<256x256xbf16, #tpu.memory_space<vmem>>, vector<256x256xbf16>
    %c0_10 = arith.constant 0 : index
    %c0_11 = arith.constant 0 : index
    %5 = vector.load %arg5[%c0_10, %c0_11] : memref<1x256xf32, #tpu.memory_space<vmem>>, vector<1x256xf32>
    %c0_12 = arith.constant 0 : index
    %c0_13 = arith.constant 0 : index
    %6 = vector.load %arg6[%c0_12, %c0_13] : memref<256x32xf32, #tpu.memory_space<vmem>>, vector<256x32xf32>
    %c0_14 = arith.constant 0 : index
    %c0_15 = arith.constant 0 : index
    %7 = vector.load %arg7[%c0_14, %c0_15] : memref<1x32xf32, #tpu.memory_space<vmem>>, vector<1x32xf32>
    %c0_16 = arith.constant 0 : index
    %c0_17 = arith.constant 0 : index
    %8 = vector.load %arg8[%c0_16, %c0_17] : memref<256x32xf32, #tpu.memory_space<vmem>>, vector<256x32xf32>
    %c0_18 = arith.constant 0 : index
    %c0_19 = arith.constant 0 : index
    %9 = vector.load %arg9[%c0_18, %c0_19] : memref<1x32xf32, #tpu.memory_space<vmem>>, vector<1x32xf32>
    %c0_20 = arith.constant 0 : index
    %c0_21 = arith.constant 0 : index
    %10 = vector.load %arg10[%c0_20, %c0_21] : memref<32x256xf32, #tpu.memory_space<vmem>>, vector<32x256xf32>
    %c0_22 = arith.constant 0 : index
    %c0_23 = arith.constant 0 : index
    %11 = vector.load %arg11[%c0_22, %c0_23] : memref<1x256xf32, #tpu.memory_space<vmem>>, vector<1x256xf32>
    %12 = arith.truncf %0 : vector<2x6656xf32> to vector<2x6656xbf16>
    %cst = arith.constant dense<0.000000e+00> : vector<2x256xf32>
    %13 = tpu.matmul %12, %2, %cst {dimension_numbers = #tpu.dot_dimension_numbers<[1], [0], [0], [1], [0, 0, 1, 1], [], []>} : vector<2x6656xbf16>, vector<6656x256xbf16>, vector<2x256xf32> -> vector<2x256xf32>
    %14 = vector.broadcast %3 : vector<1x256xf32> to vector<2x256xf32>
    %15 = arith.addf %13, %14 : vector<2x256xf32>
    %16 = arith.truncf %15 : vector<2x256xf32> to vector<2x256xbf16>
    %cst_24 = arith.constant dense<0.000000e+00> : vector<2x256xf32>
    %17 = tpu.matmul %16, %4, %cst_24 {dimension_numbers = #tpu.dot_dimension_numbers<[1], [0], [0], [1], [0, 0, 1, 1], [], []>} : vector<2x256xbf16>, vector<256x256xbf16>, vector<2x256xf32> -> vector<2x256xf32>
    %18 = vector.broadcast %5 : vector<1x256xf32> to vector<2x256xf32>
    %19 = arith.addf %17, %18 : vector<2x256xf32>
    %cst_25 = arith.constant 5.000000e-01 : f32
    %20 = vector.broadcast %cst_25 : f32 to vector<2x256xf32>
    %21 = arith.mulf %20, %19 : vector<2x256xf32>
    %cst_26 = arith.constant 0.707106769 : f32
    %22 = vector.broadcast %cst_26 : f32 to vector<2x256xf32>
    %23 = arith.mulf %19, %22 : vector<2x256xf32>
    %24 = math.erf %23 : vector<2x256xf32>
    %cst_27 = arith.constant 1.000000e+00 : f32
    %25 = vector.broadcast %cst_27 : f32 to vector<2x256xf32>
    %26 = arith.addf %25, %24 : vector<2x256xf32>
    %27 = arith.mulf %21, %26 : vector<2x256xf32>
    %cst_28 = arith.constant dense<0.000000e+00> : vector<2x32xf32>
    %28 = tpu.matmul %27, %6, %cst_28 {dimension_numbers = #tpu.dot_dimension_numbers<[1], [0], [0], [1], [0, 0, 1, 1], [], []>} : vector<2x256xf32>, vector<256x32xf32>, vector<2x32xf32> -> vector<2x32xf32>
    %29 = vector.broadcast %7 : vector<1x32xf32> to vector<2x32xf32>
    %30 = arith.addf %28, %29 : vector<2x32xf32>
    %cst_29 = arith.constant dense<0.000000e+00> : vector<2x32xf32>
    %31 = tpu.matmul %27, %8, %cst_29 {dimension_numbers = #tpu.dot_dimension_numbers<[1], [0], [0], [1], [0, 0, 1, 1], [], []>} : vector<2x256xf32>, vector<256x32xf32>, vector<2x32xf32> -> vector<2x32xf32>
    %32 = vector.broadcast %9 : vector<1x32xf32> to vector<2x32xf32>
    %33 = arith.addf %31, %32 : vector<2x32xf32>
    %cst_30 = arith.constant 5.000000e-01 : f32
    %34 = vector.broadcast %cst_30 : f32 to vector<2x32xf32>
    %35 = arith.mulf %34, %33 : vector<2x32xf32>
    %36 = math.exp %35 : vector<2x32xf32>
    %37 = vector.shape_cast %30 : vector<2x32xf32> to vector<2x1x32xf32>
    %38 = vector.shape_cast %36 : vector<2x32xf32> to vector<2x1x32xf32>
    %39 = vector.broadcast %38 : vector<2x1x32xf32> to vector<2x8x32xf32>
    %40 = arith.mulf %39, %1 : vector<2x8x32xf32>
    %41 = vector.broadcast %37 : vector<2x1x32xf32> to vector<2x8x32xf32>
    %42 = arith.addf %41, %40 : vector<2x8x32xf32>
    %43 = vector.shape_cast %42 : vector<2x8x32xf32> to vector<16x32xf32>
    %cst_31 = arith.constant dense<0.000000e+00> : vector<16x256xf32>
    %44 = tpu.matmul %43, %10, %cst_31 {dimension_numbers = #tpu.dot_dimension_numbers<[1], [0], [0], [1], [0, 0, 1, 1], [], []>} : vector<16x32xf32>, vector<32x256xf32>, vector<16x256xf32> -> vector<16x256xf32>
    %45 = vector.broadcast %11 : vector<1x256xf32> to vector<16x256xf32>
    %46 = arith.addf %44, %45 : vector<16x256xf32>
    %cst_32 = arith.constant 5.000000e-01 : f32
    %47 = vector.broadcast %cst_32 : f32 to vector<16x256xf32>
    %48 = arith.mulf %47, %46 : vector<16x256xf32>
    %cst_33 = arith.constant 0.707106769 : f32
    %49 = vector.broadcast %cst_33 : f32 to vector<16x256xf32>
    %50 = arith.mulf %46, %49 : vector<16x256xf32>
    %51 = math.erf %50 : vector<16x256xf32>
    %cst_34 = arith.constant 1.000000e+00 : f32
    %52 = vector.broadcast %cst_34 : f32 to vector<16x256xf32>
    %53 = arith.addf %52, %51 : vector<16x256xf32>
    %54 = arith.mulf %48, %53 : vector<16x256xf32>
    %c0_35 = arith.constant 0 : index
    %c0_36 = arith.constant 0 : index
    %55 = vector.load %arg14[%c0_35, %c0_36] : memref<2x32xf32, #tpu.memory_space<vmem>>, vector<2x32xf32>
    tpu.vector_store %arg14[%c0_35, %c0_36], %30 {strides = array<i32>} : memref<2x32xf32, #tpu.memory_space<vmem>>, vector<2x32xf32>,
    %c0_37 = arith.constant 0 : index
    %c0_38 = arith.constant 0 : index
    %56 = vector.load %arg15[%c0_37, %c0_38] : memref<2x32xf32, #tpu.memory_space<vmem>>, vector<2x32xf32>
    tpu.vector_store %arg15[%c0_37, %c0_38], %33 {strides = array<i32>} : memref<2x32xf32, #tpu.memory_space<vmem>>, vector<2x32xf32>,
    %c0_39 = arith.constant 0 : index
    %c0_40 = arith.constant 0 : index
    %c0_41 = arith.constant 0 : index
    %57 = vector.load %arg16[%c0_39, %c0_40, %c0_41] : memref<2x8x32xf32, #tpu.memory_space<vmem>>, vector<2x8x32xf32>
    tpu.vector_store %arg16[%c0_39, %c0_40, %c0_41], %42 {strides = array<i32>} : memref<2x8x32xf32, #tpu.memory_space<vmem>>, vector<2x8x32xf32>,
    %58 = arith.truncf %54 : vector<16x256xf32> to vector<16x256xbf16>
    %c0_42 = arith.constant 0 : index
    %c0_43 = arith.constant 0 : index
    %59 = vector.load %arg12[%c0_42, %c0_43] : memref<256x6656xbf16, #tpu.memory_space<vmem>>, vector<256x6656xbf16>
    %cst_44 = arith.constant dense<0.000000e+00> : vector<16x6656xf32>
    %60 = tpu.matmul %58, %59, %cst_44 {dimension_numbers = #tpu.dot_dimension_numbers<[1], [0], [0], [1], [0, 0, 1, 1], [], []>} : vector<16x256xbf16>, vector<256x6656xbf16>, vector<16x6656xf32> -> vector<16x6656xf32>
    %c0_45 = arith.constant 0 : index
    %c0_46 = arith.constant 0 : index
    %61 = vector.load %arg13[%c0_45, %c0_46] : memref<1x6656xf32, #tpu.memory_space<vmem>>, vector<1x6656xf32>
    %62 = vector.broadcast %61 : vector<1x6656xf32> to vector<16x6656xf32>
    %63 = arith.addf %60, %62 : vector<16x6656xf32>
    %64 = vector.extract_strided_slice %63 {offsets = [0, 0], sizes = [16, 6561], strides = [1, 1]} : vector<16x6656xf32> to vector<16x6561xf32>
    %c0_47 = arith.constant 0 : index
    %c0_48 = arith.constant 0 : index
    %65 = vector.load %arg17[%c0_47, %c0_48] : memref<16x6561xf32, #tpu.memory_space<vmem>>, vector<16x6561xf32>
    tpu.vector_store %arg17[%c0_47, %c0_48], %64 {strides = array<i32>} : memref<16x6561xf32, #tpu.memory_space<vmem>>, vector<16x6561xf32>,
    return
  }
}

</mosaic_0001>

<bundles_post_ra>
// kernel: ivae_forward.1
= control target key start
LH: loop header
LB: loop body
LE: loop exit
PB: predicated region body
PF: predicated region fallthrough
CT: control target
= control target key end

     0   :  { %s21976_s0 = inlined_call_operand.vmem [shape: f32[2,6656], index: 0, kind: input, shape index: {}]   ;;  %s21977_s1 = inlined_call_operand.vmem [shape: f32[2,8,32], index: 1, kind: input, shape index: {}]   ;;  %s21978_s2 = inlined_call_operand.vmem [shape: bf16[6656,256], index: 2, kind: input, shape index: {}]   ;;  %s21979_s3 = inlined_call_operand.hbm [shape: f32[1,256], index: 3, kind: input, shape index: {}]   ;;  %s21980_s4 = inlined_call_operand.hbm [shape: bf16[256,256], index: 4, kind: input, shape index: {}]   ;;  %s21981_s5 = inlined_call_operand.hbm [shape: f32[1,256], index: 5, kind: input, shape index: {}]   ;;  %s21982_s6 = inlined_call_operand.hbm [shape: f32[256,32], index: 6, kind: input, shape index: {}]   ;;  %s21983_s7 = inlined_call_operand.hbm [shape: f32[1,32], index: 7, kind: input, shape index: {}]   ;;  %s21984_s8 = inlined_call_operand.hbm [shape: f32[256,32], index: 8, kind: input, shape index: {}]   ;;  %s21985_s9 = inlined_call_operand.hbm [shape: f32[1,32], index: 9, kind: input, shape index: {}]   ;;  %s21986_s10 = inlined_call_operand.vmem [shape: f32[32,256], index: 10, kind: input, shape index: {}]   ;;  %s21987_s11 = inlined_call_operand.hbm [shape: f32[1,256], index: 11, kind: input, shape index: {}]   ;;  %s21988_s12 = inlined_call_operand.hbm [shape: bf16[256,6656], index: 12, kind: input, shape index: {}]   ;;  %s21989_s13 = inlined_call_operand.vmem [shape: f32[1,6656], index: 13, kind: input, shape index: {}]   ;;  %s21990_s14 = inlined_call_operand.hbm [shape: f32[2,32], index: 14, kind: output, shape index: {0}]   ;;  %s21991_s15 = inlined_call_operand.hbm [shape: f32[2,32], index: 15, kind: output, shape index: {1}]   ;;  %s21992_s16 = inlined_call_operand.hbm [shape: f32[2,8,32], index: 16, kind: output, shape index: {2}]   ;;  %s21993_s17 = inlined_call_operand.hbm [shape: f32[16,6561], index: 17, kind: output, shape index: {3}]  }
   0x1   :  { %21997 = sst [smem:[#allocation31_spill]] %s21976_s0 }
   0x2   :  { %21998 = sst [smem:[#allocation32_spill]] %s21977_s1 }
   0x3   :  { %21999 = sst [smem:[#allocation33_spill]] %s21993_s17 }
   0x4   :  { %23 = vsyncpa [#allocation3], 0 }
   0x5   :  { %24 = vsyncpa [#allocation6], 0 }
   0x6   :  { %25 = vsyncpa [#allocation9], 0 }
   0x7   :  { %26 = vsyncpa [#allocation12], 0 }
   0x8   :  { %27 = vsyncpa [#allocation15], 0 }
   0x9   :  { %28 = vsyncpa [#allocation4], 0 }
   0xa   :  { %29 = vsyncpa [#allocation19], 0 }
   0xb   :  { %30 = vsyncpa [#allocation22], 0  ;;  %s18661_s24 = smov [#allocation5]   ;;  %s18359_s28 = scalar_lea.hbm %s21980_s4, 4096 }
   0xc   :  { %s52_s25 = sshll.u32 %s18661_s24, 4  ;;  %p18360_p0 = scmp.ne.s32.totalorder %s21980_s4, %s18359_s28  ;;  %s53_s25 = int_to_ptr.vmem [resolvable:$true] %s52_s25 }
   0xd   :  { %p18363_p1 = scmp.lt.u32.totalorder %s18359_s28, %s21980_s4 }
   0xf   :  { %p18365_p2 = pnand %p18363_p1, %p18360_p0 }
  0x11   :  { %18368 = shalt.err (!%p18365_p2)
}
  0x12   :  { %s18369_s19 = scalar_lea.vmem %s53_s25, 4096  ;;  %p18374_p4 = scmp.lt.s32.totalorder %s53_s25, %s53_s25 }
  0x13   :  { %p18370_p3 = scmp.ne.s32.totalorder %s53_s25, %s18369_s19  ;;  %p18375_p5 = scmp.lt.s32.totalorder %s18369_s19, %s18369_s19 }
  0x15   :  { %p18376_p6 = por %p18375_p5, %p18374_p4 }
  0x17   :  { %p18377_p7 = pnand %p18376_p6, %p18370_p3 }
  0x19   :  { %18380 = shalt.err (!%p18377_p7)
}
  0x1a   :  { %s18662_s1 = smov 128   ;;  %s18663_s20 = smov 8  }
  0x1b   :  { %58 = dma.hbm_to_vmem [thread:$0]  %s21980_s4, 4096, %s53_s25, [#allocation6], %s18662_s1, %s18662_s1, %s18663_s20  }
  0x1c   :  { %s18664_s23 = smov [#allocation8]   ;;  %s18665_s26 = smov [#allocation11]  }
  0x1d   :  { %s74_s24 = sshll.u32 %s18664_s23, 4  ;;  %s96_s27 = sshll.u32 %s18665_s26, 4  ;;  %s75_s24 = int_to_ptr.vmem [resolvable:$true] %s74_s24  ;;  %s97_s27 = int_to_ptr.vmem [resolvable:$true] %s96_s27 }
  0x1e   :  { %s18381_s0 = scalar_lea.hbm %s21982_s6, 4096 }
  0x1f   :  { %p18382_p8 = scmp.ne.s32.totalorder %s21982_s6, %s18381_s0  ;;  %p18385_p9 = scmp.lt.u32.totalorder %s18381_s0, %s21982_s6 }
  0x21   :  { %p18387_p10 = pnand %p18385_p9, %p18382_p8 }
  0x23   :  { %18390 = shalt.err (!%p18387_p10)
}
  0x24   :  { %s18391_s4 = scalar_lea.vmem %s75_s24, 4096  ;;  %p18396_p12 = scmp.lt.s32.totalorder %s75_s24, %s75_s24 }
  0x25   :  { %p18392_p11 = scmp.ne.s32.totalorder %s75_s24, %s18391_s4  ;;  %p18397_p13 = scmp.lt.s32.totalorder %s18391_s4, %s18391_s4 }
  0x27   :  { %p18398_p0 = por %p18397_p13, %p18396_p12 }
  0x29   :  { %p18399_p1 = pnand %p18398_p0, %p18392_p11 }
  0x2b   :  { %18402 = shalt.err (!%p18399_p1)
}
  0x2c   :  { %80 = dma.hbm_to_vmem [thread:$0]  %s21982_s6, 4096, %s75_s24, [#allocation9], %s18662_s1, %s18662_s1, %s18663_s20  }
  0x2d   :  { %s18403_s23 = scalar_lea.hbm %s21984_s8, 4096 }
  0x2e   :  { %p18404_p2 = scmp.ne.s32.totalorder %s21984_s8, %s18403_s23  ;;  %p18407_p3 = scmp.lt.u32.totalorder %s18403_s23, %s21984_s8 }
  0x30   :  { %p18409_p4 = pnand %p18407_p3, %p18404_p2 }
  0x32   :  { %18412 = shalt.err (!%p18409_p4)
}
  0x33   :  { %s18413_s30 = scalar_lea.vmem %s97_s27, 4096  ;;  %p18418_p6 = scmp.lt.s32.totalorder %s97_s27, %s97_s27 }
  0x34   :  { %p18414_p5 = scmp.ne.s32.totalorder %s97_s27, %s18413_s30  ;;  %p18419_p7 = scmp.lt.s32.totalorder %s18413_s30, %s18413_s30 }
  0x36   :  { %p18420_p8 = por %p18419_p7, %p18418_p6 }
  0x38   :  { %p18421_p9 = pnand %p18420_p8, %p18414_p5 }
  0x3a   :  { %18424 = shalt.err (!%p18421_p9)
}
  0x3b   :  { %102 = dma.hbm_to_vmem [thread:$0]  %s21984_s8, 4096, %s97_s27, [#allocation12], %s18662_s1, %s18662_s1, %s18663_s20  }
  0x3c   :  { %s18666_s18 = smov [#allocation14]   ;;  %s18667_s4 = smov [#allocation2]  }
  0x3d   :  { %s121_s19 = sshll.u32 %s18666_s18, 4  ;;  %s43_s25 = sshll.u32 %s18667_s4, 4  ;;  %s122_s19 = int_to_ptr.vmem [resolvable:$true] %s121_s19  ;;  %s44_s25 = int_to_ptr.vmem [resolvable:$true] %s43_s25 }
  0x3e   :  { %s18425_s17 = scalar_lea.hbm %s21987_s11, 32 }
  0x3f   :  { %p18426_p10 = scmp.ne.s32.totalorder %s21987_s11, %s18425_s17  ;;  %p18429_p11 = scmp.lt.u32.totalorder %s18425_s17, %s21987_s11 }
  0x41   :  { %p18431_p12 = pnand %p18429_p11, %p18426_p10 }
  0x43   :  { %18434 = shalt.err (!%p18431_p12)
}
  0x44   :  { %s18435_s8 = scalar_lea.vmem %s122_s19, 32  ;;  %p18440_p0 = scmp.lt.s32.totalorder %s122_s19, %s122_s19 }
  0x45   :  { %p18436_p13 = scmp.ne.s32.totalorder %s122_s19, %s18435_s8  ;;  %p18441_p1 = scmp.lt.s32.totalorder %s18435_s8, %s18435_s8 }
  0x47   :  { %p18442_p2 = por %p18441_p1, %p18440_p0 }
  0x49   :  { %p18443_p3 = pnand %p18442_p2, %p18436_p13 }
  0x4b   :  { %18446 = shalt.err (!%p18443_p3)
}
  0x4c   :  { %124 = dma.hbm_to_vmem [thread:$0]  %s21987_s11, 32, %s122_s19, [#allocation15]  }
  0x4d   :  { %s18447_s24 = scalar_lea.hbm %s21979_s3, 32 }
  0x4e   :  { %p18448_p4 = scmp.ne.s32.totalorder %s21979_s3, %s18447_s24  ;;  %p18451_p5 = scmp.lt.u32.totalorder %s18447_s24, %s21979_s3 }
  0x50   :  { %p18453_p6 = pnand %p18451_p5, %p18448_p4 }
  0x52   :  { %18456 = shalt.err (!%p18453_p6)
}
  0x53   :  { %s18457_s17 = scalar_lea.vmem %s44_s25, 32  ;;  %p18462_p8 = scmp.lt.s32.totalorder %s44_s25, %s44_s25 }
  0x54   :  { %p18458_p7 = scmp.ne.s32.totalorder %s44_s25, %s18457_s17  ;;  %p18463_p9 = scmp.lt.s32.totalorder %s18457_s17, %s18457_s17 }
  0x56   :  { %p18464_p10 = por %p18463_p9, %p18462_p8 }
  0x58   :  { %p18465_p11 = pnand %p18464_p10, %p18458_p7 }
  0x5a   :  { %18468 = shalt.err (!%p18465_p11)
}
  0x5b   :  { %46 = dma.hbm_to_vmem [thread:$0]  %s21979_s3, 32, %s44_s25, [#allocation3]  }
  0x5c   :  { %s18668_s23 = smov [#allocation7]   ;;  %s18669_s28 = smov [#allocation10]  }
  0x5d   :  { %s65_s26 = sshll.u32 %s18668_s23, 4  ;;  %s87_s29 = sshll.u32 %s18669_s28, 4  ;;  %s66_s26 = int_to_ptr.vmem [resolvable:$true] %s65_s26  ;;  %s88_s29 = int_to_ptr.vmem [resolvable:$true] %s87_s29 }
  0x5e   :  { %s18469_s0 = scalar_lea.hbm %s21981_s5, 32 }
  0x5f   :  { %p18470_p12 = scmp.ne.s32.totalorder %s21981_s5, %s18469_s0  ;;  %p18473_p13 = scmp.lt.u32.totalorder %s18469_s0, %s21981_s5 }
  0x61   :  { %p18475_p0 = pnand %p18473_p13, %p18470_p12 }
  0x63   :  { %18478 = shalt.err (!%p18475_p0)
}
  0x64   :  { %s18479_s3 = scalar_lea.vmem %s66_s26, 32  ;;  %p18484_p2 = scmp.lt.s32.totalorder %s66_s26, %s66_s26 }
  0x65   :  { %p18480_p1 = scmp.ne.s32.totalorder %s66_s26, %s18479_s3  ;;  %p18485_p3 = scmp.lt.s32.totalorder %s18479_s3, %s18479_s3 }
  0x67   :  { %p18486_p4 = por %p18485_p3, %p18484_p2 }
  0x69   :  { %p18487_p5 = pnand %p18486_p4, %p18480_p1 }
  0x6b   :  { %18490 = shalt.err (!%p18487_p5)
}
  0x6c   :  { %68 = dma.hbm_to_vmem [thread:$0]  %s21981_s5, 32, %s66_s26, [#allocation6]  }
  0x6d   :  { %s18491_s17 = scalar_lea.hbm %s21983_s7, 16 }
  0x6e   :  { %p18492_p6 = scmp.ne.s32.totalorder %s21983_s7, %s18491_s17  ;;  %p18495_p7 = scmp.lt.u32.totalorder %s18491_s17, %s21983_s7 }
  0x70   :  { %p18497_p8 = pnand %p18495_p7, %p18492_p6 }
  0x72   :  { %18500 = shalt.err (!%p18497_p8)
}
  0x73   :  { %s18501_s8 = scalar_lea.vmem %s88_s29, 16  ;;  %s18505_s27 = scalar_lea.vmem %s88_s29, 32 }
  0x74   :  { %p18502_p9 = scmp.ne.s32.totalorder %s88_s29, %s18501_s8  ;;  %p18506_p10 = scmp.lt.s32.totalorder %s88_s29, %s88_s29 }
  0x75   :  { %p18507_p11 = scmp.lt.s32.totalorder %s18505_s27, %s18501_s8 }
  0x77   :  { %p18508_p12 = por %p18507_p11, %p18506_p10 }
  0x79   :  { %p18509_p13 = pnand %p18508_p12, %p18502_p9 }
  0x7b   :  { %18512 = shalt.err (!%p18509_p13)
}
  0x7c   :  { %90 = dma.hbm_to_vmem [thread:$0]  %s21983_s7, 16, %s88_s29, [#allocation9]  }
  0x7d   :  { %s18670_s0 = smov [#allocation13]   ;;  %s18671_s6 = smov [#allocation16]  }
  0x7e   :  { %s109_s30 = sshll.u32 %s18670_s0, 4  ;;  %s130_s24 = sshll.u32 %s18671_s6, 4  ;;  %s110_s30 = int_to_ptr.vmem [resolvable:$true] %s109_s30  ;;  %s131_s24 = int_to_ptr.vmem [resolvable:$true] %s130_s24 }
  0x7f   :  { %s18513_s25 = scalar_lea.hbm %s21985_s9, 16 }
  0x80   :  { %p18514_p0 = scmp.ne.s32.totalorder %s21985_s9, %s18513_s25  ;;  %p18517_p1 = scmp.lt.u32.totalorder %s18513_s25, %s21985_s9 }
  0x82   :  { %p18519_p2 = pnand %p18517_p1, %p18514_p0 }
  0x84   :  { %18522 = shalt.err (!%p18519_p2)
}
  0x85   :  { %s18523_s7 = scalar_lea.vmem %s110_s30, 16  ;;  %s18527_s29 = scalar_lea.vmem %s110_s30, 32 }
  0x86   :  { %p18524_p3 = scmp.ne.s32.totalorder %s110_s30, %s18523_s7  ;;  %p18528_p4 = scmp.lt.s32.totalorder %s110_s30, %s110_s30 }
  0x87   :  { %p18529_p5 = scmp.lt.s32.totalorder %s18527_s29, %s18523_s7 }
  0x89   :  { %p18530_p6 = por %p18529_p5, %p18528_p4 }
  0x8b   :  { %p18531_p7 = pnand %p18530_p6, %p18524_p3 }
  0x8d   :  { %18534 = shalt.err (!%p18531_p7)
}
  0x8e   :  { %112 = dma.hbm_to_vmem [thread:$0]  %s21985_s9, 16, %s110_s30, [#allocation12]  }
  0x8f   :  { %s18535_s8 = scalar_lea.hbm %s21988_s12, 106496 }
  0x90   :  { %p18536_p8 = scmp.ne.s32.totalorder %s21988_s12, %s18535_s8  ;;  %p18539_p9 = scmp.lt.u32.totalorder %s18535_s8, %s21988_s12 }
  0x92   :  { %p18541_p10 = pnand %p18539_p9, %p18536_p8 }
  0x94   :  { %18544 = shalt.err (!%p18541_p10)
}
  0x95   :  { %s18545_s6 = scalar_lea.vmem %s131_s24, 106496  ;;  %p18550_p12 = scmp.lt.s32.totalorder %s131_s24, %s131_s24 }
  0x96   :  { %p18546_p11 = scmp.ne.s32.totalorder %s131_s24, %s18545_s6  ;;  %p18551_p13 = scmp.lt.s32.totalorder %s18545_s6, %s18545_s6 }
  0x98   :  { %p18552_p0 = por %p18551_p13, %p18550_p12 }
  0x9a   :  { %p18553_p1 = pnand %p18552_p0, %p18546_p11 }
  0x9c   :  { %18556 = shalt.err (!%p18553_p1)
}
  0x9d   :  { %s18672_s9 = smov 3328   ;;  %s18673_s30 = smov 208  }
  0x9e   :  { %136 = dma.hbm_to_vmem [thread:$0]  %s21988_s12, 106496, %s131_s24, [#allocation15], %s18672_s9, %s18672_s9, %s18673_s30  }
  0x9f   :  { %18645 = dma.done.wait [#allocation3], 32  }
  0xa0   :  { %18646 = vsyncadd [#allocation3], 4294967264 }
  0xa1   :  { %18647 = dma.done.wait [#allocation6], 4128  }
  0xa2   :  { %18648 = vsyncadd [#allocation6], 4294963168 }
  0xa3   :  { %18649 = dma.done.wait [#allocation9], 4112  }
  0xa4   :  { %18650 = vsyncadd [#allocation9], 4294963184 }
  0xa5   :  { %18651 = dma.done.wait [#allocation12], 4112  }
  0xa6   :  { %18652 = vsyncadd [#allocation12], 4294963184 }
  0xa7   :  { %18653 = dma.done.wait [#allocation15], 106528  }
  0xa8   :  { %18654 = vsyncadd [#allocation15], 4294860768  ;;  %v15787_v0 = vld [vmem:[%s21978_s2 + $0x4] ss:$8 sps:$4 sm:$0xff]   ;;  %v15789_v1 = vld [vmem:[%s21978_s2] ss:$8 sps:$4 sm:$0xff]   ;;  %v1139_v9 = vlaneseq }
  0xa9   :  { %5631 = vmatprep.subr.bf16.mxu0 %v15787_v0  ;;  %v15790_v2 = vld [vmem:[%s21978_s2 + $0x14] ss:$8 sps:$4 sm:$0xff]   ;;  %v15792_v3 = vld [vmem:[%s21978_s2 + $0x10] ss:$8 sps:$4 sm:$0xff]   ;;  %v15793_v4 = vld [vmem:[%s21978_s2 + $0x24] ss:$8 sps:$4 sm:$0xff]  }
  0xaa   :  { %5632 = vmatpush1.bf16.msra.mxu0 %v15789_v1  ;;  %v15795_v5 = vld [vmem:[%s21978_s2 + $0x20] ss:$8 sps:$4 sm:$0xff]   ;;  %v15796_v6 = vld [vmem:[%s21978_s2 + $0x34] ss:$8 sps:$4 sm:$0xff]   ;;  %v18674_v7 = vmov 1983009808  }
  0xab   :  { %5633 = vmatprep.subr.bf16.mxu0 %v15790_v2  ;;  %v1137_v8 = vunpack.c.l.s4 %v18674_v7  ;;  %v15798_v10 = vld [vmem:[%s21978_s2 + $0x30] ss:$8 sps:$4 sm:$0xff]   ;;  %v15799_v11 = vld [vmem:[%s21978_s2 + $0x44] ss:$8 sps:$4 sm:$0xff]   ;;  %v18917_v13 = vshrl.u32 %v1139_v9, 7  ;;  %s22000_s24 = sld [smem:[#allocation31_spill]] }
  0xac   :  { %v15801_v14 = vld [vmem:[%s21978_s2 + $0x40] ss:$8 sps:$4 sm:$0xff]   ;;  %v15802_v15 = vld [vmem:[%s21978_s2 + $0x54] ss:$8 sps:$4 sm:$0xff]   ;;  %v15804_v17 = vld [vmem:[%s21978_s2 + $0x50] ss:$8 sps:$4 sm:$0xff]  }
  0xad   :  { %v1138_v12 = vunpack.c.0.s8 %v1137_v8  ;;  %v15805_v18 = vld [vmem:[%s21978_s2 + $0x64] ss:$8 sps:$4 sm:$0xff]   ;;  %v15807_v21 = vld [vmem:[%s21978_s2 + $0x60] ss:$8 sps:$4 sm:$0xff]   ;;  %v15808_v22 = vld [vmem:[%s21978_s2 + $0x74] ss:$8 sps:$4 sm:$0xff]  }
  0xae   :  { %5634 = vmatpush1.bf16.msra.mxu0 %v15792_v3  ;;  %v15810_v25 = vld [vmem:[%s21978_s2 + $0x70] ss:$8 sps:$4 sm:$0xff]   ;;  %v15811_v26 = vld [vmem:[%s21978_s2 + $0x84] ss:$8 sps:$4 sm:$0xff]   ;;  %v15813_v27 = vld [vmem:[%s21978_s2 + $0x80] ss:$8 sps:$4 sm:$0xff]  }
  0xaf   :  { %5635 = vmatprep.subr.bf16.mxu0 %v15793_v4  ;;  %v18926_v16 = vsub.s32 %v1138_v12, %v18917_v13  ;;  %v15814_v28 = vld [vmem:[%s21978_s2 + $0x94] ss:$8 sps:$4 sm:$0xff]   ;;  %v15816_v29 = vld [vmem:[%s21978_s2 + $0x90] ss:$8 sps:$4 sm:$0xff]   ;;  %v15817_v30 = vld [vmem:[%s21978_s2 + $0xa4] ss:$8 sps:$4 sm:$0xff]  }
  0xb0   :  { %v15819_v31 = vld [vmem:[%s21978_s2 + $0xa0] ss:$8 sps:$4 sm:$0xff]   ;;  %v15820_v32 = vld [vmem:[%s21978_s2 + $0xb4] ss:$8 sps:$4 sm:$0xff]   ;;  %v15822_v33 = vld [vmem:[%s21978_s2 + $0xb0] ss:$8 sps:$4 sm:$0xff]  }
  0xb1   :  { %v166_v19 = vld [vmem:[%s22000_s24] sm:$0xff]  ;;  %v15826_v36 = vld [vmem:[%s21978_s2 + $0xd4] ss:$8 sps:$4 sm:$0xff]   ;;  %v15828_v37 = vld [vmem:[%s21978_s2 + $0xd0] ss:$8 sps:$4 sm:$0xff]   ;;  %vm7261_vm0 = vcmask 254976  }
  0xb2   :  { %5636 = vmatpush1.bf16.msra.mxu0 %v15795_v5  ;;  %v1142_v20 = vrot.slane %v166_v19, %v18926_v16  ;;  %v15823_v34 = vld [vmem:[%s21978_s2 + $0xc4] ss:$8 sps:$4 sm:$0xff]   ;;  %v15825_v35 = vld [vmem:[%s21978_s2 + $0xc0] ss:$8 sps:$4 sm:$0xff]   ;;  %v1135_v38 = vcombine.high %v166_v19, %v166_v19  ;;  %v15832_v42 = vld [vmem:[%s21978_s2 + $0xf4] ss:$8 sps:$4 sm:$0xff]  }
  0xb3   :  { %5637 = vmatprep.subr.bf16.mxu0 %v15796_v6  ;;  %v15829_v39 = vld [vmem:[%s21978_s2 + $0xe4] ss:$8 sps:$4 sm:$0xff]   ;;  %v15831_v40 = vld [vmem:[%s21978_s2 + $0xe0] ss:$8 sps:$4 sm:$0xff]   ;;  %v15834_v43 = vld [vmem:[%s21978_s2 + $0xf0] ss:$8 sps:$4 sm:$0xff]  }
  0xb4   :  { %v1150_v23 = vcombine.high %v1142_v20, %v1142_v20  ;;  %v18990_v41 = vrot.slane %v1135_v38, %v18926_v16  ;;  %v15838_v45 = vld [vmem:[%s21978_s2 + $0x104] ss:$8 sps:$4 sm:$0xff]   ;;  %v1408_v46 = vpack.c.bf16 %v1142_v20, %v1142_v20  ;;  %v15836_v47 = vld [vmem:[%s21978_s2 + $0x100] ss:$8 sps:$4 sm:$0xff]   ;;  %v15841_v49 = vld [vmem:[%s21978_s2 + $0x114] ss:$8 sps:$4 sm:$0xff]  }
  0xb5   :  { %v15839_v50 = vld [vmem:[%s21978_s2 + $0x110] ss:$8 sps:$4 sm:$0xff]   ;;  %v15844_v51 = vld [vmem:[%s21978_s2 + $0x124] ss:$8 sps:$4 sm:$0xff]   ;;  %v15842_v52 = vld [vmem:[%s21978_s2 + $0x120] ss:$8 sps:$4 sm:$0xff]  }
  0xb6   :  { %5638 = vmatpush1.bf16.msra.mxu0 %v15798_v10  ;;  %v1409_v24 = vpack.c.bf16 %v1150_v23, %v1150_v23  ;;  %v1151_v44 = vcombine.high %v18990_v41, %v18990_v41  ;;  %v15847_v53 = vld [vmem:[%s21978_s2 + $0x134] ss:$8 sps:$4 sm:$0xff]   ;;  %v15845_v54 = vld [vmem:[%s21978_s2 + $0x130] ss:$8 sps:$4 sm:$0xff]   ;;  %v15850_v55 = vld [vmem:[%s21978_s2 + $0x144] ss:$8 sps:$4 sm:$0xff]  }
  0xb7   :  { %5639 = vmatprep.subr.bf16.mxu0 %v15799_v11  ;;  %v15848_v56 = vld [vmem:[%s21978_s2 + $0x140] ss:$8 sps:$4 sm:$0xff]   ;;  %v15853_v57 = vld [vmem:[%s21978_s2 + $0x154] ss:$8 sps:$4 sm:$0xff]   ;;  %v15851_v58 = vld [vmem:[%s21978_s2 + $0x150] ss:$8 sps:$4 sm:$0xff]  }
  0xb8   :  { %5663 = vmatprep.mubr.bf16.mxu0 %v1409_v24  ;;  %v1411_v48 = vpack.c.bf16 %v1151_v44, %v1151_v44  ;;  %v15856_v59 = vld [vmem:[%s21978_s2 + $0x164] ss:$8 sps:$4 sm:$0xff]   ;;  %v15854_v60 = vld [vmem:[%s21978_s2 + $0x160] ss:$8 sps:$4 sm:$0xff]   ;;  %v15859_v61 = vld [vmem:[%s21978_s2 + $0x174] ss:$8 sps:$4 sm:$0xff]  }
  0xb9   :  { %v15857_v62 = vld [vmem:[%s21978_s2 + $0x170] ss:$8 sps:$4 sm:$0xff]   ;;  %v15862_v63 = vld [vmem:[%s21978_s2 + $0x184] ss:$8 sps:$4 sm:$0xff]   ;;  %v15860_v0 = vld [vmem:[%s21978_s2 + $0x180] ss:$8 sps:$4 sm:$0xff]  }
  0xba   :  { %5640 = vmatpush1.bf16.msra.mxu0 %v15801_v14  ;;  %v15865_v1 = vld [vmem:[%s21978_s2 + $0x194] ss:$8 sps:$4 sm:$0xff]   ;;  %v15863_v2 = vld [vmem:[%s21978_s2 + $0x190] ss:$8 sps:$4 sm:$0xff]   ;;  %v15868_v3 = vld [vmem:[%s21978_s2 + $0x1a4] ss:$8 sps:$4 sm:$0xff]  }
  0xbb   :  { %5641 = vmatprep.subr.bf16.mxu0 %v15802_v15  ;;  %v15866_v4 = vld [vmem:[%s21978_s2 + $0x1a0] ss:$8 sps:$4 sm:$0xff]   ;;  %v15871_v5 = vld [vmem:[%s21978_s2 + $0x1b4] ss:$8 sps:$4 sm:$0xff]   ;;  %v15869_v6 = vld [vmem:[%s21978_s2 + $0x1b0] ss:$8 sps:$4 sm:$0xff]  }
  0xbc   :  { %v15874_v7 = vld [vmem:[%s21978_s2 + $0x1c4] ss:$8 sps:$4 sm:$0xff]   ;;  %v15872_v8 = vld [vmem:[%s21978_s2 + $0x1c0] ss:$8 sps:$4 sm:$0xff]   ;;  %v15877_v9 = vld [vmem:[%s21978_s2 + $0x1d4] ss:$8 sps:$4 sm:$0xff]  }
  0xbd   :  { %v15875_v10 = vld [vmem:[%s21978_s2 + $0x1d0] ss:$8 sps:$4 sm:$0xff]   ;;  %v15880_v11 = vld [vmem:[%s21978_s2 + $0x1e4] ss:$8 sps:$4 sm:$0xff]   ;;  %v15878_v14 = vld [vmem:[%s21978_s2 + $0x1e0] ss:$8 sps:$4 sm:$0xff]  }
  0xbe   :  { %5642 = vmatpush1.bf16.msra.mxu0 %v15804_v17  ;;  %v19090_v12 = vld [vmem:[%s22000_s24 + $0x8] sm:$0xff]  ;;  %v15883_v15 = vld [vmem:[%s21978_s2 + $0x1f4] ss:$8 sps:$4 sm:$0xff]   ;;  %s22001_s12 = sld [smem:[#allocation32_spill]]  ;;  %vm7157_vm1 = vcmask 261120   ;;  %s18677_s18 = smov [#allocation18]  }
  0xbf   :  { %5643 = vmatprep.subr.bf16.mxu0 %v15805_v18  ;;  %v19100_v17 = vrot.slane %v19090_v12, %v18926_v16  ;;  %v15881_v18 = vld [vmem:[%s21978_s2 + $0x1f0] ss:$8 sps:$4 sm:$0xff]   ;;  %v15886_v19 = vld [vmem:[%s21978_s2 + $0x204] ss:$8 sps:$4 sm:$0xff]   ;;  %v15889_v23 = vld [vmem:[%s21978_s2 + $0x214] ss:$8 sps:$4 sm:$0xff]  }
  0xc0   :  { %v15910_v38 = vld [vmem:[%s21978_s2 + $0x284] ss:$8 sps:$4 sm:$0xff]   ;;  %v15919_v44 = vld [vmem:[%s21978_s2 + $0x2b4] ss:$8 sps:$4 sm:$0xff]   ;;  %s18678_s3 = smov [#allocation17]  }
  0xc1   :  { %v1167_v20 = vcombine.high %v19100_v17, %v19100_v17  ;;  %s13763_s25 = sshll.u32 %s18678_s3, 4  ;;  %s13764_s25 = int_to_ptr.vmem [resolvable:$true] %s13763_s25 }
  0xc2   :  { %5644 = vmatpush1.bf16.msra.mxu0 %v15807_v21  ;;  %v1410_v21 = vpack.c.bf16 %v18990_v41, %v18990_v41  ;;  %v15911_v41 = vld [vmem:[%s21978_s2 + $0x290] ss:$8 sps:$4 sm:$0xff]  }
  0xc3   :  { %5645 = vmatprep.subr.bf16.mxu0 %v15808_v22  ;;  %v15884_v22 = vld [vmem:[%s21978_s2 + $0x200] ss:$8 sps:$4 sm:$0xff]   ;;  %v1413_v24 = vpack.c.bf16 %v1167_v20, %v1167_v20  ;;  %v15965_v20 = vld [vmem:[%s21978_s2 + $0x3b0] ss:$8 sps:$4 sm:$0xff]  }
  0xc6   :  { %5646 = vmatpush1.bf16.msra.mxu0 %v15810_v25  ;;  %v15887_v25 = vld [vmem:[%s21978_s2 + $0x210] ss:$8 sps:$4 sm:$0xff]  }
  0xc7   :  { %5647 = vmatprep.subr.bf16.mxu0 %v15811_v26  ;;  %v15892_v26 = vld [vmem:[%s21978_s2 + $0x224] ss:$8 sps:$4 sm:$0xff]  }
  0xca   :  { %5648 = vmatpush1.bf16.msra.mxu0 %v15813_v27  ;;  %v15890_v27 = vld [vmem:[%s21978_s2 + $0x220] ss:$8 sps:$4 sm:$0xff]  }
  0xcb   :  { %5649 = vmatprep.subr.bf16.mxu0 %v15814_v28  ;;  %v15895_v28 = vld [vmem:[%s21978_s2 + $0x234] ss:$8 sps:$4 sm:$0xff]  }
  0xce   :  { %5650 = vmatpush1.bf16.msra.mxu0 %v15816_v29  ;;  %v15893_v29 = vld [vmem:[%s21978_s2 + $0x230] ss:$8 sps:$4 sm:$0xff]  }
  0xcf   :  { %5651 = vmatprep.subr.bf16.mxu0 %v15817_v30  ;;  %v15898_v30 = vld [vmem:[%s21978_s2 + $0x244] ss:$8 sps:$4 sm:$0xff]  }
  0xd2   :  { %5652 = vmatpush1.bf16.msra.mxu0 %v15819_v31  ;;  %v15896_v31 = vld [vmem:[%s21978_s2 + $0x240] ss:$8 sps:$4 sm:$0xff]  }
  0xd3   :  { %5653 = vmatprep.subr.bf16.mxu0 %v15820_v32  ;;  %v15901_v32 = vld [vmem:[%s21978_s2 + $0x254] ss:$8 sps:$4 sm:$0xff]  }
  0xd6   :  { %5654 = vmatpush1.bf16.msra.mxu0 %v15822_v33  ;;  %v15899_v33 = vld [vmem:[%s21978_s2 + $0x250] ss:$8 sps:$4 sm:$0xff]  }
  0xd7   :  { %5655 = vmatprep.subr.bf16.mxu0 %v15823_v34  ;;  %v15904_v34 = vld [vmem:[%s21978_s2 + $0x264] ss:$8 sps:$4 sm:$0xff]  }
  0xda   :  { %5656 = vmatpush1.bf16.msra.mxu0 %v15825_v35  ;;  %v15902_v35 = vld [vmem:[%s21978_s2 + $0x260] ss:$8 sps:$4 sm:$0xff]  }
  0xdb   :  { %5657 = vmatprep.subr.bf16.mxu0 %v15826_v36  ;;  %v15907_v36 = vld [vmem:[%s21978_s2 + $0x274] ss:$8 sps:$4 sm:$0xff]  }
  0xde   :  { %5658 = vmatpush1.bf16.msra.mxu0 %v15828_v37  ;;  %v15905_v37 = vld [vmem:[%s21978_s2 + $0x270] ss:$8 sps:$4 sm:$0xff]  }
  0xdf   :  { %5659 = vmatprep.subr.bf16.mxu0 %v15829_v39  ;;  %v15908_v39 = vld [vmem:[%s21978_s2 + $0x280] ss:$8 sps:$4 sm:$0xff]  }
  0xe2   :  { %5660 = vmatpush1.bf16.msra.mxu0 %v15831_v40  ;;  %v15913_v40 = vld [vmem:[%s21978_s2 + $0x294] ss:$8 sps:$4 sm:$0xff]  }
  0xe3   :  { %5661 = vmatprep.subr.bf16.mxu0 %v15832_v42  ;;  %v15916_v42 = vld [vmem:[%s21978_s2 + $0x2a4] ss:$8 sps:$4 sm:$0xff]  }
  0xe6   :  { %5662 = vmatpush1.bf16.msra.mxu0 %v15834_v43  ;;  %v15914_v43 = vld [vmem:[%s21978_s2 + $0x2a0] ss:$8 sps:$4 sm:$0xff]  }
  0xe7   :  { %5672 = vmatprep.subr.bf16.mxu0 %v15838_v45  ;;  %v15917_v45 = vld [vmem:[%s21978_s2 + $0x2b0] ss:$8 sps:$4 sm:$0xff]  }
  0xe9   :  { %5664 = vmatmul.mubr.bf16.vlgmr.msra.gmra.mrb[0].mxu0 %v1408_v46  ;;  %v15922_v46 = vld [vmem:[%s21978_s2 + $0x2c4] ss:$8 sps:$4 sm:$0xff]  }
  0xea   :  { %5673 = vmatpush1.bf16.msra.mxu0 %v15836_v47  ;;  %5704 = vmatprep.mubr.bf16.mxu0 %v1411_v48  ;;  %v15920_v47 = vld [vmem:[%s21978_s2 + $0x2c0] ss:$8 sps:$4 sm:$0xff]   ;;  %v15925_v48 = vld [vmem:[%s21978_s2 + $0x2d4] ss:$8 sps:$4 sm:$0xff]  }
  0xeb   :  { %5674 = vmatprep.subr.bf16.mxu0 %v15841_v49  ;;  %v15923_v49 = vld [vmem:[%s21978_s2 + $0x2d0] ss:$8 sps:$4 sm:$0xff]  }
  0xee   :  { %5675 = vmatpush1.bf16.msra.mxu0 %v15839_v50  ;;  %v15928_v50 = vld [vmem:[%s21978_s2 + $0x2e4] ss:$8 sps:$4 sm:$0xff]  }
  0xef   :  { %5676 = vmatprep.subr.bf16.mxu0 %v15844_v51  ;;  %v1152_v51 = vcombine.high %v19090_v12, %v19090_v12  ;;  %v15956_v12 = vld [vmem:[%s21978_s2 + $0x380] ss:$8 sps:$4 sm:$0xff]  }
  0xf2   :  { %5677 = vmatpush1.bf16.msra.mxu0 %v15842_v52  ;;  %v15926_v52 = vld [vmem:[%s21978_s2 + $0x2e0] ss:$8 sps:$4 sm:$0xff]  }
  0xf3   :  { %5678 = vmatprep.subr.bf16.mxu0 %v15847_v53  ;;  %v15931_v53 = vld [vmem:[%s21978_s2 + $0x2f4] ss:$8 sps:$4 sm:$0xff]  }
  0xf6   :  { %5679 = vmatpush1.bf16.msra.mxu0 %v15845_v54  ;;  %v19205_v54 = vrot.slane %v1152_v51, %v18926_v16  ;;  %v16005_v51 = vld [vmem:[%s21978_s2 + $0x480] ss:$8 sps:$4 sm:$0xff]  }
  0xf7   :  { %5680 = vmatprep.subr.bf16.mxu0 %v15850_v55  ;;  %v15929_v55 = vld [vmem:[%s21978_s2 + $0x2f0] ss:$8 sps:$4 sm:$0xff]  }
  0xfa   :  { %5681 = vmatpush1.bf16.msra.mxu0 %v15848_v56  ;;  %v15934_v56 = vld [vmem:[%s21978_s2 + $0x304] ss:$8 sps:$4 sm:$0xff]  }
  0xfb   :  { %5682 = vmatprep.subr.bf16.mxu0 %v15853_v57  ;;  %v1168_v57 = vcombine.high %v19205_v54, %v19205_v54 }
  0xfe   :  { %5683 = vmatpush1.bf16.msra.mxu0 %v15851_v58  ;;  %v1412_v58 = vpack.c.bf16 %v19100_v17, %v19100_v17  ;;  %v15964_v17 = vld [vmem:[%s21978_s2 + $0x3a4] ss:$8 sps:$4 sm:$0xff]  }
  0xff   :  { %5684 = vmatprep.subr.bf16.mxu0 %v15856_v59  ;;  %v15932_v59 = vld [vmem:[%s21978_s2 + $0x300] ss:$8 sps:$4 sm:$0xff]  }
 0x102   :  { %5685 = vmatpush1.bf16.msra.mxu0 %v15854_v60  ;;  %v15937_v60 = vld [vmem:[%s21978_s2 + $0x314] ss:$8 sps:$4 sm:$0xff]  }
 0x103   :  { %5686 = vmatprep.subr.bf16.mxu0 %v15859_v61  ;;  %v1415_v61 = vpack.c.bf16 %v1168_v57, %v1168_v57  ;;  %v16014_v57 = vld [vmem:[%s21978_s2 + $0x4b0] ss:$8 sps:$4 sm:$0xff]  }
 0x106   :  { %5687 = vmatpush1.bf16.msra.mxu0 %v15857_v62  ;;  %v15935_v62 = vld [vmem:[%s21978_s2 + $0x310] ss:$8 sps:$4 sm:$0xff]  }
 0x107   :  { %5688 = vmatprep.subr.bf16.mxu0 %v15862_v63  ;;  %v15940_v63 = vld [vmem:[%s21978_s2 + $0x324] ss:$8 sps:$4 sm:$0xff]  }
 0x10a   :  { %5689 = vmatpush1.bf16.msra.mxu0 %v15860_v0  ;;  %v15938_v0 = vld [vmem:[%s21978_s2 + $0x320] ss:$8 sps:$4 sm:$0xff]  }
 0x10b   :  { %5690 = vmatprep.subr.bf16.mxu0 %v15865_v1  ;;  %v15943_v1 = vld [vmem:[%s21978_s2 + $0x334] ss:$8 sps:$4 sm:$0xff]  }
 0x10e   :  { %5691 = vmatpush1.bf16.msra.mxu0 %v15863_v2  ;;  %v15941_v2 = vld [vmem:[%s21978_s2 + $0x330] ss:$8 sps:$4 sm:$0xff]  }
 0x10f   :  { %5692 = vmatprep.subr.bf16.mxu0 %v15868_v3  ;;  %v15946_v3 = vld [vmem:[%s21978_s2 + $0x344] ss:$8 sps:$4 sm:$0xff]  }
 0x112   :  { %5693 = vmatpush1.bf16.msra.mxu0 %v15866_v4  ;;  %v15944_v4 = vld [vmem:[%s21978_s2 + $0x340] ss:$8 sps:$4 sm:$0xff]  }
 0x113   :  { %5694 = vmatprep.subr.bf16.mxu0 %v15871_v5  ;;  %v15949_v5 = vld [vmem:[%s21978_s2 + $0x354] ss:$8 sps:$4 sm:$0xff]  }
 0x116   :  { %5695 = vmatpush1.bf16.msra.mxu0 %v15869_v6  ;;  %v15947_v6 = vld [vmem:[%s21978_s2 + $0x350] ss:$8 sps:$4 sm:$0xff]  }
 0x117   :  { %5696 = vmatprep.subr.bf16.mxu0 %v15874_v7  ;;  %v15952_v7 = vld [vmem:[%s21978_s2 + $0x364] ss:$8 sps:$4 sm:$0xff]  }
 0x11a   :  { %5697 = vmatpush1.bf16.msra.mxu0 %v15872_v8  ;;  %v15950_v8 = vld [vmem:[%s21978_s2 + $0x360] ss:$8 sps:$4 sm:$0xff]  }
 0x11b   :  { %5698 = vmatprep.subr.bf16.mxu0 %v15877_v9  ;;  %v15955_v9 = vld [vmem:[%s21978_s2 + $0x374] ss:$8 sps:$4 sm:$0xff]  }
 0x11e   :  { %5699 = vmatpush1.bf16.msra.mxu0 %v15875_v10  ;;  %v15953_v10 = vld [vmem:[%s21978_s2 + $0x370] ss:$8 sps:$4 sm:$0xff]  }
 0x11f   :  { %5700 = vmatprep.subr.bf16.mxu0 %v15880_v11  ;;  %v15958_v11 = vld [vmem:[%s21978_s2 + $0x384] ss:$8 sps:$4 sm:$0xff]  }
 0x122   :  { %5701 = vmatpush1.bf16.msra.mxu0 %v15878_v14  ;;  %v15961_v14 = vld [vmem:[%s21978_s2 + $0x394] ss:$8 sps:$4 sm:$0xff]  }
 0x123   :  { %5702 = vmatprep.subr.bf16.mxu0 %v15883_v15  ;;  %v15959_v15 = vld [vmem:[%s21978_s2 + $0x390] ss:$8 sps:$4 sm:$0xff]  }
 0x126   :  { %5703 = vmatpush1.bf16.msra.mxu0 %v15881_v18  ;;  %v15962_v18 = vld [vmem:[%s21978_s2 + $0x3a0] ss:$8 sps:$4 sm:$0xff]  }
 0x127   :  { %5713 = vmatprep.subr.bf16.mxu0 %v15886_v19  ;;  %v15967_v19 = vld [vmem:[%s21978_s2 + $0x3b4] ss:$8 sps:$4 sm:$0xff]  }
 0x129   :  { %5705 = vmatmul.mubr.bf16.vlgmr.msra.gmra.mrb[0].mxu0 %v1410_v21  ;;  %v15970_v21 = vld [vmem:[%s21978_s2 + $0x3c4] ss:$8 sps:$4 sm:$0xff]  }
 0x12a   :  { %5714 = vmatpush1.bf16.msra.mxu0 %v15884_v22  ;;  %5745 = vmatprep.mubr.bf16.mxu0 %v1413_v24  ;;  %v15968_v22 = vld [vmem:[%s21978_s2 + $0x3c0] ss:$8 sps:$4 sm:$0xff]   ;;  %v15971_v24 = vld [vmem:[%s21978_s2 + $0x3d0] ss:$8 sps:$4 sm:$0xff]  }
 0x12b   :  { %5715 = vmatprep.subr.bf16.mxu0 %v15889_v23  ;;  %v15973_v23 = vld [vmem:[%s21978_s2 + $0x3d4] ss:$8 sps:$4 sm:$0xff]  }
 0x12e   :  { %5716 = vmatpush1.bf16.msra.mxu0 %v15887_v25  ;;  %v15976_v25 = vld [vmem:[%s21978_s2 + $0x3e4] ss:$8 sps:$4 sm:$0xff]  }
 0x12f   :  { %5717 = vmatprep.subr.bf16.mxu0 %v15892_v26  ;;  %v19304_v26 = vld [vmem:[%s22000_s24 + $0x10] sm:$0xff] }
 0x132   :  { %5718 = vmatpush1.bf16.msra.mxu0 %v15890_v27  ;;  %v15974_v27 = vld [vmem:[%s21978_s2 + $0x3e0] ss:$8 sps:$4 sm:$0xff]  }
 0x133   :  { %5719 = vmatprep.subr.bf16.mxu0 %v15895_v28  ;;  %v15979_v28 = vld [vmem:[%s21978_s2 + $0x3f4] ss:$8 sps:$4 sm:$0xff]  }
 0x136   :  { %5720 = vmatpush1.bf16.msra.mxu0 %v15893_v29  ;;  %v19314_v29 = vrot.slane %v19304_v26, %v18926_v16 }
 0x137   :  { %5721 = vmatprep.subr.bf16.mxu0 %v15898_v30  ;;  %v15977_v30 = vld [vmem:[%s21978_s2 + $0x3f0] ss:$8 sps:$4 sm:$0xff]  }
 0x13a   :  { %5722 = vmatpush1.bf16.msra.mxu0 %v15896_v31  ;;  %v15983_v31 = vld [vmem:[%s21978_s2 + $0x404] ss:$8 sps:$4 sm:$0xff]  }
 0x13b   :  { %5723 = vmatprep.subr.bf16.mxu0 %v15901_v32  ;;  %v1184_v32 = vcombine.high %v19314_v29, %v19314_v29 }
 0x13e   :  { %5724 = vmatpush1.bf16.msra.mxu0 %v15899_v33  ;;  %v1414_v33 = vpack.c.bf16 %v19205_v54, %v19205_v54  ;;  %v16013_v54 = vld [vmem:[%s21978_s2 + $0x4a4] ss:$8 sps:$4 sm:$0xff]  }
 0x13f   :  { %5725 = vmatprep.subr.bf16.mxu0 %v15904_v34  ;;  %v15981_v34 = vld [vmem:[%s21978_s2 + $0x400] ss:$8 sps:$4 sm:$0xff]  }
 0x142   :  { %5726 = vmatpush1.bf16.msra.mxu0 %v15902_v35  ;;  %v15986_v35 = vld [vmem:[%s21978_s2 + $0x414] ss:$8 sps:$4 sm:$0xff]  }
 0x143   :  { %5727 = vmatprep.subr.bf16.mxu0 %v15907_v36  ;;  %v1417_v36 = vpack.c.bf16 %v1184_v32, %v1184_v32  ;;  %v16062_v32 = vld [vmem:[%s21978_s2 + $0x5b0] ss:$8 sps:$4 sm:$0xff]  }
 0x146   :  { %5728 = vmatpush1.bf16.msra.mxu0 %v15905_v37  ;;  %v15984_v37 = vld [vmem:[%s21978_s2 + $0x410] ss:$8 sps:$4 sm:$0xff]  }
 0x147   :  { %5729 = vmatprep.subr.bf16.mxu0 %v15910_v38  ;;  %v15989_v38 = vld [vmem:[%s21978_s2 + $0x424] ss:$8 sps:$4 sm:$0xff]  }
 0x14a   :  { %5730 = vmatpush1.bf16.msra.mxu0 %v15908_v39  ;;  %v15987_v39 = vld [vmem:[%s21978_s2 + $0x420] ss:$8 sps:$4 sm:$0xff]  }
 0x14b   :  { %5731 = vmatprep.subr.bf16.mxu0 %v15913_v40  ;;  %v15992_v40 = vld [vmem:[%s21978_s2 + $0x434] ss:$8 sps:$4 sm:$0xff]  }
 0x14e   :  { %5732 = vmatpush1.bf16.msra.mxu0 %v15911_v41  ;;  %v15990_v41 = vld [vmem:[%s21978_s2 + $0x430] ss:$8 sps:$4 sm:$0xff]  }
 0x14f   :  { %5733 = vmatprep.subr.bf16.mxu0 %v15916_v42  ;;  %v15995_v42 = vld [vmem:[%s21978_s2 + $0x444] ss:$8 sps:$4 sm:$0xff]  }
 0x152   :  { %5734 = vmatpush1.bf16.msra.mxu0 %v15914_v43  ;;  %v15993_v43 = vld [vmem:[%s21978_s2 + $0x440] ss:$8 sps:$4 sm:$0xff]  }
 0x153   :  { %5735 = vmatprep.subr.bf16.mxu0 %v15919_v44  ;;  %v15998_v44 = vld [vmem:[%s21978_s2 + $0x454] ss:$8 sps:$4 sm:$0xff]  }
 0x156   :  { %5736 = vmatpush1.bf16.msra.mxu0 %v15917_v45  ;;  %v15996_v45 = vld [vmem:[%s21978_s2 + $0x450] ss:$8 sps:$4 sm:$0xff]  }
 0x157   :  { %5737 = vmatprep.subr.bf16.mxu0 %v15922_v46  ;;  %v16001_v46 = vld [vmem:[%s21978_s2 + $0x464] ss:$8 sps:$4 sm:$0xff]  }
 0x15a   :  { %5738 = vmatpush1.bf16.msra.mxu0 %v15920_v47  ;;  %v15999_v47 = vld [vmem:[%s21978_s2 + $0x460] ss:$8 sps:$4 sm:$0xff]  }
 0x15b   :  { %5739 = vmatprep.subr.bf16.mxu0 %v15925_v48  ;;  %v16004_v48 = vld [vmem:[%s21978_s2 + $0x474] ss:$8 sps:$4 sm:$0xff]  }
 0x15e   :  { %5740 = vmatpush1.bf16.msra.mxu0 %v15923_v49  ;;  %v16002_v49 = vld [vmem:[%s21978_s2 + $0x470] ss:$8 sps:$4 sm:$0xff]  }
 0x15f   :  { %5741 = vmatprep.subr.bf16.mxu0 %v15928_v50  ;;  %v16007_v50 = vld [vmem:[%s21978_s2 + $0x484] ss:$8 sps:$4 sm:$0xff]  }
 0x162   :  { %5742 = vmatpush1.bf16.msra.mxu0 %v15926_v52  ;;  %v16010_v52 = vld [vmem:[%s21978_s2 + $0x494] ss:$8 sps:$4 sm:$0xff]  }
 0x163   :  { %5743 = vmatprep.subr.bf16.mxu0 %v15931_v53  ;;  %v16008_v53 = vld [vmem:[%s21978_s2 + $0x490] ss:$8 sps:$4 sm:$0xff]  }
 0x166   :  { %5744 = vmatpush1.bf16.msra.mxu0 %v15929_v55  ;;  %v16011_v55 = vld [vmem:[%s21978_s2 + $0x4a0] ss:$8 sps:$4 sm:$0xff]  }
 0x167   :  { %5754 = vmatprep.subr.bf16.mxu0 %v15934_v56  ;;  %v16016_v56 = vld [vmem:[%s21978_s2 + $0x4b4] ss:$8 sps:$4 sm:$0xff]  }
 0x169   :  { %5746 = vmatmul.mubr.bf16.vlgmr.msra.gmra.mrb[0].mxu0 %v1412_v58  ;;  %v16019_v58 = vld [vmem:[%s21978_s2 + $0x4c4] ss:$8 sps:$4 sm:$0xff]  }
 0x16a   :  { %5755 = vmatpush1.bf16.msra.mxu0 %v15932_v59  ;;  %5786 = vmatprep.mubr.bf16.mxu0 %v1415_v61  ;;  %v16017_v59 = vld [vmem:[%s21978_s2 + $0x4c0] ss:$8 sps:$4 sm:$0xff]   ;;  %v16020_v61 = vld [vmem:[%s21978_s2 + $0x4d0] ss:$8 sps:$4 sm:$0xff]  }
 0x16b   :  { %5756 = vmatprep.subr.bf16.mxu0 %v15937_v60  ;;  %v16022_v60 = vld [vmem:[%s21978_s2 + $0x4d4] ss:$8 sps:$4 sm:$0xff]  }
 0x16e   :  { %5757 = vmatpush1.bf16.msra.mxu0 %v15935_v62  ;;  %v16025_v62 = vld [vmem:[%s21978_s2 + $0x4e4] ss:$8 sps:$4 sm:$0xff]  }
 0x16f   :  { %5758 = vmatprep.subr.bf16.mxu0 %v15940_v63  ;;  %v1169_v63 = vcombine.high %v19304_v26, %v19304_v26  ;;  %v16053_v26 = vld [vmem:[%s21978_s2 + $0x580] ss:$8 sps:$4 sm:$0xff]  }
 0x172   :  { %5759 = vmatpush1.bf16.msra.mxu0 %v15938_v0  ;;  %v16023_v0 = vld [vmem:[%s21978_s2 + $0x4e0] ss:$8 sps:$4 sm:$0xff]  }
 0x173   :  { %5760 = vmatprep.subr.bf16.mxu0 %v15943_v1  ;;  %v16028_v1 = vld [vmem:[%s21978_s2 + $0x4f4] ss:$8 sps:$4 sm:$0xff]  }
 0x176   :  { %5761 = vmatpush1.bf16.msra.mxu0 %v15941_v2  ;;  %v19419_v2 = vrot.slane %v1169_v63, %v18926_v16  ;;  %v16102_v63 = vld [vmem:[%s21978_s2 + $0x680] ss:$8 sps:$4 sm:$0xff]  }
 0x177   :  { %5762 = vmatprep.subr.bf16.mxu0 %v15946_v3  ;;  %v16026_v3 = vld [vmem:[%s21978_s2 + $0x4f0] ss:$8 sps:$4 sm:$0xff]  }
 0x17a   :  { %5763 = vmatpush1.bf16.msra.mxu0 %v15944_v4  ;;  %v16031_v4 = vld [vmem:[%s21978_s2 + $0x504] ss:$8 sps:$4 sm:$0xff]  }
 0x17b   :  { %5764 = vmatprep.subr.bf16.mxu0 %v15949_v5  ;;  %v1185_v5 = vcombine.high %v19419_v2, %v19419_v2 }
 0x17e   :  { %5765 = vmatpush1.bf16.msra.mxu0 %v15947_v6  ;;  %v1416_v6 = vpack.c.bf16 %v19314_v29, %v19314_v29  ;;  %v16061_v29 = vld [vmem:[%s21978_s2 + $0x5a4] ss:$8 sps:$4 sm:$0xff]  }
 0x17f   :  { %5766 = vmatprep.subr.bf16.mxu0 %v15952_v7  ;;  %v16029_v7 = vld [vmem:[%s21978_s2 + $0x500] ss:$8 sps:$4 sm:$0xff]  }
 0x182   :  { %5767 = vmatpush1.bf16.msra.mxu0 %v15950_v8  ;;  %v16034_v8 = vld [vmem:[%s21978_s2 + $0x514] ss:$8 sps:$4 sm:$0xff]  }
 0x183   :  { %5768 = vmatprep.subr.bf16.mxu0 %v15955_v9  ;;  %v1419_v9 = vpack.c.bf16 %v1185_v5, %v1185_v5  ;;  %v16111_v5 = vld [vmem:[%s21978_s2 + $0x6b0] ss:$8 sps:$4 sm:$0xff]  }
 0x186   :  { %5769 = vmatpush1.bf16.msra.mxu0 %v15953_v10  ;;  %v16032_v10 = vld [vmem:[%s21978_s2 + $0x510] ss:$8 sps:$4 sm:$0xff]  }
 0x187   :  { %5770 = vmatprep.subr.bf16.mxu0 %v15958_v11  ;;  %v16037_v11 = vld [vmem:[%s21978_s2 + $0x524] ss:$8 sps:$4 sm:$0xff]  }
 0x18a   :  { %5771 = vmatpush1.bf16.msra.mxu0 %v15956_v12  ;;  %v16035_v12 = vld [vmem:[%s21978_s2 + $0x520] ss:$8 sps:$4 sm:$0xff]  }
 0x18b   :  { %5772 = vmatprep.subr.bf16.mxu0 %v15961_v14  ;;  %v16040_v14 = vld [vmem:[%s21978_s2 + $0x534] ss:$8 sps:$4 sm:$0xff]  }
 0x18e   :  { %5773 = vmatpush1.bf16.msra.mxu0 %v15959_v15  ;;  %v16038_v15 = vld [vmem:[%s21978_s2 + $0x530] ss:$8 sps:$4 sm:$0xff]  }
 0x18f   :  { %5774 = vmatprep.subr.bf16.mxu0 %v15964_v17  ;;  %v16043_v17 = vld [vmem:[%s21978_s2 + $0x544] ss:$8 sps:$4 sm:$0xff]  }
 0x192   :  { %5775 = vmatpush1.bf16.msra.mxu0 %v15962_v18  ;;  %v16041_v18 = vld [vmem:[%s21978_s2 + $0x540] ss:$8 sps:$4 sm:$0xff]  }
 0x193   :  { %5776 = vmatprep.subr.bf16.mxu0 %v15967_v19  ;;  %v16046_v19 = vld [vmem:[%s21978_s2 + $0x554] ss:$8 sps:$4 sm:$0xff]  }
 0x196   :  { %5777 = vmatpush1.bf16.msra.mxu0 %v15965_v20  ;;  %v16044_v20 = vld [vmem:[%s21978_s2 + $0x550] ss:$8 sps:$4 sm:$0xff]  }
 0x197   :  { %5778 = vmatprep.subr.bf16.mxu0 %v15970_v21  ;;  %v16049_v21 = vld [vmem:[%s21978_s2 + $0x564] ss:$8 sps:$4 sm:$0xff]  }
 0x19a   :  { %5779 = vmatpush1.bf16.msra.mxu0 %v15968_v22  ;;  %v16047_v22 = vld [vmem:[%s21978_s2 + $0x560] ss:$8 sps:$4 sm:$0xff]  }
 0x19b   :  { %5780 = vmatprep.subr.bf16.mxu0 %v15973_v23  ;;  %v16052_v23 = vld [vmem:[%s21978_s2 + $0x574] ss:$8 sps:$4 sm:$0xff]  }
 0x19e   :  { %5781 = vmatpush1.bf16.msra.mxu0 %v15971_v24  ;;  %v16050_v24 = vld [vmem:[%s21978_s2 + $0x570] ss:$8 sps:$4 sm:$0xff]  }
 0x19f   :  { %5782 = vmatprep.subr.bf16.mxu0 %v15976_v25  ;;  %v16055_v25 = vld [vmem:[%s21978_s2 + $0x584] ss:$8 sps:$4 sm:$0xff]  }
 0x1a2   :  { %5783 = vmatpush1.bf16.msra.mxu0 %v15974_v27  ;;  %v16058_v27 = vld [vmem:[%s21978_s2 + $0x594] ss:$8 sps:$4 sm:$0xff]  }
 0x1a3   :  { %5784 = vmatprep.subr.bf16.mxu0 %v15979_v28  ;;  %v16056_v28 = vld [vmem:[%s21978_s2 + $0x590] ss:$8 sps:$4 sm:$0xff]  }
 0x1a6   :  { %5785 = vmatpush1.bf16.msra.mxu0 %v15977_v30  ;;  %v16059_v30 = vld [vmem:[%s21978_s2 + $0x5a0] ss:$8 sps:$4 sm:$0xff]  }
 0x1a7   :  { %5795 = vmatprep.subr.bf16.mxu0 %v15983_v31  ;;  %v16064_v31 = vld [vmem:[%s21978_s2 + $0x5b4] ss:$8 sps:$4 sm:$0xff]  }
 0x1a9   :  { %5787 = vmatmul.mubr.bf16.vlgmr.msra.gmra.mrb[0].mxu0 %v1414_v33  ;;  %v16067_v33 = vld [vmem:[%s21978_s2 + $0x5c4] ss:$8 sps:$4 sm:$0xff]  }
 0x1aa   :  { %5796 = vmatpush1.bf16.msra.mxu0 %v15981_v34  ;;  %5827 = vmatprep.mubr.bf16.mxu0 %v1417_v36  ;;  %v16065_v34 = vld [vmem:[%s21978_s2 + $0x5c0] ss:$8 sps:$4 sm:$0xff]   ;;  %v16068_v36 = vld [vmem:[%s21978_s2 + $0x5d0] ss:$8 sps:$4 sm:$0xff]  }
 0x1ab   :  { %5797 = vmatprep.subr.bf16.mxu0 %v15986_v35  ;;  %v16070_v35 = vld [vmem:[%s21978_s2 + $0x5d4] ss:$8 sps:$4 sm:$0xff]  }
 0x1ae   :  { %5798 = vmatpush1.bf16.msra.mxu0 %v15984_v37  ;;  %v16073_v37 = vld [vmem:[%s21978_s2 + $0x5e4] ss:$8 sps:$4 sm:$0xff]  }
 0x1af   :  { %5799 = vmatprep.subr.bf16.mxu0 %v15989_v38  ;;  %v19518_v38 = vld [vmem:[%s22000_s24 + $0x18] sm:$0xff] }
 0x1b2   :  { %5800 = vmatpush1.bf16.msra.mxu0 %v15987_v39  ;;  %v16071_v39 = vld [vmem:[%s21978_s2 + $0x5e0] ss:$8 sps:$4 sm:$0xff]  }
 0x1b3   :  { %5801 = vmatprep.subr.bf16.mxu0 %v15992_v40  ;;  %v16076_v40 = vld [vmem:[%s21978_s2 + $0x5f4] ss:$8 sps:$4 sm:$0xff]  }
 0x1b6   :  { %5802 = vmatpush1.bf16.msra.mxu0 %v15990_v41  ;;  %v19528_v41 = vrot.slane %v19518_v38, %v18926_v16 }
 0x1b7   :  { %5803 = vmatprep.subr.bf16.mxu0 %v15995_v42  ;;  %v16074_v42 = vld [vmem:[%s21978_s2 + $0x5f0] ss:$8 sps:$4 sm:$0xff]  }
 0x1ba   :  { %5804 = vmatpush1.bf16.msra.mxu0 %v15993_v43  ;;  %v16080_v43 = vld [vmem:[%s21978_s2 + $0x604] ss:$8 sps:$4 sm:$0xff]  }
 0x1bb   :  { %5805 = vmatprep.subr.bf16.mxu0 %v15998_v44  ;;  %v1201_v44 = vcombine.high %v19528_v41, %v19528_v41 }
 0x1be   :  { %5806 = vmatpush1.bf16.msra.mxu0 %v15996_v45  ;;  %v1418_v45 = vpack.c.bf16 %v19419_v2, %v19419_v2  ;;  %v16110_v2 = vld [vmem:[%s21978_s2 + $0x6a4] ss:$8 sps:$4 sm:$0xff]  }
 0x1bf   :  { %5807 = vmatprep.subr.bf16.mxu0 %v16001_v46  ;;  %v16078_v46 = vld [vmem:[%s21978_s2 + $0x600] ss:$8 sps:$4 sm:$0xff]  }
 0x1c2   :  { %5808 = vmatpush1.bf16.msra.mxu0 %v15999_v47  ;;  %v16083_v47 = vld [vmem:[%s21978_s2 + $0x614] ss:$8 sps:$4 sm:$0xff]  }
 0x1c3   :  { %5809 = vmatprep.subr.bf16.mxu0 %v16004_v48  ;;  %v1421_v48 = vpack.c.bf16 %v1201_v44, %v1201_v44  ;;  %v16159_v44 = vld [vmem:[%s21978_s2 + $0x7b0] ss:$8 sps:$4 sm:$0xff]  }
 0x1c6   :  { %5810 = vmatpush1.bf16.msra.mxu0 %v16002_v49  ;;  %v16081_v49 = vld [vmem:[%s21978_s2 + $0x610] ss:$8 sps:$4 sm:$0xff]  }
 0x1c7   :  { %5811 = vmatprep.subr.bf16.mxu0 %v16007_v50  ;;  %v16086_v50 = vld [vmem:[%s21978_s2 + $0x624] ss:$8 sps:$4 sm:$0xff]  }
 0x1ca   :  { %5812 = vmatpush1.bf16.msra.mxu0 %v16005_v51  ;;  %v16084_v51 = vld [vmem:[%s21978_s2 + $0x620] ss:$8 sps:$4 sm:$0xff]  }
 0x1cb   :  { %5813 = vmatprep.subr.bf16.mxu0 %v16010_v52  ;;  %v16089_v52 = vld [vmem:[%s21978_s2 + $0x634] ss:$8 sps:$4 sm:$0xff]  }
 0x1ce   :  { %5814 = vmatpush1.bf16.msra.mxu0 %v16008_v53  ;;  %v16087_v53 = vld [vmem:[%s21978_s2 + $0x630] ss:$8 sps:$4 sm:$0xff]  }
 0x1cf   :  { %5815 = vmatprep.subr.bf16.mxu0 %v16013_v54  ;;  %v16092_v54 = vld [vmem:[%s21978_s2 + $0x644] ss:$8 sps:$4 sm:$0xff]  }
 0x1d2   :  { %5816 = vmatpush1.bf16.msra.mxu0 %v16011_v55  ;;  %v16090_v55 = vld [vmem:[%s21978_s2 + $0x640] ss:$8 sps:$4 sm:$0xff]  }
 0x1d3   :  { %5817 = vmatprep.subr.bf16.mxu0 %v16016_v56  ;;  %v16095_v56 = vld [vmem:[%s21978_s2 + $0x654] ss:$8 sps:$4 sm:$0xff]  }
 0x1d6   :  { %5818 = vmatpush1.bf16.msra.mxu0 %v16014_v57  ;;  %v16093_v57 = vld [vmem:[%s21978_s2 + $0x650] ss:$8 sps:$4 sm:$0xff]  }
 0x1d7   :  { %5819 = vmatprep.subr.bf16.mxu0 %v16019_v58  ;;  %v16098_v58 = vld [vmem:[%s21978_s2 + $0x664] ss:$8 sps:$4 sm:$0xff]  }
 0x1da   :  { %5820 = vmatpush1.bf16.msra.mxu0 %v16017_v59  ;;  %v16096_v59 = vld [vmem:[%s21978_s2 + $0x660] ss:$8 sps:$4 sm:$0xff]  }
 0x1db   :  { %5821 = vmatprep.subr.bf16.mxu0 %v16022_v60  ;;  %v16101_v60 = vld [vmem:[%s21978_s2 + $0x674] ss:$8 sps:$4 sm:$0xff]  }
 0x1de   :  { %5822 = vmatpush1.bf16.msra.mxu0 %v16020_v61  ;;  %v16099_v61 = vld [vmem:[%s21978_s2 + $0x670] ss:$8 sps:$4 sm:$0xff]  }
 0x1df   :  { %5823 = vmatprep.subr.bf16.mxu0 %v16025_v62  ;;  %v16104_v62 = vld [vmem:[%s21978_s2 + $0x684] ss:$8 sps:$4 sm:$0xff]  }
 0x1e2   :  { %5824 = vmatpush1.bf16.msra.mxu0 %v16023_v0  ;;  %v16107_v0 = vld [vmem:[%s21978_s2 + $0x694] ss:$8 sps:$4 sm:$0xff]  }
 0x1e3   :  { %5825 = vmatprep.subr.bf16.mxu0 %v16028_v1  ;;  %v16105_v1 = vld [vmem:[%s21978_s2 + $0x690] ss:$8 sps:$4 sm:$0xff]  }
 0x1e6   :  { %5826 = vmatpush1.bf16.msra.mxu0 %v16026_v3  ;;  %v16108_v3 = vld [vmem:[%s21978_s2 + $0x6a0] ss:$8 sps:$4 sm:$0xff]  }
 0x1e7   :  { %5836 = vmatprep.subr.bf16.mxu0 %v16031_v4  ;;  %v16113_v4 = vld [vmem:[%s21978_s2 + $0x6b4] ss:$8 sps:$4 sm:$0xff]  }
 0x1e9   :  { %5828 = vmatmul.mubr.bf16.vlgmr.msra.gmra.mrb[0].mxu0 %v1416_v6  ;;  %v16116_v6 = vld [vmem:[%s21978_s2 + $0x6c4] ss:$8 sps:$4 sm:$0xff]  }
 0x1ea   :  { %5837 = vmatpush1.bf16.msra.mxu0 %v16029_v7  ;;  %5868 = vmatprep.mubr.bf16.mxu0 %v1419_v9  ;;  %v16114_v7 = vld [vmem:[%s21978_s2 + $0x6c0] ss:$8 sps:$4 sm:$0xff]   ;;  %v16117_v9 = vld [vmem:[%s21978_s2 + $0x6d0] ss:$8 sps:$4 sm:$0xff]  }
 0x1eb   :  { %5838 = vmatprep.subr.bf16.mxu0 %v16034_v8  ;;  %v16119_v8 = vld [vmem:[%s21978_s2 + $0x6d4] ss:$8 sps:$4 sm:$0xff]  }
 0x1ee   :  { %5839 = vmatpush1.bf16.msra.mxu0 %v16032_v10  ;;  %v16122_v10 = vld [vmem:[%s21978_s2 + $0x6e4] ss:$8 sps:$4 sm:$0xff]  }
 0x1ef   :  { %5840 = vmatprep.subr.bf16.mxu0 %v16037_v11  ;;  %v1186_v11 = vcombine.high %v19518_v38, %v19518_v38  ;;  %v16150_v38 = vld [vmem:[%s21978_s2 + $0x780] ss:$8 sps:$4 sm:$0xff]  }
 0x1f2   :  { %5841 = vmatpush1.bf16.msra.mxu0 %v16035_v12  ;;  %v16120_v12 = vld [vmem:[%s21978_s2 + $0x6e0] ss:$8 sps:$4 sm:$0xff]  }
 0x1f3   :  { %5842 = vmatprep.subr.bf16.mxu0 %v16040_v14  ;;  %v16125_v14 = vld [vmem:[%s21978_s2 + $0x6f4] ss:$8 sps:$4 sm:$0xff]  }
 0x1f6   :  { %5843 = vmatpush1.bf16.msra.mxu0 %v16038_v15  ;;  %v19633_v15 = vrot.slane %v1186_v11, %v18926_v16  ;;  %v16199_v11 = vld [vmem:[%s21978_s2 + $0x880] ss:$8 sps:$4 sm:$0xff]  }
 0x1f7   :  { %5844 = vmatprep.subr.bf16.mxu0 %v16043_v17  ;;  %v16123_v17 = vld [vmem:[%s21978_s2 + $0x6f0] ss:$8 sps:$4 sm:$0xff]  }
 0x1fa   :  { %5845 = vmatpush1.bf16.msra.mxu0 %v16041_v18  ;;  %v16128_v18 = vld [vmem:[%s21978_s2 + $0x704] ss:$8 sps:$4 sm:$0xff]  }
 0x1fb   :  { %5846 = vmatprep.subr.bf16.mxu0 %v16046_v19  ;;  %v1202_v19 = vcombine.high %v19633_v15, %v19633_v15 }
 0x1fe   :  { %5847 = vmatpush1.bf16.msra.mxu0 %v16044_v20  ;;  %v1420_v20 = vpack.c.bf16 %v19528_v41, %v19528_v41  ;;  %v16158_v41 = vld [vmem:[%s21978_s2 + $0x7a4] ss:$8 sps:$4 sm:$0xff]  }
 0x1ff   :  { %5848 = vmatprep.subr.bf16.mxu0 %v16049_v21  ;;  %v16126_v21 = vld [vmem:[%s21978_s2 + $0x700] ss:$8 sps:$4 sm:$0xff]  }
 0x202   :  { %5849 = vmatpush1.bf16.msra.mxu0 %v16047_v22  ;;  %v16131_v22 = vld [vmem:[%s21978_s2 + $0x714] ss:$8 sps:$4 sm:$0xff]  }
 0x203   :  { %5850 = vmatprep.subr.bf16.mxu0 %v16052_v23  ;;  %v1423_v23 = vpack.c.bf16 %v1202_v19, %v1202_v19  ;;  %v16208_v19 = vld [vmem:[%s21978_s2 + $0x8b0] ss:$8 sps:$4 sm:$0xff]  }
 0x206   :  { %5851 = vmatpush1.bf16.msra.mxu0 %v16050_v24  ;;  %v16129_v24 = vld [vmem:[%s21978_s2 + $0x710] ss:$8 sps:$4 sm:$0xff]  }
 0x207   :  { %5852 = vmatprep.subr.bf16.mxu0 %v16055_v25  ;;  %v16134_v25 = vld [vmem:[%s21978_s2 + $0x724] ss:$8 sps:$4 sm:$0xff]  }
 0x20a   :  { %5853 = vmatpush1.bf16.msra.mxu0 %v16053_v26  ;;  %v16132_v26 = vld [vmem:[%s21978_s2 + $0x720] ss:$8 sps:$4 sm:$0xff]  }
 0x20b   :  { %5854 = vmatprep.subr.bf16.mxu0 %v16058_v27  ;;  %v16137_v27 = vld [vmem:[%s21978_s2 + $0x734] ss:$8 sps:$4 sm:$0xff]  }
 0x20e   :  { %5855 = vmatpush1.bf16.msra.mxu0 %v16056_v28  ;;  %v16135_v28 = vld [vmem:[%s21978_s2 + $0x730] ss:$8 sps:$4 sm:$0xff]  }
 0x20f   :  { %5856 = vmatprep.subr.bf16.mxu0 %v16061_v29  ;;  %v16140_v29 = vld [vmem:[%s21978_s2 + $0x744] ss:$8 sps:$4 sm:$0xff]  }
 0x212   :  { %5857 = vmatpush1.bf16.msra.mxu0 %v16059_v30  ;;  %v16138_v30 = vld [vmem:[%s21978_s2 + $0x740] ss:$8 sps:$4 sm:$0xff]  }
 0x213   :  { %5858 = vmatprep.subr.bf16.mxu0 %v16064_v31  ;;  %v16143_v31 = vld [vmem:[%s21978_s2 + $0x754] ss:$8 sps:$4 sm:$0xff]  }
 0x216   :  { %5859 = vmatpush1.bf16.msra.mxu0 %v16062_v32  ;;  %v16141_v32 = vld [vmem:[%s21978_s2 + $0x750] ss:$8 sps:$4 sm:$0xff]  }
 0x217   :  { %5860 = vmatprep.subr.bf16.mxu0 %v16067_v33  ;;  %v16146_v33 = vld [vmem:[%s21978_s2 + $0x764] ss:$8 sps:$4 sm:$0xff]  }
 0x21a   :  { %5861 = vmatpush1.bf16.msra.mxu0 %v16065_v34  ;;  %v16144_v34 = vld [vmem:[%s21978_s2 + $0x760] ss:$8 sps:$4 sm:$0xff]  }
 0x21b   :  { %5862 = vmatprep.subr.bf16.mxu0 %v16070_v35  ;;  %v16149_v35 = vld [vmem:[%s21978_s2 + $0x774] ss:$8 sps:$4 sm:$0xff]  }
 0x21e   :  { %5863 = vmatpush1.bf16.msra.mxu0 %v16068_v36  ;;  %v16147_v36 = vld [vmem:[%s21978_s2 + $0x770] ss:$8 sps:$4 sm:$0xff]  }
 0x21f   :  { %5864 = vmatprep.subr.bf16.mxu0 %v16073_v37  ;;  %v16152_v37 = vld [vmem:[%s21978_s2 + $0x784] ss:$8 sps:$4 sm:$0xff]  }
 0x222   :  { %5865 = vmatpush1.bf16.msra.mxu0 %v16071_v39  ;;  %v16155_v39 = vld [vmem:[%s21978_s2 + $0x794] ss:$8 sps:$4 sm:$0xff]  }
 0x223   :  { %5866 = vmatprep.subr.bf16.mxu0 %v16076_v40  ;;  %v16153_v40 = vld [vmem:[%s21978_s2 + $0x790] ss:$8 sps:$4 sm:$0xff]  }
 0x226   :  { %5867 = vmatpush1.bf16.msra.mxu0 %v16074_v42  ;;  %v16156_v42 = vld [vmem:[%s21978_s2 + $0x7a0] ss:$8 sps:$4 sm:$0xff]  }
 0x227   :  { %5877 = vmatprep.subr.bf16.mxu0 %v16080_v43  ;;  %v16161_v43 = vld [vmem:[%s21978_s2 + $0x7b4] ss:$8 sps:$4 sm:$0xff]  }
 0x229   :  { %5869 = vmatmul.mubr.bf16.vlgmr.msra.gmra.mrb[0].mxu0 %v1418_v45  ;;  %v16164_v45 = vld [vmem:[%s21978_s2 + $0x7c4] ss:$8 sps:$4 sm:$0xff]  }
 0x22a   :  { %5878 = vmatpush1.bf16.msra.mxu0 %v16078_v46  ;;  %5909 = vmatprep.mubr.bf16.mxu0 %v1421_v48  ;;  %v16162_v46 = vld [vmem:[%s21978_s2 + $0x7c0] ss:$8 sps:$4 sm:$0xff]   ;;  %v16165_v48 = vld [vmem:[%s21978_s2 + $0x7d0] ss:$8 sps:$4 sm:$0xff]  }
 0x22b   :  { %5879 = vmatprep.subr.bf16.mxu0 %v16083_v47  ;;  %v16167_v47 = vld [vmem:[%s21978_s2 + $0x7d4] ss:$8 sps:$4 sm:$0xff]  }
 0x22e   :  { %5880 = vmatpush1.bf16.msra.mxu0 %v16081_v49  ;;  %v16170_v49 = vld [vmem:[%s21978_s2 + $0x7e4] ss:$8 sps:$4 sm:$0xff]  }
 0x22f   :  { %5881 = vmatprep.subr.bf16.mxu0 %v16086_v50  ;;  %v19732_v50 = vld [vmem:[%s22000_s24 + $0x20] sm:$0xff] }
 0x232   :  { %5882 = vmatpush1.bf16.msra.mxu0 %v16084_v51  ;;  %v16168_v51 = vld [vmem:[%s21978_s2 + $0x7e0] ss:$8 sps:$4 sm:$0xff]  }
 0x233   :  { %5883 = vmatprep.subr.bf16.mxu0 %v16089_v52  ;;  %v16173_v52 = vld [vmem:[%s21978_s2 + $0x7f4] ss:$8 sps:$4 sm:$0xff]  }
 0x236   :  { %5884 = vmatpush1.bf16.msra.mxu0 %v16087_v53  ;;  %v19742_v53 = vrot.slane %v19732_v50, %v18926_v16 }
 0x237   :  { %5885 = vmatprep.subr.bf16.mxu0 %v16092_v54  ;;  %v16171_v54 = vld [vmem:[%s21978_s2 + $0x7f0] ss:$8 sps:$4 sm:$0xff]  }
 0x23a   :  { %5886 = vmatpush1.bf16.msra.mxu0 %v16090_v55  ;;  %v16177_v55 = vld [vmem:[%s21978_s2 + $0x804] ss:$8 sps:$4 sm:$0xff]  }
 0x23b   :  { %5887 = vmatprep.subr.bf16.mxu0 %v16095_v56  ;;  %v1218_v56 = vcombine.high %v19742_v53, %v19742_v53 }
 0x23e   :  { %5888 = vmatpush1.bf16.msra.mxu0 %v16093_v57  ;;  %v1422_v57 = vpack.c.bf16 %v19633_v15, %v19633_v15  ;;  %v16207_v15 = vld [vmem:[%s21978_s2 + $0x8a4] ss:$8 sps:$4 sm:$0xff]  }
 0x23f   :  { %5889 = vmatprep.subr.bf16.mxu0 %v16098_v58  ;;  %v16175_v58 = vld [vmem:[%s21978_s2 + $0x800] ss:$8 sps:$4 sm:$0xff]  }
 0x242   :  { %5890 = vmatpush1.bf16.msra.mxu0 %v16096_v59  ;;  %v16180_v59 = vld [vmem:[%s21978_s2 + $0x814] ss:$8 sps:$4 sm:$0xff]  }
 0x243   :  { %5891 = vmatprep.subr.bf16.mxu0 %v16101_v60  ;;  %v1425_v60 = vpack.c.bf16 %v1218_v56, %v1218_v56  ;;  %v16256_v56 = vld [vmem:[%s21978_s2 + $0x9b0] ss:$8 sps:$4 sm:$0xff]  }
 0x246   :  { %5892 = vmatpush1.bf16.msra.mxu0 %v16099_v61  ;;  %v16178_v61 = vld [vmem:[%s21978_s2 + $0x810] ss:$8 sps:$4 sm:$0xff]  }
 0x247   :  { %5893 = vmatprep.subr.bf16.mxu0 %v16104_v62  ;;  %v16183_v62 = vld [vmem:[%s21978_s2 + $0x824] ss:$8 sps:$4 sm:$0xff]  }
 0x24a   :  { %5894 = vmatpush1.bf16.msra.mxu0 %v16102_v63  ;;  %v16181_v63 = vld [vmem:[%s21978_s2 + $0x820] ss:$8 sps:$4 sm:$0xff]  }
 0x24b   :  { %5895 = vmatprep.subr.bf16.mxu0 %v16107_v0  ;;  %v16186_v0 = vld [vmem:[%s21978_s2 + $0x834] ss:$8 sps:$4 sm:$0xff]  }
 0x24e   :  { %5896 = vmatpush1.bf16.msra.mxu0 %v16105_v1  ;;  %v16184_v1 = vld [vmem:[%s21978_s2 + $0x830] ss:$8 sps:$4 sm:$0xff]  }
 0x24f   :  { %5897 = vmatprep.subr.bf16.mxu0 %v16110_v2  ;;  %v16189_v2 = vld [vmem:[%s21978_s2 + $0x844] ss:$8 sps:$4 sm:$0xff]  }
 0x252   :  { %5898 = vmatpush1.bf16.msra.mxu0 %v16108_v3  ;;  %v16187_v3 = vld [vmem:[%s21978_s2 + $0x840] ss:$8 sps:$4 sm:$0xff]  }
 0x253   :  { %5899 = vmatprep.subr.bf16.mxu0 %v16113_v4  ;;  %v16192_v4 = vld [vmem:[%s21978_s2 + $0x854] ss:$8 sps:$4 sm:$0xff]  }
 0x256   :  { %5900 = vmatpush1.bf16.msra.mxu0 %v16111_v5  ;;  %v16190_v5 = vld [vmem:[%s21978_s2 + $0x850] ss:$8 sps:$4 sm:$0xff]  }
 0x257   :  { %5901 = vmatprep.subr.bf16.mxu0 %v16116_v6  ;;  %v16195_v6 = vld [vmem:[%s21978_s2 + $0x864] ss:$8 sps:$4 sm:$0xff]  }
 0x25a   :  { %5902 = vmatpush1.bf16.msra.mxu0 %v16114_v7  ;;  %v16193_v7 = vld [vmem:[%s21978_s2 + $0x860] ss:$8 sps:$4 sm:$0xff]  }
 0x25b   :  { %5903 = vmatprep.subr.bf16.mxu0 %v16119_v8  ;;  %v16198_v8 = vld [vmem:[%s21978_s2 + $0x874] ss:$8 sps:$4 sm:$0xff]  }
 0x25e   :  { %5904 = vmatpush1.bf16.msra.mxu0 %v16117_v9  ;;  %v16196_v9 = vld [vmem:[%s21978_s2 + $0x870] ss:$8 sps:$4 sm:$0xff]  }
 0x25f   :  { %5905 = vmatprep.subr.bf16.mxu0 %v16122_v10  ;;  %v16201_v10 = vld [vmem:[%s21978_s2 + $0x884] ss:$8 sps:$4 sm:$0xff]  }
 0x262   :  { %5906 = vmatpush1.bf16.msra.mxu0 %v16120_v12  ;;  %v16204_v12 = vld [vmem:[%s21978_s2 + $0x894] ss:$8 sps:$4 sm:$0xff]  }
 0x263   :  { %5907 = vmatprep.subr.bf16.mxu0 %v16125_v14  ;;  %v16202_v14 = vld [vmem:[%s21978_s2 + $0x890] ss:$8 sps:$4 sm:$0xff]  }
 0x266   :  { %5908 = vmatpush1.bf16.msra.mxu0 %v16123_v17  ;;  %v16205_v17 = vld [vmem:[%s21978_s2 + $0x8a0] ss:$8 sps:$4 sm:$0xff]  }
 0x267   :  { %5918 = vmatprep.subr.bf16.mxu0 %v16128_v18  ;;  %v16210_v18 = vld [vmem:[%s21978_s2 + $0x8b4] ss:$8 sps:$4 sm:$0xff]  }
 0x269   :  { %5910 = vmatmul.mubr.bf16.vlgmr.msra.gmra.mrb[0].mxu0 %v1420_v20  ;;  %v16213_v20 = vld [vmem:[%s21978_s2 + $0x8c4] ss:$8 sps:$4 sm:$0xff]  }
 0x26a   :  { %5919 = vmatpush1.bf16.msra.mxu0 %v16126_v21  ;;  %5950 = vmatprep.mubr.bf16.mxu0 %v1423_v23  ;;  %v16211_v21 = vld [vmem:[%s21978_s2 + $0x8c0] ss:$8 sps:$4 sm:$0xff]   ;;  %v16214_v23 = vld [vmem:[%s21978_s2 + $0x8d0] ss:$8 sps:$4 sm:$0xff]  }
 0x26b   :  { %5920 = vmatprep.subr.bf16.mxu0 %v16131_v22  ;;  %v16216_v22 = vld [vmem:[%s21978_s2 + $0x8d4] ss:$8 sps:$4 sm:$0xff]  }
 0x26e   :  { %5921 = vmatpush1.bf16.msra.mxu0 %v16129_v24  ;;  %v16219_v24 = vld [vmem:[%s21978_s2 + $0x8e4] ss:$8 sps:$4 sm:$0xff]  }
 0x26f   :  { %5922 = vmatprep.subr.bf16.mxu0 %v16134_v25  ;;  %v1203_v25 = vcombine.high %v19732_v50, %v19732_v50  ;;  %v16247_v50 = vld [vmem:[%s21978_s2 + $0x980] ss:$8 sps:$4 sm:$0xff]  }
 0x272   :  { %5923 = vmatpush1.bf16.msra.mxu0 %v16132_v26  ;;  %v16217_v26 = vld [vmem:[%s21978_s2 + $0x8e0] ss:$8 sps:$4 sm:$0xff]  }
 0x273   :  { %5924 = vmatprep.subr.bf16.mxu0 %v16137_v27  ;;  %v16222_v27 = vld [vmem:[%s21978_s2 + $0x8f4] ss:$8 sps:$4 sm:$0xff]  }
 0x276   :  { %5925 = vmatpush1.bf16.msra.mxu0 %v16135_v28  ;;  %v19847_v28 = vrot.slane %v1203_v25, %v18926_v16  ;;  %v16296_v25 = vld [vmem:[%s21978_s2 + $0xa80] ss:$8 sps:$4 sm:$0xff]  }
 0x277   :  { %5926 = vmatprep.subr.bf16.mxu0 %v16140_v29  ;;  %v16220_v29 = vld [vmem:[%s21978_s2 + $0x8f0] ss:$8 sps:$4 sm:$0xff]  }
 0x27a   :  { %5927 = vmatpush1.bf16.msra.mxu0 %v16138_v30  ;;  %v16225_v30 = vld [vmem:[%s21978_s2 + $0x904] ss:$8 sps:$4 sm:$0xff]  }
 0x27b   :  { %5928 = vmatprep.subr.bf16.mxu0 %v16143_v31  ;;  %v1219_v31 = vcombine.high %v19847_v28, %v19847_v28 }
 0x27e   :  { %5929 = vmatpush1.bf16.msra.mxu0 %v16141_v32  ;;  %v1424_v32 = vpack.c.bf16 %v19742_v53, %v19742_v53  ;;  %v16255_v53 = vld [vmem:[%s21978_s2 + $0x9a4] ss:$8 sps:$4 sm:$0xff]  }
 0x27f   :  { %5930 = vmatprep.subr.bf16.mxu0 %v16146_v33  ;;  %v16223_v33 = vld [vmem:[%s21978_s2 + $0x900] ss:$8 sps:$4 sm:$0xff]  }
 0x282   :  { %5931 = vmatpush1.bf16.msra.mxu0 %v16144_v34  ;;  %v16228_v34 = vld [vmem:[%s21978_s2 + $0x914] ss:$8 sps:$4 sm:$0xff]  }
 0x283   :  { %5932 = vmatprep.subr.bf16.mxu0 %v16149_v35  ;;  %v1427_v35 = vpack.c.bf16 %v1219_v31, %v1219_v31  ;;  %v16305_v31 = vld [vmem:[%s21978_s2 + $0xab0] ss:$8 sps:$4 sm:$0xff]  }
 0x286   :  { %5933 = vmatpush1.bf16.msra.mxu0 %v16147_v36  ;;  %v16226_v36 = vld [vmem:[%s21978_s2 + $0x910] ss:$8 sps:$4 sm:$0xff]  }
 0x287   :  { %5934 = vmatprep.subr.bf16.mxu0 %v16152_v37  ;;  %v16231_v37 = vld [vmem:[%s21978_s2 + $0x924] ss:$8 sps:$4 sm:$0xff]  }
 0x28a   :  { %5935 = vmatpush1.bf16.msra.mxu0 %v16150_v38  ;;  %v16229_v38 = vld [vmem:[%s21978_s2 + $0x920] ss:$8 sps:$4 sm:$0xff]  }
 0x28b   :  { %5936 = vmatprep.subr.bf16.mxu0 %v16155_v39  ;;  %v16234_v39 = vld [vmem:[%s21978_s2 + $0x934] ss:$8 sps:$4 sm:$0xff]  }
 0x28e   :  { %5937 = vmatpush1.bf16.msra.mxu0 %v16153_v40  ;;  %v16232_v40 = vld [vmem:[%s21978_s2 + $0x930] ss:$8 sps:$4 sm:$0xff]  }
 0x28f   :  { %5938 = vmatprep.subr.bf16.mxu0 %v16158_v41  ;;  %v16237_v41 = vld [vmem:[%s21978_s2 + $0x944] ss:$8 sps:$4 sm:$0xff]  }
 0x292   :  { %5939 = vmatpush1.bf16.msra.mxu0 %v16156_v42  ;;  %v16235_v42 = vld [vmem:[%s21978_s2 + $0x940] ss:$8 sps:$4 sm:$0xff]  }
 0x293   :  { %5940 = vmatprep.subr.bf16.mxu0 %v16161_v43  ;;  %v16240_v43 = vld [vmem:[%s21978_s2 + $0x954] ss:$8 sps:$4 sm:$0xff]  }
 0x296   :  { %5941 = vmatpush1.bf16.msra.mxu0 %v16159_v44  ;;  %v16238_v44 = vld [vmem:[%s21978_s2 + $0x950] ss:$8 sps:$4 sm:$0xff]  }
 0x297   :  { %5942 = vmatprep.subr.bf16.mxu0 %v16164_v45  ;;  %v16243_v45 = vld [vmem:[%s21978_s2 + $0x964] ss:$8 sps:$4 sm:$0xff]  }
 0x29a   :  { %5943 = vmatpush1.bf16.msra.mxu0 %v16162_v46  ;;  %v16241_v46 = vld [vmem:[%s21978_s2 + $0x960] ss:$8 sps:$4 sm:$0xff]  }
 0x29b   :  { %5944 = vmatprep.subr.bf16.mxu0 %v16167_v47  ;;  %v16246_v47 = vld [vmem:[%s21978_s2 + $0x974] ss:$8 sps:$4 sm:$0xff]  }
 0x29e   :  { %5945 = vmatpush1.bf16.msra.mxu0 %v16165_v48  ;;  %v16244_v48 = vld [vmem:[%s21978_s2 + $0x970] ss:$8 sps:$4 sm:$0xff]  }
 0x29f   :  { %5946 = vmatprep.subr.bf16.mxu0 %v16170_v49  ;;  %v16249_v49 = vld [vmem:[%s21978_s2 + $0x984] ss:$8 sps:$4 sm:$0xff]  }
 0x2a2   :  { %5947 = vmatpush1.bf16.msra.mxu0 %v16168_v51  ;;  %v16252_v51 = vld [vmem:[%s21978_s2 + $0x994] ss:$8 sps:$4 sm:$0xff]  }
 0x2a3   :  { %5948 = vmatprep.subr.bf16.mxu0 %v16173_v52  ;;  %v16250_v52 = vld [vmem:[%s21978_s2 + $0x990] ss:$8 sps:$4 sm:$0xff]  }
 0x2a6   :  { %5949 = vmatpush1.bf16.msra.mxu0 %v16171_v54  ;;  %v16253_v54 = vld [vmem:[%s21978_s2 + $0x9a0] ss:$8 sps:$4 sm:$0xff]  }
 0x2a7   :  { %5959 = vmatprep.subr.bf16.mxu0 %v16177_v55  ;;  %v16258_v55 = vld [vmem:[%s21978_s2 + $0x9b4] ss:$8 sps:$4 sm:$0xff]  }
 0x2a9   :  { %5951 = vmatmul.mubr.bf16.vlgmr.msra.gmra.mrb[0].mxu0 %v1422_v57  ;;  %v16261_v57 = vld [vmem:[%s21978_s2 + $0x9c4] ss:$8 sps:$4 sm:$0xff]  }
 0x2aa   :  { %5960 = vmatpush1.bf16.msra.mxu0 %v16175_v58  ;;  %5991 = vmatprep.mubr.bf16.mxu0 %v1425_v60  ;;  %v16259_v58 = vld [vmem:[%s21978_s2 + $0x9c0] ss:$8 sps:$4 sm:$0xff]   ;;  %v16262_v60 = vld [vmem:[%s21978_s2 + $0x9d0] ss:$8 sps:$4 sm:$0xff]  }
 0x2ab   :  { %5961 = vmatprep.subr.bf16.mxu0 %v16180_v59  ;;  %v16264_v59 = vld [vmem:[%s21978_s2 + $0x9d4] ss:$8 sps:$4 sm:$0xff]  }
 0x2ae   :  { %5962 = vmatpush1.bf16.msra.mxu0 %v16178_v61  ;;  %v16267_v61 = vld [vmem:[%s21978_s2 + $0x9e4] ss:$8 sps:$4 sm:$0xff]  }
 0x2af   :  { %5963 = vmatprep.subr.bf16.mxu0 %v16183_v62  ;;  %v19946_v62 = vld [vmem:[%s22000_s24 + $0x28] sm:$0xff] }
 0x2b2   :  { %5964 = vmatpush1.bf16.msra.mxu0 %v16181_v63  ;;  %v16265_v63 = vld [vmem:[%s21978_s2 + $0x9e0] ss:$8 sps:$4 sm:$0xff]  }
 0x2b3   :  { %5965 = vmatprep.subr.bf16.mxu0 %v16186_v0  ;;  %v16270_v0 = vld [vmem:[%s21978_s2 + $0x9f4] ss:$8 sps:$4 sm:$0xff]  }
 0x2b6   :  { %5966 = vmatpush1.bf16.msra.mxu0 %v16184_v1  ;;  %v19956_v1 = vrot.slane %v19946_v62, %v18926_v16 }
 0x2b7   :  { %5967 = vmatprep.subr.bf16.mxu0 %v16189_v2  ;;  %v16268_v2 = vld [vmem:[%s21978_s2 + $0x9f0] ss:$8 sps:$4 sm:$0xff]  }
 0x2ba   :  { %5968 = vmatpush1.bf16.msra.mxu0 %v16187_v3  ;;  %v16274_v3 = vld [vmem:[%s21978_s2 + $0xa04] ss:$8 sps:$4 sm:$0xff]  }
 0x2bb   :  { %5969 = vmatprep.subr.bf16.mxu0 %v16192_v4  ;;  %v1235_v4 = vcombine.high %v19956_v1, %v19956_v1 }
 0x2be   :  { %5970 = vmatpush1.bf16.msra.mxu0 %v16190_v5  ;;  %v1426_v5 = vpack.c.bf16 %v19847_v28, %v19847_v28  ;;  %v16304_v28 = vld [vmem:[%s21978_s2 + $0xaa4] ss:$8 sps:$4 sm:$0xff]  }
 0x2bf   :  { %5971 = vmatprep.subr.bf16.mxu0 %v16195_v6  ;;  %v16272_v6 = vld [vmem:[%s21978_s2 + $0xa00] ss:$8 sps:$4 sm:$0xff]  }
 0x2c2   :  { %5972 = vmatpush1.bf16.msra.mxu0 %v16193_v7  ;;  %v16277_v7 = vld [vmem:[%s21978_s2 + $0xa14] ss:$8 sps:$4 sm:$0xff]  }
 0x2c3   :  { %5973 = vmatprep.subr.bf16.mxu0 %v16198_v8  ;;  %v1429_v8 = vpack.c.bf16 %v1235_v4, %v1235_v4  ;;  %v16353_v4 = vld [vmem:[%s21978_s2 + $0xbb0] ss:$8 sps:$4 sm:$0xff]  }
 0x2c6   :  { %5974 = vmatpush1.bf16.msra.mxu0 %v16196_v9  ;;  %v16275_v9 = vld [vmem:[%s21978_s2 + $0xa10] ss:$8 sps:$4 sm:$0xff]  }
 0x2c7   :  { %5975 = vmatprep.subr.bf16.mxu0 %v16201_v10  ;;  %v16280_v10 = vld [vmem:[%s21978_s2 + $0xa24] ss:$8 sps:$4 sm:$0xff]  }
 0x2ca   :  { %5976 = vmatpush1.bf16.msra.mxu0 %v16199_v11  ;;  %v16278_v11 = vld [vmem:[%s21978_s2 + $0xa20] ss:$8 sps:$4 sm:$0xff]  }
 0x2cb   :  { %5977 = vmatprep.subr.bf16.mxu0 %v16204_v12  ;;  %v16283_v12 = vld [vmem:[%s21978_s2 + $0xa34] ss:$8 sps:$4 sm:$0xff]  }
 0x2ce   :  { %5978 = vmatpush1.bf16.msra.mxu0 %v16202_v14  ;;  %v16281_v14 = vld [vmem:[%s21978_s2 + $0xa30] ss:$8 sps:$4 sm:$0xff]  }
 0x2cf   :  { %5979 = vmatprep.subr.bf16.mxu0 %v16207_v15  ;;  %v16286_v15 = vld [vmem:[%s21978_s2 + $0xa44] ss:$8 sps:$4 sm:$0xff]  }
 0x2d2   :  { %5980 = vmatpush1.bf16.msra.mxu0 %v16205_v17  ;;  %v16284_v17 = vld [vmem:[%s21978_s2 + $0xa40] ss:$8 sps:$4 sm:$0xff]  }
 0x2d3   :  { %5981 = vmatprep.subr.bf16.mxu0 %v16210_v18  ;;  %v16289_v18 = vld [vmem:[%s21978_s2 + $0xa54] ss:$8 sps:$4 sm:$0xff]  }
 0x2d6   :  { %5982 = vmatpush1.bf16.msra.mxu0 %v16208_v19  ;;  %v16287_v19 = vld [vmem:[%s21978_s2 + $0xa50] ss:$8 sps:$4 sm:$0xff]  }
 0x2d7   :  { %5983 = vmatprep.subr.bf16.mxu0 %v16213_v20  ;;  %v16292_v20 = vld [vmem:[%s21978_s2 + $0xa64] ss:$8 sps:$4 sm:$0xff]  }
 0x2da   :  { %5984 = vmatpush1.bf16.msra.mxu0 %v16211_v21  ;;  %v16290_v21 = vld [vmem:[%s21978_s2 + $0xa60] ss:$8 sps:$4 sm:$0xff]  }
 0x2db   :  { %5985 = vmatprep.subr.bf16.mxu0 %v16216_v22  ;;  %v16295_v22 = vld [vmem:[%s21978_s2 + $0xa74] ss:$8 sps:$4 sm:$0xff]  }
 0x2de   :  { %5986 = vmatpush1.bf16.msra.mxu0 %v16214_v23  ;;  %v16293_v23 = vld [vmem:[%s21978_s2 + $0xa70] ss:$8 sps:$4 sm:$0xff]  }
 0x2df   :  { %5987 = vmatprep.subr.bf16.mxu0 %v16219_v24  ;;  %v16298_v24 = vld [vmem:[%s21978_s2 + $0xa84] ss:$8 sps:$4 sm:$0xff]  }
 0x2e2   :  { %5988 = vmatpush1.bf16.msra.mxu0 %v16217_v26  ;;  %v16301_v26 = vld [vmem:[%s21978_s2 + $0xa94] ss:$8 sps:$4 sm:$0xff]  }
 0x2e3   :  { %5989 = vmatprep.subr.bf16.mxu0 %v16222_v27  ;;  %v16299_v27 = vld [vmem:[%s21978_s2 + $0xa90] ss:$8 sps:$4 sm:$0xff]  }
 0x2e6   :  { %5990 = vmatpush1.bf16.msra.mxu0 %v16220_v29  ;;  %v16302_v29 = vld [vmem:[%s21978_s2 + $0xaa0] ss:$8 sps:$4 sm:$0xff]  }
 0x2e7   :  { %6000 = vmatprep.subr.bf16.mxu0 %v16225_v30  ;;  %v16307_v30 = vld [vmem:[%s21978_s2 + $0xab4] ss:$8 sps:$4 sm:$0xff]  }
 0x2e9   :  { %5992 = vmatmul.mubr.bf16.vlgmr.msra.gmra.mrb[0].mxu0 %v1424_v32  ;;  %v16310_v32 = vld [vmem:[%s21978_s2 + $0xac4] ss:$8 sps:$4 sm:$0xff]  }
 0x2ea   :  { %6001 = vmatpush1.bf16.msra.mxu0 %v16223_v33  ;;  %6032 = vmatprep.mubr.bf16.mxu0 %v1427_v35  ;;  %v16308_v33 = vld [vmem:[%s21978_s2 + $0xac0] ss:$8 sps:$4 sm:$0xff]   ;;  %v16311_v35 = vld [vmem:[%s21978_s2 + $0xad0] ss:$8 sps:$4 sm:$0xff]  }
 0x2eb   :  { %6002 = vmatprep.subr.bf16.mxu0 %v16228_v34  ;;  %v16313_v34 = vld [vmem:[%s21978_s2 + $0xad4] ss:$8 sps:$4 sm:$0xff]  }
 0x2ee   :  { %6003 = vmatpush1.bf16.msra.mxu0 %v16226_v36  ;;  %v16316_v36 = vld [vmem:[%s21978_s2 + $0xae4] ss:$8 sps:$4 sm:$0xff]  }
 0x2ef   :  { %6004 = vmatprep.subr.bf16.mxu0 %v16231_v37  ;;  %v1220_v37 = vcombine.high %v19946_v62, %v19946_v62  ;;  %v16344_v62 = vld [vmem:[%s21978_s2 + $0xb80] ss:$8 sps:$4 sm:$0xff]  }
 0x2f2   :  { %6005 = vmatpush1.bf16.msra.mxu0 %v16229_v38  ;;  %v16314_v38 = vld [vmem:[%s21978_s2 + $0xae0] ss:$8 sps:$4 sm:$0xff]  }
 0x2f3   :  { %6006 = vmatprep.subr.bf16.mxu0 %v16234_v39  ;;  %v16319_v39 = vld [vmem:[%s21978_s2 + $0xaf4] ss:$8 sps:$4 sm:$0xff]  }
 0x2f6   :  { %6007 = vmatpush1.bf16.msra.mxu0 %v16232_v40  ;;  %v20061_v40 = vrot.slane %v1220_v37, %v18926_v16  ;;  %v16393_v37 = vld [vmem:[%s21978_s2 + $0xc80] ss:$8 sps:$4 sm:$0xff]  }
 0x2f7   :  { %6008 = vmatprep.subr.bf16.mxu0 %v16237_v41  ;;  %v16317_v41 = vld [vmem:[%s21978_s2 + $0xaf0] ss:$8 sps:$4 sm:$0xff]  }
 0x2fa   :  { %6009 = vmatpush1.bf16.msra.mxu0 %v16235_v42  ;;  %v16322_v42 = vld [vmem:[%s21978_s2 + $0xb04] ss:$8 sps:$4 sm:$0xff]  }
 0x2fb   :  { %6010 = vmatprep.subr.bf16.mxu0 %v16240_v43  ;;  %v1236_v43 = vcombine.high %v20061_v40, %v20061_v40 }
 0x2fe   :  { %6011 = vmatpush1.bf16.msra.mxu0 %v16238_v44  ;;  %v1428_v44 = vpack.c.bf16 %v19956_v1, %v19956_v1  ;;  %v16352_v1 = vld [vmem:[%s21978_s2 + $0xba4] ss:$8 sps:$4 sm:$0xff]  }
 0x2ff   :  { %6012 = vmatprep.subr.bf16.mxu0 %v16243_v45  ;;  %v16320_v45 = vld [vmem:[%s21978_s2 + $0xb00] ss:$8 sps:$4 sm:$0xff]  }
 0x302   :  { %6013 = vmatpush1.bf16.msra.mxu0 %v16241_v46  ;;  %v16325_v46 = vld [vmem:[%s21978_s2 + $0xb14] ss:$8 sps:$4 sm:$0xff]  }
 0x303   :  { %6014 = vmatprep.subr.bf16.mxu0 %v16246_v47  ;;  %v1431_v47 = vpack.c.bf16 %v1236_v43, %v1236_v43  ;;  %v16402_v43 = vld [vmem:[%s21978_s2 + $0xcb0] ss:$8 sps:$4 sm:$0xff]  }
 0x306   :  { %6015 = vmatpush1.bf16.msra.mxu0 %v16244_v48  ;;  %v16323_v48 = vld [vmem:[%s21978_s2 + $0xb10] ss:$8 sps:$4 sm:$0xff]  }
 0x307   :  { %6016 = vmatprep.subr.bf16.mxu0 %v16249_v49  ;;  %v16328_v49 = vld [vmem:[%s21978_s2 + $0xb24] ss:$8 sps:$4 sm:$0xff]  }
 0x30a   :  { %6017 = vmatpush1.bf16.msra.mxu0 %v16247_v50  ;;  %v16326_v50 = vld [vmem:[%s21978_s2 + $0xb20] ss:$8 sps:$4 sm:$0xff]  }
 0x30b   :  { %6018 = vmatprep.subr.bf16.mxu0 %v16252_v51  ;;  %v16331_v51 = vld [vmem:[%s21978_s2 + $0xb34] ss:$8 sps:$4 sm:$0xff]  }
 0x30e   :  { %6019 = vmatpush1.bf16.msra.mxu0 %v16250_v52  ;;  %v16329_v52 = vld [vmem:[%s21978_s2 + $0xb30] ss:$8 sps:$4 sm:$0xff]  }
 0x30f   :  { %6020 = vmatprep.subr.bf16.mxu0 %v16255_v53  ;;  %v16334_v53 = vld [vmem:[%s21978_s2 + $0xb44] ss:$8 sps:$4 sm:$0xff]  }
 0x312   :  { %6021 = vmatpush1.bf16.msra.mxu0 %v16253_v54  ;;  %v16332_v54 = vld [vmem:[%s21978_s2 + $0xb40] ss:$8 sps:$4 sm:$0xff]  }
 0x313   :  { %6022 = vmatprep.subr.bf16.mxu0 %v16258_v55  ;;  %v16337_v55 = vld [vmem:[%s21978_s2 + $0xb54] ss:$8 sps:$4 sm:$0xff]  }
 0x316   :  { %6023 = vmatpush1.bf16.msra.mxu0 %v16256_v56  ;;  %v16335_v56 = vld [vmem:[%s21978_s2 + $0xb50] ss:$8 sps:$4 sm:$0xff]  }
 0x317   :  { %6024 = vmatprep.subr.bf16.mxu0 %v16261_v57  ;;  %v16340_v57 = vld [vmem:[%s21978_s2 + $0xb64] ss:$8 sps:$4 sm:$0xff]  }
 0x31a   :  { %6025 = vmatpush1.bf16.msra.mxu0 %v16259_v58  ;;  %v16338_v58 = vld [vmem:[%s21978_s2 + $0xb60] ss:$8 sps:$4 sm:$0xff]  }
 0x31b   :  { %6026 = vmatprep.subr.bf16.mxu0 %v16264_v59  ;;  %v16343_v59 = vld [vmem:[%s21978_s2 + $0xb74] ss:$8 sps:$4 sm:$0xff]  }
 0x31e   :  { %6027 = vmatpush1.bf16.msra.mxu0 %v16262_v60  ;;  %v16341_v60 = vld [vmem:[%s21978_s2 + $0xb70] ss:$8 sps:$4 sm:$0xff]  }
 0x31f   :  { %6028 = vmatprep.subr.bf16.mxu0 %v16267_v61  ;;  %v16346_v61 = vld [vmem:[%s21978_s2 + $0xb84] ss:$8 sps:$4 sm:$0xff]  }
 0x322   :  { %6029 = vmatpush1.bf16.msra.mxu0 %v16265_v63  ;;  %v16349_v63 = vld [vmem:[%s21978_s2 + $0xb94] ss:$8 sps:$4 sm:$0xff]  }
 0x323   :  { %6030 = vmatprep.subr.bf16.mxu0 %v16270_v0  ;;  %v16347_v0 = vld [vmem:[%s21978_s2 + $0xb90] ss:$8 sps:$4 sm:$0xff]  }
 0x326   :  { %6031 = vmatpush1.bf16.msra.mxu0 %v16268_v2  ;;  %v16350_v2 = vld [vmem:[%s21978_s2 + $0xba0] ss:$8 sps:$4 sm:$0xff]  }
 0x327   :  { %6041 = vmatprep.subr.bf16.mxu0 %v16274_v3  ;;  %v16355_v3 = vld [vmem:[%s21978_s2 + $0xbb4] ss:$8 sps:$4 sm:$0xff]  }
 0x329   :  { %6033 = vmatmul.mubr.bf16.vlgmr.msra.gmra.mrb[0].mxu0 %v1426_v5  ;;  %v16358_v5 = vld [vmem:[%s21978_s2 + $0xbc4] ss:$8 sps:$4 sm:$0xff]  }
 0x32a   :  { %6042 = vmatpush1.bf16.msra.mxu0 %v16272_v6  ;;  %6073 = vmatprep.mubr.bf16.mxu0 %v1429_v8  ;;  %v16356_v6 = vld [vmem:[%s21978_s2 + $0xbc0] ss:$8 sps:$4 sm:$0xff]   ;;  %v16359_v8 = vld [vmem:[%s21978_s2 + $0xbd0] ss:$8 sps:$4 sm:$0xff]  }
 0x32b   :  { %6043 = vmatprep.subr.bf16.mxu0 %v16277_v7  ;;  %v16361_v7 = vld [vmem:[%s21978_s2 + $0xbd4] ss:$8 sps:$4 sm:$0xff]  }
 0x32e   :  { %6044 = vmatpush1.bf16.msra.mxu0 %v16275_v9  ;;  %v16364_v9 = vld [vmem:[%s21978_s2 + $0xbe4] ss:$8 sps:$4 sm:$0xff]  }
 0x32f   :  { %6045 = vmatprep.subr.bf16.mxu0 %v16280_v10  ;;  %v20160_v10 = vld [vmem:[%s22000_s24 + $0x30] sm:$0xff] }
 0x332   :  { %6046 = vmatpush1.bf16.msra.mxu0 %v16278_v11  ;;  %v16362_v11 = vld [vmem:[%s21978_s2 + $0xbe0] ss:$8 sps:$4 sm:$0xff]  }
 0x333   :  { %6047 = vmatprep.subr.bf16.mxu0 %v16283_v12  ;;  %v20167_v12 = vrot.slane %v20160_v10, %v18926_v16 }
 0x336   :  { %6048 = vmatpush1.bf16.msra.mxu0 %v16281_v14  ;;  %v16367_v14 = vld [vmem:[%s21978_s2 + $0xbf4] ss:$8 sps:$4 sm:$0xff]  }
 0x337   :  { %6049 = vmatprep.subr.bf16.mxu0 %v16286_v15  ;;  %v16365_v15 = vld [vmem:[%s21978_s2 + $0xbf0] ss:$8 sps:$4 sm:$0xff]  }
 0x33a   :  { %6050 = vmatpush1.bf16.msra.mxu0 %v16284_v17  ;;  %v1252_v17 = vcombine.high %v20167_v12, %v20167_v12 }
 0x33b   :  { %6051 = vmatprep.subr.bf16.mxu0 %v16289_v18  ;;  %v16371_v18 = vld [vmem:[%s21978_s2 + $0xc04] ss:$8 sps:$4 sm:$0xff]  }
 0x33e   :  { %6052 = vmatpush1.bf16.msra.mxu0 %v16287_v19  ;;  %v1430_v19 = vpack.c.bf16 %v20061_v40, %v20061_v40  ;;  %v16401_v40 = vld [vmem:[%s21978_s2 + $0xca4] ss:$8 sps:$4 sm:$0xff]  }
 0x33f   :  { %6053 = vmatprep.subr.bf16.mxu0 %v16292_v20  ;;  %v16369_v20 = vld [vmem:[%s21978_s2 + $0xc00] ss:$8 sps:$4 sm:$0xff]  }
 0x342   :  { %6054 = vmatpush1.bf16.msra.mxu0 %v16290_v21  ;;  %v1433_v21 = vpack.c.bf16 %v1252_v17, %v1252_v17  ;;  %v16452_v17 = vld [vmem:[%s21978_s2 + $0xdb4] ss:$8 sps:$4 sm:$0xff]  }
 0x343   :  { %6055 = vmatprep.subr.bf16.mxu0 %v16295_v22  ;;  %v16374_v22 = vld [vmem:[%s21978_s2 + $0xc14] ss:$8 sps:$4 sm:$0xff]  }
 0x346   :  { %6056 = vmatpush1.bf16.msra.mxu0 %v16293_v23  ;;  %v16372_v23 = vld [vmem:[%s21978_s2 + $0xc10] ss:$8 sps:$4 sm:$0xff]  }
 0x347   :  { %6057 = vmatprep.subr.bf16.mxu0 %v16298_v24  ;;  %v16377_v24 = vld [vmem:[%s21978_s2 + $0xc24] ss:$8 sps:$4 sm:$0xff]  }
 0x34a   :  { %6058 = vmatpush1.bf16.msra.mxu0 %v16296_v25  ;;  %v16375_v25 = vld [vmem:[%s21978_s2 + $0xc20] ss:$8 sps:$4 sm:$0xff]  }
 0x34b   :  { %6059 = vmatprep.subr.bf16.mxu0 %v16301_v26  ;;  %v16380_v26 = vld [vmem:[%s21978_s2 + $0xc34] ss:$8 sps:$4 sm:$0xff]  }
 0x34e   :  { %6060 = vmatpush1.bf16.msra.mxu0 %v16299_v27  ;;  %v16378_v27 = vld [vmem:[%s21978_s2 + $0xc30] ss:$8 sps:$4 sm:$0xff]  }
 0x34f   :  { %6061 = vmatprep.subr.bf16.mxu0 %v16304_v28  ;;  %v16383_v28 = vld [vmem:[%s21978_s2 + $0xc44] ss:$8 sps:$4 sm:$0xff]  }
 0x352   :  { %6062 = vmatpush1.bf16.msra.mxu0 %v16302_v29  ;;  %v16381_v29 = vld [vmem:[%s21978_s2 + $0xc40] ss:$8 sps:$4 sm:$0xff]  }
 0x353   :  { %6063 = vmatprep.subr.bf16.mxu0 %v16307_v30  ;;  %v16386_v30 = vld [vmem:[%s21978_s2 + $0xc54] ss:$8 sps:$4 sm:$0xff]  }
 0x356   :  { %6064 = vmatpush1.bf16.msra.mxu0 %v16305_v31  ;;  %v16384_v31 = vld [vmem:[%s21978_s2 + $0xc50] ss:$8 sps:$4 sm:$0xff]  }
 0x357   :  { %6065 = vmatprep.subr.bf16.mxu0 %v16310_v32  ;;  %v16389_v32 = vld [vmem:[%s21978_s2 + $0xc64] ss:$8 sps:$4 sm:$0xff]  }
 0x35a   :  { %6066 = vmatpush1.bf16.msra.mxu0 %v16308_v33  ;;  %v16387_v33 = vld [vmem:[%s21978_s2 + $0xc60] ss:$8 sps:$4 sm:$0xff]  }
 0x35b   :  { %6067 = vmatprep.subr.bf16.mxu0 %v16313_v34  ;;  %v16392_v34 = vld [vmem:[%s21978_s2 + $0xc74] ss:$8 sps:$4 sm:$0xff]  }
 0x35e   :  { %6068 = vmatpush1.bf16.msra.mxu0 %v16311_v35  ;;  %v16390_v35 = vld [vmem:[%s21978_s2 + $0xc70] ss:$8 sps:$4 sm:$0xff]  }
 0x35f   :  { %6069 = vmatprep.subr.bf16.mxu0 %v16316_v36  ;;  %v16395_v36 = vld [vmem:[%s21978_s2 + $0xc84] ss:$8 sps:$4 sm:$0xff]  }
 0x362   :  { %6070 = vmatpush1.bf16.msra.mxu0 %v16314_v38  ;;  %v16398_v38 = vld [vmem:[%s21978_s2 + $0xc94] ss:$8 sps:$4 sm:$0xff]  }
 0x363   :  { %6071 = vmatprep.subr.bf16.mxu0 %v16319_v39  ;;  %v16396_v39 = vld [vmem:[%s21978_s2 + $0xc90] ss:$8 sps:$4 sm:$0xff]  }
 0x366   :  { %6072 = vmatpush1.bf16.msra.mxu0 %v16317_v41  ;;  %v16399_v41 = vld [vmem:[%s21978_s2 + $0xca0] ss:$8 sps:$4 sm:$0xff]  }
 0x367   :  { %6082 = vmatprep.subr.bf16.mxu0 %v16322_v42  ;;  %v16404_v42 = vld [vmem:[%s21978_s2 + $0xcb4] ss:$8 sps:$4 sm:$0xff]  }
 0x369   :  { %6074 = vmatmul.mubr.bf16.vlgmr.msra.gmra.mrb[0].mxu0 %v1428_v44  ;;  %v16407_v44 = vld [vmem:[%s21978_s2 + $0xcc4] ss:$8 sps:$4 sm:$0xff]  }
 0x36a   :  { %6083 = vmatpush1.bf16.msra.mxu0 %v16320_v45  ;;  %6114 = vmatprep.mubr.bf16.mxu0 %v1431_v47  ;;  %v16405_v45 = vld [vmem:[%s21978_s2 + $0xcc0] ss:$8 sps:$4 sm:$0xff]   ;;  %v16408_v47 = vld [vmem:[%s21978_s2 + $0xcd0] ss:$8 sps:$4 sm:$0xff]  }
 0x36b   :  { %6084 = vmatprep.subr.bf16.mxu0 %v16325_v46  ;;  %v16410_v46 = vld [vmem:[%s21978_s2 + $0xcd4] ss:$8 sps:$4 sm:$0xff]  }
 0x36e   :  { %6085 = vmatpush1.bf16.msra.mxu0 %v16323_v48  ;;  %v1237_v48 = vcombine.high %v20160_v10, %v20160_v10  ;;  %v16441_v10 = vld [vmem:[%s21978_s2 + $0xd80] ss:$8 sps:$4 sm:$0xff]  }
 0x36f   :  { %6086 = vmatprep.subr.bf16.mxu0 %v16328_v49  ;;  %v16413_v49 = vld [vmem:[%s21978_s2 + $0xce4] ss:$8 sps:$4 sm:$0xff]  }
 0x372   :  { %6087 = vmatpush1.bf16.msra.mxu0 %v16326_v50  ;;  %v16411_v50 = vld [vmem:[%s21978_s2 + $0xce0] ss:$8 sps:$4 sm:$0xff]  }
 0x373   :  { %6088 = vmatprep.subr.bf16.mxu0 %v16331_v51  ;;  %v20272_v51 = vrot.slane %v1237_v48, %v18926_v16  ;;  %v16492_v48 = vld [vmem:[%s21978_s2 + $0xe84] ss:$8 sps:$4 sm:$0xff]  }
 0x376   :  { %6089 = vmatpush1.bf16.msra.mxu0 %v16329_v52  ;;  %v16416_v52 = vld [vmem:[%s21978_s2 + $0xcf4] ss:$8 sps:$4 sm:$0xff]  }
 0x377   :  { %6090 = vmatprep.subr.bf16.mxu0 %v16334_v53  ;;  %v16414_v53 = vld [vmem:[%s21978_s2 + $0xcf0] ss:$8 sps:$4 sm:$0xff]  }
 0x37a   :  { %6091 = vmatpush1.bf16.msra.mxu0 %v16332_v54  ;;  %v1253_v54 = vcombine.high %v20272_v51, %v20272_v51 }
 0x37b   :  { %6092 = vmatprep.subr.bf16.mxu0 %v16337_v55  ;;  %v16419_v55 = vld [vmem:[%s21978_s2 + $0xd04] ss:$8 sps:$4 sm:$0xff]  }
 0x37e   :  { %6093 = vmatpush1.bf16.msra.mxu0 %v16335_v56  ;;  %v1432_v56 = vpack.c.bf16 %v20167_v12, %v20167_v12  ;;  %v16444_v12 = vld [vmem:[%s21978_s2 + $0xd90] ss:$8 sps:$4 sm:$0xff]  }
 0x37f   :  { %6094 = vmatprep.subr.bf16.mxu0 %v16340_v57  ;;  %v16417_v57 = vld [vmem:[%s21978_s2 + $0xd00] ss:$8 sps:$4 sm:$0xff]  }
 0x382   :  { %6095 = vmatpush1.bf16.msra.mxu0 %v16338_v58  ;;  %v1435_v58 = vpack.c.bf16 %v1253_v54, %v1253_v54  ;;  %v16501_v54 = vld [vmem:[%s21978_s2 + $0xeb4] ss:$8 sps:$4 sm:$0xff]  }
 0x383   :  { %6096 = vmatprep.subr.bf16.mxu0 %v16343_v59  ;;  %v16422_v59 = vld [vmem:[%s21978_s2 + $0xd14] ss:$8 sps:$4 sm:$0xff]  }
 0x386   :  { %6097 = vmatpush1.bf16.msra.mxu0 %v16341_v60  ;;  %v16420_v60 = vld [vmem:[%s21978_s2 + $0xd10] ss:$8 sps:$4 sm:$0xff]  }
 0x387   :  { %6098 = vmatprep.subr.bf16.mxu0 %v16346_v61  ;;  %v16425_v61 = vld [vmem:[%s21978_s2 + $0xd24] ss:$8 sps:$4 sm:$0xff]  }
 0x38a   :  { %6099 = vmatpush1.bf16.msra.mxu0 %v16344_v62  ;;  %v16423_v62 = vld [vmem:[%s21978_s2 + $0xd20] ss:$8 sps:$4 sm:$0xff]  }
 0x38b   :  { %6100 = vmatprep.subr.bf16.mxu0 %v16349_v63  ;;  %v16428_v63 = vld [vmem:[%s21978_s2 + $0xd34] ss:$8 sps:$4 sm:$0xff]  }
 0x38e   :  { %6101 = vmatpush1.bf16.msra.mxu0 %v16347_v0  ;;  %v16426_v0 = vld [vmem:[%s21978_s2 + $0xd30] ss:$8 sps:$4 sm:$0xff]  }
 0x38f   :  { %6102 = vmatprep.subr.bf16.mxu0 %v16352_v1  ;;  %v16431_v1 = vld [vmem:[%s21978_s2 + $0xd44] ss:$8 sps:$4 sm:$0xff]  }
 0x392   :  { %6103 = vmatpush1.bf16.msra.mxu0 %v16350_v2  ;;  %v16429_v2 = vld [vmem:[%s21978_s2 + $0xd40] ss:$8 sps:$4 sm:$0xff]  }
 0x393   :  { %6104 = vmatprep.subr.bf16.mxu0 %v16355_v3  ;;  %v16434_v3 = vld [vmem:[%s21978_s2 + $0xd54] ss:$8 sps:$4 sm:$0xff]  }
 0x396   :  { %6105 = vmatpush1.bf16.msra.mxu0 %v16353_v4  ;;  %v16432_v4 = vld [vmem:[%s21978_s2 + $0xd50] ss:$8 sps:$4 sm:$0xff]  }
 0x397   :  { %6106 = vmatprep.subr.bf16.mxu0 %v16358_v5  ;;  %v16437_v5 = vld [vmem:[%s21978_s2 + $0xd64] ss:$8 sps:$4 sm:$0xff]  }
 0x39a   :  { %6107 = vmatpush1.bf16.msra.mxu0 %v16356_v6  ;;  %v16435_v6 = vld [vmem:[%s21978_s2 + $0xd60] ss:$8 sps:$4 sm:$0xff]  }
 0x39b   :  { %6108 = vmatprep.subr.bf16.mxu0 %v16361_v7  ;;  %v16440_v7 = vld [vmem:[%s21978_s2 + $0xd74] ss:$8 sps:$4 sm:$0xff]  }
 0x39e   :  { %6109 = vmatpush1.bf16.msra.mxu0 %v16359_v8  ;;  %v16438_v8 = vld [vmem:[%s21978_s2 + $0xd70] ss:$8 sps:$4 sm:$0xff]  }
 0x39f   :  { %6110 = vmatprep.subr.bf16.mxu0 %v16364_v9  ;;  %v16443_v9 = vld [vmem:[%s21978_s2 + $0xd84] ss:$8 sps:$4 sm:$0xff]  }
 0x3a2   :  { %6111 = vmatpush1.bf16.msra.mxu0 %v16362_v11  ;;  %v16446_v11 = vld [vmem:[%s21978_s2 + $0xd94] ss:$8 sps:$4 sm:$0xff]  }
 0x3a3   :  { %6112 = vmatprep.subr.bf16.mxu0 %v16367_v14  ;;  %v16449_v14 = vld [vmem:[%s21978_s2 + $0xda4] ss:$8 sps:$4 sm:$0xff]  }
 0x3a6   :  { %6113 = vmatpush1.bf16.msra.mxu0 %v16365_v15  ;;  %v16447_v15 = vld [vmem:[%s21978_s2 + $0xda0] ss:$8 sps:$4 sm:$0xff]  }
 0x3a7   :  { %6123 = vmatprep.subr.bf16.mxu0 %v16371_v18  ;;  %v16450_v18 = vld [vmem:[%s21978_s2 + $0xdb0] ss:$8 sps:$4 sm:$0xff]  }
 0x3a9   :  { %6115 = vmatmul.mubr.bf16.vlgmr.msra.gmra.mrb[0].mxu0 %v1430_v19  ;;  %v16455_v19 = vld [vmem:[%s21978_s2 + $0xdc4] ss:$8 sps:$4 sm:$0xff]  }
 0x3aa   :  { %6124 = vmatpush1.bf16.msra.mxu0 %v16369_v20  ;;  %6155 = vmatprep.mubr.bf16.mxu0 %v1433_v21  ;;  %v16453_v20 = vld [vmem:[%s21978_s2 + $0xdc0] ss:$8 sps:$4 sm:$0xff]   ;;  %v16458_v21 = vld [vmem:[%s21978_s2 + $0xdd4] ss:$8 sps:$4 sm:$0xff]  }
 0x3ab   :  { %6125 = vmatprep.subr.bf16.mxu0 %v16374_v22  ;;  %v16456_v22 = vld [vmem:[%s21978_s2 + $0xdd0] ss:$8 sps:$4 sm:$0xff]  }
 0x3ae   :  { %6126 = vmatpush1.bf16.msra.mxu0 %v16372_v23  ;;  %v16461_v23 = vld [vmem:[%s21978_s2 + $0xde4] ss:$8 sps:$4 sm:$0xff]  }
 0x3af   :  { %6127 = vmatprep.subr.bf16.mxu0 %v16377_v24  ;;  %v20374_v24 = vld [vmem:[%s22000_s24 + $0x38] sm:$0xff] }
 0x3b2   :  { %6128 = vmatpush1.bf16.msra.mxu0 %v16375_v25  ;;  %v16459_v25 = vld [vmem:[%s21978_s2 + $0xde0] ss:$8 sps:$4 sm:$0xff]  }
 0x3b3   :  { %6129 = vmatprep.subr.bf16.mxu0 %v16380_v26  ;;  %v20381_v26 = vrot.slane %v20374_v24, %v18926_v16 }
 0x3b6   :  { %6130 = vmatpush1.bf16.msra.mxu0 %v16378_v27  ;;  %v16464_v27 = vld [vmem:[%s21978_s2 + $0xdf4] ss:$8 sps:$4 sm:$0xff]  }
 0x3b7   :  { %6131 = vmatprep.subr.bf16.mxu0 %v16383_v28  ;;  %v16462_v28 = vld [vmem:[%s21978_s2 + $0xdf0] ss:$8 sps:$4 sm:$0xff]  }
 0x3ba   :  { %6132 = vmatpush1.bf16.msra.mxu0 %v16381_v29  ;;  %v1269_v29 = vcombine.high %v20381_v26, %v20381_v26 }
 0x3bb   :  { %6133 = vmatprep.subr.bf16.mxu0 %v16386_v30  ;;  %v16468_v30 = vld [vmem:[%s21978_s2 + $0xe04] ss:$8 sps:$4 sm:$0xff]  }
 0x3be   :  { %6134 = vmatpush1.bf16.msra.mxu0 %v16384_v31  ;;  %v1434_v31 = vpack.c.bf16 %v20272_v51, %v20272_v51  ;;  %v16493_v51 = vld [vmem:[%s21978_s2 + $0xe90] ss:$8 sps:$4 sm:$0xff]  }
 0x3bf   :  { %6135 = vmatprep.subr.bf16.mxu0 %v16389_v32  ;;  %v16466_v32 = vld [vmem:[%s21978_s2 + $0xe00] ss:$8 sps:$4 sm:$0xff]  }
 0x3c2   :  { %6136 = vmatpush1.bf16.msra.mxu0 %v16387_v33  ;;  %v1437_v33 = vpack.c.bf16 %v1269_v29, %v1269_v29  ;;  %v16549_v29 = vld [vmem:[%s21978_s2 + $0xfb4] ss:$8 sps:$4 sm:$0xff]  }
 0x3c3   :  { %6137 = vmatprep.subr.bf16.mxu0 %v16392_v34  ;;  %v16471_v34 = vld [vmem:[%s21978_s2 + $0xe14] ss:$8 sps:$4 sm:$0xff]  }
 0x3c6   :  { %6138 = vmatpush1.bf16.msra.mxu0 %v16390_v35  ;;  %v16469_v35 = vld [vmem:[%s21978_s2 + $0xe10] ss:$8 sps:$4 sm:$0xff]  }
 0x3c7   :  { %6139 = vmatprep.subr.bf16.mxu0 %v16395_v36  ;;  %v16474_v36 = vld [vmem:[%s21978_s2 + $0xe24] ss:$8 sps:$4 sm:$0xff]  }
 0x3ca   :  { %6140 = vmatpush1.bf16.msra.mxu0 %v16393_v37  ;;  %v16472_v37 = vld [vmem:[%s21978_s2 + $0xe20] ss:$8 sps:$4 sm:$0xff]  }
 0x3cb   :  { %6141 = vmatprep.subr.bf16.mxu0 %v16398_v38  ;;  %v16477_v38 = vld [vmem:[%s21978_s2 + $0xe34] ss:$8 sps:$4 sm:$0xff]  }
 0x3ce   :  { %6142 = vmatpush1.bf16.msra.mxu0 %v16396_v39  ;;  %v16475_v39 = vld [vmem:[%s21978_s2 + $0xe30] ss:$8 sps:$4 sm:$0xff]  }
 0x3cf   :  { %6143 = vmatprep.subr.bf16.mxu0 %v16401_v40  ;;  %v16480_v40 = vld [vmem:[%s21978_s2 + $0xe44] ss:$8 sps:$4 sm:$0xff]  }
 0x3d2   :  { %6144 = vmatpush1.bf16.msra.mxu0 %v16399_v41  ;;  %v16478_v41 = vld [vmem:[%s21978_s2 + $0xe40] ss:$8 sps:$4 sm:$0xff]  }
 0x3d3   :  { %6145 = vmatprep.subr.bf16.mxu0 %v16404_v42  ;;  %v16483_v42 = vld [vmem:[%s21978_s2 + $0xe54] ss:$8 sps:$4 sm:$0xff]  }
 0x3d6   :  { %6146 = vmatpush1.bf16.msra.mxu0 %v16402_v43  ;;  %v16481_v43 = vld [vmem:[%s21978_s2 + $0xe50] ss:$8 sps:$4 sm:$0xff]  }
 0x3d7   :  { %6147 = vmatprep.subr.bf16.mxu0 %v16407_v44  ;;  %v16486_v44 = vld [vmem:[%s21978_s2 + $0xe64] ss:$8 sps:$4 sm:$0xff]  }
 0x3da   :  { %6148 = vmatpush1.bf16.msra.mxu0 %v16405_v45  ;;  %v16484_v45 = vld [vmem:[%s21978_s2 + $0xe60] ss:$8 sps:$4 sm:$0xff]  }
 0x3db   :  { %6149 = vmatprep.subr.bf16.mxu0 %v16410_v46  ;;  %v16489_v46 = vld [vmem:[%s21978_s2 + $0xe74] ss:$8 sps:$4 sm:$0xff]  }
 0x3de   :  { %6150 = vmatpush1.bf16.msra.mxu0 %v16408_v47  ;;  %v16487_v47 = vld [vmem:[%s21978_s2 + $0xe70] ss:$8 sps:$4 sm:$0xff]  }
 0x3df   :  { %6151 = vmatprep.subr.bf16.mxu0 %v16413_v49  ;;  %v16490_v49 = vld [vmem:[%s21978_s2 + $0xe80] ss:$8 sps:$4 sm:$0xff]  }
 0x3e2   :  { %6152 = vmatpush1.bf16.msra.mxu0 %v16411_v50  ;;  %v16495_v50 = vld [vmem:[%s21978_s2 + $0xe94] ss:$8 sps:$4 sm:$0xff]  }
 0x3e3   :  { %6153 = vmatprep.subr.bf16.mxu0 %v16416_v52  ;;  %v16498_v52 = vld [vmem:[%s21978_s2 + $0xea4] ss:$8 sps:$4 sm:$0xff]  }
 0x3e6   :  { %6154 = vmatpush1.bf16.msra.mxu0 %v16414_v53  ;;  %v16496_v53 = vld [vmem:[%s21978_s2 + $0xea0] ss:$8 sps:$4 sm:$0xff]  }
 0x3e7   :  { %6164 = vmatprep.subr.bf16.mxu0 %v16419_v55  ;;  %v16499_v55 = vld [vmem:[%s21978_s2 + $0xeb0] ss:$8 sps:$4 sm:$0xff]  }
 0x3e9   :  { %6156 = vmatmul.mubr.bf16.vlgmr.msra.gmra.mrb[0].mxu0 %v1432_v56  ;;  %v16504_v56 = vld [vmem:[%s21978_s2 + $0xec4] ss:$8 sps:$4 sm:$0xff]  }
 0x3ea   :  { %6165 = vmatpush1.bf16.msra.mxu0 %v16417_v57  ;;  %6196 = vmatprep.mubr.bf16.mxu0 %v1435_v58  ;;  %v16502_v57 = vld [vmem:[%s21978_s2 + $0xec0] ss:$8 sps:$4 sm:$0xff]   ;;  %v16507_v58 = vld [vmem:[%s21978_s2 + $0xed4] ss:$8 sps:$4 sm:$0xff]  }
 0x3eb   :  { %6166 = vmatprep.subr.bf16.mxu0 %v16422_v59  ;;  %v16505_v59 = vld [vmem:[%s21978_s2 + $0xed0] ss:$8 sps:$4 sm:$0xff]  }
 0x3ee   :  { %6167 = vmatpush1.bf16.msra.mxu0 %v16420_v60  ;;  %v1254_v60 = vcombine.high %v20374_v24, %v20374_v24  ;;  %v16538_v24 = vld [vmem:[%s21978_s2 + $0xf80] ss:$8 sps:$4 sm:$0xff]  }
 0x3ef   :  { %6168 = vmatprep.subr.bf16.mxu0 %v16425_v61  ;;  %v16510_v61 = vld [vmem:[%s21978_s2 + $0xee4] ss:$8 sps:$4 sm:$0xff]  }
 0x3f2   :  { %6169 = vmatpush1.bf16.msra.mxu0 %v16423_v62  ;;  %v16508_v62 = vld [vmem:[%s21978_s2 + $0xee0] ss:$8 sps:$4 sm:$0xff]  }
 0x3f3   :  { %6170 = vmatprep.subr.bf16.mxu0 %v16428_v63  ;;  %v20486_v63 = vrot.slane %v1254_v60, %v18926_v16  ;;  %v16589_v60 = vld [vmem:[%s21978_s2 + $0x1084] ss:$8 sps:$4 sm:$0xff]  }
 0x3f6   :  { %6171 = vmatpush1.bf16.msra.mxu0 %v16426_v0  ;;  %v16513_v0 = vld [vmem:[%s21978_s2 + $0xef4] ss:$8 sps:$4 sm:$0xff]  }
 0x3f7   :  { %6172 = vmatprep.subr.bf16.mxu0 %v16431_v1  ;;  %v16511_v1 = vld [vmem:[%s21978_s2 + $0xef0] ss:$8 sps:$4 sm:$0xff]  }
 0x3fa   :  { %6173 = vmatpush1.bf16.msra.mxu0 %v16429_v2  ;;  %v1270_v2 = vcombine.high %v20486_v63, %v20486_v63 }
 0x3fb   :  { %6174 = vmatprep.subr.bf16.mxu0 %v16434_v3  ;;  %v16516_v3 = vld [vmem:[%s21978_s2 + $0xf04] ss:$8 sps:$4 sm:$0xff]  }
 0x3fe   :  { %6175 = vmatpush1.bf16.msra.mxu0 %v16432_v4  ;;  %v1436_v4 = vpack.c.bf16 %v20381_v26, %v20381_v26  ;;  %v16541_v26 = vld [vmem:[%s21978_s2 + $0xf90] ss:$8 sps:$4 sm:$0xff]  }
 0x3ff   :  { %6176 = vmatprep.subr.bf16.mxu0 %v16437_v5  ;;  %v16514_v5 = vld [vmem:[%s21978_s2 + $0xf00] ss:$8 sps:$4 sm:$0xff]  }
 0x402   :  { %6177 = vmatpush1.bf16.msra.mxu0 %v16435_v6  ;;  %v1439_v6 = vpack.c.bf16 %v1270_v2, %v1270_v2  ;;  %v16598_v2 = vld [vmem:[%s21978_s2 + $0x10b4] ss:$8 sps:$4 sm:$0xff]  }
 0x403   :  { %6178 = vmatprep.subr.bf16.mxu0 %v16440_v7  ;;  %v16519_v7 = vld [vmem:[%s21978_s2 + $0xf14] ss:$8 sps:$4 sm:$0xff]  }
 0x406   :  { %6179 = vmatpush1.bf16.msra.mxu0 %v16438_v8  ;;  %v16517_v8 = vld [vmem:[%s21978_s2 + $0xf10] ss:$8 sps:$4 sm:$0xff]  }
 0x407   :  { %6180 = vmatprep.subr.bf16.mxu0 %v16443_v9  ;;  %v16522_v9 = vld [vmem:[%s21978_s2 + $0xf24] ss:$8 sps:$4 sm:$0xff]  }
 0x40a   :  { %6181 = vmatpush1.bf16.msra.mxu0 %v16441_v10  ;;  %v16520_v10 = vld [vmem:[%s21978_s2 + $0xf20] ss:$8 sps:$4 sm:$0xff]  }
 0x40b   :  { %6182 = vmatprep.subr.bf16.mxu0 %v16446_v11  ;;  %v16525_v11 = vld [vmem:[%s21978_s2 + $0xf34] ss:$8 sps:$4 sm:$0xff]  }
 0x40e   :  { %6183 = vmatpush1.bf16.msra.mxu0 %v16444_v12  ;;  %v16523_v12 = vld [vmem:[%s21978_s2 + $0xf30] ss:$8 sps:$4 sm:$0xff]  }
 0x40f   :  { %6184 = vmatprep.subr.bf16.mxu0 %v16449_v14  ;;  %v16528_v14 = vld [vmem:[%s21978_s2 + $0xf44] ss:$8 sps:$4 sm:$0xff]  }
 0x412   :  { %6185 = vmatpush1.bf16.msra.mxu0 %v16447_v15  ;;  %v16526_v15 = vld [vmem:[%s21978_s2 + $0xf40] ss:$8 sps:$4 sm:$0xff]  }
 0x413   :  { %6186 = vmatprep.subr.bf16.mxu0 %v16452_v17  ;;  %v16531_v17 = vld [vmem:[%s21978_s2 + $0xf54] ss:$8 sps:$4 sm:$0xff]  }
 0x416   :  { %6187 = vmatpush1.bf16.msra.mxu0 %v16450_v18  ;;  %v16529_v18 = vld [vmem:[%s21978_s2 + $0xf50] ss:$8 sps:$4 sm:$0xff]  }
 0x417   :  { %6188 = vmatprep.subr.bf16.mxu0 %v16455_v19  ;;  %v16534_v19 = vld [vmem:[%s21978_s2 + $0xf64] ss:$8 sps:$4 sm:$0xff]  }
 0x41a   :  { %6189 = vmatpush1.bf16.msra.mxu0 %v16453_v20  ;;  %v16532_v20 = vld [vmem:[%s21978_s2 + $0xf60] ss:$8 sps:$4 sm:$0xff]  }
 0x41b   :  { %6190 = vmatprep.subr.bf16.mxu0 %v16458_v21  ;;  %v16537_v21 = vld [vmem:[%s21978_s2 + $0xf74] ss:$8 sps:$4 sm:$0xff]  }
 0x41e   :  { %6191 = vmatpush1.bf16.msra.mxu0 %v16456_v22  ;;  %v16535_v22 = vld [vmem:[%s21978_s2 + $0xf70] ss:$8 sps:$4 sm:$0xff]  }
 0x41f   :  { %6192 = vmatprep.subr.bf16.mxu0 %v16461_v23  ;;  %v16540_v23 = vld [vmem:[%s21978_s2 + $0xf84] ss:$8 sps:$4 sm:$0xff]  }
 0x422   :  { %6193 = vmatpush1.bf16.msra.mxu0 %v16459_v25  ;;  %v16543_v25 = vld [vmem:[%s21978_s2 + $0xf94] ss:$8 sps:$4 sm:$0xff]  }
 0x423   :  { %6194 = vmatprep.subr.bf16.mxu0 %v16464_v27  ;;  %v16546_v27 = vld [vmem:[%s21978_s2 + $0xfa4] ss:$8 sps:$4 sm:$0xff]  }
 0x426   :  { %6195 = vmatpush1.bf16.msra.mxu0 %v16462_v28  ;;  %v16544_v28 = vld [vmem:[%s21978_s2 + $0xfa0] ss:$8 sps:$4 sm:$0xff]  }
 0x427   :  { %6205 = vmatprep.subr.bf16.mxu0 %v16468_v30  ;;  %v16547_v30 = vld [vmem:[%s21978_s2 + $0xfb0] ss:$8 sps:$4 sm:$0xff]  }
 0x429   :  { %6197 = vmatmul.mubr.bf16.vlgmr.msra.gmra.mrb[0].mxu0 %v1434_v31  ;;  %v16552_v31 = vld [vmem:[%s21978_s2 + $0xfc4] ss:$8 sps:$4 sm:$0xff]  }
 0x42a   :  { %6206 = vmatpush1.bf16.msra.mxu0 %v16466_v32  ;;  %6237 = vmatprep.mubr.bf16.mxu0 %v1437_v33  ;;  %v16550_v32 = vld [vmem:[%s21978_s2 + $0xfc0] ss:$8 sps:$4 sm:$0xff]   ;;  %v16555_v33 = vld [vmem:[%s21978_s2 + $0xfd4] ss:$8 sps:$4 sm:$0xff]  }
 0x42b   :  { %6207 = vmatprep.subr.bf16.mxu0 %v16471_v34  ;;  %v16553_v34 = vld [vmem:[%s21978_s2 + $0xfd0] ss:$8 sps:$4 sm:$0xff]  }
 0x42e   :  { %6208 = vmatpush1.bf16.msra.mxu0 %v16469_v35  ;;  %v16558_v35 = vld [vmem:[%s21978_s2 + $0xfe4] ss:$8 sps:$4 sm:$0xff]  }
 0x42f   :  { %6209 = vmatprep.subr.bf16.mxu0 %v16474_v36  ;;  %v20588_v36 = vld [vmem:[%s22000_s24 + $0x40] sm:$0xff] }
 0x432   :  { %6210 = vmatpush1.bf16.msra.mxu0 %v16472_v37  ;;  %v16556_v37 = vld [vmem:[%s21978_s2 + $0xfe0] ss:$8 sps:$4 sm:$0xff]  }
 0x433   :  { %6211 = vmatprep.subr.bf16.mxu0 %v16477_v38  ;;  %v20595_v38 = vrot.slane %v20588_v36, %v18926_v16 }
 0x436   :  { %6212 = vmatpush1.bf16.msra.mxu0 %v16475_v39  ;;  %v16561_v39 = vld [vmem:[%s21978_s2 + $0xff4] ss:$8 sps:$4 sm:$0xff]  }
 0x437   :  { %6213 = vmatprep.subr.bf16.mxu0 %v16480_v40  ;;  %v16559_v40 = vld [vmem:[%s21978_s2 + $0xff0] ss:$8 sps:$4 sm:$0xff]  }
 0x43a   :  { %6214 = vmatpush1.bf16.msra.mxu0 %v16478_v41  ;;  %v1286_v41 = vcombine.high %v20595_v38, %v20595_v38 }
 0x43b   :  { %6215 = vmatprep.subr.bf16.mxu0 %v16483_v42  ;;  %v16565_v42 = vld [vmem:[%s21978_s2 + $0x1004] ss:$8 sps:$4 sm:$0xff]  }
 0x43e   :  { %6216 = vmatpush1.bf16.msra.mxu0 %v16481_v43  ;;  %v1438_v43 = vpack.c.bf16 %v20486_v63, %v20486_v63  ;;  %v16590_v63 = vld [vmem:[%s21978_s2 + $0x1090] ss:$8 sps:$4 sm:$0xff]  }
 0x43f   :  { %6217 = vmatprep.subr.bf16.mxu0 %v16486_v44  ;;  %v16563_v44 = vld [vmem:[%s21978_s2 + $0x1000] ss:$8 sps:$4 sm:$0xff]  }
 0x442   :  { %6218 = vmatpush1.bf16.msra.mxu0 %v16484_v45  ;;  %v1441_v45 = vpack.c.bf16 %v1286_v41, %v1286_v41  ;;  %v16646_v41 = vld [vmem:[%s21978_s2 + $0x11b4] ss:$8 sps:$4 sm:$0xff]  }
 0x443   :  { %6219 = vmatprep.subr.bf16.mxu0 %v16489_v46  ;;  %v16568_v46 = vld [vmem:[%s21978_s2 + $0x1014] ss:$8 sps:$4 sm:$0xff]  }
 0x446   :  { %6220 = vmatpush1.bf16.msra.mxu0 %v16487_v47  ;;  %v16566_v47 = vld [vmem:[%s21978_s2 + $0x1010] ss:$8 sps:$4 sm:$0xff]  }
 0x447   :  { %6221 = vmatprep.subr.bf16.mxu0 %v16492_v48  ;;  %v16571_v48 = vld [vmem:[%s21978_s2 + $0x1024] ss:$8 sps:$4 sm:$0xff]  }
 0x44a   :  { %6222 = vmatpush1.bf16.msra.mxu0 %v16490_v49  ;;  %v16569_v49 = vld [vmem:[%s21978_s2 + $0x1020] ss:$8 sps:$4 sm:$0xff]  }
 0x44b   :  { %6223 = vmatprep.subr.bf16.mxu0 %v16495_v50  ;;  %v16574_v50 = vld [vmem:[%s21978_s2 + $0x1034] ss:$8 sps:$4 sm:$0xff]  }
 0x44e   :  { %6224 = vmatpush1.bf16.msra.mxu0 %v16493_v51  ;;  %v16572_v51 = vld [vmem:[%s21978_s2 + $0x1030] ss:$8 sps:$4 sm:$0xff]  }
 0x44f   :  { %6225 = vmatprep.subr.bf16.mxu0 %v16498_v52  ;;  %v16577_v52 = vld [vmem:[%s21978_s2 + $0x1044] ss:$8 sps:$4 sm:$0xff]  }
 0x452   :  { %6226 = vmatpush1.bf16.msra.mxu0 %v16496_v53  ;;  %v16575_v53 = vld [vmem:[%s21978_s2 + $0x1040] ss:$8 sps:$4 sm:$0xff]  }
 0x453   :  { %6227 = vmatprep.subr.bf16.mxu0 %v16501_v54  ;;  %v16580_v54 = vld [vmem:[%s21978_s2 + $0x1054] ss:$8 sps:$4 sm:$0xff]  }
 0x456   :  { %6228 = vmatpush1.bf16.msra.mxu0 %v16499_v55  ;;  %v16578_v55 = vld [vmem:[%s21978_s2 + $0x1050] ss:$8 sps:$4 sm:$0xff]  }
 0x457   :  { %6229 = vmatprep.subr.bf16.mxu0 %v16504_v56  ;;  %v16583_v56 = vld [vmem:[%s21978_s2 + $0x1064] ss:$8 sps:$4 sm:$0xff]  }
 0x45a   :  { %6230 = vmatpush1.bf16.msra.mxu0 %v16502_v57  ;;  %v16581_v57 = vld [vmem:[%s21978_s2 + $0x1060] ss:$8 sps:$4 sm:$0xff]  }
 0x45b   :  { %6231 = vmatprep.subr.bf16.mxu0 %v16507_v58  ;;  %v16586_v58 = vld [vmem:[%s21978_s2 + $0x1074] ss:$8 sps:$4 sm:$0xff]  }
 0x45e   :  { %6232 = vmatpush1.bf16.msra.mxu0 %v16505_v59  ;;  %v16584_v59 = vld [vmem:[%s21978_s2 + $0x1070] ss:$8 sps:$4 sm:$0xff]  }
 0x45f   :  { %6233 = vmatprep.subr.bf16.mxu0 %v16510_v61  ;;  %v16587_v61 = vld [vmem:[%s21978_s2 + $0x1080] ss:$8 sps:$4 sm:$0xff]  }
 0x462   :  { %6234 = vmatpush1.bf16.msra.mxu0 %v16508_v62  ;;  %v16592_v62 = vld [vmem:[%s21978_s2 + $0x1094] ss:$8 sps:$4 sm:$0xff]  }
 0x463   :  { %6235 = vmatprep.subr.bf16.mxu0 %v16513_v0  ;;  %v16595_v0 = vld [vmem:[%s21978_s2 + $0x10a4] ss:$8 sps:$4 sm:$0xff]  }
 0x466   :  { %6236 = vmatpush1.bf16.msra.mxu0 %v16511_v1  ;;  %v16593_v1 = vld [vmem:[%s21978_s2 + $0x10a0] ss:$8 sps:$4 sm:$0xff]  }
 0x467   :  { %6246 = vmatprep.subr.bf16.mxu0 %v16516_v3  ;;  %v16596_v3 = vld [vmem:[%s21978_s2 + $0x10b0] ss:$8 sps:$4 sm:$0xff]  }
 0x469   :  { %6238 = vmatmul.mubr.bf16.vlgmr.msra.gmra.mrb[0].mxu0 %v1436_v4  ;;  %v16601_v4 = vld [vmem:[%s21978_s2 + $0x10c4] ss:$8 sps:$4 sm:$0xff]  }
 0x46a   :  { %6247 = vmatpush1.bf16.msra.mxu0 %v16514_v5  ;;  %6278 = vmatprep.mubr.bf16.mxu0 %v1439_v6  ;;  %v16599_v5 = vld [vmem:[%s21978_s2 + $0x10c0] ss:$8 sps:$4 sm:$0xff]   ;;  %v16604_v6 = vld [vmem:[%s21978_s2 + $0x10d4] ss:$8 sps:$4 sm:$0xff]  }
 0x46b   :  { %6248 = vmatprep.subr.bf16.mxu0 %v16519_v7  ;;  %v16602_v7 = vld [vmem:[%s21978_s2 + $0x10d0] ss:$8 sps:$4 sm:$0xff]  }
 0x46e   :  { %6249 = vmatpush1.bf16.msra.mxu0 %v16517_v8  ;;  %v1271_v8 = vcombine.high %v20588_v36, %v20588_v36  ;;  %v16635_v36 = vld [vmem:[%s21978_s2 + $0x1180] ss:$8 sps:$4 sm:$0xff]  }
 0x46f   :  { %6250 = vmatprep.subr.bf16.mxu0 %v16522_v9  ;;  %v16607_v9 = vld [vmem:[%s21978_s2 + $0x10e4] ss:$8 sps:$4 sm:$0xff]  }
 0x472   :  { %6251 = vmatpush1.bf16.msra.mxu0 %v16520_v10  ;;  %v16605_v10 = vld [vmem:[%s21978_s2 + $0x10e0] ss:$8 sps:$4 sm:$0xff]  }
 0x473   :  { %6252 = vmatprep.subr.bf16.mxu0 %v16525_v11  ;;  %v20700_v11 = vrot.slane %v1271_v8, %v18926_v16  ;;  %v16686_v8 = vld [vmem:[%s21978_s2 + $0x1284] ss:$8 sps:$4 sm:$0xff]  }
 0x476   :  { %6253 = vmatpush1.bf16.msra.mxu0 %v16523_v12  ;;  %v16610_v12 = vld [vmem:[%s21978_s2 + $0x10f4] ss:$8 sps:$4 sm:$0xff]  }
 0x477   :  { %6254 = vmatprep.subr.bf16.mxu0 %v16528_v14  ;;  %v16608_v14 = vld [vmem:[%s21978_s2 + $0x10f0] ss:$8 sps:$4 sm:$0xff]  }
 0x47a   :  { %6255 = vmatpush1.bf16.msra.mxu0 %v16526_v15  ;;  %v1287_v15 = vcombine.high %v20700_v11, %v20700_v11 }
 0x47b   :  { %6256 = vmatprep.subr.bf16.mxu0 %v16531_v17  ;;  %v16613_v17 = vld [vmem:[%s21978_s2 + $0x1104] ss:$8 sps:$4 sm:$0xff]  }
 0x47e   :  { %6257 = vmatpush1.bf16.msra.mxu0 %v16529_v18  ;;  %v1440_v18 = vpack.c.bf16 %v20595_v38, %v20595_v38  ;;  %v16638_v38 = vld [vmem:[%s21978_s2 + $0x1190] ss:$8 sps:$4 sm:$0xff]  }
 0x47f   :  { %6258 = vmatprep.subr.bf16.mxu0 %v16534_v19  ;;  %v16611_v19 = vld [vmem:[%s21978_s2 + $0x1100] ss:$8 sps:$4 sm:$0xff]  }
 0x482   :  { %6259 = vmatpush1.bf16.msra.mxu0 %v16532_v20  ;;  %v1443_v20 = vpack.c.bf16 %v1287_v15, %v1287_v15  ;;  %v16695_v15 = vld [vmem:[%s21978_s2 + $0x12b4] ss:$8 sps:$4 sm:$0xff]  }
 0x483   :  { %6260 = vmatprep.subr.bf16.mxu0 %v16537_v21  ;;  %v16616_v21 = vld [vmem:[%s21978_s2 + $0x1114] ss:$8 sps:$4 sm:$0xff]  }
 0x486   :  { %6261 = vmatpush1.bf16.msra.mxu0 %v16535_v22  ;;  %v16614_v22 = vld [vmem:[%s21978_s2 + $0x1110] ss:$8 sps:$4 sm:$0xff]  }
 0x487   :  { %6262 = vmatprep.subr.bf16.mxu0 %v16540_v23  ;;  %v16619_v23 = vld [vmem:[%s21978_s2 + $0x1124] ss:$8 sps:$4 sm:$0xff]  }
 0x48a   :  { %6263 = vmatpush1.bf16.msra.mxu0 %v16538_v24  ;;  %v16617_v24 = vld [vmem:[%s21978_s2 + $0x1120] ss:$8 sps:$4 sm:$0xff]  }
 0x48b   :  { %6264 = vmatprep.subr.bf16.mxu0 %v16543_v25  ;;  %v16622_v25 = vld [vmem:[%s21978_s2 + $0x1134] ss:$8 sps:$4 sm:$0xff]  }
 0x48e   :  { %6265 = vmatpush1.bf16.msra.mxu0 %v16541_v26  ;;  %v16620_v26 = vld [vmem:[%s21978_s2 + $0x1130] ss:$8 sps:$4 sm:$0xff]  }
 0x48f   :  { %6266 = vmatprep.subr.bf16.mxu0 %v16546_v27  ;;  %v16625_v27 = vld [vmem:[%s21978_s2 + $0x1144] ss:$8 sps:$4 sm:$0xff]  }
 0x492   :  { %6267 = vmatpush1.bf16.msra.mxu0 %v16544_v28  ;;  %v16623_v28 = vld [vmem:[%s21978_s2 + $0x1140] ss:$8 sps:$4 sm:$0xff]  }
 0x493   :  { %6268 = vmatprep.subr.bf16.mxu0 %v16549_v29  ;;  %v16628_v29 = vld [vmem:[%s21978_s2 + $0x1154] ss:$8 sps:$4 sm:$0xff]  }
 0x496   :  { %6269 = vmatpush1.bf16.msra.mxu0 %v16547_v30  ;;  %v16626_v30 = vld [vmem:[%s21978_s2 + $0x1150] ss:$8 sps:$4 sm:$0xff]  }
 0x497   :  { %6270 = vmatprep.subr.bf16.mxu0 %v16552_v31  ;;  %v16631_v31 = vld [vmem:[%s21978_s2 + $0x1164] ss:$8 sps:$4 sm:$0xff]  }
 0x49a   :  { %6271 = vmatpush1.bf16.msra.mxu0 %v16550_v32  ;;  %v16629_v32 = vld [vmem:[%s21978_s2 + $0x1160] ss:$8 sps:$4 sm:$0xff]  }
 0x49b   :  { %6272 = vmatprep.subr.bf16.mxu0 %v16555_v33  ;;  %v16634_v33 = vld [vmem:[%s21978_s2 + $0x1174] ss:$8 sps:$4 sm:$0xff]  }
 0x49e   :  { %6273 = vmatpush1.bf16.msra.mxu0 %v16553_v34  ;;  %v16632_v34 = vld [vmem:[%s21978_s2 + $0x1170] ss:$8 sps:$4 sm:$0xff]  }
 0x49f   :  { %6274 = vmatprep.subr.bf16.mxu0 %v16558_v35  ;;  %v16637_v35 = vld [vmem:[%s21978_s2 + $0x1184] ss:$8 sps:$4 sm:$0xff]  }
 0x4a2   :  { %6275 = vmatpush1.bf16.msra.mxu0 %v16556_v37  ;;  %v16640_v37 = vld [vmem:[%s21978_s2 + $0x1194] ss:$8 sps:$4 sm:$0xff]  }
 0x4a3   :  { %6276 = vmatprep.subr.bf16.mxu0 %v16561_v39  ;;  %v16643_v39 = vld [vmem:[%s21978_s2 + $0x11a4] ss:$8 sps:$4 sm:$0xff]  }
 0x4a6   :  { %6277 = vmatpush1.bf16.msra.mxu0 %v16559_v40  ;;  %v16641_v40 = vld [vmem:[%s21978_s2 + $0x11a0] ss:$8 sps:$4 sm:$0xff]  }
 0x4a7   :  { %6287 = vmatprep.subr.bf16.mxu0 %v16565_v42  ;;  %v16644_v42 = vld [vmem:[%s21978_s2 + $0x11b0] ss:$8 sps:$4 sm:$0xff]  }
 0x4a9   :  { %6279 = vmatmul.mubr.bf16.vlgmr.msra.gmra.mrb[0].mxu0 %v1438_v43  ;;  %v16649_v43 = vld [vmem:[%s21978_s2 + $0x11c4] ss:$8 sps:$4 sm:$0xff]  }
 0x4aa   :  { %6288 = vmatpush1.bf16.msra.mxu0 %v16563_v44  ;;  %6319 = vmatprep.mubr.bf16.mxu0 %v1441_v45  ;;  %v16647_v44 = vld [vmem:[%s21978_s2 + $0x11c0] ss:$8 sps:$4 sm:$0xff]   ;;  %v16652_v45 = vld [vmem:[%s21978_s2 + $0x11d4] ss:$8 sps:$4 sm:$0xff]  }
 0x4ab   :  { %6289 = vmatprep.subr.bf16.mxu0 %v16568_v46  ;;  %v16650_v46 = vld [vmem:[%s21978_s2 + $0x11d0] ss:$8 sps:$4 sm:$0xff]  }
 0x4ae   :  { %6290 = vmatpush1.bf16.msra.mxu0 %v16566_v47  ;;  %v16655_v47 = vld [vmem:[%s21978_s2 + $0x11e4] ss:$8 sps:$4 sm:$0xff]  }
 0x4af   :  { %6291 = vmatprep.subr.bf16.mxu0 %v16571_v48  ;;  %v20802_v48 = vld [vmem:[%s22000_s24 + $0x48] sm:$0xff] }
 0x4b2   :  { %6292 = vmatpush1.bf16.msra.mxu0 %v16569_v49  ;;  %v16653_v49 = vld [vmem:[%s21978_s2 + $0x11e0] ss:$8 sps:$4 sm:$0xff]  }
 0x4b3   :  { %6293 = vmatprep.subr.bf16.mxu0 %v16574_v50  ;;  %v20809_v50 = vrot.slane %v20802_v48, %v18926_v16 }
 0x4b6   :  { %6294 = vmatpush1.bf16.msra.mxu0 %v16572_v51  ;;  %v16658_v51 = vld [vmem:[%s21978_s2 + $0x11f4] ss:$8 sps:$4 sm:$0xff]  }
 0x4b7   :  { %6295 = vmatprep.subr.bf16.mxu0 %v16577_v52  ;;  %v16656_v52 = vld [vmem:[%s21978_s2 + $0x11f0] ss:$8 sps:$4 sm:$0xff]  }
 0x4ba   :  { %6296 = vmatpush1.bf16.msra.mxu0 %v16575_v53  ;;  %v1303_v53 = vcombine.high %v20809_v50, %v20809_v50 }
 0x4bb   :  { %6297 = vmatprep.subr.bf16.mxu0 %v16580_v54  ;;  %v16662_v54 = vld [vmem:[%s21978_s2 + $0x1204] ss:$8 sps:$4 sm:$0xff]  }
 0x4be   :  { %6298 = vmatpush1.bf16.msra.mxu0 %v16578_v55  ;;  %v1442_v55 = vpack.c.bf16 %v20700_v11, %v20700_v11  ;;  %v16687_v11 = vld [vmem:[%s21978_s2 + $0x1290] ss:$8 sps:$4 sm:$0xff]  }
 0x4bf   :  { %6299 = vmatprep.subr.bf16.mxu0 %v16583_v56  ;;  %v16660_v56 = vld [vmem:[%s21978_s2 + $0x1200] ss:$8 sps:$4 sm:$0xff]  }
 0x4c2   :  { %6300 = vmatpush1.bf16.msra.mxu0 %v16581_v57  ;;  %v1445_v57 = vpack.c.bf16 %v1303_v53, %v1303_v53  ;;  %v16743_v53 = vld [vmem:[%s21978_s2 + $0x13b4] ss:$8 sps:$4 sm:$0xff]  }
 0x4c3   :  { %6301 = vmatprep.subr.bf16.mxu0 %v16586_v58  ;;  %v16665_v58 = vld [vmem:[%s21978_s2 + $0x1214] ss:$8 sps:$4 sm:$0xff]  }
 0x4c6   :  { %6302 = vmatpush1.bf16.msra.mxu0 %v16584_v59  ;;  %v16663_v59 = vld [vmem:[%s21978_s2 + $0x1210] ss:$8 sps:$4 sm:$0xff]  }
 0x4c7   :  { %6303 = vmatprep.subr.bf16.mxu0 %v16589_v60  ;;  %v16668_v60 = vld [vmem:[%s21978_s2 + $0x1224] ss:$8 sps:$4 sm:$0xff]  }
 0x4ca   :  { %6304 = vmatpush1.bf16.msra.mxu0 %v16587_v61  ;;  %v16666_v61 = vld [vmem:[%s21978_s2 + $0x1220] ss:$8 sps:$4 sm:$0xff]  }
 0x4cb   :  { %6305 = vmatprep.subr.bf16.mxu0 %v16592_v62  ;;  %v16671_v62 = vld [vmem:[%s21978_s2 + $0x1234] ss:$8 sps:$4 sm:$0xff]  }
 0x4ce   :  { %6306 = vmatpush1.bf16.msra.mxu0 %v16590_v63  ;;  %v16669_v63 = vld [vmem:[%s21978_s2 + $0x1230] ss:$8 sps:$4 sm:$0xff]  }
 0x4cf   :  { %6307 = vmatprep.subr.bf16.mxu0 %v16595_v0  ;;  %v16674_v0 = vld [vmem:[%s21978_s2 + $0x1244] ss:$8 sps:$4 sm:$0xff]  }
 0x4d2   :  { %6308 = vmatpush1.bf16.msra.mxu0 %v16593_v1  ;;  %v16672_v1 = vld [vmem:[%s21978_s2 + $0x1240] ss:$8 sps:$4 sm:$0xff]  }
 0x4d3   :  { %6309 = vmatprep.subr.bf16.mxu0 %v16598_v2  ;;  %v16677_v2 = vld [vmem:[%s21978_s2 + $0x1254] ss:$8 sps:$4 sm:$0xff]  }
 0x4d6   :  { %6310 = vmatpush1.bf16.msra.mxu0 %v16596_v3  ;;  %v16675_v3 = vld [vmem:[%s21978_s2 + $0x1250] ss:$8 sps:$4 sm:$0xff]  }
 0x4d7   :  { %6311 = vmatprep.subr.bf16.mxu0 %v16601_v4  ;;  %v16680_v4 = vld [vmem:[%s21978_s2 + $0x1264] ss:$8 sps:$4 sm:$0xff]  }
 0x4da   :  { %6312 = vmatpush1.bf16.msra.mxu0 %v16599_v5  ;;  %v16678_v5 = vld [vmem:[%s21978_s2 + $0x1260] ss:$8 sps:$4 sm:$0xff]  }
 0x4db   :  { %6313 = vmatprep.subr.bf16.mxu0 %v16604_v6  ;;  %v16683_v6 = vld [vmem:[%s21978_s2 + $0x1274] ss:$8 sps:$4 sm:$0xff]  }
 0x4de   :  { %6314 = vmatpush1.bf16.msra.mxu0 %v16602_v7  ;;  %v16681_v7 = vld [vmem:[%s21978_s2 + $0x1270] ss:$8 sps:$4 sm:$0xff]  }
 0x4df   :  { %6315 = vmatprep.subr.bf16.mxu0 %v16607_v9  ;;  %v16684_v9 = vld [vmem:[%s21978_s2 + $0x1280] ss:$8 sps:$4 sm:$0xff]  }
 0x4e2   :  { %6316 = vmatpush1.bf16.msra.mxu0 %v16605_v10  ;;  %v16689_v10 = vld [vmem:[%s21978_s2 + $0x1294] ss:$8 sps:$4 sm:$0xff]  }
 0x4e3   :  { %6317 = vmatprep.subr.bf16.mxu0 %v16610_v12  ;;  %v16692_v12 = vld [vmem:[%s21978_s2 + $0x12a4] ss:$8 sps:$4 sm:$0xff]  }
 0x4e6   :  { %6318 = vmatpush1.bf16.msra.mxu0 %v16608_v14  ;;  %v16690_v14 = vld [vmem:[%s21978_s2 + $0x12a0] ss:$8 sps:$4 sm:$0xff]  }
 0x4e7   :  { %6328 = vmatprep.subr.bf16.mxu0 %v16613_v17  ;;  %v16693_v17 = vld [vmem:[%s21978_s2 + $0x12b0] ss:$8 sps:$4 sm:$0xff]  }
 0x4e9   :  { %6320 = vmatmul.mubr.bf16.vlgmr.msra.gmra.mrb[0].mxu0 %v1440_v18  ;;  %v16698_v18 = vld [vmem:[%s21978_s2 + $0x12c4] ss:$8 sps:$4 sm:$0xff]  }
 0x4ea   :  { %6329 = vmatpush1.bf16.msra.mxu0 %v16611_v19  ;;  %6360 = vmatprep.mubr.bf16.mxu0 %v1443_v20  ;;  %v16696_v19 = vld [vmem:[%s21978_s2 + $0x12c0] ss:$8 sps:$4 sm:$0xff]   ;;  %v16701_v20 = vld [vmem:[%s21978_s2 + $0x12d4] ss:$8 sps:$4 sm:$0xff]  }
 0x4eb   :  { %6330 = vmatprep.subr.bf16.mxu0 %v16616_v21  ;;  %v16699_v21 = vld [vmem:[%s21978_s2 + $0x12d0] ss:$8 sps:$4 sm:$0xff]  }
 0x4ee   :  { %6331 = vmatpush1.bf16.msra.mxu0 %v16614_v22  ;;  %v1288_v22 = vcombine.high %v20802_v48, %v20802_v48  ;;  %v16732_v48 = vld [vmem:[%s21978_s2 + $0x1380] ss:$8 sps:$4 sm:$0xff]  }
 0x4ef   :  { %6332 = vmatprep.subr.bf16.mxu0 %v16619_v23  ;;  %v16704_v23 = vld [vmem:[%s21978_s2 + $0x12e4] ss:$8 sps:$4 sm:$0xff]  }
 0x4f2   :  { %6333 = vmatpush1.bf16.msra.mxu0 %v16617_v24  ;;  %v16702_v24 = vld [vmem:[%s21978_s2 + $0x12e0] ss:$8 sps:$4 sm:$0xff]  }
 0x4f3   :  { %6334 = vmatprep.subr.bf16.mxu0 %v16622_v25  ;;  %v20914_v25 = vrot.slane %v1288_v22, %v18926_v16  ;;  %v16783_v22 = vld [vmem:[%s21978_s2 + $0x1484] ss:$8 sps:$4 sm:$0xff]  }
 0x4f6   :  { %6335 = vmatpush1.bf16.msra.mxu0 %v16620_v26  ;;  %v16707_v26 = vld [vmem:[%s21978_s2 + $0x12f4] ss:$8 sps:$4 sm:$0xff]  }
 0x4f7   :  { %6336 = vmatprep.subr.bf16.mxu0 %v16625_v27  ;;  %v16705_v27 = vld [vmem:[%s21978_s2 + $0x12f0] ss:$8 sps:$4 sm:$0xff]  }
 0x4fa   :  { %6337 = vmatpush1.bf16.msra.mxu0 %v16623_v28  ;;  %v1304_v28 = vcombine.high %v20914_v25, %v20914_v25 }
 0x4fb   :  { %6338 = vmatprep.subr.bf16.mxu0 %v16628_v29  ;;  %v16710_v29 = vld [vmem:[%s21978_s2 + $0x1304] ss:$8 sps:$4 sm:$0xff]  }
 0x4fe   :  { %6339 = vmatpush1.bf16.msra.mxu0 %v16626_v30  ;;  %v1444_v30 = vpack.c.bf16 %v20809_v50, %v20809_v50  ;;  %v16735_v50 = vld [vmem:[%s21978_s2 + $0x1390] ss:$8 sps:$4 sm:$0xff]  }
 0x4ff   :  { %6340 = vmatprep.subr.bf16.mxu0 %v16631_v31  ;;  %v16708_v31 = vld [vmem:[%s21978_s2 + $0x1300] ss:$8 sps:$4 sm:$0xff]  }
 0x502   :  { %6341 = vmatpush1.bf16.msra.mxu0 %v16629_v32  ;;  %v1447_v32 = vpack.c.bf16 %v1304_v28, %v1304_v28  ;;  %v16792_v28 = vld [vmem:[%s21978_s2 + $0x14b4] ss:$8 sps:$4 sm:$0xff]  }
 0x503   :  { %6342 = vmatprep.subr.bf16.mxu0 %v16634_v33  ;;  %v16713_v33 = vld [vmem:[%s21978_s2 + $0x1314] ss:$8 sps:$4 sm:$0xff]  }
 0x506   :  { %6343 = vmatpush1.bf16.msra.mxu0 %v16632_v34  ;;  %v16711_v34 = vld [vmem:[%s21978_s2 + $0x1310] ss:$8 sps:$4 sm:$0xff]  }
 0x507   :  { %6344 = vmatprep.subr.bf16.mxu0 %v16637_v35  ;;  %v16716_v35 = vld [vmem:[%s21978_s2 + $0x1324] ss:$8 sps:$4 sm:$0xff]  }
 0x50a   :  { %6345 = vmatpush1.bf16.msra.mxu0 %v16635_v36  ;;  %v16714_v36 = vld [vmem:[%s21978_s2 + $0x1320] ss:$8 sps:$4 sm:$0xff]  }
 0x50b   :  { %6346 = vmatprep.subr.bf16.mxu0 %v16640_v37  ;;  %v16719_v37 = vld [vmem:[%s21978_s2 + $0x1334] ss:$8 sps:$4 sm:$0xff]  }
 0x50e   :  { %6347 = vmatpush1.bf16.msra.mxu0 %v16638_v38  ;;  %v16717_v38 = vld [vmem:[%s21978_s2 + $0x1330] ss:$8 sps:$4 sm:$0xff]  }
 0x50f   :  { %6348 = vmatprep.subr.bf16.mxu0 %v16643_v39  ;;  %v16722_v39 = vld [vmem:[%s21978_s2 + $0x1344] ss:$8 sps:$4 sm:$0xff]  }
 0x512   :  { %6349 = vmatpush1.bf16.msra.mxu0 %v16641_v40  ;;  %v16720_v40 = vld [vmem:[%s21978_s2 + $0x1340] ss:$8 sps:$4 sm:$0xff]  }
 0x513   :  { %6350 = vmatprep.subr.bf16.mxu0 %v16646_v41  ;;  %v16725_v41 = vld [vmem:[%s21978_s2 + $0x1354] ss:$8 sps:$4 sm:$0xff]  }
 0x516   :  { %6351 = vmatpush1.bf16.msra.mxu0 %v16644_v42  ;;  %v16723_v42 = vld [vmem:[%s21978_s2 + $0x1350] ss:$8 sps:$4 sm:$0xff]  }
 0x517   :  { %6352 = vmatprep.subr.bf16.mxu0 %v16649_v43  ;;  %v16728_v43 = vld [vmem:[%s21978_s2 + $0x1364] ss:$8 sps:$4 sm:$0xff]  }
 0x51a   :  { %6353 = vmatpush1.bf16.msra.mxu0 %v16647_v44  ;;  %v16726_v44 = vld [vmem:[%s21978_s2 + $0x1360] ss:$8 sps:$4 sm:$0xff]  }
 0x51b   :  { %6354 = vmatprep.subr.bf16.mxu0 %v16652_v45  ;;  %v16731_v45 = vld [vmem:[%s21978_s2 + $0x1374] ss:$8 sps:$4 sm:$0xff]  }
 0x51e   :  { %6355 = vmatpush1.bf16.msra.mxu0 %v16650_v46  ;;  %v16729_v46 = vld [vmem:[%s21978_s2 + $0x1370] ss:$8 sps:$4 sm:$0xff]  }
 0x51f   :  { %6356 = vmatprep.subr.bf16.mxu0 %v16655_v47  ;;  %v16734_v47 = vld [vmem:[%s21978_s2 + $0x1384] ss:$8 sps:$4 sm:$0xff]  }
 0x522   :  { %6357 = vmatpush1.bf16.msra.mxu0 %v16653_v49  ;;  %v16737_v49 = vld [vmem:[%s21978_s2 + $0x1394] ss:$8 sps:$4 sm:$0xff]  }
 0x523   :  { %6358 = vmatprep.subr.bf16.mxu0 %v16658_v51  ;;  %v16740_v51 = vld [vmem:[%s21978_s2 + $0x13a4] ss:$8 sps:$4 sm:$0xff]  }
 0x526   :  { %6359 = vmatpush1.bf16.msra.mxu0 %v16656_v52  ;;  %v16738_v52 = vld [vmem:[%s21978_s2 + $0x13a0] ss:$8 sps:$4 sm:$0xff]  }
 0x527   :  { %6369 = vmatprep.subr.bf16.mxu0 %v16662_v54  ;;  %v16741_v54 = vld [vmem:[%s21978_s2 + $0x13b0] ss:$8 sps:$4 sm:$0xff]  }
 0x529   :  { %6361 = vmatmul.mubr.bf16.vlgmr.msra.gmra.mrb[0].mxu0 %v1442_v55  ;;  %v16746_v55 = vld [vmem:[%s21978_s2 + $0x13c4] ss:$8 sps:$4 sm:$0xff]  }
 0x52a   :  { %6370 = vmatpush1.bf16.msra.mxu0 %v16660_v56  ;;  %6401 = vmatprep.mubr.bf16.mxu0 %v1445_v57  ;;  %v16744_v56 = vld [vmem:[%s21978_s2 + $0x13c0] ss:$8 sps:$4 sm:$0xff]   ;;  %v16749_v57 = vld [vmem:[%s21978_s2 + $0x13d4] ss:$8 sps:$4 sm:$0xff]  }
 0x52b   :  { %6371 = vmatprep.subr.bf16.mxu0 %v16665_v58  ;;  %v16747_v58 = vld [vmem:[%s21978_s2 + $0x13d0] ss:$8 sps:$4 sm:$0xff]  }
 0x52e   :  { %6372 = vmatpush1.bf16.msra.mxu0 %v16663_v59  ;;  %v16752_v59 = vld [vmem:[%s21978_s2 + $0x13e4] ss:$8 sps:$4 sm:$0xff]  }
 0x52f   :  { %6373 = vmatprep.subr.bf16.mxu0 %v16668_v60  ;;  %v21016_v60 = vld [vmem:[%s22000_s24 + $0x50] sm:$0xff] }
 0x532   :  { %6374 = vmatpush1.bf16.msra.mxu0 %v16666_v61  ;;  %v16750_v61 = vld [vmem:[%s21978_s2 + $0x13e0] ss:$8 sps:$4 sm:$0xff]  }
 0x533   :  { %6375 = vmatprep.subr.bf16.mxu0 %v16671_v62  ;;  %v21023_v62 = vrot.slane %v21016_v60, %v18926_v16 }
 0x536   :  { %6376 = vmatpush1.bf16.msra.mxu0 %v16669_v63  ;;  %v16755_v63 = vld [vmem:[%s21978_s2 + $0x13f4] ss:$8 sps:$4 sm:$0xff]  }
 0x537   :  { %6377 = vmatprep.subr.bf16.mxu0 %v16674_v0  ;;  %v16753_v0 = vld [vmem:[%s21978_s2 + $0x13f0] ss:$8 sps:$4 sm:$0xff]  }
 0x53a   :  { %6378 = vmatpush1.bf16.msra.mxu0 %v16672_v1  ;;  %v1320_v1 = vcombine.high %v21023_v62, %v21023_v62 }
 0x53b   :  { %6379 = vmatprep.subr.bf16.mxu0 %v16677_v2  ;;  %v16759_v2 = vld [vmem:[%s21978_s2 + $0x1404] ss:$8 sps:$4 sm:$0xff]  }
 0x53e   :  { %6380 = vmatpush1.bf16.msra.mxu0 %v16675_v3  ;;  %v1446_v3 = vpack.c.bf16 %v20914_v25, %v20914_v25  ;;  %v16784_v25 = vld [vmem:[%s21978_s2 + $0x1490] ss:$8 sps:$4 sm:$0xff]  }
 0x53f   :  { %6381 = vmatprep.subr.bf16.mxu0 %v16680_v4  ;;  %v16757_v4 = vld [vmem:[%s21978_s2 + $0x1400] ss:$8 sps:$4 sm:$0xff]  }
 0x542   :  { %6382 = vmatpush1.bf16.msra.mxu0 %v16678_v5  ;;  %v1449_v5 = vpack.c.bf16 %v1320_v1, %v1320_v1  ;;  %v16840_v1 = vld [vmem:[%s21978_s2 + $0x15b4] ss:$8 sps:$4 sm:$0xff]  }
 0x543   :  { %6383 = vmatprep.subr.bf16.mxu0 %v16683_v6  ;;  %v16762_v6 = vld [vmem:[%s21978_s2 + $0x1414] ss:$8 sps:$4 sm:$0xff]  }
 0x546   :  { %6384 = vmatpush1.bf16.msra.mxu0 %v16681_v7  ;;  %v16760_v7 = vld [vmem:[%s21978_s2 + $0x1410] ss:$8 sps:$4 sm:$0xff]  }
 0x547   :  { %6385 = vmatprep.subr.bf16.mxu0 %v16686_v8  ;;  %v16765_v8 = vld [vmem:[%s21978_s2 + $0x1424] ss:$8 sps:$4 sm:$0xff]  }
 0x54a   :  { %6386 = vmatpush1.bf16.msra.mxu0 %v16684_v9  ;;  %v16763_v9 = vld [vmem:[%s21978_s2 + $0x1420] ss:$8 sps:$4 sm:$0xff]  }
 0x54b   :  { %6387 = vmatprep.subr.bf16.mxu0 %v16689_v10  ;;  %v16768_v10 = vld [vmem:[%s21978_s2 + $0x1434] ss:$8 sps:$4 sm:$0xff]  }
 0x54e   :  { %6388 = vmatpush1.bf16.msra.mxu0 %v16687_v11  ;;  %v16766_v11 = vld [vmem:[%s21978_s2 + $0x1430] ss:$8 sps:$4 sm:$0xff]  }
 0x54f   :  { %6389 = vmatprep.subr.bf16.mxu0 %v16692_v12  ;;  %v16771_v12 = vld [vmem:[%s21978_s2 + $0x1444] ss:$8 sps:$4 sm:$0xff]  }
 0x552   :  { %6390 = vmatpush1.bf16.msra.mxu0 %v16690_v14  ;;  %v16769_v14 = vld [vmem:[%s21978_s2 + $0x1440] ss:$8 sps:$4 sm:$0xff]  }
 0x553   :  { %6391 = vmatprep.subr.bf16.mxu0 %v16695_v15  ;;  %v16774_v15 = vld [vmem:[%s21978_s2 + $0x1454] ss:$8 sps:$4 sm:$0xff]  }
 0x556   :  { %6392 = vmatpush1.bf16.msra.mxu0 %v16693_v17  ;;  %v16772_v17 = vld [vmem:[%s21978_s2 + $0x1450] ss:$8 sps:$4 sm:$0xff]  }
 0x557   :  { %6393 = vmatprep.subr.bf16.mxu0 %v16698_v18  ;;  %v16777_v18 = vld [vmem:[%s21978_s2 + $0x1464] ss:$8 sps:$4 sm:$0xff]  }
 0x55a   :  { %6394 = vmatpush1.bf16.msra.mxu0 %v16696_v19  ;;  %v16775_v19 = vld [vmem:[%s21978_s2 + $0x1460] ss:$8 sps:$4 sm:$0xff]  }
 0x55b   :  { %6395 = vmatprep.subr.bf16.mxu0 %v16701_v20  ;;  %v16780_v20 = vld [vmem:[%s21978_s2 + $0x1474] ss:$8 sps:$4 sm:$0xff]  }
 0x55e   :  { %6396 = vmatpush1.bf16.msra.mxu0 %v16699_v21  ;;  %v16778_v21 = vld [vmem:[%s21978_s2 + $0x1470] ss:$8 sps:$4 sm:$0xff]  }
 0x55f   :  { %6397 = vmatprep.subr.bf16.mxu0 %v16704_v23  ;;  %v16781_v23 = vld [vmem:[%s21978_s2 + $0x1480] ss:$8 sps:$4 sm:$0xff]  }
 0x562   :  { %6398 = vmatpush1.bf16.msra.mxu0 %v16702_v24  ;;  %v16786_v24 = vld [vmem:[%s21978_s2 + $0x1494] ss:$8 sps:$4 sm:$0xff]  }
 0x563   :  { %6399 = vmatprep.subr.bf16.mxu0 %v16707_v26  ;;  %v16789_v26 = vld [vmem:[%s21978_s2 + $0x14a4] ss:$8 sps:$4 sm:$0xff]  }
 0x566   :  { %6400 = vmatpush1.bf16.msra.mxu0 %v16705_v27  ;;  %v16787_v27 = vld [vmem:[%s21978_s2 + $0x14a0] ss:$8 sps:$4 sm:$0xff]  }
 0x567   :  { %6410 = vmatprep.subr.bf16.mxu0 %v16710_v29  ;;  %v16790_v29 = vld [vmem:[%s21978_s2 + $0x14b0] ss:$8 sps:$4 sm:$0xff]  }
 0x569   :  { %6402 = vmatmul.mubr.bf16.vlgmr.msra.gmra.mrb[0].mxu0 %v1444_v30  ;;  %v16795_v30 = vld [vmem:[%s21978_s2 + $0x14c4] ss:$8 sps:$4 sm:$0xff]  }
 0x56a   :  { %6411 = vmatpush1.bf16.msra.mxu0 %v16708_v31  ;;  %6442 = vmatprep.mubr.bf16.mxu0 %v1447_v32  ;;  %v16793_v31 = vld [vmem:[%s21978_s2 + $0x14c0] ss:$8 sps:$4 sm:$0xff]   ;;  %v16798_v32 = vld [vmem:[%s21978_s2 + $0x14d4] ss:$8 sps:$4 sm:$0xff]  }
 0x56b   :  { %6412 = vmatprep.subr.bf16.mxu0 %v16713_v33  ;;  %v16796_v33 = vld [vmem:[%s21978_s2 + $0x14d0] ss:$8 sps:$4 sm:$0xff]  }
 0x56e   :  { %6413 = vmatpush1.bf16.msra.mxu0 %v16711_v34  ;;  %v1305_v34 = vcombine.high %v21016_v60, %v21016_v60  ;;  %v16829_v60 = vld [vmem:[%s21978_s2 + $0x1580] ss:$8 sps:$4 sm:$0xff]  }
 0x56f   :  { %6414 = vmatprep.subr.bf16.mxu0 %v16716_v35  ;;  %v16801_v35 = vld [vmem:[%s21978_s2 + $0x14e4] ss:$8 sps:$4 sm:$0xff]  }
 0x572   :  { %6415 = vmatpush1.bf16.msra.mxu0 %v16714_v36  ;;  %v16799_v36 = vld [vmem:[%s21978_s2 + $0x14e0] ss:$8 sps:$4 sm:$0xff]  }
 0x573   :  { %6416 = vmatprep.subr.bf16.mxu0 %v16719_v37  ;;  %v21128_v37 = vrot.slane %v1305_v34, %v18926_v16  ;;  %v16880_v34 = vld [vmem:[%s21978_s2 + $0x1684] ss:$8 sps:$4 sm:$0xff]  }
 0x576   :  { %6417 = vmatpush1.bf16.msra.mxu0 %v16717_v38  ;;  %v16804_v38 = vld [vmem:[%s21978_s2 + $0x14f4] ss:$8 sps:$4 sm:$0xff]  }
 0x577   :  { %6418 = vmatprep.subr.bf16.mxu0 %v16722_v39  ;;  %v16802_v39 = vld [vmem:[%s21978_s2 + $0x14f0] ss:$8 sps:$4 sm:$0xff]  }
 0x57a   :  { %6419 = vmatpush1.bf16.msra.mxu0 %v16720_v40  ;;  %v1321_v40 = vcombine.high %v21128_v37, %v21128_v37 }
 0x57b   :  { %6420 = vmatprep.subr.bf16.mxu0 %v16725_v41  ;;  %v16807_v41 = vld [vmem:[%s21978_s2 + $0x1504] ss:$8 sps:$4 sm:$0xff]  }
 0x57e   :  { %6421 = vmatpush1.bf16.msra.mxu0 %v16723_v42  ;;  %v1448_v42 = vpack.c.bf16 %v21023_v62, %v21023_v62  ;;  %v16832_v62 = vld [vmem:[%s21978_s2 + $0x1590] ss:$8 sps:$4 sm:$0xff]  }
 0x57f   :  { %6422 = vmatprep.subr.bf16.mxu0 %v16728_v43  ;;  %v16805_v43 = vld [vmem:[%s21978_s2 + $0x1500] ss:$8 sps:$4 sm:$0xff]  }
 0x582   :  { %6423 = vmatpush1.bf16.msra.mxu0 %v16726_v44  ;;  %v1451_v44 = vpack.c.bf16 %v1321_v40, %v1321_v40  ;;  %v16889_v40 = vld [vmem:[%s21978_s2 + $0x16b4] ss:$8 sps:$4 sm:$0xff]  }
 0x583   :  { %6424 = vmatprep.subr.bf16.mxu0 %v16731_v45  ;;  %v16810_v45 = vld [vmem:[%s21978_s2 + $0x1514] ss:$8 sps:$4 sm:$0xff]  }
 0x586   :  { %6425 = vmatpush1.bf16.msra.mxu0 %v16729_v46  ;;  %v16808_v46 = vld [vmem:[%s21978_s2 + $0x1510] ss:$8 sps:$4 sm:$0xff]  }
 0x587   :  { %6426 = vmatprep.subr.bf16.mxu0 %v16734_v47  ;;  %v16813_v47 = vld [vmem:[%s21978_s2 + $0x1524] ss:$8 sps:$4 sm:$0xff]  }
 0x58a   :  { %6427 = vmatpush1.bf16.msra.mxu0 %v16732_v48  ;;  %v16811_v48 = vld [vmem:[%s21978_s2 + $0x1520] ss:$8 sps:$4 sm:$0xff]  }
 0x58b   :  { %6428 = vmatprep.subr.bf16.mxu0 %v16737_v49  ;;  %v16816_v49 = vld [vmem:[%s21978_s2 + $0x1534] ss:$8 sps:$4 sm:$0xff]  }
 0x58e   :  { %6429 = vmatpush1.bf16.msra.mxu0 %v16735_v50  ;;  %v16814_v50 = vld [vmem:[%s21978_s2 + $0x1530] ss:$8 sps:$4 sm:$0xff]  }
 0x58f   :  { %6430 = vmatprep.subr.bf16.mxu0 %v16740_v51  ;;  %v16819_v51 = vld [vmem:[%s21978_s2 + $0x1544] ss:$8 sps:$4 sm:$0xff]  }
 0x592   :  { %6431 = vmatpush1.bf16.msra.mxu0 %v16738_v52  ;;  %v16817_v52 = vld [vmem:[%s21978_s2 + $0x1540] ss:$8 sps:$4 sm:$0xff]  }
 0x593   :  { %6432 = vmatprep.subr.bf16.mxu0 %v16743_v53  ;;  %v16822_v53 = vld [vmem:[%s21978_s2 + $0x1554] ss:$8 sps:$4 sm:$0xff]  }
 0x596   :  { %6433 = vmatpush1.bf16.msra.mxu0 %v16741_v54  ;;  %v16820_v54 = vld [vmem:[%s21978_s2 + $0x1550] ss:$8 sps:$4 sm:$0xff]  }
 0x597   :  { %6434 = vmatprep.subr.bf16.mxu0 %v16746_v55  ;;  %v16825_v55 = vld [vmem:[%s21978_s2 + $0x1564] ss:$8 sps:$4 sm:$0xff]  }
 0x59a   :  { %6435 = vmatpush1.bf16.msra.mxu0 %v16744_v56  ;;  %v16823_v56 = vld [vmem:[%s21978_s2 + $0x1560] ss:$8 sps:$4 sm:$0xff]  }
 0x59b   :  { %6436 = vmatprep.subr.bf16.mxu0 %v16749_v57  ;;  %v16828_v57 = vld [vmem:[%s21978_s2 + $0x1574] ss:$8 sps:$4 sm:$0xff]  }
 0x59e   :  { %6437 = vmatpush1.bf16.msra.mxu0 %v16747_v58  ;;  %v16826_v58 = vld [vmem:[%s21978_s2 + $0x1570] ss:$8 sps:$4 sm:$0xff]  }
 0x59f   :  { %6438 = vmatprep.subr.bf16.mxu0 %v16752_v59  ;;  %v16831_v59 = vld [vmem:[%s21978_s2 + $0x1584] ss:$8 sps:$4 sm:$0xff]  }
 0x5a2   :  { %6439 = vmatpush1.bf16.msra.mxu0 %v16750_v61  ;;  %v16834_v61 = vld [vmem:[%s21978_s2 + $0x1594] ss:$8 sps:$4 sm:$0xff]  }
 0x5a3   :  { %6440 = vmatprep.subr.bf16.mxu0 %v16755_v63  ;;  %v16837_v63 = vld [vmem:[%s21978_s2 + $0x15a4] ss:$8 sps:$4 sm:$0xff]  }
 0x5a6   :  { %6441 = vmatpush1.bf16.msra.mxu0 %v16753_v0  ;;  %v16835_v0 = vld [vmem:[%s21978_s2 + $0x15a0] ss:$8 sps:$4 sm:$0xff]  }
 0x5a7   :  { %6451 = vmatprep.subr.bf16.mxu0 %v16759_v2  ;;  %v16838_v2 = vld [vmem:[%s21978_s2 + $0x15b0] ss:$8 sps:$4 sm:$0xff]  }
 0x5a9   :  { %6443 = vmatmul.mubr.bf16.vlgmr.msra.gmra.mrb[0].mxu0 %v1446_v3  ;;  %v16843_v3 = vld [vmem:[%s21978_s2 + $0x15c4] ss:$8 sps:$4 sm:$0xff]  }
 0x5aa   :  { %6452 = vmatpush1.bf16.msra.mxu0 %v16757_v4  ;;  %6483 = vmatprep.mubr.bf16.mxu0 %v1449_v5  ;;  %v16841_v4 = vld [vmem:[%s21978_s2 + $0x15c0] ss:$8 sps:$4 sm:$0xff]   ;;  %v16846_v5 = vld [vmem:[%s21978_s2 + $0x15d4] ss:$8 sps:$4 sm:$0xff]  }
 0x5ab   :  { %6453 = vmatprep.subr.bf16.mxu0 %v16762_v6  ;;  %v16844_v6 = vld [vmem:[%s21978_s2 + $0x15d0] ss:$8 sps:$4 sm:$0xff]  }
 0x5ae   :  { %6454 = vmatpush1.bf16.msra.mxu0 %v16760_v7  ;;  %v16849_v7 = vld [vmem:[%s21978_s2 + $0x15e4] ss:$8 sps:$4 sm:$0xff]  }
 0x5af   :  { %6455 = vmatprep.subr.bf16.mxu0 %v16765_v8  ;;  %v21230_v8 = vld [vmem:[%s22000_s24 + $0x58] sm:$0xff] }
 0x5b2   :  { %6456 = vmatpush1.bf16.msra.mxu0 %v16763_v9  ;;  %v16847_v9 = vld [vmem:[%s21978_s2 + $0x15e0] ss:$8 sps:$4 sm:$0xff]  }
 0x5b3   :  { %6457 = vmatprep.subr.bf16.mxu0 %v16768_v10  ;;  %v21237_v10 = vrot.slane %v21230_v8, %v18926_v16 }
 0x5b6   :  { %6458 = vmatpush1.bf16.msra.mxu0 %v16766_v11  ;;  %v16852_v11 = vld [vmem:[%s21978_s2 + $0x15f4] ss:$8 sps:$4 sm:$0xff]  }
 0x5b7   :  { %6459 = vmatprep.subr.bf16.mxu0 %v16771_v12  ;;  %v16850_v12 = vld [vmem:[%s21978_s2 + $0x15f0] ss:$8 sps:$4 sm:$0xff]  }
 0x5ba   :  { %6460 = vmatpush1.bf16.msra.mxu0 %v16769_v14  ;;  %v1337_v14 = vcombine.high %v21237_v10, %v21237_v10 }
 0x5bb   :  { %6461 = vmatprep.subr.bf16.mxu0 %v16774_v15  ;;  %v16856_v15 = vld [vmem:[%s21978_s2 + $0x1604] ss:$8 sps:$4 sm:$0xff]  }
 0x5be   :  { %6462 = vmatpush1.bf16.msra.mxu0 %v16772_v17  ;;  %v1450_v17 = vpack.c.bf16 %v21128_v37, %v21128_v37  ;;  %v16881_v37 = vld [vmem:[%s21978_s2 + $0x1690] ss:$8 sps:$4 sm:$0xff]  }
 0x5bf   :  { %6463 = vmatprep.subr.bf16.mxu0 %v16777_v18  ;;  %v16854_v18 = vld [vmem:[%s21978_s2 + $0x1600] ss:$8 sps:$4 sm:$0xff]  }
 0x5c2   :  { %6464 = vmatpush1.bf16.msra.mxu0 %v16775_v19  ;;  %v1453_v19 = vpack.c.bf16 %v1337_v14, %v1337_v14  ;;  %v16937_v14 = vld [vmem:[%s21978_s2 + $0x17b4] ss:$8 sps:$4 sm:$0xff]  }
 0x5c3   :  { %6465 = vmatprep.subr.bf16.mxu0 %v16780_v20  ;;  %v16859_v20 = vld [vmem:[%s21978_s2 + $0x1614] ss:$8 sps:$4 sm:$0xff]  }
 0x5c6   :  { %6466 = vmatpush1.bf16.msra.mxu0 %v16778_v21  ;;  %v16857_v21 = vld [vmem:[%s21978_s2 + $0x1610] ss:$8 sps:$4 sm:$0xff]  }
 0x5c7   :  { %6467 = vmatprep.subr.bf16.mxu0 %v16783_v22  ;;  %v16862_v22 = vld [vmem:[%s21978_s2 + $0x1624] ss:$8 sps:$4 sm:$0xff]  }
 0x5ca   :  { %6468 = vmatpush1.bf16.msra.mxu0 %v16781_v23  ;;  %v16860_v23 = vld [vmem:[%s21978_s2 + $0x1620] ss:$8 sps:$4 sm:$0xff]  }
 0x5cb   :  { %6469 = vmatprep.subr.bf16.mxu0 %v16786_v24  ;;  %v16865_v24 = vld [vmem:[%s21978_s2 + $0x1634] ss:$8 sps:$4 sm:$0xff]  }
 0x5ce   :  { %6470 = vmatpush1.bf16.msra.mxu0 %v16784_v25  ;;  %v16863_v25 = vld [vmem:[%s21978_s2 + $0x1630] ss:$8 sps:$4 sm:$0xff]  }
 0x5cf   :  { %6471 = vmatprep.subr.bf16.mxu0 %v16789_v26  ;;  %v16868_v26 = vld [vmem:[%s21978_s2 + $0x1644] ss:$8 sps:$4 sm:$0xff]  }
 0x5d2   :  { %6472 = vmatpush1.bf16.msra.mxu0 %v16787_v27  ;;  %v16866_v27 = vld [vmem:[%s21978_s2 + $0x1640] ss:$8 sps:$4 sm:$0xff]  }
 0x5d3   :  { %6473 = vmatprep.subr.bf16.mxu0 %v16792_v28  ;;  %v16871_v28 = vld [vmem:[%s21978_s2 + $0x1654] ss:$8 sps:$4 sm:$0xff]  }
 0x5d6   :  { %6474 = vmatpush1.bf16.msra.mxu0 %v16790_v29  ;;  %v16869_v29 = vld [vmem:[%s21978_s2 + $0x1650] ss:$8 sps:$4 sm:$0xff]  }
 0x5d7   :  { %6475 = vmatprep.subr.bf16.mxu0 %v16795_v30  ;;  %v16874_v30 = vld [vmem:[%s21978_s2 + $0x1664] ss:$8 sps:$4 sm:$0xff]  }
 0x5da   :  { %6476 = vmatpush1.bf16.msra.mxu0 %v16793_v31  ;;  %v16872_v31 = vld [vmem:[%s21978_s2 + $0x1660] ss:$8 sps:$4 sm:$0xff]  }
 0x5db   :  { %6477 = vmatprep.subr.bf16.mxu0 %v16798_v32  ;;  %v16877_v32 = vld [vmem:[%s21978_s2 + $0x1674] ss:$8 sps:$4 sm:$0xff]  }
 0x5de   :  { %6478 = vmatpush1.bf16.msra.mxu0 %v16796_v33  ;;  %v16875_v33 = vld [vmem:[%s21978_s2 + $0x1670] ss:$8 sps:$4 sm:$0xff]  }
 0x5df   :  { %6479 = vmatprep.subr.bf16.mxu0 %v16801_v35  ;;  %v16878_v35 = vld [vmem:[%s21978_s2 + $0x1680] ss:$8 sps:$4 sm:$0xff]  }
 0x5e2   :  { %6480 = vmatpush1.bf16.msra.mxu0 %v16799_v36  ;;  %v16883_v36 = vld [vmem:[%s21978_s2 + $0x1694] ss:$8 sps:$4 sm:$0xff]  }
 0x5e3   :  { %6481 = vmatprep.subr.bf16.mxu0 %v16804_v38  ;;  %v16886_v38 = vld [vmem:[%s21978_s2 + $0x16a4] ss:$8 sps:$4 sm:$0xff]  }
 0x5e6   :  { %6482 = vmatpush1.bf16.msra.mxu0 %v16802_v39  ;;  %v16884_v39 = vld [vmem:[%s21978_s2 + $0x16a0] ss:$8 sps:$4 sm:$0xff]  }
 0x5e7   :  { %6492 = vmatprep.subr.bf16.mxu0 %v16807_v41  ;;  %v16887_v41 = vld [vmem:[%s21978_s2 + $0x16b0] ss:$8 sps:$4 sm:$0xff]  }
 0x5e9   :  { %6484 = vmatmul.mubr.bf16.vlgmr.msra.gmra.mrb[0].mxu0 %v1448_v42  ;;  %v16892_v42 = vld [vmem:[%s21978_s2 + $0x16c4] ss:$8 sps:$4 sm:$0xff]  }
 0x5ea   :  { %6493 = vmatpush1.bf16.msra.mxu0 %v16805_v43  ;;  %6524 = vmatprep.mubr.bf16.mxu0 %v1451_v44  ;;  %v16890_v43 = vld [vmem:[%s21978_s2 + $0x16c0] ss:$8 sps:$4 sm:$0xff]   ;;  %v16895_v44 = vld [vmem:[%s21978_s2 + $0x16d4] ss:$8 sps:$4 sm:$0xff]  }
 0x5eb   :  { %6494 = vmatprep.subr.bf16.mxu0 %v16810_v45  ;;  %v16893_v45 = vld [vmem:[%s21978_s2 + $0x16d0] ss:$8 sps:$4 sm:$0xff]  }
 0x5ee   :  { %6495 = vmatpush1.bf16.msra.mxu0 %v16808_v46  ;;  %v1322_v46 = vcombine.high %v21230_v8, %v21230_v8  ;;  %v16926_v8 = vld [vmem:[%s21978_s2 + $0x1780] ss:$8 sps:$4 sm:$0xff]  }
 0x5ef   :  { %6496 = vmatprep.subr.bf16.mxu0 %v16813_v47  ;;  %v16898_v47 = vld [vmem:[%s21978_s2 + $0x16e4] ss:$8 sps:$4 sm:$0xff]  }
 0x5f2   :  { %6497 = vmatpush1.bf16.msra.mxu0 %v16811_v48  ;;  %v16896_v48 = vld [vmem:[%s21978_s2 + $0x16e0] ss:$8 sps:$4 sm:$0xff]  }
 0x5f3   :  { %6498 = vmatprep.subr.bf16.mxu0 %v16816_v49  ;;  %v21342_v49 = vrot.slane %v1322_v46, %v18926_v16  ;;  %v17059_v46 = vld [vmem:[#allocation5 + $0x30] ss:$8 sps:$4 sm:$0xff]  }
 0x5f6   :  { %6499 = vmatpush1.bf16.msra.mxu0 %v16814_v50  ;;  %v16901_v50 = vld [vmem:[%s21978_s2 + $0x16f4] ss:$8 sps:$4 sm:$0xff]  }
 0x5f7   :  { %6500 = vmatprep.subr.bf16.mxu0 %v16819_v51  ;;  %v16899_v51 = vld [vmem:[%s21978_s2 + $0x16f0] ss:$8 sps:$4 sm:$0xff]  }
 0x5fa   :  { %6501 = vmatpush1.bf16.msra.mxu0 %v16817_v52  ;;  %v1338_v52 = vcombine.high %v21342_v49, %v21342_v49 }
 0x5fb   :  { %6502 = vmatprep.subr.bf16.mxu0 %v16822_v53  ;;  %v16904_v53 = vld [vmem:[%s21978_s2 + $0x1704] ss:$8 sps:$4 sm:$0xff]  }
 0x5fe   :  { %6503 = vmatpush1.bf16.msra.mxu0 %v16820_v54  ;;  %v1452_v54 = vpack.c.bf16 %v21237_v10, %v21237_v10  ;;  %v16929_v10 = vld [vmem:[%s21978_s2 + $0x1790] ss:$8 sps:$4 sm:$0xff]  }
 0x5ff   :  { %6504 = vmatprep.subr.bf16.mxu0 %v16825_v55  ;;  %v16902_v55 = vld [vmem:[%s21978_s2 + $0x1700] ss:$8 sps:$4 sm:$0xff]  }
 0x602   :  { %6505 = vmatpush1.bf16.msra.mxu0 %v16823_v56  ;;  %v1455_v56 = vpack.c.bf16 %v1338_v52, %v1338_v52  ;;  %v16966_v52 = vld [vmem:[%s21978_s2 + $0x1850] ss:$8 sps:$4 sm:$0xff]  }
 0x603   :  { %6506 = vmatprep.subr.bf16.mxu0 %v16828_v57  ;;  %v16907_v57 = vld [vmem:[%s21978_s2 + $0x1714] ss:$8 sps:$4 sm:$0xff]  }
 0x606   :  { %6507 = vmatpush1.bf16.msra.mxu0 %v16826_v58  ;;  %v16905_v58 = vld [vmem:[%s21978_s2 + $0x1710] ss:$8 sps:$4 sm:$0xff]  }
 0x607   :  { %6508 = vmatprep.subr.bf16.mxu0 %v16831_v59  ;;  %v16910_v59 = vld [vmem:[%s21978_s2 + $0x1724] ss:$8 sps:$4 sm:$0xff]  }
 0x60a   :  { %6509 = vmatpush1.bf16.msra.mxu0 %v16829_v60  ;;  %v16908_v60 = vld [vmem:[%s21978_s2 + $0x1720] ss:$8 sps:$4 sm:$0xff]  }
 0x60b   :  { %6510 = vmatprep.subr.bf16.mxu0 %v16834_v61  ;;  %v16913_v61 = vld [vmem:[%s21978_s2 + $0x1734] ss:$8 sps:$4 sm:$0xff]  }
 0x60e   :  { %6511 = vmatpush1.bf16.msra.mxu0 %v16832_v62  ;;  %v16911_v62 = vld [vmem:[%s21978_s2 + $0x1730] ss:$8 sps:$4 sm:$0xff]  }
 0x60f   :  { %6512 = vmatprep.subr.bf16.mxu0 %v16837_v63  ;;  %v16916_v63 = vld [vmem:[%s21978_s2 + $0x1744] ss:$8 sps:$4 sm:$0xff]  }
 0x612   :  { %6513 = vmatpush1.bf16.msra.mxu0 %v16835_v0  ;;  %v16914_v0 = vld [vmem:[%s21978_s2 + $0x1740] ss:$8 sps:$4 sm:$0xff]  }
 0x613   :  { %6514 = vmatprep.subr.bf16.mxu0 %v16840_v1  ;;  %v16919_v1 = vld [vmem:[%s21978_s2 + $0x1754] ss:$8 sps:$4 sm:$0xff]  }
 0x616   :  { %6515 = vmatpush1.bf16.msra.mxu0 %v16838_v2  ;;  %v16917_v2 = vld [vmem:[%s21978_s2 + $0x1750] ss:$8 sps:$4 sm:$0xff]  }
 0x617   :  { %6516 = vmatprep.subr.bf16.mxu0 %v16843_v3  ;;  %v16922_v3 = vld [vmem:[%s21978_s2 + $0x1764] ss:$8 sps:$4 sm:$0xff]  }
 0x61a   :  { %6517 = vmatpush1.bf16.msra.mxu0 %v16841_v4  ;;  %v16920_v4 = vld [vmem:[%s21978_s2 + $0x1760] ss:$8 sps:$4 sm:$0xff]  }
 0x61b   :  { %6518 = vmatprep.subr.bf16.mxu0 %v16846_v5  ;;  %v16925_v5 = vld [vmem:[%s21978_s2 + $0x1774] ss:$8 sps:$4 sm:$0xff]  }
 0x61e   :  { %6519 = vmatpush1.bf16.msra.mxu0 %v16844_v6  ;;  %v16923_v6 = vld [vmem:[%s21978_s2 + $0x1770] ss:$8 sps:$4 sm:$0xff]  }
 0x61f   :  { %6520 = vmatprep.subr.bf16.mxu0 %v16849_v7  ;;  %v16928_v7 = vld [vmem:[%s21978_s2 + $0x1784] ss:$8 sps:$4 sm:$0xff]  }
 0x622   :  { %6521 = vmatpush1.bf16.msra.mxu0 %v16847_v9  ;;  %v16931_v9 = vld [vmem:[%s21978_s2 + $0x1794] ss:$8 sps:$4 sm:$0xff]  }
 0x623   :  { %6522 = vmatprep.subr.bf16.mxu0 %v16852_v11  ;;  %v16934_v11 = vld [vmem:[%s21978_s2 + $0x17a4] ss:$8 sps:$4 sm:$0xff]  }
 0x626   :  { %6523 = vmatpush1.bf16.msra.mxu0 %v16850_v12  ;;  %v16932_v12 = vld [vmem:[%s21978_s2 + $0x17a0] ss:$8 sps:$4 sm:$0xff]  }
 0x627   :  { %6533 = vmatprep.subr.bf16.mxu0 %v16856_v15  ;;  %v16935_v15 = vld [vmem:[%s21978_s2 + $0x17b0] ss:$8 sps:$4 sm:$0xff]  }
 0x629   :  { %6525 = vmatmul.mubr.bf16.vlgmr.msra.gmra.mrb[0].mxu0 %v1450_v17  ;;  %v16940_v17 = vld [vmem:[%s21978_s2 + $0x17c4] ss:$8 sps:$4 sm:$0xff]  }
 0x62a   :  { %6534 = vmatpush1.bf16.msra.mxu0 %v16854_v18  ;;  %6565 = vmatprep.mubr.bf16.mxu0 %v1453_v19  ;;  %v16938_v18 = vld [vmem:[%s21978_s2 + $0x17c0] ss:$8 sps:$4 sm:$0xff]   ;;  %v16943_v19 = vld [vmem:[%s21978_s2 + $0x17d4] ss:$8 sps:$4 sm:$0xff]  }
 0x62b   :  { %6535 = vmatprep.subr.bf16.mxu0 %v16859_v20  ;;  %v16941_v20 = vld [vmem:[%s21978_s2 + $0x17d0] ss:$8 sps:$4 sm:$0xff]  }
 0x62e   :  { %6536 = vmatpush1.bf16.msra.mxu0 %v16857_v21  ;;  %v16946_v21 = vld [vmem:[%s21978_s2 + $0x17e4] ss:$8 sps:$4 sm:$0xff]  }
 0x62f   :  { %6537 = vmatprep.subr.bf16.mxu0 %v16862_v22  ;;  %v21444_v22 = vld [vmem:[%s22000_s24 + $0x60] sm:$0xff]  ;;  %s13773_s24 = sshll.u32 %s18677_s18, 4  ;;  %s13774_s24 = int_to_ptr.vmem [resolvable:$true] %s13773_s24 }
 0x630   :  { %s18557_s4 = scalar_lea.vmem %s13774_s24, 32  ;;  %p18562_p3 = scmp.lt.s32.totalorder %s13774_s24, %s13774_s24 }
 0x631   :  { %p18558_p2 = scmp.ne.s32.totalorder %s13774_s24, %s18557_s4  ;;  %p18563_p4 = scmp.lt.s32.totalorder %s18557_s4, %s18557_s4 }
 0x632   :  { %6538 = vmatpush1.bf16.msra.mxu0 %v16860_v23  ;;  %v16944_v23 = vld [vmem:[%s21978_s2 + $0x17e0] ss:$8 sps:$4 sm:$0xff]  }
 0x633   :  { %6539 = vmatprep.subr.bf16.mxu0 %v16865_v24  ;;  %v21451_v24 = vrot.slane %v21444_v22, %v18926_v16  ;;  %p18564_p5 = por %p18563_p4, %p18562_p3 }
 0x635   :  { %p18565_p6 = pnand %p18564_p5, %p18558_p2 }
 0x636   :  { %6540 = vmatpush1.bf16.msra.mxu0 %v16863_v25  ;;  %v16949_v25 = vld [vmem:[%s21978_s2 + $0x17f4] ss:$8 sps:$4 sm:$0xff]  }
 0x637   :  { %6541 = vmatprep.subr.bf16.mxu0 %v16868_v26  ;;  %v16947_v26 = vld [vmem:[%s21978_s2 + $0x17f0] ss:$8 sps:$4 sm:$0xff]  }
 0x63a   :  { %6542 = vmatpush1.bf16.msra.mxu0 %v16866_v27  ;;  %v1354_v27 = vcombine.high %v21451_v24, %v21451_v24 }
 0x63b   :  { %6543 = vmatprep.subr.bf16.mxu0 %v16871_v28  ;;  %v16953_v28 = vld [vmem:[%s21978_s2 + $0x1804] ss:$8 sps:$4 sm:$0xff]  }
 0x63e   :  { %6544 = vmatpush1.bf16.msra.mxu0 %v16869_v29  ;;  %v1454_v29 = vpack.c.bf16 %v21342_v49, %v21342_v49  ;;  %v16968_v49 = vld [vmem:[%s21978_s2 + $0x1854] ss:$8 sps:$4 sm:$0xff]  }
 0x63f   :  { %6545 = vmatprep.subr.bf16.mxu0 %v16874_v30  ;;  %v16951_v30 = vld [vmem:[%s21978_s2 + $0x1800] ss:$8 sps:$4 sm:$0xff]  }
 0x642   :  { %6546 = vmatpush1.bf16.msra.mxu0 %v16872_v31  ;;  %v1457_v31 = vpack.c.bf16 %v1354_v27, %v1354_v27  ;;  %v17089_v27 = vld [vmem:[#allocation5 + $0xd0] ss:$8 sps:$4 sm:$0xff]  }
 0x643   :  { %6547 = vmatprep.subr.bf16.mxu0 %v16877_v32  ;;  %v16956_v32 = vld [vmem:[%s21978_s2 + $0x1814] ss:$8 sps:$4 sm:$0xff]  }
 0x646   :  { %6548 = vmatpush1.bf16.msra.mxu0 %v16875_v33  ;;  %v17048_v33 = vld [vmem:[#allocation5 + $0x4] ss:$8 sps:$4 sm:$0xff]  }
 0x647   :  { %6549 = vmatprep.subr.bf16.mxu0 %v16880_v34  ;;  %v17050_v34 = vld [vmem:[#allocation5] ss:$8 sps:$4 sm:$0xff]   ;;  %6870 = vmatprep.subr.bf16.mxu1 %v17048_v33  ;;  %v1456_v33 = vpack.c.bf16 %v21451_v24, %v21451_v24  ;;  %v17007_v24 = vld [vmem:[%s21978_s2 + $0x1924] ss:$8 sps:$4 sm:$0xff]  }
 0x648   :  { %6871 = vmatpush1.bf16.msra.mxu1 %v17050_v34  ;;  %v16999_v34 = vld [vmem:[%s21978_s2 + $0x1900] ss:$8 sps:$4 sm:$0xff]  }
 0x64a   :  { %6550 = vmatpush1.bf16.msra.mxu0 %v16878_v35  ;;  %v17051_v35 = vld [vmem:[#allocation5 + $0x14] ss:$8 sps:$4 sm:$0xff]  }
 0x64b   :  { %6551 = vmatprep.subr.bf16.mxu0 %v16883_v36  ;;  %v16954_v36 = vld [vmem:[%s21978_s2 + $0x1810] ss:$8 sps:$4 sm:$0xff]   ;;  %6872 = vmatprep.subr.bf16.mxu1 %v17051_v35 }
 0x64e   :  { %6552 = vmatpush1.bf16.msra.mxu0 %v16881_v37  ;;  %v16959_v37 = vld [vmem:[%s21978_s2 + $0x1824] ss:$8 sps:$4 sm:$0xff]  }
 0x64f   :  { %6553 = vmatprep.subr.bf16.mxu0 %v16886_v38  ;;  %v17053_v38 = vld [vmem:[#allocation5 + $0x10] ss:$8 sps:$4 sm:$0xff]  }
 0x650   :  { %6873 = vmatpush1.bf16.msra.mxu1 %v17053_v38  ;;  %v17005_v38 = vld [vmem:[%s21978_s2 + $0x1920] ss:$8 sps:$4 sm:$0xff]  }
 0x652   :  { %6554 = vmatpush1.bf16.msra.mxu0 %v16884_v39  ;;  %v17054_v39 = vld [vmem:[#allocation5 + $0x24] ss:$8 sps:$4 sm:$0xff]  }
 0x653   :  { %6555 = vmatprep.subr.bf16.mxu0 %v16889_v40  ;;  %v16957_v40 = vld [vmem:[%s21978_s2 + $0x1820] ss:$8 sps:$4 sm:$0xff]   ;;  %6874 = vmatprep.subr.bf16.mxu1 %v17054_v39  ;;  %v17010_v39 = vld [vmem:[%s21978_s2 + $0x1934] ss:$8 sps:$4 sm:$0xff]  }
 0x656   :  { %6556 = vmatpush1.bf16.msra.mxu0 %v16887_v41  ;;  %v16962_v41 = vld [vmem:[%s21978_s2 + $0x1834] ss:$8 sps:$4 sm:$0xff]  }
 0x657   :  { %6557 = vmatprep.subr.bf16.mxu0 %v16892_v42  ;;  %v17056_v42 = vld [vmem:[#allocation5 + $0x20] ss:$8 sps:$4 sm:$0xff]  }
 0x658   :  { %6875 = vmatpush1.bf16.msra.mxu1 %v17056_v42  ;;  %v17011_v42 = vld [vmem:[%s21978_s2 + $0x1940] ss:$8 sps:$4 sm:$0xff]  }
 0x65a   :  { %6558 = vmatpush1.bf16.msra.mxu0 %v16890_v43  ;;  %v17057_v43 = vld [vmem:[#allocation5 + $0x34] ss:$8 sps:$4 sm:$0xff]  }
 0x65b   :  { %6559 = vmatprep.subr.bf16.mxu0 %v16895_v44  ;;  %v16960_v44 = vld [vmem:[%s21978_s2 + $0x1830] ss:$8 sps:$4 sm:$0xff]   ;;  %6876 = vmatprep.subr.bf16.mxu1 %v17057_v43  ;;  %v17016_v43 = vld [vmem:[%s21978_s2 + $0x1954] ss:$8 sps:$4 sm:$0xff]  }
 0x65c   :  { %6877 = vmatpush1.bf16.msra.mxu1 %v17059_v46  ;;  %v17017_v46 = vld [vmem:[%s21978_s2 + $0x1960] ss:$8 sps:$4 sm:$0xff]  }
 0x65e   :  { %6560 = vmatpush1.bf16.msra.mxu0 %v16893_v45  ;;  %v16965_v45 = vld [vmem:[%s21978_s2 + $0x1844] ss:$8 sps:$4 sm:$0xff]  }
 0x65f   :  { %6561 = vmatprep.subr.bf16.mxu0 %v16898_v47  ;;  %v17060_v47 = vld [vmem:[#allocation5 + $0x44] ss:$8 sps:$4 sm:$0xff]  }
 0x660   :  { %6878 = vmatprep.subr.bf16.mxu1 %v17060_v47  ;;  %v17022_v47 = vld [vmem:[%s21978_s2 + $0x1974] ss:$8 sps:$4 sm:$0xff]  }
 0x662   :  { %6562 = vmatpush1.bf16.msra.mxu0 %v16896_v48  ;;  %v16963_v48 = vld [vmem:[%s21978_s2 + $0x1840] ss:$8 sps:$4 sm:$0xff]  }
 0x663   :  { %6563 = vmatprep.subr.bf16.mxu0 %v16901_v50  ;;  %v17062_v50 = vld [vmem:[#allocation5 + $0x40] ss:$8 sps:$4 sm:$0xff]  }
 0x664   :  { %6879 = vmatpush1.bf16.msra.mxu1 %v17062_v50  ;;  %v17023_v50 = vld [vmem:[%s21978_s2 + $0x1980] ss:$8 sps:$4 sm:$0xff]  }
 0x666   :  { %6564 = vmatpush1.bf16.msra.mxu0 %v16899_v51  ;;  %v17063_v51 = vld [vmem:[#allocation5 + $0x54] ss:$8 sps:$4 sm:$0xff]  }
 0x667   :  { %6574 = vmatprep.subr.bf16.mxu0 %v16904_v53  ;;  %v16971_v53 = vld [vmem:[%s21978_s2 + $0x1864] ss:$8 sps:$4 sm:$0xff]   ;;  %6880 = vmatprep.subr.bf16.mxu1 %v17063_v51  ;;  %v17028_v51 = vld [vmem:[%s21978_s2 + $0x1994] ss:$8 sps:$4 sm:$0xff]  }
 0x669   :  { %6566 = vmatmul.mubr.bf16.vlgmr.msra.gmra.mrb[0].mxu0 %v1452_v54  ;;  %v17065_v54 = vld [vmem:[#allocation5 + $0x50] ss:$8 sps:$4 sm:$0xff]  }
 0x66a   :  { %6575 = vmatpush1.bf16.msra.mxu0 %v16902_v55  ;;  %6606 = vmatprep.mubr.bf16.mxu0 %v1455_v56  ;;  %v17066_v55 = vld [vmem:[#allocation5 + $0x64] ss:$8 sps:$4 sm:$0xff]  }
 0x66b   :  { %6576 = vmatprep.subr.bf16.mxu0 %v16907_v57  ;;  %v16969_v56 = vld [vmem:[%s21978_s2 + $0x1860] ss:$8 sps:$4 sm:$0xff]   ;;  %v16974_v57 = vld [vmem:[%s21978_s2 + $0x1874] ss:$8 sps:$4 sm:$0xff]   ;;  %6881 = vmatpush1.bf16.msra.mxu1 %v17065_v54 }
 0x66c   :  { %6882 = vmatprep.subr.bf16.mxu1 %v17066_v55  ;;  %v17029_v54 = vld [vmem:[%s21978_s2 + $0x19a0] ss:$8 sps:$4 sm:$0xff]   ;;  %v17034_v55 = vld [vmem:[%s21978_s2 + $0x19b4] ss:$8 sps:$4 sm:$0xff]  }
 0x66e   :  { %6577 = vmatpush1.bf16.msra.mxu0 %v16905_v58  ;;  %v17068_v58 = vld [vmem:[#allocation5 + $0x60] ss:$8 sps:$4 sm:$0xff]  }
 0x66f   :  { %6578 = vmatprep.subr.bf16.mxu0 %v16910_v59  ;;  %v17069_v59 = vld [vmem:[#allocation5 + $0x74] ss:$8 sps:$4 sm:$0xff]   ;;  %6883 = vmatpush1.bf16.msra.mxu1 %v17068_v58 }
 0x670   :  { %6884 = vmatprep.subr.bf16.mxu1 %v17069_v59  ;;  %v17035_v58 = vld [vmem:[%s21978_s2 + $0x19c0] ss:$8 sps:$4 sm:$0xff]   ;;  %v17040_v59 = vld [vmem:[%s21978_s2 + $0x19d4] ss:$8 sps:$4 sm:$0xff]  }
 0x672   :  { %6579 = vmatpush1.bf16.msra.mxu0 %v16908_v60  ;;  %v16972_v60 = vld [vmem:[%s21978_s2 + $0x1870] ss:$8 sps:$4 sm:$0xff]  }
 0x673   :  { %6580 = vmatprep.subr.bf16.mxu0 %v16913_v61  ;;  %v16977_v61 = vld [vmem:[%s21978_s2 + $0x1884] ss:$8 sps:$4 sm:$0xff]  }
 0x676   :  { %6581 = vmatpush1.bf16.msra.mxu0 %v16911_v62  ;;  %v17071_v62 = vld [vmem:[#allocation5 + $0x70] ss:$8 sps:$4 sm:$0xff]  }
 0x677   :  { %6582 = vmatprep.subr.bf16.mxu0 %v16916_v63  ;;  %v17072_v63 = vld [vmem:[#allocation5 + $0x84] ss:$8 sps:$4 sm:$0xff]   ;;  %6885 = vmatpush1.bf16.msra.mxu1 %v17071_v62 }
 0x678   :  { %6886 = vmatprep.subr.bf16.mxu1 %v17072_v63  ;;  %v17041_v62 = vld [vmem:[%s21978_s2 + $0x19e0] ss:$8 sps:$4 sm:$0xff]   ;;  %v17046_v63 = vld [vmem:[%s21978_s2 + $0x19f4] ss:$8 sps:$4 sm:$0xff]  }
 0x67a   :  { %6583 = vmatpush1.bf16.msra.mxu0 %v16914_v0  ;;  %v16975_v0 = vld [vmem:[%s21978_s2 + $0x1880] ss:$8 sps:$4 sm:$0xff]  }
 0x67b   :  { %6584 = vmatprep.subr.bf16.mxu0 %v16919_v1  ;;  %v16980_v1 = vld [vmem:[%s21978_s2 + $0x1894] ss:$8 sps:$4 sm:$0xff]  }
 0x67e   :  { %6585 = vmatpush1.bf16.msra.mxu0 %v16917_v2  ;;  %v17074_v2 = vld [vmem:[#allocation5 + $0x80] ss:$8 sps:$4 sm:$0xff]  }
 0x67f   :  { %6586 = vmatprep.subr.bf16.mxu0 %v16922_v3  ;;  %v17075_v3 = vld [vmem:[#allocation5 + $0x94] ss:$8 sps:$4 sm:$0xff]   ;;  %6887 = vmatpush1.bf16.msra.mxu1 %v17074_v2  ;;  %v17092_v2 = vld [vmem:[#allocation5 + $0xe0] ss:$8 sps:$4 sm:$0xff]  }
 0x680   :  { %6888 = vmatprep.subr.bf16.mxu1 %v17075_v3  ;;  %v17093_v3 = vld [vmem:[#allocation5 + $0xf4] ss:$8 sps:$4 sm:$0xff]  }
 0x682   :  { %6587 = vmatpush1.bf16.msra.mxu0 %v16920_v4  ;;  %v16978_v4 = vld [vmem:[%s21978_s2 + $0x1890] ss:$8 sps:$4 sm:$0xff]  }
 0x683   :  { %6588 = vmatprep.subr.bf16.mxu0 %v16925_v5  ;;  %v16983_v5 = vld [vmem:[%s21978_s2 + $0x18a4] ss:$8 sps:$4 sm:$0xff]  }
 0x686   :  { %6589 = vmatpush1.bf16.msra.mxu0 %v16923_v6  ;;  %v17077_v6 = vld [vmem:[#allocation5 + $0x90] ss:$8 sps:$4 sm:$0xff]  }
 0x687   :  { %6590 = vmatprep.subr.bf16.mxu0 %v16928_v7  ;;  %v17078_v7 = vld [vmem:[#allocation5 + $0xa4] ss:$8 sps:$4 sm:$0xff]   ;;  %6889 = vmatpush1.bf16.msra.mxu1 %v17077_v6 }
 0x688   :  { %6890 = vmatprep.subr.bf16.mxu1 %v17078_v7  ;;  %v1064_v6 = vld [vmem:[#allocation8 + $0x88] sm:$0xff] }
 0x68a   :  { %6591 = vmatpush1.bf16.msra.mxu0 %v16926_v8  ;;  %v16981_v8 = vld [vmem:[%s21978_s2 + $0x18a0] ss:$8 sps:$4 sm:$0xff]  }
 0x68b   :  { %6592 = vmatprep.subr.bf16.mxu0 %v16931_v9  ;;  %v16986_v9 = vld [vmem:[%s21978_s2 + $0x18b4] ss:$8 sps:$4 sm:$0xff]  }
 0x68e   :  { %6593 = vmatpush1.bf16.msra.mxu0 %v16929_v10  ;;  %v17080_v10 = vld [vmem:[#allocation5 + $0xa0] ss:$8 sps:$4 sm:$0xff]  }
 0x68f   :  { %6594 = vmatprep.subr.bf16.mxu0 %v16934_v11  ;;  %v17081_v11 = vld [vmem:[#allocation5 + $0xb4] ss:$8 sps:$4 sm:$0xff]   ;;  %6891 = vmatpush1.bf16.msra.mxu1 %v17080_v10  ;;  %v21670_v10 = vsub.s32 1, %v18917_v13 }
 0x690   :  { %6892 = vmatprep.subr.bf16.mxu1 %v17081_v11 }
 0x692   :  { %6595 = vmatpush1.bf16.msra.mxu0 %v16932_v12  ;;  %v16984_v12 = vld [vmem:[%s21978_s2 + $0x18b0] ss:$8 sps:$4 sm:$0xff]  }
 0x693   :  { %6596 = vmatprep.subr.bf16.mxu0 %v16937_v14  ;;  %v16989_v14 = vld [vmem:[%s21978_s2 + $0x18c4] ss:$8 sps:$4 sm:$0xff]  }
 0x696   :  { %6597 = vmatpush1.bf16.msra.mxu0 %v16935_v15  ;;  %v17083_v15 = vld [vmem:[#allocation5 + $0xb0] ss:$8 sps:$4 sm:$0xff]  }
 0x697   :  { %6598 = vmatprep.subr.bf16.mxu0 %v16940_v17  ;;  %v17084_v17 = vld [vmem:[#allocation5 + $0xc4] ss:$8 sps:$4 sm:$0xff]   ;;  %6893 = vmatpush1.bf16.msra.mxu1 %v17083_v15 }
 0x698   :  { %6894 = vmatprep.subr.bf16.mxu1 %v17084_v17 }
 0x69a   :  { %6599 = vmatpush1.bf16.msra.mxu0 %v16938_v18  ;;  %v16987_v18 = vld [vmem:[%s21978_s2 + $0x18c0] ss:$8 sps:$4 sm:$0xff]  }
 0x69b   :  { %6600 = vmatprep.subr.bf16.mxu0 %v16943_v19  ;;  %v16992_v19 = vld [vmem:[%s21978_s2 + $0x18d4] ss:$8 sps:$4 sm:$0xff]  }
 0x69e   :  { %6601 = vmatpush1.bf16.msra.mxu0 %v16941_v20  ;;  %v17086_v20 = vld [vmem:[#allocation5 + $0xc0] ss:$8 sps:$4 sm:$0xff]  }
 0x69f   :  { %6602 = vmatprep.subr.bf16.mxu0 %v16946_v21  ;;  %v17087_v21 = vld [vmem:[#allocation5 + $0xd4] ss:$8 sps:$4 sm:$0xff]   ;;  %6895 = vmatpush1.bf16.msra.mxu1 %v17086_v20 }
 0x6a0   :  { %6896 = vmatprep.subr.bf16.mxu1 %v17087_v21 }
 0x6a2   :  { %6603 = vmatpush1.bf16.msra.mxu0 %v16944_v23  ;;  %v16990_v23 = vld [vmem:[%s21978_s2 + $0x18d0] ss:$8 sps:$4 sm:$0xff]  }
 0x6a3   :  { %6604 = vmatprep.subr.bf16.mxu0 %v16949_v25  ;;  %v1339_v25 = vcombine.high %v21444_v22, %v21444_v22  ;;  %v16998_v22 = vld [vmem:[%s21978_s2 + $0x18f4] ss:$8 sps:$4 sm:$0xff]   ;;  %6897 = vmatpush1.bf16.msra.mxu1 %v17089_v27 }
 0x6a6   :  { %6605 = vmatpush1.bf16.msra.mxu0 %v16947_v26  ;;  %v16995_v26 = vld [vmem:[%s21978_s2 + $0x18e4] ss:$8 sps:$4 sm:$0xff]  }
 0x6a7   :  { %6615 = vmatprep.subr.bf16.mxu0 %v16953_v28  ;;  %v17090_v28 = vld [vmem:[#allocation5 + $0xe4] ss:$8 sps:$4 sm:$0xff]  }
 0x6a8   :  { %6898 = vmatprep.subr.bf16.mxu1 %v17090_v28 }
 0x6a9   :  { %6607 = vmatmul.mubr.bf16.vlgmr.msra.gmra.mrb[0].mxu0 %v1454_v29  ;;  %v16993_v29 = vld [vmem:[%s21978_s2 + $0x18e0] ss:$8 sps:$4 sm:$0xff]   ;;  %6899 = vmatpush1.bf16.msra.mxu1 %v17092_v2 }
 0x6aa   :  { %6616 = vmatpush1.bf16.msra.mxu0 %v16951_v30  ;;  %6647 = vmatprep.mubr.bf16.mxu0 %v1457_v31  ;;  %v21556_v30 = vrot.slane %v1339_v25, %v18926_v16  ;;  %v16996_v31 = vld [vmem:[%s21978_s2 + $0x18f0] ss:$8 sps:$4 sm:$0xff]   ;;  %v17001_v16 = vld [vmem:[%s21978_s2 + $0x1904] ss:$8 sps:$4 sm:$0xff]  }
 0x6ab   :  { %6617 = vmatprep.subr.bf16.mxu0 %v16956_v32  ;;  %6900 = vmatprep.subr.bf16.mxu1 %v17093_v3  ;;  %v1066_v25 = vld [vmem:[#allocation8 + $0x98] sm:$0xff]  ;;  %v1096_v3 = vld [vmem:[#allocation11 + $0x80] sm:$0xff] }
 0x6ac   :  { %v1355_v32 = vcombine.high %v21556_v30, %v21556_v30 }
 0x6ae   :  { %6618 = vmatpush1.bf16.msra.mxu0 %v16954_v36  ;;  %v1459_v35 = vpack.c.bf16 %v1355_v32, %v1355_v32  ;;  %v17004_v36 = vld [vmem:[%s21978_s2 + $0x1914] ss:$8 sps:$4 sm:$0xff]  }
 0x6af   :  { %6619 = vmatprep.subr.bf16.mxu0 %v16959_v37  ;;  %v17002_v37 = vld [vmem:[%s21978_s2 + $0x1910] ss:$8 sps:$4 sm:$0xff]  }
 0x6b0   :  { %v1067_v32 = vld [vmem:[#allocation8 + $0xa0] sm:$0xff] }
 0x6b2   :  { %6620 = vmatpush1.bf16.msra.mxu0 %v16957_v40  ;;  %v17008_v40 = vld [vmem:[%s21978_s2 + $0x1930] ss:$8 sps:$4 sm:$0xff]  }
 0x6b3   :  { %6621 = vmatprep.subr.bf16.mxu0 %v16962_v41  ;;  %v17013_v41 = vld [vmem:[%s21978_s2 + $0x1944] ss:$8 sps:$4 sm:$0xff]  }
 0x6b6   :  { %6622 = vmatpush1.bf16.msra.mxu0 %v16960_v44  ;;  %v17014_v44 = vld [vmem:[%s21978_s2 + $0x1950] ss:$8 sps:$4 sm:$0xff]  }
 0x6b7   :  { %6623 = vmatprep.subr.bf16.mxu0 %v16965_v45  ;;  %v17019_v45 = vld [vmem:[%s21978_s2 + $0x1964] ss:$8 sps:$4 sm:$0xff]  }
 0x6ba   :  { %6624 = vmatpush1.bf16.msra.mxu0 %v16963_v48  ;;  %v17020_v48 = vld [vmem:[%s21978_s2 + $0x1970] ss:$8 sps:$4 sm:$0xff]  }
 0x6bb   :  { %6625 = vmatprep.subr.bf16.mxu0 %v16968_v49  ;;  %v17025_v49 = vld [vmem:[%s21978_s2 + $0x1984] ss:$8 sps:$4 sm:$0xff]  }
 0x6be   :  { %6626 = vmatpush1.bf16.msra.mxu0 %v16966_v52  ;;  %v17026_v52 = vld [vmem:[%s21978_s2 + $0x1990] ss:$8 sps:$4 sm:$0xff]  }
 0x6bf   :  { %6627 = vmatprep.subr.bf16.mxu0 %v16971_v53  ;;  %v17031_v53 = vld [vmem:[%s21978_s2 + $0x19a4] ss:$8 sps:$4 sm:$0xff]  }
 0x6c2   :  { %6628 = vmatpush1.bf16.msra.mxu0 %v16969_v56  ;;  %v17032_v56 = vld [vmem:[%s21978_s2 + $0x19b0] ss:$8 sps:$4 sm:$0xff]  }
 0x6c3   :  { %6629 = vmatprep.subr.bf16.mxu0 %v16974_v57  ;;  %v17037_v57 = vld [vmem:[%s21978_s2 + $0x19c4] ss:$8 sps:$4 sm:$0xff]  }
 0x6c6   :  { %6630 = vmatpush1.bf16.msra.mxu0 %v16972_v60  ;;  %v17038_v60 = vld [vmem:[%s21978_s2 + $0x19d0] ss:$8 sps:$4 sm:$0xff]  }
 0x6c7   :  { %6631 = vmatprep.subr.bf16.mxu0 %v16977_v61  ;;  %v17043_v61 = vld [vmem:[%s21978_s2 + $0x19e4] ss:$8 sps:$4 sm:$0xff]  }
 0x6ca   :  { %6632 = vmatpush1.bf16.msra.mxu0 %v16975_v0  ;;  %v17044_v0 = vld [vmem:[%s21978_s2 + $0x19f0] ss:$8 sps:$4 sm:$0xff]  }
 0x6cb   :  { %6633 = vmatprep.subr.bf16.mxu0 %v16980_v1  ;;  %v1458_v1 = vpack.c.bf16 %v21556_v30, %v21556_v30 }
 0x6ce   :  { %6634 = vmatpush1.bf16.msra.mxu0 %v16978_v4  ;;  %v17095_v4 = vld [vmem:[#allocation5 + $0xf0] ss:$8 sps:$4 sm:$0xff]  }
 0x6cf   :  { %6635 = vmatprep.subr.bf16.mxu0 %v16983_v5  ;;  %6901 = vmatpush1.bf16.msra.mxu1 %v17095_v4  ;;  %v1063_v5 = vld [vmem:[#allocation8 + $0x80] sm:$0xff]  ;;  %v1097_v4 = vld [vmem:[#allocation11 + $0x88] sm:$0xff] }
 0x6d0   :  { %v15591_v7 = vpack.c.bf16 %v1064_v6, %v1063_v5  ;;  %v15623_v5 = vpack.c.bf16 %v1097_v4, %v1096_v3  ;;  %v1046_v6 = vld [vmem:[#allocation7] sm:$0x3] }
 0x6d1   :  { %v1111_v3 = vld [vmem:[#allocation11 + $0xf8] sm:$0xff] }
 0x6d2   :  { %6636 = vmatpush1.bf16.msra.mxu0 %v16981_v8  ;;  %15592 = vmatprep.subr.bf16.mxu1 %v15591_v7  ;;  %v21667_v8 = vsub.s32 0, %v18917_v13 }
 0x6d3   :  { %6637 = vmatprep.subr.bf16.mxu0 %v16986_v9  ;;  %v1013_v9 = vld [vmem:[#allocation2] sm:$0x3] }
 0x6d4   :  { %v1464_v11 = vrot.slane %v1013_v9, %v21667_v8  ;;  %v6703_v7 = vrot.slane %v1046_v6, %v21667_v8 }
 0x6d6   :  { %6638 = vmatpush1.bf16.msra.mxu0 %v16984_v12  ;;  %v1468_v12 = vrot.slane %v1013_v9, %v21670_v10  ;;  %v6707_v9 = vrot.slane %v1046_v6, %v21670_v10  ;;  %v1094_v6 = vld [vmem:[#allocation11 + $0x70] sm:$0xff] }
 0x6d7   :  { %6639 = vmatprep.subr.bf16.mxu0 %v16989_v14 }
 0x6da   :  { %6640 = vmatpush1.bf16.msra.mxu0 %v16987_v18  ;;  %v1047_v18 = vld [vmem:[#allocation8] sm:$0xff] }
 0x6db   :  { %6641 = vmatprep.subr.bf16.mxu0 %v16992_v19  ;;  %v1048_v19 = vld [vmem:[#allocation8 + $0x8] sm:$0xff] }
 0x6dc   :  { %v15593_v28 = vpack.c.bf16 %v1048_v19, %v1047_v18 }
 0x6de   :  { %6642 = vmatpush1.bf16.msra.mxu0 %v16990_v23  ;;  %v1065_v23 = vld [vmem:[#allocation8 + $0x90] sm:$0xff] }
 0x6df   :  { %6643 = vmatprep.subr.bf16.mxu0 %v16995_v26  ;;  %v15595_v30 = vpack.c.bf16 %v1066_v25, %v1065_v23 }
 0x6e2   :  { %6644 = vmatpush1.bf16.msra.mxu0 %v16993_v29 }
 0x6e3   :  { %6645 = vmatprep.subr.bf16.mxu0 %v16998_v22  ;;  %v1049_v22 = vld [vmem:[#allocation8 + $0x10] sm:$0xff] }
 0x6e6   :  { %6646 = vmatpush1.bf16.msra.mxu0 %v16996_v31  ;;  %v1050_v31 = vld [vmem:[#allocation8 + $0x18] sm:$0xff] }
 0x6e7   :  { %6656 = vmatprep.subr.bf16.mxu0 %v17001_v16  ;;  %v1068_v16 = vld [vmem:[#allocation8 + $0xa8] sm:$0xff] }
 0x6e9   :  { %6648 = vmatmul.mubr.bf16.vlgmr.msra.gmra.mrb[0].mxu0 %v1456_v33  ;;  %v15597_v33 = vpack.c.bf16 %v1050_v31, %v1049_v22  ;;  %v1099_v22 = vld [vmem:[#allocation11 + $0x98] sm:$0xff] }
 0x6ea   :  { %6657 = vmatpush1.bf16.msra.mxu0 %v16999_v34  ;;  %6688 = vmatprep.mubr.bf16.mxu0 %v1459_v35  ;;  %v15599_v34 = vpack.c.bf16 %v1068_v16, %v1067_v32  ;;  %v1051_v35 = vld [vmem:[#allocation8 + $0x20] sm:$0xff] }
 0x6eb   :  { %6658 = vmatprep.subr.bf16.mxu0 %v17004_v36  ;;  %v1052_v36 = vld [vmem:[#allocation8 + $0x28] sm:$0xff] }
 0x6ee   :  { %6659 = vmatpush1.bf16.msra.mxu0 %v17002_v37  ;;  %v15601_v37 = vpack.c.bf16 %v1052_v36, %v1051_v35  ;;  %v1082_v35 = vld [vmem:[#allocation11 + $0x10] sm:$0xff]  ;;  %v1083_v36 = vld [vmem:[#allocation11 + $0x18] sm:$0xff] }
 0x6ef   :  { %6660 = vmatprep.subr.bf16.mxu0 %v17007_v24  ;;  %v1069_v24 = vld [vmem:[#allocation8 + $0xb0] sm:$0xff] }
 0x6f2   :  { %6661 = vmatpush1.bf16.msra.mxu0 %v17005_v38  ;;  %v1070_v38 = vld [vmem:[#allocation8 + $0xb8] sm:$0xff] }
 0x6f3   :  { %6662 = vmatprep.subr.bf16.mxu0 %v17010_v39  ;;  %v15603_v39 = vpack.c.bf16 %v1070_v38, %v1069_v24  ;;  %v1101_v24 = vld [vmem:[#allocation11 + $0xa8] sm:$0xff]  ;;  %v15629_v38 = vpack.c.bf16 %v1083_v36, %v1082_v35  ;;  %v17123_v36 = vld [vmem:[#allocation16 + $0x740] ss:$208 sps:$4 sm:$0xff]  }
 0x6f4   :  { %v17125_v35 = vld [vmem:[#allocation16 + $0x744] ss:$208 sps:$4 sm:$0xff]  }
 0x6f6   :  { %6663 = vmatpush1.bf16.msra.mxu0 %v17008_v40  ;;  %v1053_v40 = vld [vmem:[#allocation8 + $0x30] sm:$0xff] }
 0x6f7   :  { %6664 = vmatprep.subr.bf16.mxu0 %v17013_v41  ;;  %v1054_v41 = vld [vmem:[#allocation8 + $0x38] sm:$0xff] }
 0x6fa   :  { %6665 = vmatpush1.bf16.msra.mxu0 %v17011_v42  ;;  %v15605_v42 = vpack.c.bf16 %v1054_v41, %v1053_v40  ;;  %v1084_v40 = vld [vmem:[#allocation11 + $0x20] sm:$0xff]  ;;  %v1085_v41 = vld [vmem:[#allocation11 + $0x28] sm:$0xff] }
 0x6fb   :  { %6666 = vmatprep.subr.bf16.mxu0 %v17016_v43  ;;  %v1071_v43 = vld [vmem:[#allocation8 + $0xc0] sm:$0xff] }
 0x6fe   :  { %6667 = vmatpush1.bf16.msra.mxu0 %v17014_v44  ;;  %v1072_v44 = vld [vmem:[#allocation8 + $0xc8] sm:$0xff] }
 0x6ff   :  { %6668 = vmatprep.subr.bf16.mxu0 %v17019_v45  ;;  %v15607_v45 = vpack.c.bf16 %v1072_v44, %v1071_v43  ;;  %v1103_v43 = vld [vmem:[#allocation11 + $0xb8] sm:$0xff]  ;;  %v15633_v44 = vpack.c.bf16 %v1085_v41, %v1084_v40  ;;  %v17141_v41 = vld [vmem:[#allocation16 + $0xc20] ss:$208 sps:$4 sm:$0xff]  }
 0x700   :  { %v17143_v40 = vld [vmem:[#allocation16 + $0xc24] ss:$208 sps:$4 sm:$0xff]  }
 0x702   :  { %6669 = vmatpush1.bf16.msra.mxu0 %v17017_v46  ;;  %v1055_v46 = vld [vmem:[#allocation8 + $0x40] sm:$0xff] }
 0x703   :  { %6670 = vmatprep.subr.bf16.mxu0 %v17022_v47  ;;  %v1056_v47 = vld [vmem:[#allocation8 + $0x48] sm:$0xff] }
 0x706   :  { %6671 = vmatpush1.bf16.msra.mxu0 %v17020_v48  ;;  %v15609_v48 = vpack.c.bf16 %v1056_v47, %v1055_v46  ;;  %v1086_v46 = vld [vmem:[#allocation11 + $0x30] sm:$0xff]  ;;  %v1087_v47 = vld [vmem:[#allocation11 + $0x38] sm:$0xff] }
 0x707   :  { %6672 = vmatprep.subr.bf16.mxu0 %v17025_v49  ;;  %v1073_v49 = vld [vmem:[#allocation8 + $0xd0] sm:$0xff] }
 0x70a   :  { %6673 = vmatpush1.bf16.msra.mxu0 %v17023_v50  ;;  %v1074_v50 = vld [vmem:[#allocation8 + $0xd8] sm:$0xff] }
 0x70b   :  { %6674 = vmatprep.subr.bf16.mxu0 %v17028_v51  ;;  %v15611_v51 = vpack.c.bf16 %v1074_v50, %v1073_v49  ;;  %v1105_v49 = vld [vmem:[#allocation11 + $0xc8] sm:$0xff]  ;;  %v15637_v50 = vpack.c.bf16 %v1087_v47, %v1086_v46 }
 0x70e   :  { %6675 = vmatpush1.bf16.msra.mxu0 %v17026_v52  ;;  %v1057_v52 = vld [vmem:[#allocation8 + $0x50] sm:$0xff] }
 0x70f   :  { %6676 = vmatprep.subr.bf16.mxu0 %v17031_v53  ;;  %v1058_v53 = vld [vmem:[#allocation8 + $0x58] sm:$0xff] }
 0x712   :  { %6677 = vmatpush1.bf16.msra.mxu0 %v17029_v54  ;;  %v15613_v54 = vpack.c.bf16 %v1058_v53, %v1057_v52  ;;  %v1088_v52 = vld [vmem:[#allocation11 + $0x40] sm:$0xff]  ;;  %v1089_v53 = vld [vmem:[#allocation11 + $0x48] sm:$0xff] }
 0x713   :  { %6678 = vmatprep.subr.bf16.mxu0 %v17034_v55  ;;  %v1075_v55 = vld [vmem:[#allocation8 + $0xe0] sm:$0xff] }
 0x716   :  { %6679 = vmatpush1.bf16.msra.mxu0 %v17032_v56  ;;  %v1076_v56 = vld [vmem:[#allocation8 + $0xe8] sm:$0xff] }
 0x717   :  { %6680 = vmatprep.subr.bf16.mxu0 %v17037_v57  ;;  %v15615_v57 = vpack.c.bf16 %v1076_v56, %v1075_v55  ;;  %v1107_v55 = vld [vmem:[#allocation11 + $0xd8] sm:$0xff]  ;;  %v15641_v56 = vpack.c.bf16 %v1089_v53, %v1088_v52 }
 0x71a   :  { %6681 = vmatpush1.bf16.msra.mxu0 %v17035_v58  ;;  %v1059_v58 = vld [vmem:[#allocation8 + $0x60] sm:$0xff] }
 0x71b   :  { %6682 = vmatprep.subr.bf16.mxu0 %v17040_v59  ;;  %v1060_v59 = vld [vmem:[#allocation8 + $0x68] sm:$0xff] }
 0x71e   :  { %6683 = vmatpush1.bf16.msra.mxu0 %v17038_v60  ;;  %v15617_v60 = vpack.c.bf16 %v1060_v59, %v1059_v58  ;;  %v1090_v58 = vld [vmem:[#allocation11 + $0x50] sm:$0xff]  ;;  %v1091_v59 = vld [vmem:[#allocation11 + $0x58] sm:$0xff] }
 0x71f   :  { %6684 = vmatprep.subr.bf16.mxu0 %v17043_v61  ;;  %v1077_v61 = vld [vmem:[#allocation8 + $0xf0] sm:$0xff] }
 0x722   :  { %6685 = vmatpush1.bf16.msra.mxu0 %v17041_v62  ;;  %v1078_v62 = vld [vmem:[#allocation8 + $0xf8] sm:$0xff] }
 0x723   :  { %6686 = vmatprep.subr.bf16.mxu0 %v17046_v63  ;;  %v15619_v63 = vpack.c.bf16 %v1078_v62, %v1077_v61  ;;  %v1109_v61 = vld [vmem:[#allocation11 + $0xe8] sm:$0xff]  ;;  %v15645_v62 = vpack.c.bf16 %v1091_v59, %v1090_v58 }
 0x726   :  { %6687 = vmatpush1.bf16.msra.mxu0 %v17044_v0  ;;  %v1061_v0 = vld [vmem:[#allocation8 + $0x70] sm:$0xff] }
 0x729   :  { %6689 = vmatmul.mubr.bf16.vlgmr.msra.gmra.mrb[0].mxu0 %v1458_v1  ;;  %v1062_v1 = vld [vmem:[#allocation8 + $0x78] sm:$0xff] }
 0x72a   :  { %v15621_v2 = vpack.c.bf16 %v1062_v1, %v1061_v0  ;;  %v1092_v0 = vld [vmem:[#allocation11 + $0x60] sm:$0xff]  ;;  %v1093_v1 = vld [vmem:[#allocation11 + $0x68] sm:$0xff] }
 0x72b   :  { %v15649_v4 = vpack.c.bf16 %v1093_v1, %v1092_v0 }
 0x7fc   :  { %v6690_v14 = vpop.f32.mrb[0].mxu0 }
 0x7fd   :  { %v15663_v15 = vadd.f32 %v6690_v14, %v1464_v11  ;;  %v6692_v17 = vpop.f32.mrb[1].mxu0 }
 0x7fe   :  { %v6694_v20 = vpop.f32.mrb[2].mxu0  ;;  %v15664_v21 = vadd.f32 %v6692_v17, %v1468_v12 }
 0x7ff   :  { %v6695_v26 = vpop.f32.mrb[3].mxu0  ;;  %v6697_v29 = vpack.c.bf16 %v15663_v15, %v15663_v15 }
 0x800   :  { %v6698_v27 = vpack.c.bf16 %v15664_v21, %v15664_v21  ;;  %v1080_v26 = vld [vmem:[#allocation11] sm:$0xff] }
 0x802   :  { %6902 = vmatprep.mubr.bf16.mxu1 %v6698_v27  ;;  %v1081_v27 = vld [vmem:[#allocation11 + $0x8] sm:$0xff] }
 0x803   :  { %6903 = vmatmul.mubr.bf16.vlgmr.msra.gmra.mrb[0].mxu1 %v6697_v29  ;;  %v15625_v16 = vpack.c.bf16 %v1081_v27, %v1080_v26 }
 0x804   :  { %15594 = vmatpush3.bf16.msra.mxu1 %v15593_v28 }
 0x805   :  { %15596 = vmatprep.subr.bf16.mxu1 %v15595_v30  ;;  %v1098_v30 = vld [vmem:[#allocation11 + $0x90] sm:$0xff] }
 0x808   :  { %15598 = vmatpush3.bf16.msra.mxu1 %v15597_v33 }
 0x809   :  { %15600 = vmatprep.subr.bf16.mxu1 %v15599_v34  ;;  %v15627_v34 = vpack.c.bf16 %v1099_v22, %v1098_v30  ;;  %v17101_v30 = vld [vmem:[#allocation16 + $0xc4] ss:$208 sps:$4 sm:$0xff]  }
 0x80a   :  { %v17107_v22 = vld [vmem:[#allocation16 + $0x264] ss:$208 sps:$4 sm:$0xff]   ;;  %13566 = vmatprep.subr.bf16.mxu0 %v17101_v30  ;;  %v17120_v30 = vld [vmem:[#allocation16 + $0x680] ss:$208 sps:$4 sm:$0xff]  }
 0x80c   :  { %15602 = vmatpush3.bf16.msra.mxu1 %v15601_v37  ;;  %v1100_v37 = vld [vmem:[#allocation11 + $0xa0] sm:$0xff] }
 0x80d   :  { %15604 = vmatprep.subr.bf16.mxu1 %v15603_v39  ;;  %v15631_v39 = vpack.c.bf16 %v1101_v24, %v1100_v37  ;;  %v17131_v37 = vld [vmem:[#allocation16 + $0x8e4] ss:$208 sps:$4 sm:$0xff]   ;;  %v17129_v24 = vld [vmem:[#allocation16 + $0x8e0] ss:$208 sps:$4 sm:$0xff]  }
 0x810   :  { %15606 = vmatpush3.bf16.msra.mxu1 %v15605_v42  ;;  %v1102_v42 = vld [vmem:[#allocation11 + $0xb0] sm:$0xff] }
 0x811   :  { %15608 = vmatprep.subr.bf16.mxu1 %v15607_v45  ;;  %v15635_v45 = vpack.c.bf16 %v1103_v43, %v1102_v42  ;;  %v17149_v42 = vld [vmem:[#allocation16 + $0xdc4] ss:$208 sps:$4 sm:$0xff]   ;;  %v17147_v43 = vld [vmem:[#allocation16 + $0xdc0] ss:$208 sps:$4 sm:$0xff]  }
 0x814   :  { %15610 = vmatpush3.bf16.msra.mxu1 %v15609_v48  ;;  %v1104_v48 = vld [vmem:[#allocation11 + $0xc0] sm:$0xff] }
 0x815   :  { %15612 = vmatprep.subr.bf16.mxu1 %v15611_v51  ;;  %v15639_v51 = vpack.c.bf16 %v1105_v49, %v1104_v48 }
 0x818   :  { %15614 = vmatpush3.bf16.msra.mxu1 %v15613_v54  ;;  %v1106_v54 = vld [vmem:[#allocation11 + $0xd0] sm:$0xff] }
 0x819   :  { %15616 = vmatprep.subr.bf16.mxu1 %v15615_v57  ;;  %v15643_v57 = vpack.c.bf16 %v1107_v55, %v1106_v54  ;;  %v18676_v54 = vmov 1966171168  }
 0x81a   :  { %v7078_v55 = vunpack.c.l.s4 %v18676_v54  ;;  %v17177_v54 = vld [vmem:[#allocation16 + $0x15e0] ss:$208 sps:$4 sm:$0xff]  }
 0x81c   :  { %15618 = vmatpush3.bf16.msra.mxu1 %v15617_v60  ;;  %v1108_v60 = vld [vmem:[#allocation11 + $0xe0] sm:$0xff]  ;;  %v7079_v58 = vunpack.c.0.s8 %v7078_v55  ;;  %v17182_v55 = vld [vmem:[#allocation16 + $0x16c4] ss:$208 sps:$4 sm:$0xff]  }
 0x81d   :  { %15620 = vmatprep.subr.bf16.mxu1 %v15619_v63  ;;  %v15647_v63 = vpack.c.bf16 %v1109_v61, %v1108_v60 }
 0x81e   :  { %v7082_v59 = vsub.s32 %v7079_v58, %v18917_v13  ;;  %v17183_v58 = vld [vmem:[#allocation16 + $0x1780] ss:$208 sps:$4 sm:$0xff]  }
 0x820   :  { %15622 = vmatpush3.bf16.msra.mxu1 %v15621_v2  ;;  %v1110_v2 = vld [vmem:[#allocation11 + $0xf0] sm:$0xff] }
 0x821   :  { %15624 = vmatprep.subr.bf16.mxu1 %v15623_v5  ;;  %v15651_v5 = vpack.c.bf16 %v1111_v3, %v1110_v2  ;;  %v179_v3 = vld [vmem:[%s22001_s12] sm:$0xff] }
 0x8d6   :  { %v6904_v11 = vpop.f32.mrb[0].mxu1 }
 0x8d7   :  { %v6905_v12 = vadd.f32 %v6904_v11, %v6703_v7  ;;  %v6906_v14 = vpop.f32.mrb[1].mxu1  ;;  %v1095_v7 = vld [vmem:[#allocation11 + $0x78] sm:$0xff] }
 0x8d8   :  { %v6907_v15 = vadd.f32 %v6906_v14, %v6707_v9  ;;  %v6908_v17 = vpop.f32.mrb[2].mxu1  ;;  %v15653_v9 = vpack.c.bf16 %v1095_v7, %v1094_v6  ;;  %v1114_v11 = vld [vmem:[%s21986_s10 + $0x8] sm:$0xff] }
 0x8d9   :  { %v6913_v18 = vmul.f32 0.70710677, %v6905_v12  ;;  %v6909_v19 = vpop.f32.mrb[3].mxu1  ;;  %v6911_v31 = vmul.f32 0.5, %v6905_v12  ;;  %v1116_v12 = vld [vmem:[%s21986_s10 + $0x18] sm:$0xff]  ;;  %v1115_v17 = vld [vmem:[%s21986_s10 + $0x10] sm:$0xff] }
 0x8da   :  { %v6914_v20 = vmul.f32 0.70710677, %v6907_v15  ;;  %v6912_v28 = vmul.f32 0.5, %v6907_v15  ;;  %v15655_v14 = vpack.c.bf16 %v1116_v12, %v1114_v11  ;;  %v1113_v15 = vld [vmem:[%s21986_s10] sm:$0xff]  ;;  %v180_v7 = vld [vmem:[%s22001_s12 + $0x8] sm:$0xff] }
 0x8db   :  { %18344 = verf.f32 %v6913_v18  ;;  %v1118_v18 = vld [vmem:[%s21986_s10 + $0x28] sm:$0xff]  ;;  %v15657_v19 = vpack.c.bf16 %v1115_v17, %v1113_v15 }
 0x8dc   :  { %18346 = verf.f32 %v6914_v20  ;;  %v1120_v20 = vld [vmem:[%s21986_s10 + $0x38] sm:$0xff] }
 0x8dd   :  { %v15659_v26 = vpack.c.bf16 %v1120_v20, %v1118_v18 }
 0x8e5   :  { %v18345_v21 = vpop.eup %18344 }
 0x8e6   :  { %v18347_v23 = vpop.eup %18346  ;;  %v6917_v25 = vadd.f32 1.0, %v18345_v21  ;;  %v1117_v21 = vld [vmem:[%s21986_s10 + $0x20] sm:$0xff] }
 0x8e7   :  { %v6918_v29 = vadd.f32 1.0, %v18347_v23  ;;  %v1119_v23 = vld [vmem:[%s21986_s10 + $0x30] sm:$0xff] }
 0x8e8   :  { %v6919_v33 = vmul.f32 %v6917_v25, %v6911_v31  ;;  %v18675_v25 = vmov 0.0   ;;  %v15661_v27 = vpack.c.bf16 %v1119_v23, %v1117_v21  ;;  %v17105_v31 = vld [vmem:[#allocation16 + $0x260] ss:$208 sps:$4 sm:$0xff]   ;;  %v17110_v23 = vld [vmem:[#allocation16 + $0x344] ss:$208 sps:$4 sm:$0xff]  }
 0x8e9   :  { %v6920_v32 = vmul.f32 %v6918_v29, %v6912_v28  ;;  %v17098_v28 = vld [vmem:[#allocation16 + $0x4] ss:$208 sps:$4 sm:$0xff]   ;;  %v17099_v29 = vld [vmem:[#allocation16 + $0xc0] ss:$208 sps:$4 sm:$0xff]  }
 0x8ea   :  { %13567 = vmatpush1.bf16.msra.mxu0 %v17099_v29  ;;  %v17102_v21 = vld [vmem:[#allocation16 + $0x1a0] ss:$208 sps:$4 sm:$0xff]   ;;  %v17122_v29 = vld [vmem:[#allocation16 + $0x684] ss:$208 sps:$4 sm:$0xff]  }
 0x8eb   :  { %6991 = vmatprep.mubr.f32.mxu1 %v6920_v32  ;;  %13568 = vmatprep.subr.bf16.mxu0 %v17107_v22  ;;  %v17128_v22 = vld [vmem:[#allocation16 + $0x824] ss:$208 sps:$4 sm:$0xff]  }
 0x8ec   :  { %6992 = vmatmul.mubr.f32.vlgmr.msra.gmra.mrb[4].mxu1 %v6919_v33 }
 0x8ed   :  { %15626 = vmatpush3.bf16.msra.mxu1 %v15625_v16  ;;  %7067 = vmatprep.mubr.f32.mxu1 %v6920_v32  ;;  %v17113_v32 = vld [vmem:[#allocation16 + $0x404] ss:$208 sps:$4 sm:$0xff]   ;;  %v17111_v16 = vld [vmem:[#allocation16 + $0x400] ss:$208 sps:$4 sm:$0xff]  }
 0x8ee   :  { %15628 = vmatprep.subr.bf16.mxu1 %v15627_v34  ;;  %13569 = vmatpush1.bf16.msra.mxu0 %v17105_v31  ;;  %v17117_v34 = vld [vmem:[#allocation16 + $0x5a0] ss:$208 sps:$4 sm:$0xff]   ;;  %v17134_v31 = vld [vmem:[#allocation16 + $0x9c4] ss:$208 sps:$4 sm:$0xff]  }
 0x8ef   :  { %13570 = vmatprep.subr.bf16.mxu0 %v17113_v32  ;;  %v17132_v32 = vld [vmem:[#allocation16 + $0x9c0] ss:$208 sps:$4 sm:$0xff]  }
 0x8f1   :  { %15630 = vmatpush3.bf16.msra.mxu1 %v15629_v38  ;;  %v17137_v38 = vld [vmem:[#allocation16 + $0xa84] ss:$208 sps:$4 sm:$0xff]  }
 0x8f2   :  { %15632 = vmatprep.subr.bf16.mxu1 %v15631_v39  ;;  %13571 = vmatpush1.bf16.msra.mxu0 %v17111_v16  ;;  %v17135_v39 = vld [vmem:[#allocation16 + $0xa80] ss:$208 sps:$4 sm:$0xff]   ;;  %v17140_v16 = vld [vmem:[#allocation16 + $0xb64] ss:$208 sps:$4 sm:$0xff]  }
 0x8f5   :  { %15634 = vmatpush3.bf16.msra.mxu1 %v15633_v44 }
 0x8f6   :  { %15636 = vmatprep.subr.bf16.mxu1 %v15635_v45  ;;  %v14685_v45 = vld [vmem:[#allocation10] ss:$0 sm:$0xff] }
 0x8f9   :  { %15638 = vmatpush3.bf16.msra.mxu1 %v15637_v50  ;;  %v14686_v50 = vld [vmem:[#allocation13] ss:$0 sm:$0xff] }
 0x8fa   :  { %15640 = vmatprep.subr.bf16.mxu1 %v15639_v51 }
 0x8fd   :  { %15642 = vmatpush3.bf16.msra.mxu1 %v15641_v56 }
 0x8fe   :  { %15644 = vmatprep.subr.bf16.mxu1 %v15643_v57 }
 0x901   :  { %15646 = vmatpush3.bf16.msra.mxu1 %v15645_v62 }
 0x902   :  { %15648 = vmatprep.subr.bf16.mxu1 %v15647_v63 }
 0x905   :  { %15650 = vmatpush3.bf16.msra.mxu1 %v15649_v4 }
 0x906   :  { %15652 = vmatprep.subr.bf16.mxu1 %v15651_v5 }
 0x909   :  { %15654 = vmatpush3.bf16.msra.mxu1 %v15653_v9 }
 0x90a   :  { %15656 = vmatprep.subr.bf16.mxu1 %v15655_v14  ;;  %v17096_v14 = vld [vmem:[#allocation16] ss:$208 sps:$4 sm:$0xff]  }
 0x90c   :  { %7068 = vmatmul.mubr.f32.vlgmr.msra.gmra.mrb[6].mxu1 %v6919_v33  ;;  %v17119_v33 = vld [vmem:[#allocation16 + $0x5a4] ss:$208 sps:$4 sm:$0xff]  }
 0x90d   :  { %7228 = vmatprep.mubr.f32.mxu1 %v18675_v25  ;;  %15658 = vmatpush1.bf16.msra.mxu1 %v15657_v19  ;;  %v17104_v19 = vld [vmem:[#allocation16 + $0x1a4] ss:$208 sps:$4 sm:$0xff]  }
 0x90e   :  { %15660 = vmatprep.subr.bf16.mxu1 %v15659_v26  ;;  %13572 = vmatprep.subr.bf16.mxu0 %v17119_v33  ;;  %v17108_v26 = vld [vmem:[#allocation16 + $0x340] ss:$208 sps:$4 sm:$0xff]  }
 0x90f   :  { %13573 = vmatpush1.bf16.msra.mxu0 %v17117_v34  ;;  %v17138_v33 = vld [vmem:[#allocation16 + $0xb60] ss:$208 sps:$4 sm:$0xff]   ;;  %v17146_v34 = vld [vmem:[#allocation16 + $0xd04] ss:$208 sps:$4 sm:$0xff]  }
 0x910   :  { %13574 = vmatprep.subr.bf16.mxu0 %v17125_v35  ;;  %v17144_v35 = vld [vmem:[#allocation16 + $0xd00] ss:$208 sps:$4 sm:$0xff]  }
 0x911   :  { %15662 = vmatpush1.bf16.msra.mxu1 %v15661_v27  ;;  %v17116_v27 = vld [vmem:[#allocation16 + $0x4e4] ss:$208 sps:$4 sm:$0xff]  }
 0x912   :  { %12534 = vmatprep.subr.bf16.mxu1 %v17098_v28  ;;  %v17114_v28 = vld [vmem:[#allocation16 + $0x4e0] ss:$208 sps:$4 sm:$0xff]  }
 0x913   :  { %13575 = vmatpush1.bf16.msra.mxu0 %v17123_v36  ;;  %v17152_v36 = vld [vmem:[#allocation16 + $0xea4] ss:$208 sps:$4 sm:$0xff]  }
 0x914   :  { %13576 = vmatprep.subr.bf16.mxu0 %v17131_v37  ;;  %v17150_v37 = vld [vmem:[#allocation16 + $0xea0] ss:$208 sps:$4 sm:$0xff]  }
 0x917   :  { %13577 = vmatpush1.bf16.msra.mxu0 %v17129_v24  ;;  %v17155_v24 = vld [vmem:[#allocation16 + $0xf64] ss:$208 sps:$4 sm:$0xff]  }
 0x918   :  { %13578 = vmatprep.subr.bf16.mxu0 %v17137_v38  ;;  %v17153_v38 = vld [vmem:[#allocation16 + $0xf60] ss:$208 sps:$4 sm:$0xff]  }
 0x91b   :  { %13579 = vmatpush1.bf16.msra.mxu0 %v17135_v39  ;;  %v17158_v39 = vld [vmem:[#allocation16 + $0x1044] ss:$208 sps:$4 sm:$0xff]  }
 0x91c   :  { %13580 = vmatprep.subr.bf16.mxu0 %v17143_v40  ;;  %v17156_v40 = vld [vmem:[#allocation16 + $0x1040] ss:$208 sps:$4 sm:$0xff]  }
 0x91f   :  { %13581 = vmatpush1.bf16.msra.mxu0 %v17141_v41  ;;  %v17161_v41 = vld [vmem:[#allocation16 + $0x1104] ss:$208 sps:$4 sm:$0xff]  }
 0x920   :  { %13582 = vmatprep.subr.bf16.mxu0 %v17149_v42  ;;  %v17159_v42 = vld [vmem:[#allocation16 + $0x1100] ss:$208 sps:$4 sm:$0xff]  }
 0x923   :  { %13583 = vmatpush1.bf16.msra.mxu0 %v17147_v43  ;;  %v17164_v43 = vld [vmem:[#allocation16 + $0x11e4] ss:$208 sps:$4 sm:$0xff]  }
 0x924   :  { %13584 = vmatprep.subr.bf16.mxu0 %v17155_v24  ;;  %v17197_v24 = vld [vmem:[#allocation16 + $0x1ac] ss:$208 sps:$4 sm:$0xff]  }
 0x927   :  { %13585 = vmatpush1.bf16.msra.mxu0 %v17153_v38  ;;  %v17195_v38 = vld [vmem:[#allocation16 + $0x1a8] ss:$208 sps:$4 sm:$0xff]  }
 0x928   :  { %13586 = vmatprep.subr.bf16.mxu0 %v17161_v41  ;;  %v17203_v41 = vld [vmem:[#allocation16 + $0x4ec] ss:$208 sps:$4 sm:$0xff]  }
 0x92b   :  { %13587 = vmatpush1.bf16.msra.mxu0 %v17159_v42  ;;  %v17201_v42 = vld [vmem:[#allocation16 + $0x4e8] ss:$208 sps:$4 sm:$0xff]  }
 0x9bf   :  { %v15553_v44 = vpop.f32.mrb[4].mxu1 }
 0x9c0   :  { %v15554_v46 = vpop.f32.mrb[5].mxu1 }
 0x9c1   :  { %v15555_v47 = vadd.f32 %v15554_v46, %v15553_v44  ;;  %v17162_v44 = vld [vmem:[#allocation16 + $0x11e0] ss:$208 sps:$4 sm:$0xff]  }
 0x9c2   :  { %v17165_v46 = vld [vmem:[#allocation16 + $0x12a0] ss:$208 sps:$4 sm:$0xff]  }
 0x9c3   :  { %v6994_v48 = vadd.f32 %v15555_v47, %v14685_v45  ;;  %v17167_v45 = vld [vmem:[#allocation16 + $0x12a4] ss:$208 sps:$4 sm:$0xff]  }
 0x9c4   :  { %13588 = vmatprep.subr.bf16.mxu0 %v17167_v45  ;;  %v17170_v47 = vld [vmem:[#allocation16 + $0x1384] ss:$208 sps:$4 sm:$0xff]   ;;  %v17209_v45 = vld [vmem:[#allocation16 + $0x82c] ss:$208 sps:$4 sm:$0xff]  }
 0x9c5   :  { %7262 = vst.msk [vmem:[#allocation17] sm:$0x3] %vm7261_vm0, %v6994_v48  ;;  %v7083_v60 = vrot.slane %v6994_v48, %v7082_v59  ;;  %13589 = vmatpush1.bf16.msra.mxu0 %v17165_v46  ;;  %v17168_v48 = vld [vmem:[#allocation16 + $0x1380] ss:$208 sps:$4 sm:$0xff]   ;;  %v17207_v46 = vld [vmem:[#allocation16 + $0x828] ss:$208 sps:$4 sm:$0xff]  }
 0x9c7   :  { %v7084_v62 = vcombine.high %v7083_v60, %v7083_v60  ;;  %v7091_v0 = vrot.slane %v7083_v60, %v7082_v59  ;;  %v17186_v60 = vld [vmem:[#allocation16 + $0x1860] ss:$208 sps:$4 sm:$0xff]  }
 0x9c9   :  { %v7098_v4 = vrot.slane %v7084_v62, %v7082_v59  ;;  %v7137_v9 = vrot.slane %v7091_v0, %v21667_v8  ;;  %v17189_v62 = vld [vmem:[#allocation16 + $0x1920] ss:$208 sps:$4 sm:$0xff]   ;;  %v1121_v0 = vld [vmem:[#allocation14] sm:$0x3] }
 0x9cb   :  { %v7141_v18 = vrot.slane %v7098_v4, %v21667_v8 }
 0x9df   :  { %v15588_v49 = vpop.f32.mrb[6].mxu1 }
 0x9e0   :  { %v15589_v51 = vpop.f32.mrb[7].mxu1 }
 0x9e1   :  { %v15590_v52 = vadd.f32 %v15589_v51, %v15588_v49  ;;  %v17173_v49 = vld [vmem:[#allocation16 + $0x1444] ss:$208 sps:$4 sm:$0xff]  }
 0x9e2   :  { %13590 = vmatprep.subr.bf16.mxu0 %v17173_v49  ;;  %v17176_v51 = vld [vmem:[#allocation16 + $0x1524] ss:$208 sps:$4 sm:$0xff]   ;;  %v17215_v49 = vld [vmem:[#allocation16 + $0xb6c] ss:$208 sps:$4 sm:$0xff]  }
 0x9e3   :  { %v7070_v53 = vadd.f32 %v15590_v52, %v14686_v50  ;;  %v17171_v50 = vld [vmem:[#allocation16 + $0x1440] ss:$208 sps:$4 sm:$0xff]  }
 0x9e4   :  { %13591 = vmatpush1.bf16.msra.mxu0 %v17171_v50  ;;  %v17174_v52 = vld [vmem:[#allocation16 + $0x1520] ss:$208 sps:$4 sm:$0xff]   ;;  %v17213_v50 = vld [vmem:[#allocation16 + $0xb68] ss:$208 sps:$4 sm:$0xff]  }
 0x9e5   :  { %v7073_v56 = vmul.f32 0.5, %v7070_v53  ;;  %7263 = vst.msk [vmem:[#allocation18] sm:$0x3] %vm7261_vm0, %v7070_v53  ;;  %v17179_v53 = vld [vmem:[#allocation16 + $0x15e4] ss:$208 sps:$4 sm:$0xff]  }
 0x9e6   :  { %13592 = vmatprep.subr.bf16.mxu0 %v17179_v53  ;;  %v17221_v53 = vld [vmem:[#allocation16 + $0xeac] ss:$208 sps:$4 sm:$0xff]  }
 0x9e7   :  { %v7074_v57 = vmul.f32 1.442695, %v7073_v56  ;;  %v17180_v56 = vld [vmem:[#allocation16 + $0x16c0] ss:$208 sps:$4 sm:$0xff]  }
 0x9e8   :  { %13593 = vmatpush1.bf16.msra.mxu0 %v17177_v54  ;;  %v17219_v54 = vld [vmem:[#allocation16 + $0xea8] ss:$208 sps:$4 sm:$0xff]  }
 0x9e9   :  { %18348 = vpow2.f32 %v7074_v57  ;;  %v17185_v57 = vld [vmem:[#allocation16 + $0x1784] ss:$208 sps:$4 sm:$0xff]  }
 0x9ea   :  { %13594 = vmatprep.subr.bf16.mxu0 %v17185_v57  ;;  %v17227_v57 = vld [vmem:[#allocation16 + $0x11ec] ss:$208 sps:$4 sm:$0xff]  }
 0x9ec   :  { %13595 = vmatpush1.bf16.msra.mxu0 %v17183_v58  ;;  %v17225_v58 = vld [vmem:[#allocation16 + $0x11e8] ss:$208 sps:$4 sm:$0xff]  }
 0x9f3   :  { %v18349_v61 = vpop.eup %18348 }
 0x9f4   :  { %v7106_v63 = vrot.slane %v18349_v61, %v7082_v59  ;;  %v17191_v61 = vld [vmem:[#allocation16 + $0x1924] ss:$208 sps:$4 sm:$0xff]  }
 0x9f5   :  { %13596 = vmatprep.subr.bf16.mxu0 %v17191_v61  ;;  %v17233_v61 = vld [vmem:[#allocation16 + $0x152c] ss:$208 sps:$4 sm:$0xff]  }
 0x9f6   :  { %v7114_v1 = vrot.slane %v7106_v63, %v7082_v59  ;;  %v7107_v2 = vcombine.high %v7106_v63, %v7106_v63  ;;  %13597 = vmatpush1.bf16.msra.mxu0 %v17189_v62  ;;  %v17194_v63 = vld [vmem:[#allocation16 + $0xc] ss:$208 sps:$4 sm:$0xff]   ;;  %v17231_v62 = vld [vmem:[#allocation16 + $0x1528] ss:$208 sps:$4 sm:$0xff]  }
 0x9f8   :  { %v7125_v5 = vrot.slane %v7114_v1, %v21667_v8  ;;  %v7121_v6 = vrot.slane %v7107_v2, %v7082_v59  ;;  %v17188_v59 = vld [vmem:[#allocation16 + $0x1864] ss:$208 sps:$4 sm:$0xff]   ;;  %v7150_v1 = vrot.slane %v1121_v0, %v21667_v8  ;;  %v7154_v2 = vrot.slane %v1121_v0, %v21670_v10  ;;  %v17234_v0 = vld [vmem:[#allocation16 + $0x16c8] ss:$208 sps:$4 sm:$0xff]  }
 0x9fa   :  { %v7132_v11 = vmul.f32 %v7125_v5, %v179_v3  ;;  %v7129_v12 = vrot.slane %v7121_v6, %v21667_v8 }
 0x9fc   :  { %v7144_v15 = vadd.f32 %v7137_v9, %v7132_v11  ;;  %v7133_v17 = vmul.f32 %v7129_v12, %v180_v7 }
 0x9fe   :  { %14687 = vmatmul.mubr.msk.f32.vlgmr.msra.gmra.mrb[8].mxu1 %vm7157_vm1, %v7144_v15  ;;  %7264 = vst.msk [vmem:[#allocation20] sm:$0xff] %vm7157_vm1, %v7144_v15  ;;  %v7145_v20 = vadd.f32 %v7141_v18, %v7133_v17 }
 0x9ff   :  { %7234 = vmatprep.mubr.f32.mxu1 %v18675_v25  ;;  %12535 = vmatpush1.bf16.msra.mxu1 %v17096_v14  ;;  %v17126_v25 = vld [vmem:[#allocation16 + $0x820] ss:$208 sps:$4 sm:$0xff]  }
 0xa00   :  { %7265 = vst.msk [vmem:[#allocation20 + $0x8] sm:$0xff] %vm7157_vm1, %v7145_v20  ;;  %12536 = vmatprep.subr.bf16.mxu1 %v17104_v19 }
 0xa02   :  { %14688 = vmatmul.mubr.msk.f32.gmra.mrb[10].mxu1 %vm7157_vm1, %v7145_v20 }
 0xa03   :  { %12537 = vmatpush1.bf16.msra.mxu1 %v17102_v21 }
 0xa04   :  { %12538 = vmatprep.subr.bf16.mxu1 %v17110_v23 }
 0xa07   :  { %12539 = vmatpush1.bf16.msra.mxu1 %v17108_v26 }
 0xa08   :  { %12540 = vmatprep.subr.bf16.mxu1 %v17116_v27 }
 0xa0b   :  { %12541 = vmatpush1.bf16.msra.mxu1 %v17114_v28 }
 0xa0c   :  { %12542 = vmatprep.subr.bf16.mxu1 %v17122_v29 }
 0xa0f   :  { %12543 = vmatpush1.bf16.msra.mxu1 %v17120_v30 }
 0xa10   :  { %12544 = vmatprep.subr.bf16.mxu1 %v17128_v22 }
 0xa13   :  { %12545 = vmatpush1.bf16.msra.mxu1 %v17126_v25 }
 0xa14   :  { %12546 = vmatprep.subr.bf16.mxu1 %v17134_v31 }
 0xa17   :  { %12547 = vmatpush1.bf16.msra.mxu1 %v17132_v32 }
 0xa18   :  { %12548 = vmatprep.subr.bf16.mxu1 %v17140_v16 }
 0xa1b   :  { %12549 = vmatpush1.bf16.msra.mxu1 %v17138_v33 }
 0xa1c   :  { %12550 = vmatprep.subr.bf16.mxu1 %v17146_v34 }
 0xa1f   :  { %12551 = vmatpush1.bf16.msra.mxu1 %v17144_v35 }
 0xa20   :  { %12552 = vmatprep.subr.bf16.mxu1 %v17152_v36 }
 0xa23   :  { %12553 = vmatpush1.bf16.msra.mxu1 %v17150_v37  ;;  %v17192_v37 = vld [vmem:[#allocation16 + $0x8] ss:$208 sps:$4 sm:$0xff]  }
 0xa24   :  { %12554 = vmatprep.subr.bf16.mxu1 %v17158_v39  ;;  %v17200_v39 = vld [vmem:[#allocation16 + $0x34c] ss:$208 sps:$4 sm:$0xff]  }
 0xa27   :  { %12555 = vmatpush1.bf16.msra.mxu1 %v17156_v40  ;;  %v17198_v40 = vld [vmem:[#allocation16 + $0x348] ss:$208 sps:$4 sm:$0xff]  }
 0xa28   :  { %12556 = vmatprep.subr.bf16.mxu1 %v17164_v43  ;;  %v17206_v43 = vld [vmem:[#allocation16 + $0x68c] ss:$208 sps:$4 sm:$0xff]  }
 0xa2b   :  { %12557 = vmatpush1.bf16.msra.mxu1 %v17162_v44  ;;  %v17204_v44 = vld [vmem:[#allocation16 + $0x688] ss:$208 sps:$4 sm:$0xff]  }
 0xa2c   :  { %12558 = vmatprep.subr.bf16.mxu1 %v17170_v47  ;;  %v17212_v47 = vld [vmem:[#allocation16 + $0x9cc] ss:$208 sps:$4 sm:$0xff]  }
 0xa2f   :  { %12559 = vmatpush1.bf16.msra.mxu1 %v17168_v48  ;;  %v17210_v48 = vld [vmem:[#allocation16 + $0x9c8] ss:$208 sps:$4 sm:$0xff]  }
 0xa30   :  { %12560 = vmatprep.subr.bf16.mxu1 %v17176_v51  ;;  %v17218_v51 = vld [vmem:[#allocation16 + $0xd0c] ss:$208 sps:$4 sm:$0xff]  }
 0xa33   :  { %12561 = vmatpush1.bf16.msra.mxu1 %v17174_v52  ;;  %v17216_v52 = vld [vmem:[#allocation16 + $0xd08] ss:$208 sps:$4 sm:$0xff]  }
 0xa34   :  { %12562 = vmatprep.subr.bf16.mxu1 %v17182_v55  ;;  %v17224_v55 = vld [vmem:[#allocation16 + $0x104c] ss:$208 sps:$4 sm:$0xff]  }
 0xa37   :  { %12563 = vmatpush1.bf16.msra.mxu1 %v17180_v56  ;;  %v17222_v56 = vld [vmem:[#allocation16 + $0x1048] ss:$208 sps:$4 sm:$0xff]  }
 0xa38   :  { %12564 = vmatprep.subr.bf16.mxu1 %v17188_v59  ;;  %v17230_v59 = vld [vmem:[#allocation16 + $0x138c] ss:$208 sps:$4 sm:$0xff]  }
 0xa3b   :  { %12565 = vmatpush1.bf16.msra.mxu1 %v17186_v60  ;;  %v17228_v60 = vld [vmem:[#allocation16 + $0x1388] ss:$208 sps:$4 sm:$0xff]  }
 0xa3c   :  { %12577 = vmatprep.subr.bf16.mxu1 %v17194_v63  ;;  %v17236_v63 = vld [vmem:[#allocation16 + $0x16cc] ss:$208 sps:$4 sm:$0xff]  }
 0xad1   :  { %v7230_v3 = vpop.f32.mrb[8].mxu1 }
 0xad2   :  { %v7231_v4 = vadd.f32 %v7230_v3, %v7150_v1  ;;  %v7232_v5 = vpop.f32.mrb[9].mxu1  ;;  %v17242_v3 = vld [vmem:[#allocation16 + $0x14] ss:$208 sps:$4 sm:$0xff]  }
 0xad3   :  { %v7233_v6 = vadd.f32 %v7232_v5, %v7154_v2  ;;  %v17245_v5 = vld [vmem:[#allocation16 + $0x1b4] ss:$208 sps:$4 sm:$0xff]  }
 0xad4   :  { %v7245_v7 = vmul.f32 0.70710677, %v7231_v4  ;;  %v7241_v28 = vmul.f32 0.5, %v7231_v4  ;;  %v17240_v4 = vld [vmem:[#allocation16 + $0x10] ss:$208 sps:$4 sm:$0xff]  }
 0xad5   :  { %v7246_v9 = vmul.f32 0.70710677, %v7233_v6  ;;  %v7236_v11 = vpop.f32.mrb[10].mxu1  ;;  %v7242_v22 = vmul.f32 0.5, %v7233_v6  ;;  %v17243_v6 = vld [vmem:[#allocation16 + $0x1b0] ss:$208 sps:$4 sm:$0xff]  }
 0xad6   :  { %18350 = verf.f32 %v7245_v7  ;;  %v7237_v12 = vadd.f32 %v7236_v11, %v7150_v1  ;;  %v7238_v14 = vpop.f32.mrb[11].mxu1  ;;  %v17239_v1 = vld [vmem:[#allocation16 + $0x186c] ss:$208 sps:$4 sm:$0xff]   ;;  %v17248_v7 = vld [vmem:[#allocation16 + $0x354] ss:$208 sps:$4 sm:$0xff]  }
 0xad7   :  { %18352 = verf.f32 %v7246_v9  ;;  %v7239_v15 = vadd.f32 %v7238_v14, %v7154_v2  ;;  %v17237_v2 = vld [vmem:[#allocation16 + $0x1868] ss:$208 sps:$4 sm:$0xff]   ;;  %v17246_v9 = vld [vmem:[#allocation16 + $0x350] ss:$208 sps:$4 sm:$0xff]   ;;  %v17251_v11 = vld [vmem:[#allocation16 + $0x4f4] ss:$208 sps:$4 sm:$0xff]  }
 0xad8   :  { %v7247_v17 = vmul.f32 0.70710677, %v7237_v12  ;;  %v7243_v29 = vmul.f32 0.5, %v7237_v12  ;;  %v17249_v12 = vld [vmem:[#allocation16 + $0x4f0] ss:$208 sps:$4 sm:$0xff]  }
 0xad9   :  { %v7248_v18 = vmul.f32 0.70710677, %v7239_v15  ;;  %v7244_v25 = vmul.f32 0.5, %v7239_v15  ;;  %v17254_v14 = vld [vmem:[#allocation16 + $0x694] ss:$208 sps:$4 sm:$0xff]  }
 0xada   :  { %18354 = verf.f32 %v7247_v17  ;;  %v17252_v15 = vld [vmem:[#allocation16 + $0x690] ss:$208 sps:$4 sm:$0xff]   ;;  %v17257_v17 = vld [vmem:[#allocation16 + $0x834] ss:$208 sps:$4 sm:$0xff]  }
 0xadb   :  { %18356 = verf.f32 %v7248_v18  ;;  %v17255_v18 = vld [vmem:[#allocation16 + $0x830] ss:$208 sps:$4 sm:$0xff]  }
 0xae0   :  { %v18351_v19 = vpop.eup %18350 }
 0xae1   :  { %v18353_v20 = vpop.eup %18352  ;;  %v7253_v21 = vadd.f32 1.0, %v18351_v19  ;;  %v17260_v19 = vld [vmem:[#allocation16 + $0x9d4] ss:$208 sps:$4 sm:$0xff]  }
 0xae2   :  { %v7254_v26 = vadd.f32 1.0, %v18353_v20  ;;  %v17258_v20 = vld [vmem:[#allocation16 + $0x9d0] ss:$208 sps:$4 sm:$0xff]  }
 0xae3   :  { %v7257_v32 = vmul.f32 %v7253_v21, %v7241_v28  ;;  %v17263_v21 = vld [vmem:[#allocation16 + $0xb74] ss:$208 sps:$4 sm:$0xff]  }
 0xae4   :  { %v18355_v23 = vpop.eup %18354  ;;  %v7258_v33 = vmul.f32 %v7254_v26, %v7242_v22  ;;  %v17266_v26 = vld [vmem:[#allocation16 + $0xd14] ss:$208 sps:$4 sm:$0xff]   ;;  %v17270_v22 = vld [vmem:[#allocation16 + $0x1050] ss:$208 sps:$4 sm:$0xff]  }
 0xae5   :  { %v18357_v27 = vpop.eup %18356  ;;  %v7255_v30 = vadd.f32 1.0, %v18355_v23  ;;  %v17261_v23 = vld [vmem:[#allocation16 + $0xb70] ss:$208 sps:$4 sm:$0xff]   ;;  %v17269_v28 = vld [vmem:[#allocation16 + $0xeb4] ss:$208 sps:$4 sm:$0xff]  }
 0xae6   :  { %v7256_v31 = vadd.f32 1.0, %v18357_v27  ;;  %v17264_v27 = vld [vmem:[#allocation16 + $0xd10] ss:$208 sps:$4 sm:$0xff]  }
 0xae7   :  { %v7259_v16 = vmul.f32 %v7255_v30, %v7243_v29  ;;  %v17267_v29 = vld [vmem:[#allocation16 + $0xeb0] ss:$208 sps:$4 sm:$0xff]   ;;  %v17272_v30 = vld [vmem:[#allocation16 + $0x1054] ss:$208 sps:$4 sm:$0xff]  }
 0xae8   :  { %v7260_v34 = vmul.f32 %v7256_v31, %v7244_v25  ;;  %v17275_v25 = vld [vmem:[#allocation16 + $0x11f4] ss:$208 sps:$4 sm:$0xff]   ;;  %v17273_v31 = vld [vmem:[#allocation16 + $0x11f0] ss:$208 sps:$4 sm:$0xff]  }
 0xae9   :  { %v21715_v35 = vpack.c.bf16 %v7259_v16, %v7257_v32  ;;  %v17278_v32 = vld [vmem:[#allocation16 + $0x1394] ss:$208 sps:$4 sm:$0xff]   ;;  %v17276_v16 = vld [vmem:[#allocation16 + $0x1390] ss:$208 sps:$4 sm:$0xff]  }
 0xaea   :  { %v21717_v36 = vpack.c.bf16 %v7260_v34, %v7258_v33  ;;  %v17281_v33 = vld [vmem:[#allocation16 + $0x1534] ss:$208 sps:$4 sm:$0xff]   ;;  %v17279_v34 = vld [vmem:[#allocation16 + $0x1530] ss:$208 sps:$4 sm:$0xff]  }
 0xaec   :  { %12566 = vmatprep.mubr.bf16.mxu1 %v21717_v36  ;;  %13598 = vmatprep.mubr.bf16.mxu0 %v21717_v36 }
 0xaed   :  { %12567 = vmatmul.mubr.bf16.vlgmr.msra.gmra.mrb[12].mxu1 %v21715_v35  ;;  %13599 = vmatmul.mubr.bf16.vlgmr.msra.gmra.mrb[4].mxu0 %v21715_v35 }
 0xaee   :  { %12578 = vmatpush1.bf16.msra.mxu1 %v17192_v37  ;;  %12609 = vmatprep.mubr.bf16.mxu1 %v21717_v36  ;;  %v17284_v37 = vld [vmem:[#allocation16 + $0x16d4] ss:$208 sps:$4 sm:$0xff]  }
 0xaef   :  { %12579 = vmatprep.subr.bf16.mxu1 %v17197_v24  ;;  %v17282_v24 = vld [vmem:[#allocation16 + $0x16d0] ss:$208 sps:$4 sm:$0xff]  }
 0xaf2   :  { %12580 = vmatpush1.bf16.msra.mxu1 %v17195_v38  ;;  %v17287_v38 = vld [vmem:[#allocation16 + $0x1874] ss:$208 sps:$4 sm:$0xff]  }
 0xaf3   :  { %12581 = vmatprep.subr.bf16.mxu1 %v17200_v39  ;;  %v17285_v39 = vld [vmem:[#allocation16 + $0x1870] ss:$208 sps:$4 sm:$0xff]  }
 0xaf6   :  { %12582 = vmatpush1.bf16.msra.mxu1 %v17198_v40  ;;  %v17290_v40 = vld [vmem:[#allocation16 + $0x1c] ss:$208 sps:$4 sm:$0xff]  }
 0xaf7   :  { %12583 = vmatprep.subr.bf16.mxu1 %v17203_v41  ;;  %v17288_v41 = vld [vmem:[#allocation16 + $0x18] ss:$208 sps:$4 sm:$0xff]  }
 0xafa   :  { %12584 = vmatpush1.bf16.msra.mxu1 %v17201_v42  ;;  %v17293_v42 = vld [vmem:[#allocation16 + $0x1bc] ss:$208 sps:$4 sm:$0xff]  }
 0xafb   :  { %12585 = vmatprep.subr.bf16.mxu1 %v17206_v43  ;;  %v17291_v43 = vld [vmem:[#allocation16 + $0x1b8] ss:$208 sps:$4 sm:$0xff]  }
 0xafe   :  { %12586 = vmatpush1.bf16.msra.mxu1 %v17204_v44  ;;  %v17296_v44 = vld [vmem:[#allocation16 + $0x35c] ss:$208 sps:$4 sm:$0xff]  }
 0xaff   :  { %12587 = vmatprep.subr.bf16.mxu1 %v17209_v45  ;;  %v17294_v45 = vld [vmem:[#allocation16 + $0x358] ss:$208 sps:$4 sm:$0xff]  }
 0xb02   :  { %12588 = vmatpush1.bf16.msra.mxu1 %v17207_v46  ;;  %v17299_v46 = vld [vmem:[#allocation16 + $0x4fc] ss:$208 sps:$4 sm:$0xff]  }
 0xb03   :  { %12589 = vmatprep.subr.bf16.mxu1 %v17212_v47  ;;  %v17297_v47 = vld [vmem:[#allocation16 + $0x4f8] ss:$208 sps:$4 sm:$0xff]  }
 0xb06   :  { %12590 = vmatpush1.bf16.msra.mxu1 %v17210_v48  ;;  %v17302_v48 = vld [vmem:[#allocation16 + $0x69c] ss:$208 sps:$4 sm:$0xff]  }
 0xb07   :  { %12591 = vmatprep.subr.bf16.mxu1 %v17215_v49  ;;  %v17300_v49 = vld [vmem:[#allocation16 + $0x698] ss:$208 sps:$4 sm:$0xff]  }
 0xb0a   :  { %12592 = vmatpush1.bf16.msra.mxu1 %v17213_v50  ;;  %v17305_v50 = vld [vmem:[#allocation16 + $0x83c] ss:$208 sps:$4 sm:$0xff]  }
 0xb0b   :  { %12593 = vmatprep.subr.bf16.mxu1 %v17218_v51  ;;  %v17303_v51 = vld [vmem:[#allocation16 + $0x838] ss:$208 sps:$4 sm:$0xff]  }
 0xb0e   :  { %12594 = vmatpush1.bf16.msra.mxu1 %v17216_v52  ;;  %v17308_v52 = vld [vmem:[#allocation16 + $0x9dc] ss:$208 sps:$4 sm:$0xff]  }
 0xb0f   :  { %12595 = vmatprep.subr.bf16.mxu1 %v17221_v53  ;;  %v17306_v53 = vld [vmem:[#allocation16 + $0x9d8] ss:$208 sps:$4 sm:$0xff]  }
 0xb12   :  { %12596 = vmatpush1.bf16.msra.mxu1 %v17219_v54  ;;  %v17311_v54 = vld [vmem:[#allocation16 + $0xb7c] ss:$208 sps:$4 sm:$0xff]  }
 0xb13   :  { %12597 = vmatprep.subr.bf16.mxu1 %v17224_v55  ;;  %v17309_v55 = vld [vmem:[#allocation16 + $0xb78] ss:$208 sps:$4 sm:$0xff]  }
 0xb16   :  { %12598 = vmatpush1.bf16.msra.mxu1 %v17222_v56  ;;  %v17314_v56 = vld [vmem:[#allocation16 + $0xd1c] ss:$208 sps:$4 sm:$0xff]  }
 0xb17   :  { %12599 = vmatprep.subr.bf16.mxu1 %v17227_v57  ;;  %v17312_v57 = vld [vmem:[#allocation16 + $0xd18] ss:$208 sps:$4 sm:$0xff]  }
 0xb1a   :  { %12600 = vmatpush1.bf16.msra.mxu1 %v17225_v58  ;;  %v17317_v58 = vld [vmem:[#allocation16 + $0xebc] ss:$208 sps:$4 sm:$0xff]  }
 0xb1b   :  { %12601 = vmatprep.subr.bf16.mxu1 %v17230_v59  ;;  %v17315_v59 = vld [vmem:[#allocation16 + $0xeb8] ss:$208 sps:$4 sm:$0xff]  }
 0xb1e   :  { %12602 = vmatpush1.bf16.msra.mxu1 %v17228_v60  ;;  %v17320_v60 = vld [vmem:[#allocation16 + $0x105c] ss:$208 sps:$4 sm:$0xff]  }
 0xb1f   :  { %12603 = vmatprep.subr.bf16.mxu1 %v17233_v61  ;;  %v17318_v61 = vld [vmem:[#allocation16 + $0x1058] ss:$208 sps:$4 sm:$0xff]  }
 0xb22   :  { %12604 = vmatpush1.bf16.msra.mxu1 %v17231_v62  ;;  %v17323_v62 = vld [vmem:[#allocation16 + $0x11fc] ss:$208 sps:$4 sm:$0xff]  }
 0xb23   :  { %12605 = vmatprep.subr.bf16.mxu1 %v17236_v63  ;;  %v17321_v63 = vld [vmem:[#allocation16 + $0x11f8] ss:$208 sps:$4 sm:$0xff]  }
 0xb26   :  { %12606 = vmatpush1.bf16.msra.mxu1 %v17234_v0  ;;  %v17326_v0 = vld [vmem:[#allocation16 + $0x139c] ss:$208 sps:$4 sm:$0xff]  }
 0xb27   :  { %12607 = vmatprep.subr.bf16.mxu1 %v17239_v1  ;;  %v17324_v1 = vld [vmem:[#allocation16 + $0x1398] ss:$208 sps:$4 sm:$0xff]  }
 0xb2a   :  { %12608 = vmatpush1.bf16.msra.mxu1 %v17237_v2  ;;  %v17329_v2 = vld [vmem:[#allocation16 + $0x153c] ss:$208 sps:$4 sm:$0xff]  }
 0xb2b   :  { %12620 = vmatprep.subr.bf16.mxu1 %v17242_v3  ;;  %v17327_v3 = vld [vmem:[#allocation16 + $0x1538] ss:$208 sps:$4 sm:$0xff]  }
 0xb2d   :  { %12610 = vmatmul.mubr.bf16.vlgmr.msra.gmra.mrb[16].mxu1 %v21715_v35 }
 0xb2e   :  { %12621 = vmatpush1.bf16.msra.mxu1 %v17240_v4  ;;  %12652 = vmatprep.mubr.bf16.mxu1 %v21717_v36  ;;  %v17332_v4 = vld [vmem:[#allocation16 + $0x16dc] ss:$208 sps:$4 sm:$0xff]  }
 0xb2f   :  { %12622 = vmatprep.subr.bf16.mxu1 %v17245_v5  ;;  %v17330_v5 = vld [vmem:[#allocation16 + $0x16d8] ss:$208 sps:$4 sm:$0xff]  }
 0xb32   :  { %12623 = vmatpush1.bf16.msra.mxu1 %v17243_v6  ;;  %v17335_v6 = vld [vmem:[#allocation16 + $0x187c] ss:$208 sps:$4 sm:$0xff]  }
 0xb33   :  { %12624 = vmatprep.subr.bf16.mxu1 %v17248_v7  ;;  %v17333_v7 = vld [vmem:[#allocation16 + $0x1878] ss:$208 sps:$4 sm:$0xff]  }
 0xb36   :  { %12625 = vmatpush1.bf16.msra.mxu1 %v17246_v9  ;;  %v17338_v9 = vld [vmem:[#allocation16 + $0x24] ss:$208 sps:$4 sm:$0xff]  }
 0xb37   :  { %12626 = vmatprep.subr.bf16.mxu1 %v17251_v11  ;;  %v17336_v11 = vld [vmem:[#allocation16 + $0x20] ss:$208 sps:$4 sm:$0xff]  }
 0xb3a   :  { %12627 = vmatpush1.bf16.msra.mxu1 %v17249_v12  ;;  %v17341_v12 = vld [vmem:[#allocation16 + $0x1c4] ss:$208 sps:$4 sm:$0xff]  }
 0xb3b   :  { %12628 = vmatprep.subr.bf16.mxu1 %v17254_v14  ;;  %v17339_v14 = vld [vmem:[#allocation16 + $0x1c0] ss:$208 sps:$4 sm:$0xff]  }
 0xb3e   :  { %12629 = vmatpush1.bf16.msra.mxu1 %v17252_v15  ;;  %v17344_v15 = vld [vmem:[#allocation16 + $0x364] ss:$208 sps:$4 sm:$0xff]  }
 0xb3f   :  { %12630 = vmatprep.subr.bf16.mxu1 %v17257_v17  ;;  %v17342_v17 = vld [vmem:[#allocation16 + $0x360] ss:$208 sps:$4 sm:$0xff]  }
 0xb42   :  { %12631 = vmatpush1.bf16.msra.mxu1 %v17255_v18  ;;  %v17347_v18 = vld [vmem:[#allocation16 + $0x504] ss:$208 sps:$4 sm:$0xff]  }
 0xb43   :  { %12632 = vmatprep.subr.bf16.mxu1 %v17260_v19  ;;  %v17345_v19 = vld [vmem:[#allocation16 + $0x500] ss:$208 sps:$4 sm:$0xff]  }
 0xb46   :  { %12633 = vmatpush1.bf16.msra.mxu1 %v17258_v20  ;;  %v17350_v20 = vld [vmem:[#allocation16 + $0x6a4] ss:$208 sps:$4 sm:$0xff]  }
 0xb47   :  { %12634 = vmatprep.subr.bf16.mxu1 %v17263_v21  ;;  %v17348_v21 = vld [vmem:[#allocation16 + $0x6a0] ss:$208 sps:$4 sm:$0xff]  }
 0xb4a   :  { %12635 = vmatpush1.bf16.msra.mxu1 %v17261_v23  ;;  %v21733_v23 = vld [vmem:[%s21989_s13] sm:$0xff] }
 0xb4b   :  { %12636 = vmatprep.subr.bf16.mxu1 %v17266_v26  ;;  %v8106_v26 = vld [vmem:[%s21989_s13 + $0x30] sm:$0xf] }
 0xb4e   :  { %12637 = vmatpush1.bf16.msra.mxu1 %v17264_v27  ;;  %v17353_v27 = vld [vmem:[#allocation16 + $0x844] ss:$208 sps:$4 sm:$0xff]  }
 0xb4f   :  { %12638 = vmatprep.subr.bf16.mxu1 %v17269_v28  ;;  %v8117_v28 = vrot.slane %v21733_v23, %v21667_v8 }
 0xb52   :  { %12639 = vmatpush1.bf16.msra.mxu1 %v17267_v29  ;;  %v8309_v29 = vrot.slane %v8106_v26, %v21667_v8 }
 0xb53   :  { %12640 = vmatprep.subr.bf16.mxu1 %v17272_v30  ;;  %v17351_v30 = vld [vmem:[#allocation16 + $0x840] ss:$208 sps:$4 sm:$0xff]  }
 0xb56   :  { %12641 = vmatpush1.bf16.msra.mxu1 %v17270_v22  ;;  %v8121_v22 = vrot.slane %v21733_v23, %v21670_v10 }
 0xb57   :  { %12642 = vmatprep.subr.bf16.mxu1 %v17275_v25  ;;  %v8313_v25 = vrot.slane %v8106_v26, %v21670_v10  ;;  %v17399_v26 = vld [vmem:[#allocation16 + $0x848] ss:$208 sps:$4 sm:$0xff]  }
 0xb5a   :  { %12643 = vmatpush1.bf16.msra.mxu1 %v17273_v31  ;;  %v17356_v31 = vld [vmem:[#allocation16 + $0x9e4] ss:$208 sps:$4 sm:$0xff]  }
 0xb5b   :  { %12644 = vmatprep.subr.bf16.mxu1 %v17278_v32 }
 0xb5e   :  { %12645 = vmatpush1.bf16.msra.mxu1 %v17276_v16 }
 0xb5f   :  { %12646 = vmatprep.subr.bf16.mxu1 %v17281_v33 }
 0xb62   :  { %12647 = vmatpush1.bf16.msra.mxu1 %v17279_v34 }
 0xb63   :  { %12648 = vmatprep.subr.bf16.mxu1 %v17284_v37 }
 0xb66   :  { %12649 = vmatpush1.bf16.msra.mxu1 %v17282_v24 }
 0xb67   :  { %12650 = vmatprep.subr.bf16.mxu1 %v17287_v38 }
 0xb6a   :  { %12651 = vmatpush1.bf16.msra.mxu1 %v17285_v39 }
 0xb6b   :  { %12663 = vmatprep.subr.bf16.mxu1 %v17290_v40 }
 0xb6d   :  { %12653 = vmatmul.mubr.bf16.vlgmr.msra.gmra.mrb[20].mxu1 %v21715_v35 }
 0xb6e   :  { %12664 = vmatpush1.bf16.msra.mxu1 %v17288_v41  ;;  %12695 = vmatprep.mubr.bf16.mxu1 %v21717_v36 }
 0xb6f   :  { %12665 = vmatprep.subr.bf16.mxu1 %v17293_v42  ;;  %v17354_v42 = vld [vmem:[#allocation16 + $0x9e0] ss:$208 sps:$4 sm:$0xff]  }
 0xb72   :  { %12666 = vmatpush1.bf16.msra.mxu1 %v17291_v43 }
 0xb73   :  { %12667 = vmatprep.subr.bf16.mxu1 %v17296_v44 }
 0xb76   :  { %12668 = vmatpush1.bf16.msra.mxu1 %v17294_v45 }
 0xb77   :  { %12669 = vmatprep.subr.bf16.mxu1 %v17299_v46 }
 0xb7a   :  { %12670 = vmatpush1.bf16.msra.mxu1 %v17297_v47  ;;  %v17359_v47 = vld [vmem:[#allocation16 + $0xb84] ss:$208 sps:$4 sm:$0xff]  }
 0xb7b   :  { %12671 = vmatprep.subr.bf16.mxu1 %v17302_v48 }
 0xb7e   :  { %12672 = vmatpush1.bf16.msra.mxu1 %v17300_v49 }
 0xb7f   :  { %12673 = vmatprep.subr.bf16.mxu1 %v17305_v50  ;;  %v17357_v50 = vld [vmem:[#allocation16 + $0xb80] ss:$208 sps:$4 sm:$0xff]  }
 0xb82   :  { %12674 = vmatpush1.bf16.msra.mxu1 %v17303_v51  ;;  %v17362_v51 = vld [vmem:[#allocation16 + $0xd24] ss:$208 sps:$4 sm:$0xff]  }
 0xb83   :  { %12675 = vmatprep.subr.bf16.mxu1 %v17308_v52  ;;  %v17360_v52 = vld [vmem:[#allocation16 + $0xd20] ss:$208 sps:$4 sm:$0xff]  }
 0xb86   :  { %12676 = vmatpush1.bf16.msra.mxu1 %v17306_v53  ;;  %v17365_v53 = vld [vmem:[#allocation16 + $0xec4] ss:$208 sps:$4 sm:$0xff]  }
 0xb87   :  { %12677 = vmatprep.subr.bf16.mxu1 %v17311_v54  ;;  %v17363_v54 = vld [vmem:[#allocation16 + $0xec0] ss:$208 sps:$4 sm:$0xff]  }
 0xb8a   :  { %12678 = vmatpush1.bf16.msra.mxu1 %v17309_v55  ;;  %v17368_v55 = vld [vmem:[#allocation16 + $0x1064] ss:$208 sps:$4 sm:$0xff]  }
 0xb8b   :  { %12679 = vmatprep.subr.bf16.mxu1 %v17314_v56  ;;  %v17366_v56 = vld [vmem:[#allocation16 + $0x1060] ss:$208 sps:$4 sm:$0xff]  }
 0xb8e   :  { %12680 = vmatpush1.bf16.msra.mxu1 %v17312_v57  ;;  %v17371_v57 = vld [vmem:[#allocation16 + $0x1204] ss:$208 sps:$4 sm:$0xff]  }
 0xb8f   :  { %12681 = vmatprep.subr.bf16.mxu1 %v17317_v58  ;;  %v17369_v58 = vld [vmem:[#allocation16 + $0x1200] ss:$208 sps:$4 sm:$0xff]  }
 0xb92   :  { %12682 = vmatpush1.bf16.msra.mxu1 %v17315_v59  ;;  %v17374_v59 = vld [vmem:[#allocation16 + $0x13a4] ss:$208 sps:$4 sm:$0xff]  }
 0xb93   :  { %12683 = vmatprep.subr.bf16.mxu1 %v17320_v60  ;;  %v17372_v60 = vld [vmem:[#allocation16 + $0x13a0] ss:$208 sps:$4 sm:$0xff]  }
 0xb96   :  { %12684 = vmatpush1.bf16.msra.mxu1 %v17318_v61  ;;  %v17377_v61 = vld [vmem:[#allocation16 + $0x1544] ss:$208 sps:$4 sm:$0xff]  }
 0xb97   :  { %12685 = vmatprep.subr.bf16.mxu1 %v17323_v62  ;;  %v17375_v62 = vld [vmem:[#allocation16 + $0x1540] ss:$208 sps:$4 sm:$0xff]  }
 0xb9a   :  { %12686 = vmatpush1.bf16.msra.mxu1 %v17321_v63  ;;  %v17380_v63 = vld [vmem:[#allocation16 + $0x16e4] ss:$208 sps:$4 sm:$0xff]  }
 0xb9b   :  { %12687 = vmatprep.subr.bf16.mxu1 %v17326_v0  ;;  %v17378_v0 = vld [vmem:[#allocation16 + $0x16e0] ss:$208 sps:$4 sm:$0xff]  }
 0xb9e   :  { %12688 = vmatpush1.bf16.msra.mxu1 %v17324_v1  ;;  %v17383_v1 = vld [vmem:[#allocation16 + $0x1884] ss:$208 sps:$4 sm:$0xff]  }
 0xb9f   :  { %12689 = vmatprep.subr.bf16.mxu1 %v17329_v2  ;;  %v17381_v2 = vld [vmem:[#allocation16 + $0x1880] ss:$208 sps:$4 sm:$0xff]  }
 0xba2   :  { %12690 = vmatpush1.bf16.msra.mxu1 %v17327_v3  ;;  %v17386_v3 = vld [vmem:[#allocation16 + $0x2c] ss:$208 sps:$4 sm:$0xff]  }
 0xba3   :  { %12691 = vmatprep.subr.bf16.mxu1 %v17332_v4  ;;  %v17384_v4 = vld [vmem:[#allocation16 + $0x28] ss:$208 sps:$4 sm:$0xff]  }
 0xba6   :  { %12692 = vmatpush1.bf16.msra.mxu1 %v17330_v5  ;;  %v17389_v5 = vld [vmem:[#allocation16 + $0x1cc] ss:$208 sps:$4 sm:$0xff]  }
 0xba7   :  { %12693 = vmatprep.subr.bf16.mxu1 %v17335_v6  ;;  %v17387_v6 = vld [vmem:[#allocation16 + $0x1c8] ss:$208 sps:$4 sm:$0xff]  }
 0xbaa   :  { %12694 = vmatpush1.bf16.msra.mxu1 %v17333_v7  ;;  %v17392_v7 = vld [vmem:[#allocation16 + $0x36c] ss:$208 sps:$4 sm:$0xff]  }
 0xbab   :  { %12706 = vmatprep.subr.bf16.mxu1 %v17338_v9  ;;  %v17390_v9 = vld [vmem:[#allocation16 + $0x368] ss:$208 sps:$4 sm:$0xff]  }
 0xbad   :  { %12696 = vmatmul.mubr.bf16.vlgmr.msra.gmra.mrb[24].mxu1 %v21715_v35 }
 0xbae   :  { %12707 = vmatpush1.bf16.msra.mxu1 %v17336_v11  ;;  %12738 = vmatprep.mubr.bf16.mxu1 %v21717_v36  ;;  %v17395_v11 = vld [vmem:[#allocation16 + $0x50c] ss:$208 sps:$4 sm:$0xff]  }
 0xbaf   :  { %12708 = vmatprep.subr.bf16.mxu1 %v17341_v12  ;;  %v17393_v12 = vld [vmem:[#allocation16 + $0x508] ss:$208 sps:$4 sm:$0xff]  }
 0xbb2   :  { %12709 = vmatpush1.bf16.msra.mxu1 %v17339_v14  ;;  %v17398_v14 = vld [vmem:[#allocation16 + $0x6ac] ss:$208 sps:$4 sm:$0xff]  }
 0xbb3   :  { %12710 = vmatprep.subr.bf16.mxu1 %v17344_v15  ;;  %v21747_v15 = vsub.s32 2, %v18917_v13 }
 0xbb6   :  { %12711 = vmatpush1.bf16.msra.mxu1 %v17342_v17  ;;  %v17396_v17 = vld [vmem:[#allocation16 + $0x6a8] ss:$208 sps:$4 sm:$0xff]  }
 0xbb7   :  { %12712 = vmatprep.subr.bf16.mxu1 %v17347_v18  ;;  %v21750_v18 = vsub.s32 3, %v18917_v13 }
 0xbba   :  { %12713 = vmatpush1.bf16.msra.mxu1 %v17345_v19  ;;  %v17401_v19 = vld [vmem:[#allocation16 + $0x84c] ss:$208 sps:$4 sm:$0xff]  }
 0xbbb   :  { %12714 = vmatprep.subr.bf16.mxu1 %v17350_v20  ;;  %v8125_v20 = vrot.slane %v21733_v23, %v21747_v15 }
 0xbbe   :  { %12715 = vmatpush1.bf16.msra.mxu1 %v17348_v21  ;;  %v8129_v21 = vrot.slane %v21733_v23, %v21750_v18 }
 0xbbf   :  { %12716 = vmatprep.subr.bf16.mxu1 %v17353_v27  ;;  %v17404_v27 = vld [vmem:[#allocation16 + $0x9ec] ss:$208 sps:$4 sm:$0xff]  }
 0xbc0   :  { %v12568_v32 = vpop.f32.mrb[12].mxu1  ;;  %v13600_v16 = vpop.f32.mrb[4].mxu0 }
 0xbc1   :  { %v12569_v33 = vadd.f32 %v12568_v32, %v8117_v28  ;;  %v13601_v34 = vadd.f32 %v13600_v16, %v8309_v29  ;;  %v12570_v37 = vpop.f32.mrb[13].mxu1  ;;  %v13602_v24 = vpop.f32.mrb[5].mxu0 }
 0xbc2   :  { %v12571_v38 = vadd.f32 %v12570_v37, %v8121_v22  ;;  %12717 = vmatpush1.bf16.msra.mxu1 %v17351_v30  ;;  %v13603_v39 = vadd.f32 %v13602_v24, %v8313_v25  ;;  %v12572_v40 = vpop.f32.mrb[14].mxu1  ;;  %v13604_v41 = vpop.f32.mrb[6].mxu0  ;;  %v17405_v37 = vld [vmem:[#allocation16 + $0xb88] ss:$208 sps:$4 sm:$0xff]   ;;  %v17410_v24 = vld [vmem:[#allocation16 + $0xd2c] ss:$208 sps:$4 sm:$0xff]  }
 0xbc3   :  { %13652 = vst [vmem:[#allocation21] sm:$0xff] %v12569_v33  ;;  %13700 = vst [vmem:[#allocation21 + $0x180] sm:$0xff] %v13601_v34  ;;  %v12573_v43 = vadd.f32 %v12572_v40, %v8117_v28  ;;  %v13605_v44 = vadd.f32 %v13604_v41, %v8309_v29  ;;  %v12574_v45 = vpop.f32.mrb[15].mxu1  ;;  %v13606_v46 = vpop.f32.mrb[7].mxu0  ;;  %12718 = vmatprep.subr.bf16.mxu1 %v17356_v31  ;;  %v17402_v31 = vld [vmem:[#allocation16 + $0x9e8] ss:$208 sps:$4 sm:$0xff]  }
 0xbc4   :  { %13653 = vst [vmem:[#allocation21 + $0x8] sm:$0xff] %v12571_v38  ;;  %13701 = vst [vmem:[#allocation21 + $0x188] sm:$0xff] %v13603_v39  ;;  %v12575_v48 = vadd.f32 %v12574_v45, %v8121_v22  ;;  %v13607_v49 = vadd.f32 %v13606_v46, %v8313_v25  ;;  %v17407_v33 = vld [vmem:[#allocation16 + $0xb8c] ss:$208 sps:$4 sm:$0xff]   ;;  %v17408_v38 = vld [vmem:[#allocation16 + $0xd28] ss:$208 sps:$4 sm:$0xff]  }
 0xbc5   :  { %13705 = vst [vmem:[#allocation21 + $0x1a0] sm:$0xff] %v12573_v43  ;;  %13753 = vst [vmem:[#allocation21 + $0x320] sm:$0xff] %v13605_v44  ;;  %v17413_v39 = vld [vmem:[#allocation16 + $0xecc] ss:$208 sps:$4 sm:$0xff]   ;;  %v17411_v40 = vld [vmem:[#allocation16 + $0xec8] ss:$208 sps:$4 sm:$0xff]  }
 0xbc6   :  { %13706 = vst [vmem:[#allocation21 + $0x1a8] sm:$0xff] %v12575_v48  ;;  %13754 = vst [vmem:[#allocation21 + $0x328] sm:$0xff] %v13607_v49  ;;  %12719 = vmatpush1.bf16.msra.mxu1 %v17354_v42  ;;  %v17416_v41 = vld [vmem:[#allocation16 + $0x106c] ss:$208 sps:$4 sm:$0xff]   ;;  %v17414_v42 = vld [vmem:[#allocation16 + $0x1068] ss:$208 sps:$4 sm:$0xff]  }
 0xbc7   :  { %12720 = vmatprep.subr.bf16.mxu1 %v17359_v47  ;;  %v17419_v43 = vld [vmem:[#allocation16 + $0x120c] ss:$208 sps:$4 sm:$0xff]   ;;  %v17417_v44 = vld [vmem:[#allocation16 + $0x1208] ss:$208 sps:$4 sm:$0xff]  }
 0xbc8   :  { %v17422_v45 = vld [vmem:[#allocation16 + $0x13ac] ss:$208 sps:$4 sm:$0xff]   ;;  %v17420_v46 = vld [vmem:[#allocation16 + $0x13a8] ss:$208 sps:$4 sm:$0xff]  }
 0xbc9   :  { %v17425_v47 = vld [vmem:[#allocation16 + $0x154c] ss:$208 sps:$4 sm:$0xff]   ;;  %v17423_v48 = vld [vmem:[#allocation16 + $0x1548] ss:$208 sps:$4 sm:$0xff]  }
 0xbca   :  { %12721 = vmatpush1.bf16.msra.mxu1 %v17357_v50  ;;  %v17428_v49 = vld [vmem:[#allocation16 + $0x16ec] ss:$208 sps:$4 sm:$0xff]   ;;  %v17426_v50 = vld [vmem:[#allocation16 + $0x16e8] ss:$208 sps:$4 sm:$0xff]  }
 0xbcb   :  { %12722 = vmatprep.subr.bf16.mxu1 %v17362_v51  ;;  %v17431_v51 = vld [vmem:[#allocation16 + $0x188c] ss:$208 sps:$4 sm:$0xff]  }
 0xbce   :  { %12723 = vmatpush1.bf16.msra.mxu1 %v17360_v52  ;;  %v17429_v52 = vld [vmem:[#allocation16 + $0x1888] ss:$208 sps:$4 sm:$0xff]  }
 0xbcf   :  { %12724 = vmatprep.subr.bf16.mxu1 %v17365_v53  ;;  %v17434_v53 = vld [vmem:[#allocation16 + $0x34] ss:$208 sps:$4 sm:$0xff]  }
 0xbd2   :  { %12725 = vmatpush1.bf16.msra.mxu1 %v17363_v54  ;;  %v17432_v54 = vld [vmem:[#allocation16 + $0x30] ss:$208 sps:$4 sm:$0xff]  }
 0xbd3   :  { %12726 = vmatprep.subr.bf16.mxu1 %v17368_v55  ;;  %v17437_v55 = vld [vmem:[#allocation16 + $0x1d4] ss:$208 sps:$4 sm:$0xff]  }
 0xbd6   :  { %12727 = vmatpush1.bf16.msra.mxu1 %v17366_v56  ;;  %v17435_v56 = vld [vmem:[#allocation16 + $0x1d0] ss:$208 sps:$4 sm:$0xff]  }
 0xbd7   :  { %12728 = vmatprep.subr.bf16.mxu1 %v17371_v57  ;;  %v17440_v57 = vld [vmem:[#allocation16 + $0x374] ss:$208 sps:$4 sm:$0xff]  }
 0xbda   :  { %12729 = vmatpush1.bf16.msra.mxu1 %v17369_v58  ;;  %v17438_v58 = vld [vmem:[#allocation16 + $0x370] ss:$208 sps:$4 sm:$0xff]  }
 0xbdb   :  { %12730 = vmatprep.subr.bf16.mxu1 %v17374_v59  ;;  %v17443_v59 = vld [vmem:[#allocation16 + $0x514] ss:$208 sps:$4 sm:$0xff]  }
 0xbde   :  { %12731 = vmatpush1.bf16.msra.mxu1 %v17372_v60  ;;  %v17441_v60 = vld [vmem:[#allocation16 + $0x510] ss:$208 sps:$4 sm:$0xff]  }
 0xbdf   :  { %12732 = vmatprep.subr.bf16.mxu1 %v17377_v61  ;;  %v17446_v61 = vld [vmem:[#allocation16 + $0x6b4] ss:$208 sps:$4 sm:$0xff]  }
 0xbe2   :  { %12733 = vmatpush1.bf16.msra.mxu1 %v17375_v62  ;;  %v21759_v62 = vsub.s32 4, %v18917_v13 }
 0xbe3   :  { %12734 = vmatprep.subr.bf16.mxu1 %v17380_v63  ;;  %v17444_v63 = vld [vmem:[#allocation16 + $0x6b0] ss:$208 sps:$4 sm:$0xff]  }
 0xbe6   :  { %12735 = vmatpush1.bf16.msra.mxu1 %v17378_v0  ;;  %v21762_v0 = vsub.s32 5, %v18917_v13 }
 0xbe7   :  { %12736 = vmatprep.subr.bf16.mxu1 %v17383_v1  ;;  %v17449_v1 = vld [vmem:[#allocation16 + $0x854] ss:$208 sps:$4 sm:$0xff]  }
 0xbea   :  { %12737 = vmatpush1.bf16.msra.mxu1 %v17381_v2  ;;  %v8133_v2 = vrot.slane %v21733_v23, %v21759_v62 }
 0xbeb   :  { %12749 = vmatprep.subr.bf16.mxu1 %v17386_v3  ;;  %v8137_v3 = vrot.slane %v21733_v23, %v21762_v0 }
 0xbed   :  { %12739 = vmatmul.mubr.bf16.vlgmr.msra.gmra.mrb[28].mxu1 %v21715_v35 }
 0xbee   :  { %12750 = vmatpush1.bf16.msra.mxu1 %v17384_v4  ;;  %12781 = vmatprep.mubr.bf16.mxu1 %v21717_v36  ;;  %v17447_v4 = vld [vmem:[#allocation16 + $0x850] ss:$208 sps:$4 sm:$0xff]  }
 0xbef   :  { %12751 = vmatprep.subr.bf16.mxu1 %v17389_v5  ;;  %v17452_v5 = vld [vmem:[#allocation16 + $0x9f4] ss:$208 sps:$4 sm:$0xff]  }
 0xbf2   :  { %12752 = vmatpush1.bf16.msra.mxu1 %v17387_v6 }
 0xbf3   :  { %12753 = vmatprep.subr.bf16.mxu1 %v17392_v7 }
 0xbf6   :  { %12754 = vmatpush1.bf16.msra.mxu1 %v17390_v9 }
 0xbf7   :  { %12755 = vmatprep.subr.bf16.mxu1 %v17395_v11 }
 0xbfa   :  { %12756 = vmatpush1.bf16.msra.mxu1 %v17393_v12 }
 0xbfb   :  { %12757 = vmatprep.subr.bf16.mxu1 %v17398_v14  ;;  %v17450_v14 = vld [vmem:[#allocation16 + $0x9f0] ss:$208 sps:$4 sm:$0xff]  }
 0xbfe   :  { %12758 = vmatpush1.bf16.msra.mxu1 %v17396_v17 }
 0xbff   :  { %12759 = vmatprep.subr.bf16.mxu1 %v17401_v19 }
 0xc00   :  { %v12611_v28 = vpop.f32.mrb[16].mxu1 }
 0xc01   :  { %v12612_v29 = vadd.f32 %v12611_v28, %v8125_v20  ;;  %v12613_v30 = vpop.f32.mrb[17].mxu1  ;;  %v17456_v28 = vld [vmem:[#allocation16 + $0xd30] ss:$208 sps:$4 sm:$0xff]  }
 0xc02   :  { %v12614_v22 = vadd.f32 %v12613_v30, %v8129_v21  ;;  %v12615_v25 = vpop.f32.mrb[18].mxu1  ;;  %12760 = vmatpush1.bf16.msra.mxu1 %v17399_v26  ;;  %v17453_v26 = vld [vmem:[#allocation16 + $0xb90] ss:$208 sps:$4 sm:$0xff]  }
 0xc03   :  { %13654 = vst [vmem:[#allocation21 + $0x10] sm:$0xff] %v12612_v29  ;;  %v12616_v32 = vadd.f32 %v12615_v25, %v8125_v20  ;;  %v12617_v16 = vpop.f32.mrb[19].mxu1  ;;  %12761 = vmatprep.subr.bf16.mxu1 %v17404_v27  ;;  %v17455_v20 = vld [vmem:[#allocation16 + $0xb94] ss:$208 sps:$4 sm:$0xff]   ;;  %v17459_v30 = vld [vmem:[#allocation16 + $0xed0] ss:$208 sps:$4 sm:$0xff]  }
 0xc04   :  { %13655 = vst [vmem:[#allocation21 + $0x18] sm:$0xff] %v12614_v22  ;;  %v12618_v34 = vadd.f32 %v12617_v16, %v8129_v21  ;;  %v17458_v27 = vld [vmem:[#allocation16 + $0xd34] ss:$208 sps:$4 sm:$0xff]   ;;  %v17462_v25 = vld [vmem:[#allocation16 + $0x1070] ss:$208 sps:$4 sm:$0xff]  }
 0xc05   :  { %13707 = vst [vmem:[#allocation21 + $0x1b0] sm:$0xff] %v12616_v32  ;;  %v17461_v29 = vld [vmem:[#allocation16 + $0xed4] ss:$208 sps:$4 sm:$0xff]   ;;  %v17465_v32 = vld [vmem:[#allocation16 + $0x1210] ss:$208 sps:$4 sm:$0xff]  }
 0xc06   :  { %13708 = vst [vmem:[#allocation21 + $0x1b8] sm:$0xff] %v12618_v34  ;;  %12762 = vmatpush1.bf16.msra.mxu1 %v17402_v31  ;;  %v17464_v22 = vld [vmem:[#allocation16 + $0x1074] ss:$208 sps:$4 sm:$0xff]  }
 0xc07   :  { %12763 = vmatprep.subr.bf16.mxu1 %v17407_v33  ;;  %v17467_v31 = vld [vmem:[#allocation16 + $0x1214] ss:$208 sps:$4 sm:$0xff]   ;;  %v17468_v33 = vld [vmem:[#allocation16 + $0x13b0] ss:$208 sps:$4 sm:$0xff]  }
 0xc08   :  { %v17470_v16 = vld [vmem:[#allocation16 + $0x13b4] ss:$208 sps:$4 sm:$0xff]  }
 0xc09   :  { %v17473_v34 = vld [vmem:[#allocation16 + $0x1554] ss:$208 sps:$4 sm:$0xff]  }
 0xc0a   :  { %12764 = vmatpush1.bf16.msra.mxu1 %v17405_v37  ;;  %v17471_v37 = vld [vmem:[#allocation16 + $0x1550] ss:$208 sps:$4 sm:$0xff]  }
 0xc0b   :  { %12765 = vmatprep.subr.bf16.mxu1 %v17410_v24  ;;  %v17476_v24 = vld [vmem:[#allocation16 + $0x16f4] ss:$208 sps:$4 sm:$0xff]  }
 0xc0e   :  { %12766 = vmatpush1.bf16.msra.mxu1 %v17408_v38  ;;  %v17474_v38 = vld [vmem:[#allocation16 + $0x16f0] ss:$208 sps:$4 sm:$0xff]  }
 0xc0f   :  { %12767 = vmatprep.subr.bf16.mxu1 %v17413_v39  ;;  %v17479_v39 = vld [vmem:[#allocation16 + $0x1894] ss:$208 sps:$4 sm:$0xff]  }
 0xc12   :  { %12768 = vmatpush1.bf16.msra.mxu1 %v17411_v40  ;;  %v17477_v40 = vld [vmem:[#allocation16 + $0x1890] ss:$208 sps:$4 sm:$0xff]  }
 0xc13   :  { %12769 = vmatprep.subr.bf16.mxu1 %v17416_v41  ;;  %v17482_v41 = vld [vmem:[#allocation16 + $0x3c] ss:$208 sps:$4 sm:$0xff]  }
 0xc16   :  { %12770 = vmatpush1.bf16.msra.mxu1 %v17414_v42  ;;  %v17480_v42 = vld [vmem:[#allocation16 + $0x38] ss:$208 sps:$4 sm:$0xff]  }
 0xc17   :  { %12771 = vmatprep.subr.bf16.mxu1 %v17419_v43  ;;  %v17485_v43 = vld [vmem:[#allocation16 + $0x1dc] ss:$208 sps:$4 sm:$0xff]  }
 0xc1a   :  { %12772 = vmatpush1.bf16.msra.mxu1 %v17417_v44  ;;  %v17483_v44 = vld [vmem:[#allocation16 + $0x1d8] ss:$208 sps:$4 sm:$0xff]  }
 0xc1b   :  { %12773 = vmatprep.subr.bf16.mxu1 %v17422_v45  ;;  %v17488_v45 = vld [vmem:[#allocation16 + $0x37c] ss:$208 sps:$4 sm:$0xff]  }
 0xc1e   :  { %12774 = vmatpush1.bf16.msra.mxu1 %v17420_v46  ;;  %v17486_v46 = vld [vmem:[#allocation16 + $0x378] ss:$208 sps:$4 sm:$0xff]  }
 0xc1f   :  { %12775 = vmatprep.subr.bf16.mxu1 %v17425_v47  ;;  %v17491_v47 = vld [vmem:[#allocation16 + $0x51c] ss:$208 sps:$4 sm:$0xff]  }
 0xc22   :  { %12776 = vmatpush1.bf16.msra.mxu1 %v17423_v48  ;;  %v17489_v48 = vld [vmem:[#allocation16 + $0x518] ss:$208 sps:$4 sm:$0xff]  }
 0xc23   :  { %12777 = vmatprep.subr.bf16.mxu1 %v17428_v49  ;;  %v17494_v49 = vld [vmem:[#allocation16 + $0x6bc] ss:$208 sps:$4 sm:$0xff]  }
 0xc26   :  { %12778 = vmatpush1.bf16.msra.mxu1 %v17426_v50  ;;  %v21771_v50 = vsub.s32 6, %v18917_v13 }
 0xc27   :  { %12779 = vmatprep.subr.bf16.mxu1 %v17431_v51  ;;  %v17492_v51 = vld [vmem:[#allocation16 + $0x6b8] ss:$208 sps:$4 sm:$0xff]  }
 0xc2a   :  { %12780 = vmatpush1.bf16.msra.mxu1 %v17429_v52  ;;  %v21774_v52 = vsub.s32 7, %v18917_v13  ;;  %v17498_v13 = vld [vmem:[#allocation16 + $0x9f8] ss:$208 sps:$4 sm:$0xff]  }
 0xc2b   :  { %12792 = vmatprep.subr.bf16.mxu1 %v17434_v53  ;;  %v17497_v53 = vld [vmem:[#allocation16 + $0x85c] ss:$208 sps:$4 sm:$0xff]  }
 0xc2d   :  { %12782 = vmatmul.mubr.bf16.vlgmr.msra.gmra.mrb[32].mxu1 %v21715_v35 }
 0xc2e   :  { %12793 = vmatpush1.bf16.msra.mxu1 %v17432_v54  ;;  %12824 = vmatprep.mubr.bf16.mxu1 %v21717_v36  ;;  %v8141_v54 = vrot.slane %v21733_v23, %v21771_v50 }
 0xc2f   :  { %12794 = vmatprep.subr.bf16.mxu1 %v17437_v55  ;;  %v8145_v55 = vrot.slane %v21733_v23, %v21774_v52  ;;  %v17501_v23 = vld [vmem:[#allocation16 + $0xb98] ss:$208 sps:$4 sm:$0xff]  }
 0xc32   :  { %12795 = vmatpush1.bf16.msra.mxu1 %v17435_v56  ;;  %v17495_v56 = vld [vmem:[#allocation16 + $0x858] ss:$208 sps:$4 sm:$0xff]  }
 0xc33   :  { %12796 = vmatprep.subr.bf16.mxu1 %v17440_v57  ;;  %v17500_v57 = vld [vmem:[#allocation16 + $0x9fc] ss:$208 sps:$4 sm:$0xff]  }
 0xc36   :  { %12797 = vmatpush1.bf16.msra.mxu1 %v17438_v58 }
 0xc37   :  { %12798 = vmatprep.subr.bf16.mxu1 %v17443_v59 }
 0xc3a   :  { %12799 = vmatpush1.bf16.msra.mxu1 %v17441_v60 }
 0xc3b   :  { %12800 = vmatprep.subr.bf16.mxu1 %v17446_v61 }
 0xc3e   :  { %12801 = vmatpush1.bf16.msra.mxu1 %v17444_v63 }
 0xc3f   :  { %12802 = vmatprep.subr.bf16.mxu1 %v17449_v1 }
 0xc40   :  { %v12654_v6 = vpop.f32.mrb[20].mxu1 }
 0xc41   :  { %v12655_v7 = vadd.f32 %v12654_v6, %v8133_v2  ;;  %v12656_v9 = vpop.f32.mrb[21].mxu1  ;;  %v17504_v6 = vld [vmem:[#allocation16 + $0xd38] ss:$208 sps:$4 sm:$0xff]  }
 0xc42   :  { %v12657_v11 = vadd.f32 %v12656_v9, %v8137_v3  ;;  %v12658_v12 = vpop.f32.mrb[22].mxu1  ;;  %12803 = vmatpush1.bf16.msra.mxu1 %v17447_v4  ;;  %v17507_v9 = vld [vmem:[#allocation16 + $0xed8] ss:$208 sps:$4 sm:$0xff]  }
 0xc43   :  { %13656 = vst [vmem:[#allocation21 + $0x20] sm:$0xff] %v12655_v7  ;;  %v12659_v17 = vadd.f32 %v12658_v12, %v8133_v2  ;;  %v12660_v19 = vpop.f32.mrb[23].mxu1  ;;  %12804 = vmatprep.subr.bf16.mxu1 %v17452_v5  ;;  %v17506_v5 = vld [vmem:[#allocation16 + $0xd3c] ss:$208 sps:$4 sm:$0xff]   ;;  %v17510_v12 = vld [vmem:[#allocation16 + $0x1078] ss:$208 sps:$4 sm:$0xff]  }
 0xc44   :  { %13657 = vst [vmem:[#allocation21 + $0x28] sm:$0xff] %v12657_v11  ;;  %v12661_v21 = vadd.f32 %v12660_v19, %v8137_v3  ;;  %v17503_v3 = vld [vmem:[#allocation16 + $0xb9c] ss:$208 sps:$4 sm:$0xff]  }
 0xc45   :  { %13709 = vst [vmem:[#allocation21 + $0x1c0] sm:$0xff] %v12659_v17  ;;  %v17509_v7 = vld [vmem:[#allocation16 + $0xedc] ss:$208 sps:$4 sm:$0xff]   ;;  %v17513_v17 = vld [vmem:[#allocation16 + $0x1218] ss:$208 sps:$4 sm:$0xff]  }
 0xc46   :  { %13710 = vst [vmem:[#allocation21 + $0x1c8] sm:$0xff] %v12661_v21  ;;  %12805 = vmatpush1.bf16.msra.mxu1 %v17450_v14  ;;  %v17512_v11 = vld [vmem:[#allocation16 + $0x107c] ss:$208 sps:$4 sm:$0xff]  }
 0xc47   :  { %12806 = vmatprep.subr.bf16.mxu1 %v17455_v20  ;;  %v17515_v14 = vld [vmem:[#allocation16 + $0x121c] ss:$208 sps:$4 sm:$0xff]   ;;  %v17516_v20 = vld [vmem:[#allocation16 + $0x13b8] ss:$208 sps:$4 sm:$0xff]  }
 0xc48   :  { %v17518_v19 = vld [vmem:[#allocation16 + $0x13bc] ss:$208 sps:$4 sm:$0xff]  }
 0xc49   :  { %v17521_v21 = vld [vmem:[#allocation16 + $0x155c] ss:$208 sps:$4 sm:$0xff]  }
 0xc4a   :  { %12807 = vmatpush1.bf16.msra.mxu1 %v17453_v26  ;;  %v17519_v26 = vld [vmem:[#allocation16 + $0x1558] ss:$208 sps:$4 sm:$0xff]  }
 0xc4b   :  { %12808 = vmatprep.subr.bf16.mxu1 %v17458_v27  ;;  %v17524_v27 = vld [vmem:[#allocation16 + $0x16fc] ss:$208 sps:$4 sm:$0xff]  }
 0xc4e   :  { %12809 = vmatpush1.bf16.msra.mxu1 %v17456_v28  ;;  %v17522_v28 = vld [vmem:[#allocation16 + $0x16f8] ss:$208 sps:$4 sm:$0xff]  }
 0xc4f   :  { %12810 = vmatprep.subr.bf16.mxu1 %v17461_v29  ;;  %v17527_v29 = vld [vmem:[#allocation16 + $0x189c] ss:$208 sps:$4 sm:$0xff]  }
 0xc52   :  { %12811 = vmatpush1.bf16.msra.mxu1 %v17459_v30  ;;  %v17525_v30 = vld [vmem:[#allocation16 + $0x1898] ss:$208 sps:$4 sm:$0xff]  }
 0xc53   :  { %12812 = vmatprep.subr.bf16.mxu1 %v17464_v22  ;;  %v17530_v22 = vld [vmem:[#allocation16 + $0x44] ss:$208 sps:$4 sm:$0xff]  }
 0xc56   :  { %12813 = vmatpush1.bf16.msra.mxu1 %v17462_v25  ;;  %v17528_v25 = vld [vmem:[#allocation16 + $0x40] ss:$208 sps:$4 sm:$0xff]  }
 0xc57   :  { %12814 = vmatprep.subr.bf16.mxu1 %v17467_v31  ;;  %v17533_v31 = vld [vmem:[#allocation16 + $0x1e4] ss:$208 sps:$4 sm:$0xff]  }
 0xc5a   :  { %12815 = vmatpush1.bf16.msra.mxu1 %v17465_v32  ;;  %v17531_v32 = vld [vmem:[#allocation16 + $0x1e0] ss:$208 sps:$4 sm:$0xff]  }
 0xc5b   :  { %12816 = vmatprep.subr.bf16.mxu1 %v17470_v16  ;;  %v17536_v16 = vld [vmem:[#allocation16 + $0x384] ss:$208 sps:$4 sm:$0xff]  }
 0xc5e   :  { %12817 = vmatpush1.bf16.msra.mxu1 %v17468_v33  ;;  %v17534_v33 = vld [vmem:[#allocation16 + $0x380] ss:$208 sps:$4 sm:$0xff]  }
 0xc5f   :  { %12818 = vmatprep.subr.bf16.mxu1 %v17473_v34  ;;  %v17539_v34 = vld [vmem:[#allocation16 + $0x524] ss:$208 sps:$4 sm:$0xff]  }
 0xc62   :  { %12819 = vmatpush1.bf16.msra.mxu1 %v17471_v37  ;;  %v17537_v37 = vld [vmem:[#allocation16 + $0x520] ss:$208 sps:$4 sm:$0xff]  }
 0xc63   :  { %12820 = vmatprep.subr.bf16.mxu1 %v17476_v24  ;;  %v17542_v24 = vld [vmem:[#allocation16 + $0x6c4] ss:$208 sps:$4 sm:$0xff]  }
 0xc66   :  { %12821 = vmatpush1.bf16.msra.mxu1 %v17474_v38  ;;  %v17540_v38 = vld [vmem:[#allocation16 + $0x6c0] ss:$208 sps:$4 sm:$0xff]  }
 0xc67   :  { %12822 = vmatprep.subr.bf16.mxu1 %v17479_v39  ;;  %v21785_v39 = vld [vmem:[%s21989_s13 + $0x8] sm:$0xff] }
 0xc6a   :  { %12823 = vmatpush1.bf16.msra.mxu1 %v17477_v40  ;;  %v17545_v40 = vld [vmem:[#allocation16 + $0x864] ss:$208 sps:$4 sm:$0xff]  }
 0xc6b   :  { %12835 = vmatprep.subr.bf16.mxu1 %v17482_v41  ;;  %v8149_v41 = vrot.slane %v21785_v39, %v21667_v8 }
 0xc6d   :  { %12825 = vmatmul.mubr.bf16.vlgmr.msra.gmra.mrb[36].mxu1 %v21715_v35 }
 0xc6e   :  { %12836 = vmatpush1.bf16.msra.mxu1 %v17480_v42  ;;  %12867 = vmatprep.mubr.bf16.mxu1 %v21717_v36  ;;  %v8153_v42 = vrot.slane %v21785_v39, %v21670_v10 }
 0xc6f   :  { %12837 = vmatprep.subr.bf16.mxu1 %v17485_v43  ;;  %v17543_v43 = vld [vmem:[#allocation16 + $0x860] ss:$208 sps:$4 sm:$0xff]  }
 0xc72   :  { %12838 = vmatpush1.bf16.msra.mxu1 %v17483_v44  ;;  %v17548_v44 = vld [vmem:[#allocation16 + $0xa04] ss:$208 sps:$4 sm:$0xff]  }
 0xc73   :  { %12839 = vmatprep.subr.bf16.mxu1 %v17488_v45 }
 0xc76   :  { %12840 = vmatpush1.bf16.msra.mxu1 %v17486_v46 }
 0xc77   :  { %12841 = vmatprep.subr.bf16.mxu1 %v17491_v47 }
 0xc7a   :  { %12842 = vmatpush1.bf16.msra.mxu1 %v17489_v48 }
 0xc7b   :  { %12843 = vmatprep.subr.bf16.mxu1 %v17494_v49 }
 0xc7e   :  { %12844 = vmatpush1.bf16.msra.mxu1 %v17492_v51  ;;  %v17546_v51 = vld [vmem:[#allocation16 + $0xa00] ss:$208 sps:$4 sm:$0xff]  }
 0xc7f   :  { %12845 = vmatprep.subr.bf16.mxu1 %v17497_v53 }
 0xc80   :  { %v12697_v58 = vpop.f32.mrb[24].mxu1 }
 0xc81   :  { %v12698_v59 = vadd.f32 %v12697_v58, %v8141_v54  ;;  %v12699_v60 = vpop.f32.mrb[25].mxu1  ;;  %v17554_v58 = vld [vmem:[#allocation16 + $0xd44] ss:$208 sps:$4 sm:$0xff]  }
 0xc82   :  { %v12700_v61 = vadd.f32 %v12699_v60, %v8145_v55  ;;  %v12701_v63 = vpop.f32.mrb[26].mxu1  ;;  %12846 = vmatpush1.bf16.msra.mxu1 %v17495_v56  ;;  %v17557_v60 = vld [vmem:[#allocation16 + $0xee4] ss:$208 sps:$4 sm:$0xff]  }
 0xc83   :  { %13658 = vst [vmem:[#allocation21 + $0x30] sm:$0xff] %v12698_v59  ;;  %v12702_v1 = vadd.f32 %v12701_v63, %v8141_v54  ;;  %v12703_v2 = vpop.f32.mrb[27].mxu1  ;;  %12847 = vmatprep.subr.bf16.mxu1 %v17500_v57  ;;  %v17549_v57 = vld [vmem:[#allocation16 + $0xba0] ss:$208 sps:$4 sm:$0xff]   ;;  %v17560_v63 = vld [vmem:[#allocation16 + $0x1084] ss:$208 sps:$4 sm:$0xff]  }
 0xc84   :  { %13659 = vst [vmem:[#allocation21 + $0x38] sm:$0xff] %v12700_v61  ;;  %v12704_v4 = vadd.f32 %v12703_v2, %v8145_v55  ;;  %v17551_v55 = vld [vmem:[#allocation16 + $0xba4] ss:$208 sps:$4 sm:$0xff]   ;;  %v17552_v59 = vld [vmem:[#allocation16 + $0xd40] ss:$208 sps:$4 sm:$0xff]  }
 0xc85   :  { %13711 = vst [vmem:[#allocation21 + $0x1d0] sm:$0xff] %v12702_v1  ;;  %v17555_v61 = vld [vmem:[#allocation16 + $0xee0] ss:$208 sps:$4 sm:$0xff]   ;;  %v17563_v1 = vld [vmem:[#allocation16 + $0x1224] ss:$208 sps:$4 sm:$0xff]  }
 0xc86   :  { %13712 = vst [vmem:[#allocation21 + $0x1d8] sm:$0xff] %v12704_v4  ;;  %12848 = vmatpush1.bf16.msra.mxu1 %v17498_v13  ;;  %v17558_v13 = vld [vmem:[#allocation16 + $0x1080] ss:$208 sps:$4 sm:$0xff]  }
 0xc87   :  { %12849 = vmatprep.subr.bf16.mxu1 %v17503_v3  ;;  %v17561_v2 = vld [vmem:[#allocation16 + $0x1220] ss:$208 sps:$4 sm:$0xff]   ;;  %v17566_v3 = vld [vmem:[#allocation16 + $0x13c4] ss:$208 sps:$4 sm:$0xff]  }
 0xc88   :  { %v17564_v4 = vld [vmem:[#allocation16 + $0x13c0] ss:$208 sps:$4 sm:$0xff]  }
 0xc8a   :  { %12850 = vmatpush1.bf16.msra.mxu1 %v17501_v23  ;;  %v17569_v23 = vld [vmem:[#allocation16 + $0x1564] ss:$208 sps:$4 sm:$0xff]  }
 0xc8b   :  { %12851 = vmatprep.subr.bf16.mxu1 %v17506_v5  ;;  %v17567_v5 = vld [vmem:[#allocation16 + $0x1560] ss:$208 sps:$4 sm:$0xff]  }
 0xc8e   :  { %12852 = vmatpush1.bf16.msra.mxu1 %v17504_v6  ;;  %v17572_v6 = vld [vmem:[#allocation16 + $0x1704] ss:$208 sps:$4 sm:$0xff]  }
 0xc8f   :  { %12853 = vmatprep.subr.bf16.mxu1 %v17509_v7  ;;  %v17570_v7 = vld [vmem:[#allocation16 + $0x1700] ss:$208 sps:$4 sm:$0xff]  }
 0xc92   :  { %12854 = vmatpush1.bf16.msra.mxu1 %v17507_v9  ;;  %v17575_v9 = vld [vmem:[#allocation16 + $0x18a4] ss:$208 sps:$4 sm:$0xff]  }
 0xc93   :  { %12855 = vmatprep.subr.bf16.mxu1 %v17512_v11  ;;  %v17573_v11 = vld [vmem:[#allocation16 + $0x18a0] ss:$208 sps:$4 sm:$0xff]  }
 0xc96   :  { %12856 = vmatpush1.bf16.msra.mxu1 %v17510_v12  ;;  %v17578_v12 = vld [vmem:[#allocation16 + $0x4c] ss:$208 sps:$4 sm:$0xff]  }
 0xc97   :  { %12857 = vmatprep.subr.bf16.mxu1 %v17515_v14  ;;  %v17576_v14 = vld [vmem:[#allocation16 + $0x48] ss:$208 sps:$4 sm:$0xff]  }
 0xc9a   :  { %12858 = vmatpush1.bf16.msra.mxu1 %v17513_v17  ;;  %v17581_v17 = vld [vmem:[#allocation16 + $0x1ec] ss:$208 sps:$4 sm:$0xff]  }
 0xc9b   :  { %12859 = vmatprep.subr.bf16.mxu1 %v17518_v19  ;;  %v17579_v19 = vld [vmem:[#allocation16 + $0x1e8] ss:$208 sps:$4 sm:$0xff]  }
 0xc9e   :  { %12860 = vmatpush1.bf16.msra.mxu1 %v17516_v20  ;;  %v17584_v20 = vld [vmem:[#allocation16 + $0x38c] ss:$208 sps:$4 sm:$0xff]  }
 0xc9f   :  { %12861 = vmatprep.subr.bf16.mxu1 %v17521_v21  ;;  %v17582_v21 = vld [vmem:[#allocation16 + $0x388] ss:$208 sps:$4 sm:$0xff]  }
 0xca2   :  { %12862 = vmatpush1.bf16.msra.mxu1 %v17519_v26  ;;  %v17587_v26 = vld [vmem:[#allocation16 + $0x52c] ss:$208 sps:$4 sm:$0xff]  }
 0xca3   :  { %12863 = vmatprep.subr.bf16.mxu1 %v17524_v27  ;;  %v17585_v27 = vld [vmem:[#allocation16 + $0x528] ss:$208 sps:$4 sm:$0xff]  }
 0xca6   :  { %12864 = vmatpush1.bf16.msra.mxu1 %v17522_v28  ;;  %v17590_v28 = vld [vmem:[#allocation16 + $0x6cc] ss:$208 sps:$4 sm:$0xff]  }
 0xca7   :  { %12865 = vmatprep.subr.bf16.mxu1 %v17527_v29  ;;  %v17588_v29 = vld [vmem:[#allocation16 + $0x6c8] ss:$208 sps:$4 sm:$0xff]  }
 0xcaa   :  { %12866 = vmatpush1.bf16.msra.mxu1 %v17525_v30  ;;  %v17593_v30 = vld [vmem:[#allocation16 + $0x86c] ss:$208 sps:$4 sm:$0xff]  }
 0xcab   :  { %12878 = vmatprep.subr.bf16.mxu1 %v17530_v22  ;;  %v8157_v22 = vrot.slane %v21785_v39, %v21747_v15 }
 0xcad   :  { %12868 = vmatmul.mubr.bf16.vlgmr.msra.gmra.mrb[40].mxu1 %v21715_v35 }
 0xcae   :  { %12879 = vmatpush1.bf16.msra.mxu1 %v17528_v25  ;;  %12910 = vmatprep.mubr.bf16.mxu1 %v21717_v36  ;;  %v8161_v25 = vrot.slane %v21785_v39, %v21750_v18 }
 0xcaf   :  { %12880 = vmatprep.subr.bf16.mxu1 %v17533_v31  ;;  %v17591_v31 = vld [vmem:[#allocation16 + $0x868] ss:$208 sps:$4 sm:$0xff]  }
 0xcb2   :  { %12881 = vmatpush1.bf16.msra.mxu1 %v17531_v32  ;;  %v17596_v32 = vld [vmem:[#allocation16 + $0xa0c] ss:$208 sps:$4 sm:$0xff]  }
 0xcb3   :  { %12882 = vmatprep.subr.bf16.mxu1 %v17536_v16 }
 0xcb6   :  { %12883 = vmatpush1.bf16.msra.mxu1 %v17534_v33 }
 0xcb7   :  { %12884 = vmatprep.subr.bf16.mxu1 %v17539_v34 }
 0xcba   :  { %12885 = vmatpush1.bf16.msra.mxu1 %v17537_v37 }
 0xcbb   :  { %12886 = vmatprep.subr.bf16.mxu1 %v17542_v24 }
 0xcbe   :  { %12887 = vmatpush1.bf16.msra.mxu1 %v17540_v38  ;;  %v17594_v38 = vld [vmem:[#allocation16 + $0xa08] ss:$208 sps:$4 sm:$0xff]  }
 0xcbf   :  { %12888 = vmatprep.subr.bf16.mxu1 %v17545_v40 }
 0xcc0   :  { %v12740_v45 = vpop.f32.mrb[28].mxu1 }
 0xcc1   :  { %v12741_v46 = vadd.f32 %v12740_v45, %v8149_v41  ;;  %v12742_v47 = vpop.f32.mrb[29].mxu1  ;;  %v17602_v45 = vld [vmem:[#allocation16 + $0xd4c] ss:$208 sps:$4 sm:$0xff]  }
 0xcc2   :  { %v12743_v48 = vadd.f32 %v12742_v47, %v8153_v42  ;;  %v12744_v49 = vpop.f32.mrb[30].mxu1  ;;  %12889 = vmatpush1.bf16.msra.mxu1 %v17543_v43  ;;  %v17605_v47 = vld [vmem:[#allocation16 + $0xeec] ss:$208 sps:$4 sm:$0xff]  }
 0xcc3   :  { %13660 = vst [vmem:[#allocation21 + $0x40] sm:$0xff] %v12741_v46  ;;  %v12745_v53 = vadd.f32 %v12744_v49, %v8149_v41  ;;  %v12746_v54 = vpop.f32.mrb[31].mxu1  ;;  %12890 = vmatprep.subr.bf16.mxu1 %v17548_v44  ;;  %v17597_v44 = vld [vmem:[#allocation16 + $0xba8] ss:$208 sps:$4 sm:$0xff]   ;;  %v17608_v49 = vld [vmem:[#allocation16 + $0x108c] ss:$208 sps:$4 sm:$0xff]  }
 0xcc4   :  { %13661 = vst [vmem:[#allocation21 + $0x48] sm:$0xff] %v12743_v48  ;;  %v12747_v56 = vadd.f32 %v12746_v54, %v8153_v42  ;;  %v17599_v42 = vld [vmem:[#allocation16 + $0xbac] ss:$208 sps:$4 sm:$0xff]   ;;  %v17600_v46 = vld [vmem:[#allocation16 + $0xd48] ss:$208 sps:$4 sm:$0xff]  }
 0xcc5   :  { %13713 = vst [vmem:[#allocation21 + $0x1e0] sm:$0xff] %v12745_v53  ;;  %v17603_v48 = vld [vmem:[#allocation16 + $0xee8] ss:$208 sps:$4 sm:$0xff]   ;;  %v17611_v53 = vld [vmem:[#allocation16 + $0x122c] ss:$208 sps:$4 sm:$0xff]  }
 0xcc6   :  { %13714 = vst [vmem:[#allocation21 + $0x1e8] sm:$0xff] %v12747_v56  ;;  %12891 = vmatpush1.bf16.msra.mxu1 %v17546_v51  ;;  %v17606_v51 = vld [vmem:[#allocation16 + $0x1088] ss:$208 sps:$4 sm:$0xff]  }
 0xcc7   :  { %12892 = vmatprep.subr.bf16.mxu1 %v17551_v55  ;;  %v17609_v54 = vld [vmem:[#allocation16 + $0x1228] ss:$208 sps:$4 sm:$0xff]   ;;  %v17614_v55 = vld [vmem:[#allocation16 + $0x13cc] ss:$208 sps:$4 sm:$0xff]  }
 0xcc8   :  { %v17612_v56 = vld [vmem:[#allocation16 + $0x13c8] ss:$208 sps:$4 sm:$0xff]  }
 0xcca   :  { %12893 = vmatpush1.bf16.msra.mxu1 %v17549_v57  ;;  %v17617_v57 = vld [vmem:[#allocation16 + $0x156c] ss:$208 sps:$4 sm:$0xff]  }
 0xccb   :  { %12894 = vmatprep.subr.bf16.mxu1 %v17554_v58  ;;  %v17615_v58 = vld [vmem:[#allocation16 + $0x1568] ss:$208 sps:$4 sm:$0xff]  }
 0xcce   :  { %12895 = vmatpush1.bf16.msra.mxu1 %v17552_v59  ;;  %v17620_v59 = vld [vmem:[#allocation16 + $0x170c] ss:$208 sps:$4 sm:$0xff]  }
 0xccf   :  { %12896 = vmatprep.subr.bf16.mxu1 %v17557_v60  ;;  %v17618_v60 = vld [vmem:[#allocation16 + $0x1708] ss:$208 sps:$4 sm:$0xff]  }
 0xcd2   :  { %12897 = vmatpush1.bf16.msra.mxu1 %v17555_v61  ;;  %v17623_v61 = vld [vmem:[#allocation16 + $0x18ac] ss:$208 sps:$4 sm:$0xff]  }
 0xcd3   :  { %12898 = vmatprep.subr.bf16.mxu1 %v17560_v63  ;;  %v17621_v63 = vld [vmem:[#allocation16 + $0x18a8] ss:$208 sps:$4 sm:$0xff]  }
 0xcd6   :  { %12899 = vmatpush1.bf16.msra.mxu1 %v17558_v13  ;;  %v17626_v13 = vld [vmem:[#allocation16 + $0x54] ss:$208 sps:$4 sm:$0xff]  }
 0xcd7   :  { %12900 = vmatprep.subr.bf16.mxu1 %v17563_v1  ;;  %v17624_v1 = vld [vmem:[#allocation16 + $0x50] ss:$208 sps:$4 sm:$0xff]  }
 0xcda   :  { %12901 = vmatpush1.bf16.msra.mxu1 %v17561_v2  ;;  %v17629_v2 = vld [vmem:[#allocation16 + $0x1f4] ss:$208 sps:$4 sm:$0xff]  }
 0xcdb   :  { %12902 = vmatprep.subr.bf16.mxu1 %v17566_v3  ;;  %v17627_v3 = vld [vmem:[#allocation16 + $0x1f0] ss:$208 sps:$4 sm:$0xff]  }
 0xcde   :  { %12903 = vmatpush1.bf16.msra.mxu1 %v17564_v4  ;;  %v17632_v4 = vld [vmem:[#allocation16 + $0x394] ss:$208 sps:$4 sm:$0xff]  }
 0xcdf   :  { %12904 = vmatprep.subr.bf16.mxu1 %v17569_v23  ;;  %v17630_v23 = vld [vmem:[#allocation16 + $0x390] ss:$208 sps:$4 sm:$0xff]  }
 0xce2   :  { %12905 = vmatpush1.bf16.msra.mxu1 %v17567_v5  ;;  %v17635_v5 = vld [vmem:[#allocation16 + $0x534] ss:$208 sps:$4 sm:$0xff]  }
 0xce3   :  { %12906 = vmatprep.subr.bf16.mxu1 %v17572_v6  ;;  %v17633_v6 = vld [vmem:[#allocation16 + $0x530] ss:$208 sps:$4 sm:$0xff]  }
 0xce6   :  { %12907 = vmatpush1.bf16.msra.mxu1 %v17570_v7  ;;  %v17638_v7 = vld [vmem:[#allocation16 + $0x6d4] ss:$208 sps:$4 sm:$0xff]  }
 0xce7   :  { %12908 = vmatprep.subr.bf16.mxu1 %v17575_v9  ;;  %v17636_v9 = vld [vmem:[#allocation16 + $0x6d0] ss:$208 sps:$4 sm:$0xff]  }
 0xcea   :  { %12909 = vmatpush1.bf16.msra.mxu1 %v17573_v11  ;;  %v17641_v11 = vld [vmem:[#allocation16 + $0x874] ss:$208 sps:$4 sm:$0xff]  }
 0xceb   :  { %12921 = vmatprep.subr.bf16.mxu1 %v17578_v12  ;;  %v8165_v12 = vrot.slane %v21785_v39, %v21759_v62 }
 0xced   :  { %12911 = vmatmul.mubr.bf16.vlgmr.msra.gmra.mrb[44].mxu1 %v21715_v35 }
 0xcee   :  { %12922 = vmatpush1.bf16.msra.mxu1 %v17576_v14  ;;  %12953 = vmatprep.mubr.bf16.mxu1 %v21717_v36  ;;  %v8169_v14 = vrot.slane %v21785_v39, %v21762_v0 }
 0xcef   :  { %12923 = vmatprep.subr.bf16.mxu1 %v17581_v17  ;;  %v17639_v17 = vld [vmem:[#allocation16 + $0x870] ss:$208 sps:$4 sm:$0xff]  }
 0xcf2   :  { %12924 = vmatpush1.bf16.msra.mxu1 %v17579_v19  ;;  %v17644_v19 = vld [vmem:[#allocation16 + $0xa14] ss:$208 sps:$4 sm:$0xff]  }
 0xcf3   :  { %12925 = vmatprep.subr.bf16.mxu1 %v17584_v20 }
 0xcf6   :  { %12926 = vmatpush1.bf16.msra.mxu1 %v17582_v21 }
 0xcf7   :  { %12927 = vmatprep.subr.bf16.mxu1 %v17587_v26 }
 0xcfa   :  { %12928 = vmatpush1.bf16.msra.mxu1 %v17585_v27 }
 0xcfb   :  { %12929 = vmatprep.subr.bf16.mxu1 %v17590_v28 }
 0xcfe   :  { %12930 = vmatpush1.bf16.msra.mxu1 %v17588_v29  ;;  %v17642_v29 = vld [vmem:[#allocation16 + $0xa10] ss:$208 sps:$4 sm:$0xff]  }
 0xcff   :  { %12931 = vmatprep.subr.bf16.mxu1 %v17593_v30 }
 0xd00   :  { %v12783_v16 = vpop.f32.mrb[32].mxu1 }
 0xd01   :  { %v12784_v33 = vadd.f32 %v12783_v16, %v8157_v22  ;;  %v12785_v34 = vpop.f32.mrb[33].mxu1  ;;  %v17650_v16 = vld [vmem:[#allocation16 + $0xd54] ss:$208 sps:$4 sm:$0xff]  }
 0xd02   :  { %v12786_v37 = vadd.f32 %v12785_v34, %v8161_v25  ;;  %v12787_v24 = vpop.f32.mrb[34].mxu1  ;;  %12932 = vmatpush1.bf16.msra.mxu1 %v17591_v31  ;;  %v17653_v34 = vld [vmem:[#allocation16 + $0xef4] ss:$208 sps:$4 sm:$0xff]  }
 0xd03   :  { %13662 = vst [vmem:[#allocation21 + $0x50] sm:$0xff] %v12784_v33  ;;  %v12788_v40 = vadd.f32 %v12787_v24, %v8157_v22  ;;  %v12789_v41 = vpop.f32.mrb[35].mxu1  ;;  %12933 = vmatprep.subr.bf16.mxu1 %v17596_v32  ;;  %v17645_v32 = vld [vmem:[#allocation16 + $0xbb0] ss:$208 sps:$4 sm:$0xff]   ;;  %v17656_v24 = vld [vmem:[#allocation16 + $0x1094] ss:$208 sps:$4 sm:$0xff]  }
 0xd04   :  { %13663 = vst [vmem:[#allocation21 + $0x58] sm:$0xff] %v12786_v37  ;;  %v12790_v43 = vadd.f32 %v12789_v41, %v8161_v25  ;;  %v17647_v25 = vld [vmem:[#allocation16 + $0xbb4] ss:$208 sps:$4 sm:$0xff]   ;;  %v17648_v33 = vld [vmem:[#allocation16 + $0xd50] ss:$208 sps:$4 sm:$0xff]  }
 0xd05   :  { %13715 = vst [vmem:[#allocation21 + $0x1f0] sm:$0xff] %v12788_v40  ;;  %v17651_v37 = vld [vmem:[#allocation16 + $0xef0] ss:$208 sps:$4 sm:$0xff]   ;;  %v17659_v40 = vld [vmem:[#allocation16 + $0x1234] ss:$208 sps:$4 sm:$0xff]  }
 0xd06   :  { %13716 = vst [vmem:[#allocation21 + $0x1f8] sm:$0xff] %v12790_v43  ;;  %12934 = vmatpush1.bf16.msra.mxu1 %v17594_v38  ;;  %v17654_v38 = vld [vmem:[#allocation16 + $0x1090] ss:$208 sps:$4 sm:$0xff]  }
 0xd07   :  { %12935 = vmatprep.subr.bf16.mxu1 %v17599_v42  ;;  %v17657_v41 = vld [vmem:[#allocation16 + $0x1230] ss:$208 sps:$4 sm:$0xff]   ;;  %v17662_v42 = vld [vmem:[#allocation16 + $0x13d4] ss:$208 sps:$4 sm:$0xff]  }
 0xd08   :  { %v17660_v43 = vld [vmem:[#allocation16 + $0x13d0] ss:$208 sps:$4 sm:$0xff]  }
 0xd0a   :  { %12936 = vmatpush1.bf16.msra.mxu1 %v17597_v44  ;;  %v17665_v44 = vld [vmem:[#allocation16 + $0x1574] ss:$208 sps:$4 sm:$0xff]  }
 0xd0b   :  { %12937 = vmatprep.subr.bf16.mxu1 %v17602_v45  ;;  %v17663_v45 = vld [vmem:[#allocation16 + $0x1570] ss:$208 sps:$4 sm:$0xff]  }
 0xd0e   :  { %12938 = vmatpush1.bf16.msra.mxu1 %v17600_v46  ;;  %v17668_v46 = vld [vmem:[#allocation16 + $0x1714] ss:$208 sps:$4 sm:$0xff]  }
 0xd0f   :  { %12939 = vmatprep.subr.bf16.mxu1 %v17605_v47  ;;  %v17666_v47 = vld [vmem:[#allocation16 + $0x1710] ss:$208 sps:$4 sm:$0xff]  }
 0xd12   :  { %12940 = vmatpush1.bf16.msra.mxu1 %v17603_v48  ;;  %v17671_v48 = vld [vmem:[#allocation16 + $0x18b4] ss:$208 sps:$4 sm:$0xff]  }
 0xd13   :  { %12941 = vmatprep.subr.bf16.mxu1 %v17608_v49  ;;  %v17669_v49 = vld [vmem:[#allocation16 + $0x18b0] ss:$208 sps:$4 sm:$0xff]  }
 0xd16   :  { %12942 = vmatpush1.bf16.msra.mxu1 %v17606_v51  ;;  %v17674_v51 = vld [vmem:[#allocation16 + $0x5c] ss:$208 sps:$4 sm:$0xff]  }
 0xd17   :  { %12943 = vmatprep.subr.bf16.mxu1 %v17611_v53  ;;  %v17672_v53 = vld [vmem:[#allocation16 + $0x58] ss:$208 sps:$4 sm:$0xff]  }
 0xd1a   :  { %12944 = vmatpush1.bf16.msra.mxu1 %v17609_v54  ;;  %v17677_v54 = vld [vmem:[#allocation16 + $0x1fc] ss:$208 sps:$4 sm:$0xff]  }
 0xd1b   :  { %12945 = vmatprep.subr.bf16.mxu1 %v17614_v55  ;;  %v17675_v55 = vld [vmem:[#allocation16 + $0x1f8] ss:$208 sps:$4 sm:$0xff]  }
 0xd1e   :  { %12946 = vmatpush1.bf16.msra.mxu1 %v17612_v56  ;;  %v17680_v56 = vld [vmem:[#allocation16 + $0x39c] ss:$208 sps:$4 sm:$0xff]  }
 0xd1f   :  { %12947 = vmatprep.subr.bf16.mxu1 %v17617_v57  ;;  %v17678_v57 = vld [vmem:[#allocation16 + $0x398] ss:$208 sps:$4 sm:$0xff]  }
 0xd22   :  { %12948 = vmatpush1.bf16.msra.mxu1 %v17615_v58  ;;  %v17683_v58 = vld [vmem:[#allocation16 + $0x53c] ss:$208 sps:$4 sm:$0xff]  }
 0xd23   :  { %12949 = vmatprep.subr.bf16.mxu1 %v17620_v59  ;;  %v17681_v59 = vld [vmem:[#allocation16 + $0x538] ss:$208 sps:$4 sm:$0xff]  }
 0xd26   :  { %12950 = vmatpush1.bf16.msra.mxu1 %v17618_v60  ;;  %v17686_v60 = vld [vmem:[#allocation16 + $0x6dc] ss:$208 sps:$4 sm:$0xff]  }
 0xd27   :  { %12951 = vmatprep.subr.bf16.mxu1 %v17623_v61  ;;  %v17684_v61 = vld [vmem:[#allocation16 + $0x6d8] ss:$208 sps:$4 sm:$0xff]  }
 0xd2a   :  { %12952 = vmatpush1.bf16.msra.mxu1 %v17621_v63  ;;  %v17689_v63 = vld [vmem:[#allocation16 + $0x87c] ss:$208 sps:$4 sm:$0xff]  }
 0xd2b   :  { %12964 = vmatprep.subr.bf16.mxu1 %v17626_v13  ;;  %v8173_v13 = vrot.slane %v21785_v39, %v21771_v50 }
 0xd2d   :  { %12954 = vmatmul.mubr.bf16.vlgmr.msra.gmra.mrb[48].mxu1 %v21715_v35 }
 0xd2e   :  { %12965 = vmatpush1.bf16.msra.mxu1 %v17624_v1  ;;  %12996 = vmatprep.mubr.bf16.mxu1 %v21717_v36  ;;  %v8177_v1 = vrot.slane %v21785_v39, %v21774_v52  ;;  %v17693_v39 = vld [vmem:[#allocation16 + $0xbb8] ss:$208 sps:$4 sm:$0xff]  }
 0xd2f   :  { %12966 = vmatprep.subr.bf16.mxu1 %v17629_v2  ;;  %v17687_v2 = vld [vmem:[#allocation16 + $0x878] ss:$208 sps:$4 sm:$0xff]  }
 0xd32   :  { %12967 = vmatpush1.bf16.msra.mxu1 %v17627_v3  ;;  %v17692_v3 = vld [vmem:[#allocation16 + $0xa1c] ss:$208 sps:$4 sm:$0xff]  }
 0xd33   :  { %12968 = vmatprep.subr.bf16.mxu1 %v17632_v4 }
 0xd36   :  { %12969 = vmatpush1.bf16.msra.mxu1 %v17630_v23 }
 0xd37   :  { %12970 = vmatprep.subr.bf16.mxu1 %v17635_v5 }
 0xd3a   :  { %12971 = vmatpush1.bf16.msra.mxu1 %v17633_v6 }
 0xd3b   :  { %12972 = vmatprep.subr.bf16.mxu1 %v17638_v7 }
 0xd3e   :  { %12973 = vmatpush1.bf16.msra.mxu1 %v17636_v9  ;;  %v17690_v9 = vld [vmem:[#allocation16 + $0xa18] ss:$208 sps:$4 sm:$0xff]  }
 0xd3f   :  { %12974 = vmatprep.subr.bf16.mxu1 %v17641_v11 }
 0xd40   :  { %v12826_v20 = vpop.f32.mrb[36].mxu1 }
 0xd41   :  { %v12827_v21 = vadd.f32 %v12826_v20, %v8165_v12  ;;  %v12828_v26 = vpop.f32.mrb[37].mxu1  ;;  %v17696_v20 = vld [vmem:[#allocation16 + $0xd58] ss:$208 sps:$4 sm:$0xff]  }
 0xd42   :  { %v12829_v27 = vadd.f32 %v12828_v26, %v8169_v14  ;;  %v12830_v28 = vpop.f32.mrb[38].mxu1  ;;  %12975 = vmatpush1.bf16.msra.mxu1 %v17639_v17  ;;  %v17699_v26 = vld [vmem:[#allocation16 + $0xef8] ss:$208 sps:$4 sm:$0xff]  }
 0xd43   :  { %13664 = vst [vmem:[#allocation21 + $0x60] sm:$0xff] %v12827_v21  ;;  %v12831_v30 = vadd.f32 %v12830_v28, %v8165_v12  ;;  %v12832_v22 = vpop.f32.mrb[39].mxu1  ;;  %12976 = vmatprep.subr.bf16.mxu1 %v17644_v19  ;;  %v17698_v19 = vld [vmem:[#allocation16 + $0xd5c] ss:$208 sps:$4 sm:$0xff]   ;;  %v17702_v28 = vld [vmem:[#allocation16 + $0x1098] ss:$208 sps:$4 sm:$0xff]  }
 0xd44   :  { %13665 = vst [vmem:[#allocation21 + $0x68] sm:$0xff] %v12829_v27  ;;  %v12833_v31 = vadd.f32 %v12832_v22, %v8169_v14  ;;  %v17695_v14 = vld [vmem:[#allocation16 + $0xbbc] ss:$208 sps:$4 sm:$0xff]  }
 0xd45   :  { %13717 = vst [vmem:[#allocation21 + $0x200] sm:$0xff] %v12831_v30  ;;  %v17701_v21 = vld [vmem:[#allocation16 + $0xefc] ss:$208 sps:$4 sm:$0xff]   ;;  %v17705_v30 = vld [vmem:[#allocation16 + $0x1238] ss:$208 sps:$4 sm:$0xff]  }
 0xd46   :  { %13718 = vst [vmem:[#allocation21 + $0x208] sm:$0xff] %v12833_v31  ;;  %12977 = vmatpush1.bf16.msra.mxu1 %v17642_v29  ;;  %v17704_v27 = vld [vmem:[#allocation16 + $0x109c] ss:$208 sps:$4 sm:$0xff]  }
 0xd47   :  { %12978 = vmatprep.subr.bf16.mxu1 %v17647_v25  ;;  %v17707_v29 = vld [vmem:[#allocation16 + $0x123c] ss:$208 sps:$4 sm:$0xff]   ;;  %v17708_v25 = vld [vmem:[#allocation16 + $0x13d8] ss:$208 sps:$4 sm:$0xff]  }
 0xd48   :  { %v17710_v22 = vld [vmem:[#allocation16 + $0x13dc] ss:$208 sps:$4 sm:$0xff]  }
 0xd49   :  { %v17713_v31 = vld [vmem:[#allocation16 + $0x157c] ss:$208 sps:$4 sm:$0xff]  }
 0xd4a   :  { %12979 = vmatpush1.bf16.msra.mxu1 %v17645_v32  ;;  %v17711_v32 = vld [vmem:[#allocation16 + $0x1578] ss:$208 sps:$4 sm:$0xff]  }
 0xd4b   :  { %12980 = vmatprep.subr.bf16.mxu1 %v17650_v16  ;;  %v17716_v16 = vld [vmem:[#allocation16 + $0x171c] ss:$208 sps:$4 sm:$0xff]  }
 0xd4e   :  { %12981 = vmatpush1.bf16.msra.mxu1 %v17648_v33  ;;  %v17714_v33 = vld [vmem:[#allocation16 + $0x1718] ss:$208 sps:$4 sm:$0xff]  }
 0xd4f   :  { %12982 = vmatprep.subr.bf16.mxu1 %v17653_v34  ;;  %v17719_v34 = vld [vmem:[#allocation16 + $0x18bc] ss:$208 sps:$4 sm:$0xff]  }
 0xd52   :  { %12983 = vmatpush1.bf16.msra.mxu1 %v17651_v37  ;;  %v17717_v37 = vld [vmem:[#allocation16 + $0x18b8] ss:$208 sps:$4 sm:$0xff]  }
 0xd53   :  { %12984 = vmatprep.subr.bf16.mxu1 %v17656_v24  ;;  %v17722_v24 = vld [vmem:[#allocation16 + $0x64] ss:$208 sps:$4 sm:$0xff]  }
 0xd56   :  { %12985 = vmatpush1.bf16.msra.mxu1 %v17654_v38  ;;  %v17720_v38 = vld [vmem:[#allocation16 + $0x60] ss:$208 sps:$4 sm:$0xff]  }
 0xd57   :  { %12986 = vmatprep.subr.bf16.mxu1 %v17659_v40  ;;  %v17725_v40 = vld [vmem:[#allocation16 + $0x204] ss:$208 sps:$4 sm:$0xff]  }
 0xd5a   :  { %12987 = vmatpush1.bf16.msra.mxu1 %v17657_v41  ;;  %v17723_v41 = vld [vmem:[#allocation16 + $0x200] ss:$208 sps:$4 sm:$0xff]  }
 0xd5b   :  { %12988 = vmatprep.subr.bf16.mxu1 %v17662_v42  ;;  %v17728_v42 = vld [vmem:[#allocation16 + $0x3a4] ss:$208 sps:$4 sm:$0xff]  }
 0xd5e   :  { %12989 = vmatpush1.bf16.msra.mxu1 %v17660_v43  ;;  %v17726_v43 = vld [vmem:[#allocation16 + $0x3a0] ss:$208 sps:$4 sm:$0xff]  }
 0xd5f   :  { %12990 = vmatprep.subr.bf16.mxu1 %v17665_v44  ;;  %v17731_v44 = vld [vmem:[#allocation16 + $0x544] ss:$208 sps:$4 sm:$0xff]  }
 0xd62   :  { %12991 = vmatpush1.bf16.msra.mxu1 %v17663_v45  ;;  %v17729_v45 = vld [vmem:[#allocation16 + $0x540] ss:$208 sps:$4 sm:$0xff]  }
 0xd63   :  { %12992 = vmatprep.subr.bf16.mxu1 %v17668_v46  ;;  %v17734_v46 = vld [vmem:[#allocation16 + $0x6e4] ss:$208 sps:$4 sm:$0xff]  }
 0xd66   :  { %12993 = vmatpush1.bf16.msra.mxu1 %v17666_v47  ;;  %v17732_v47 = vld [vmem:[#allocation16 + $0x6e0] ss:$208 sps:$4 sm:$0xff]  }
 0xd67   :  { %12994 = vmatprep.subr.bf16.mxu1 %v17671_v48  ;;  %v21814_v48 = vld [vmem:[%s21989_s13 + $0x10] sm:$0xff] }
 0xd6a   :  { %12995 = vmatpush1.bf16.msra.mxu1 %v17669_v49  ;;  %v17737_v49 = vld [vmem:[#allocation16 + $0x884] ss:$208 sps:$4 sm:$0xff]  }
 0xd6b   :  { %13007 = vmatprep.subr.bf16.mxu1 %v17674_v51  ;;  %v8181_v51 = vrot.slane %v21814_v48, %v21667_v8 }
 0xd6d   :  { %12997 = vmatmul.mubr.bf16.vlgmr.msra.gmra.mrb[52].mxu1 %v21715_v35 }
 0xd6e   :  { %13008 = vmatpush1.bf16.msra.mxu1 %v17672_v53  ;;  %13039 = vmatprep.mubr.bf16.mxu1 %v21717_v36  ;;  %v8185_v53 = vrot.slane %v21814_v48, %v21670_v10 }
 0xd6f   :  { %13009 = vmatprep.subr.bf16.mxu1 %v17677_v54  ;;  %v17735_v54 = vld [vmem:[#allocation16 + $0x880] ss:$208 sps:$4 sm:$0xff]  }
 0xd72   :  { %13010 = vmatpush1.bf16.msra.mxu1 %v17675_v55  ;;  %v17740_v55 = vld [vmem:[#allocation16 + $0xa24] ss:$208 sps:$4 sm:$0xff]  }
 0xd73   :  { %13011 = vmatprep.subr.bf16.mxu1 %v17680_v56 }
 0xd76   :  { %13012 = vmatpush1.bf16.msra.mxu1 %v17678_v57 }
 0xd77   :  { %13013 = vmatprep.subr.bf16.mxu1 %v17683_v58 }
 0xd7a   :  { %13014 = vmatpush1.bf16.msra.mxu1 %v17681_v59 }
 0xd7b   :  { %13015 = vmatprep.subr.bf16.mxu1 %v17686_v60 }
 0xd7e   :  { %13016 = vmatpush1.bf16.msra.mxu1 %v17684_v61  ;;  %v17738_v61 = vld [vmem:[#allocation16 + $0xa20] ss:$208 sps:$4 sm:$0xff]  }
 0xd7f   :  { %13017 = vmatprep.subr.bf16.mxu1 %v17689_v63 }
 0xd80   :  { %v12869_v4 = vpop.f32.mrb[40].mxu1 }
 0xd81   :  { %v12870_v23 = vadd.f32 %v12869_v4, %v8173_v13  ;;  %v12871_v5 = vpop.f32.mrb[41].mxu1  ;;  %v17746_v4 = vld [vmem:[#allocation16 + $0xd64] ss:$208 sps:$4 sm:$0xff]  }
 0xd82   :  { %v12872_v6 = vadd.f32 %v12871_v5, %v8177_v1  ;;  %v12873_v7 = vpop.f32.mrb[42].mxu1  ;;  %13018 = vmatpush1.bf16.msra.mxu1 %v17687_v2  ;;  %v17749_v5 = vld [vmem:[#allocation16 + $0xf04] ss:$208 sps:$4 sm:$0xff]  }
 0xd83   :  { %13666 = vst [vmem:[#allocation21 + $0x70] sm:$0xff] %v12870_v23  ;;  %v12874_v11 = vadd.f32 %v12873_v7, %v8173_v13  ;;  %v12875_v12 = vpop.f32.mrb[43].mxu1  ;;  %13019 = vmatprep.subr.bf16.mxu1 %v17692_v3  ;;  %v17741_v3 = vld [vmem:[#allocation16 + $0xbc0] ss:$208 sps:$4 sm:$0xff]   ;;  %v17752_v7 = vld [vmem:[#allocation16 + $0x10a4] ss:$208 sps:$4 sm:$0xff]  }
 0xd84   :  { %13667 = vst [vmem:[#allocation21 + $0x78] sm:$0xff] %v12872_v6  ;;  %v12876_v17 = vadd.f32 %v12875_v12, %v8177_v1  ;;  %v17743_v1 = vld [vmem:[#allocation16 + $0xbc4] ss:$208 sps:$4 sm:$0xff]   ;;  %v17744_v23 = vld [vmem:[#allocation16 + $0xd60] ss:$208 sps:$4 sm:$0xff]  }
 0xd85   :  { %13719 = vst [vmem:[#allocation21 + $0x210] sm:$0xff] %v12874_v11  ;;  %v17747_v6 = vld [vmem:[#allocation16 + $0xf00] ss:$208 sps:$4 sm:$0xff]   ;;  %v17755_v11 = vld [vmem:[#allocation16 + $0x1244] ss:$208 sps:$4 sm:$0xff]  }
 0xd86   :  { %13720 = vst [vmem:[#allocation21 + $0x218] sm:$0xff] %v12876_v17  ;;  %13020 = vmatpush1.bf16.msra.mxu1 %v17690_v9  ;;  %v17750_v9 = vld [vmem:[#allocation16 + $0x10a0] ss:$208 sps:$4 sm:$0xff]  }
 0xd87   :  { %13021 = vmatprep.subr.bf16.mxu1 %v17695_v14  ;;  %v17753_v12 = vld [vmem:[#allocation16 + $0x1240] ss:$208 sps:$4 sm:$0xff]   ;;  %v17758_v14 = vld [vmem:[#allocation16 + $0x13e4] ss:$208 sps:$4 sm:$0xff]  }
 0xd88   :  { %v17756_v17 = vld [vmem:[#allocation16 + $0x13e0] ss:$208 sps:$4 sm:$0xff]  }
 0xd8a   :  { %13022 = vmatpush1.bf16.msra.mxu1 %v17693_v39  ;;  %v17761_v39 = vld [vmem:[#allocation16 + $0x1584] ss:$208 sps:$4 sm:$0xff]  }
 0xd8b   :  { %13023 = vmatprep.subr.bf16.mxu1 %v17698_v19  ;;  %v17759_v19 = vld [vmem:[#allocation16 + $0x1580] ss:$208 sps:$4 sm:$0xff]  }
 0xd8e   :  { %13024 = vmatpush1.bf16.msra.mxu1 %v17696_v20  ;;  %v17764_v20 = vld [vmem:[#allocation16 + $0x1724] ss:$208 sps:$4 sm:$0xff]  }
 0xd8f   :  { %13025 = vmatprep.subr.bf16.mxu1 %v17701_v21  ;;  %v17762_v21 = vld [vmem:[#allocation16 + $0x1720] ss:$208 sps:$4 sm:$0xff]  }
 0xd92   :  { %13026 = vmatpush1.bf16.msra.mxu1 %v17699_v26  ;;  %v17767_v26 = vld [vmem:[#allocation16 + $0x18c4] ss:$208 sps:$4 sm:$0xff]  }
 0xd93   :  { %13027 = vmatprep.subr.bf16.mxu1 %v17704_v27  ;;  %v17765_v27 = vld [vmem:[#allocation16 + $0x18c0] ss:$208 sps:$4 sm:$0xff]  }
 0xd96   :  { %13028 = vmatpush1.bf16.msra.mxu1 %v17702_v28  ;;  %v17770_v28 = vld [vmem:[#allocation16 + $0x6c] ss:$208 sps:$4 sm:$0xff]  }
 0xd97   :  { %13029 = vmatprep.subr.bf16.mxu1 %v17707_v29  ;;  %v17768_v29 = vld [vmem:[#allocation16 + $0x68] ss:$208 sps:$4 sm:$0xff]  }
 0xd9a   :  { %13030 = vmatpush1.bf16.msra.mxu1 %v17705_v30  ;;  %v17773_v30 = vld [vmem:[#allocation16 + $0x20c] ss:$208 sps:$4 sm:$0xff]  }
 0xd9b   :  { %13031 = vmatprep.subr.bf16.mxu1 %v17710_v22  ;;  %v17771_v22 = vld [vmem:[#allocation16 + $0x208] ss:$208 sps:$4 sm:$0xff]  }
 0xd9e   :  { %13032 = vmatpush1.bf16.msra.mxu1 %v17708_v25  ;;  %v17776_v25 = vld [vmem:[#allocation16 + $0x3ac] ss:$208 sps:$4 sm:$0xff]  }
 0xd9f   :  { %13033 = vmatprep.subr.bf16.mxu1 %v17713_v31  ;;  %v17774_v31 = vld [vmem:[#allocation16 + $0x3a8] ss:$208 sps:$4 sm:$0xff]  }
 0xda2   :  { %13034 = vmatpush1.bf16.msra.mxu1 %v17711_v32  ;;  %v17779_v32 = vld [vmem:[#allocation16 + $0x54c] ss:$208 sps:$4 sm:$0xff]  }
 0xda3   :  { %13035 = vmatprep.subr.bf16.mxu1 %v17716_v16  ;;  %v17777_v16 = vld [vmem:[#allocation16 + $0x548] ss:$208 sps:$4 sm:$0xff]  }
 0xda6   :  { %13036 = vmatpush1.bf16.msra.mxu1 %v17714_v33  ;;  %v17782_v33 = vld [vmem:[#allocation16 + $0x6ec] ss:$208 sps:$4 sm:$0xff]  }
 0xda7   :  { %13037 = vmatprep.subr.bf16.mxu1 %v17719_v34  ;;  %v17780_v34 = vld [vmem:[#allocation16 + $0x6e8] ss:$208 sps:$4 sm:$0xff]  }
 0xdaa   :  { %13038 = vmatpush1.bf16.msra.mxu1 %v17717_v37  ;;  %v17785_v37 = vld [vmem:[#allocation16 + $0x88c] ss:$208 sps:$4 sm:$0xff]  }
 0xdab   :  { %13050 = vmatprep.subr.bf16.mxu1 %v17722_v24  ;;  %v8189_v24 = vrot.slane %v21814_v48, %v21747_v15 }
 0xdad   :  { %13040 = vmatmul.mubr.bf16.vlgmr.msra.gmra.mrb[56].mxu1 %v21715_v35 }
 0xdae   :  { %13051 = vmatpush1.bf16.msra.mxu1 %v17720_v38  ;;  %13082 = vmatprep.mubr.bf16.mxu1 %v21717_v36  ;;  %v8193_v38 = vrot.slane %v21814_v48, %v21750_v18 }
 0xdaf   :  { %13052 = vmatprep.subr.bf16.mxu1 %v17725_v40  ;;  %v17783_v40 = vld [vmem:[#allocation16 + $0x888] ss:$208 sps:$4 sm:$0xff]  }
 0xdb2   :  { %13053 = vmatpush1.bf16.msra.mxu1 %v17723_v41  ;;  %v17788_v41 = vld [vmem:[#allocation16 + $0xa2c] ss:$208 sps:$4 sm:$0xff]  }
 0xdb3   :  { %13054 = vmatprep.subr.bf16.mxu1 %v17728_v42 }
 0xdb6   :  { %13055 = vmatpush1.bf16.msra.mxu1 %v17726_v43 }
 0xdb7   :  { %13056 = vmatprep.subr.bf16.mxu1 %v17731_v44 }
 0xdba   :  { %13057 = vmatpush1.bf16.msra.mxu1 %v17729_v45 }
 0xdbb   :  { %13058 = vmatprep.subr.bf16.mxu1 %v17734_v46 }
 0xdbe   :  { %13059 = vmatpush1.bf16.msra.mxu1 %v17732_v47  ;;  %v17786_v47 = vld [vmem:[#allocation16 + $0xa28] ss:$208 sps:$4 sm:$0xff]  }
 0xdbf   :  { %13060 = vmatprep.subr.bf16.mxu1 %v17737_v49 }
 0xdc0   :  { %v12912_v56 = vpop.f32.mrb[44].mxu1 }
 0xdc1   :  { %v12913_v57 = vadd.f32 %v12912_v56, %v8181_v51  ;;  %v12914_v58 = vpop.f32.mrb[45].mxu1  ;;  %v17794_v56 = vld [vmem:[#allocation16 + $0xd6c] ss:$208 sps:$4 sm:$0xff]  }
 0xdc2   :  { %v12915_v59 = vadd.f32 %v12914_v58, %v8185_v53  ;;  %v12916_v60 = vpop.f32.mrb[46].mxu1  ;;  %13061 = vmatpush1.bf16.msra.mxu1 %v17735_v54  ;;  %v17797_v58 = vld [vmem:[#allocation16 + $0xf0c] ss:$208 sps:$4 sm:$0xff]  }
 0xdc3   :  { %13668 = vst [vmem:[#allocation21 + $0x80] sm:$0xff] %v12913_v57  ;;  %v12917_v63 = vadd.f32 %v12916_v60, %v8181_v51  ;;  %v12918_v13 = vpop.f32.mrb[47].mxu1  ;;  %13062 = vmatprep.subr.bf16.mxu1 %v17740_v55  ;;  %v17789_v55 = vld [vmem:[#allocation16 + $0xbc8] ss:$208 sps:$4 sm:$0xff]   ;;  %v17800_v60 = vld [vmem:[#allocation16 + $0x10ac] ss:$208 sps:$4 sm:$0xff]  }
 0xdc4   :  { %13669 = vst [vmem:[#allocation21 + $0x88] sm:$0xff] %v12915_v59  ;;  %v12919_v2 = vadd.f32 %v12918_v13, %v8185_v53  ;;  %v17791_v53 = vld [vmem:[#allocation16 + $0xbcc] ss:$208 sps:$4 sm:$0xff]   ;;  %v17792_v57 = vld [vmem:[#allocation16 + $0xd68] ss:$208 sps:$4 sm:$0xff]  }
 0xdc5   :  { %13721 = vst [vmem:[#allocation21 + $0x220] sm:$0xff] %v12917_v63  ;;  %v17795_v59 = vld [vmem:[#allocation16 + $0xf08] ss:$208 sps:$4 sm:$0xff]   ;;  %v17803_v63 = vld [vmem:[#allocation16 + $0x124c] ss:$208 sps:$4 sm:$0xff]  }
 0xdc6   :  { %13722 = vst [vmem:[#allocation21 + $0x228] sm:$0xff] %v12919_v2  ;;  %13063 = vmatpush1.bf16.msra.mxu1 %v17738_v61  ;;  %v17798_v61 = vld [vmem:[#allocation16 + $0x10a8] ss:$208 sps:$4 sm:$0xff]  }
 0xdc7   :  { %13064 = vmatprep.subr.bf16.mxu1 %v17743_v1  ;;  %v17801_v13 = vld [vmem:[#allocation16 + $0x1248] ss:$208 sps:$4 sm:$0xff]   ;;  %v17806_v1 = vld [vmem:[#allocation16 + $0x13ec] ss:$208 sps:$4 sm:$0xff]  }
 0xdc8   :  { %v17804_v2 = vld [vmem:[#allocation16 + $0x13e8] ss:$208 sps:$4 sm:$0xff]  }
 0xdca   :  { %13065 = vmatpush1.bf16.msra.mxu1 %v17741_v3  ;;  %v17809_v3 = vld [vmem:[#allocation16 + $0x158c] ss:$208 sps:$4 sm:$0xff]  }
 0xdcb   :  { %13066 = vmatprep.subr.bf16.mxu1 %v17746_v4  ;;  %v17807_v4 = vld [vmem:[#allocation16 + $0x1588] ss:$208 sps:$4 sm:$0xff]  }
 0xdce   :  { %13067 = vmatpush1.bf16.msra.mxu1 %v17744_v23  ;;  %v17812_v23 = vld [vmem:[#allocation16 + $0x172c] ss:$208 sps:$4 sm:$0xff]  }
 0xdcf   :  { %13068 = vmatprep.subr.bf16.mxu1 %v17749_v5  ;;  %v17810_v5 = vld [vmem:[#allocation16 + $0x1728] ss:$208 sps:$4 sm:$0xff]  }
 0xdd2   :  { %13069 = vmatpush1.bf16.msra.mxu1 %v17747_v6  ;;  %v17815_v6 = vld [vmem:[#allocation16 + $0x18cc] ss:$208 sps:$4 sm:$0xff]  }
 0xdd3   :  { %13070 = vmatprep.subr.bf16.mxu1 %v17752_v7  ;;  %v17813_v7 = vld [vmem:[#allocation16 + $0x18c8] ss:$208 sps:$4 sm:$0xff]  }
 0xdd6   :  { %13071 = vmatpush1.bf16.msra.mxu1 %v17750_v9  ;;  %v17818_v9 = vld [vmem:[#allocation16 + $0x74] ss:$208 sps:$4 sm:$0xff]  }
 0xdd7   :  { %13072 = vmatprep.subr.bf16.mxu1 %v17755_v11  ;;  %v17816_v11 = vld [vmem:[#allocation16 + $0x70] ss:$208 sps:$4 sm:$0xff]  }
 0xdda   :  { %13073 = vmatpush1.bf16.msra.mxu1 %v17753_v12  ;;  %v17821_v12 = vld [vmem:[#allocation16 + $0x214] ss:$208 sps:$4 sm:$0xff]  }
 0xddb   :  { %13074 = vmatprep.subr.bf16.mxu1 %v17758_v14  ;;  %v17819_v14 = vld [vmem:[#allocation16 + $0x210] ss:$208 sps:$4 sm:$0xff]  }
 0xdde   :  { %13075 = vmatpush1.bf16.msra.mxu1 %v17756_v17  ;;  %v17824_v17 = vld [vmem:[#allocation16 + $0x3b4] ss:$208 sps:$4 sm:$0xff]  }
 0xddf   :  { %13076 = vmatprep.subr.bf16.mxu1 %v17761_v39  ;;  %v17822_v39 = vld [vmem:[#allocation16 + $0x3b0] ss:$208 sps:$4 sm:$0xff]  }
 0xde2   :  { %13077 = vmatpush1.bf16.msra.mxu1 %v17759_v19  ;;  %v17827_v19 = vld [vmem:[#allocation16 + $0x554] ss:$208 sps:$4 sm:$0xff]  }
 0xde3   :  { %13078 = vmatprep.subr.bf16.mxu1 %v17764_v20  ;;  %v17825_v20 = vld [vmem:[#allocation16 + $0x550] ss:$208 sps:$4 sm:$0xff]  }
 0xde6   :  { %13079 = vmatpush1.bf16.msra.mxu1 %v17762_v21  ;;  %v17830_v21 = vld [vmem:[#allocation16 + $0x6f4] ss:$208 sps:$4 sm:$0xff]  }
 0xde7   :  { %13080 = vmatprep.subr.bf16.mxu1 %v17767_v26  ;;  %v17828_v26 = vld [vmem:[#allocation16 + $0x6f0] ss:$208 sps:$4 sm:$0xff]  }
 0xdea   :  { %13081 = vmatpush1.bf16.msra.mxu1 %v17765_v27  ;;  %v17833_v27 = vld [vmem:[#allocation16 + $0x894] ss:$208 sps:$4 sm:$0xff]  }
 0xdeb   :  { %13093 = vmatprep.subr.bf16.mxu1 %v17770_v28  ;;  %v8197_v28 = vrot.slane %v21814_v48, %v21759_v62 }
 0xded   :  { %13083 = vmatmul.mubr.bf16.vlgmr.msra.gmra.mrb[60].mxu1 %v21715_v35 }
 0xdee   :  { %13094 = vmatpush1.bf16.msra.mxu1 %v17768_v29  ;;  %13125 = vmatprep.mubr.bf16.mxu1 %v21717_v36  ;;  %v8201_v29 = vrot.slane %v21814_v48, %v21762_v0 }
 0xdef   :  { %13095 = vmatprep.subr.bf16.mxu1 %v17773_v30  ;;  %v17831_v30 = vld [vmem:[#allocation16 + $0x890] ss:$208 sps:$4 sm:$0xff]  }
 0xdf2   :  { %13096 = vmatpush1.bf16.msra.mxu1 %v17771_v22  ;;  %v17836_v22 = vld [vmem:[#allocation16 + $0xa34] ss:$208 sps:$4 sm:$0xff]  }
 0xdf3   :  { %13097 = vmatprep.subr.bf16.mxu1 %v17776_v25 }
 0xdf6   :  { %13098 = vmatpush1.bf16.msra.mxu1 %v17774_v31 }
 0xdf7   :  { %13099 = vmatprep.subr.bf16.mxu1 %v17779_v32 }
 0xdfa   :  { %13100 = vmatpush1.bf16.msra.mxu1 %v17777_v16 }
 0xdfb   :  { %13101 = vmatprep.subr.bf16.mxu1 %v17782_v33 }
 0xdfe   :  { %13102 = vmatpush1.bf16.msra.mxu1 %v17780_v34  ;;  %v17834_v34 = vld [vmem:[#allocation16 + $0xa30] ss:$208 sps:$4 sm:$0xff]  }
 0xdff   :  { %13103 = vmatprep.subr.bf16.mxu1 %v17785_v37 }
 0xe00   :  { %v12955_v42 = vpop.f32.mrb[48].mxu1 }
 0xe01   :  { %v12956_v43 = vadd.f32 %v12955_v42, %v8189_v24  ;;  %v12957_v44 = vpop.f32.mrb[49].mxu1  ;;  %v17842_v42 = vld [vmem:[#allocation16 + $0xd74] ss:$208 sps:$4 sm:$0xff]  }
 0xe02   :  { %v12958_v45 = vadd.f32 %v12957_v44, %v8193_v38  ;;  %v12959_v46 = vpop.f32.mrb[50].mxu1  ;;  %13104 = vmatpush1.bf16.msra.mxu1 %v17783_v40  ;;  %v17845_v44 = vld [vmem:[#allocation16 + $0xf14] ss:$208 sps:$4 sm:$0xff]  }
 0xe03   :  { %13670 = vst [vmem:[#allocation21 + $0x90] sm:$0xff] %v12956_v43  ;;  %v12960_v49 = vadd.f32 %v12959_v46, %v8189_v24  ;;  %v12961_v51 = vpop.f32.mrb[51].mxu1  ;;  %13105 = vmatprep.subr.bf16.mxu1 %v17788_v41  ;;  %v17837_v41 = vld [vmem:[#allocation16 + $0xbd0] ss:$208 sps:$4 sm:$0xff]   ;;  %v17848_v46 = vld [vmem:[#allocation16 + $0x10b4] ss:$208 sps:$4 sm:$0xff]  }
 0xe04   :  { %13671 = vst [vmem:[#allocation21 + $0x98] sm:$0xff] %v12958_v45  ;;  %v12962_v54 = vadd.f32 %v12961_v51, %v8193_v38  ;;  %v17839_v38 = vld [vmem:[#allocation16 + $0xbd4] ss:$208 sps:$4 sm:$0xff]   ;;  %v17840_v43 = vld [vmem:[#allocation16 + $0xd70] ss:$208 sps:$4 sm:$0xff]  }
 0xe05   :  { %13723 = vst [vmem:[#allocation21 + $0x230] sm:$0xff] %v12960_v49  ;;  %v17843_v45 = vld [vmem:[#allocation16 + $0xf10] ss:$208 sps:$4 sm:$0xff]   ;;  %v17851_v49 = vld [vmem:[#allocation16 + $0x1254] ss:$208 sps:$4 sm:$0xff]  }
 0xe06   :  { %13724 = vst [vmem:[#allocation21 + $0x238] sm:$0xff] %v12962_v54  ;;  %13106 = vmatpush1.bf16.msra.mxu1 %v17786_v47  ;;  %v17846_v47 = vld [vmem:[#allocation16 + $0x10b0] ss:$208 sps:$4 sm:$0xff]  }
 0xe07   :  { %13107 = vmatprep.subr.bf16.mxu1 %v17791_v53  ;;  %v17849_v51 = vld [vmem:[#allocation16 + $0x1250] ss:$208 sps:$4 sm:$0xff]   ;;  %v17854_v53 = vld [vmem:[#allocation16 + $0x13f4] ss:$208 sps:$4 sm:$0xff]  }
 0xe08   :  { %v17852_v54 = vld [vmem:[#allocation16 + $0x13f0] ss:$208 sps:$4 sm:$0xff]  }
 0xe0a   :  { %13108 = vmatpush1.bf16.msra.mxu1 %v17789_v55  ;;  %v17857_v55 = vld [vmem:[#allocation16 + $0x1594] ss:$208 sps:$4 sm:$0xff]  }
 0xe0b   :  { %13109 = vmatprep.subr.bf16.mxu1 %v17794_v56  ;;  %v17855_v56 = vld [vmem:[#allocation16 + $0x1590] ss:$208 sps:$4 sm:$0xff]  }
 0xe0e   :  { %13110 = vmatpush1.bf16.msra.mxu1 %v17792_v57  ;;  %v17860_v57 = vld [vmem:[#allocation16 + $0x1734] ss:$208 sps:$4 sm:$0xff]  }
 0xe0f   :  { %13111 = vmatprep.subr.bf16.mxu1 %v17797_v58  ;;  %v17858_v58 = vld [vmem:[#allocation16 + $0x1730] ss:$208 sps:$4 sm:$0xff]  }
 0xe12   :  { %13112 = vmatpush1.bf16.msra.mxu1 %v17795_v59  ;;  %v17863_v59 = vld [vmem:[#allocation16 + $0x18d4] ss:$208 sps:$4 sm:$0xff]  }
 0xe13   :  { %13113 = vmatprep.subr.bf16.mxu1 %v17800_v60  ;;  %v17861_v60 = vld [vmem:[#allocation16 + $0x18d0] ss:$208 sps:$4 sm:$0xff]  }
 0xe16   :  { %13114 = vmatpush1.bf16.msra.mxu1 %v17798_v61  ;;  %v17866_v61 = vld [vmem:[#allocation16 + $0x7c] ss:$208 sps:$4 sm:$0xff]  }
 0xe17   :  { %13115 = vmatprep.subr.bf16.mxu1 %v17803_v63  ;;  %v17864_v63 = vld [vmem:[#allocation16 + $0x78] ss:$208 sps:$4 sm:$0xff]  }
 0xe1a   :  { %13116 = vmatpush1.bf16.msra.mxu1 %v17801_v13  ;;  %v17869_v13 = vld [vmem:[#allocation16 + $0x21c] ss:$208 sps:$4 sm:$0xff]  }
 0xe1b   :  { %13117 = vmatprep.subr.bf16.mxu1 %v17806_v1  ;;  %v17867_v1 = vld [vmem:[#allocation16 + $0x218] ss:$208 sps:$4 sm:$0xff]  }
 0xe1e   :  { %13118 = vmatpush1.bf16.msra.mxu1 %v17804_v2  ;;  %v17872_v2 = vld [vmem:[#allocation16 + $0x3bc] ss:$208 sps:$4 sm:$0xff]  }
 0xe1f   :  { %13119 = vmatprep.subr.bf16.mxu1 %v17809_v3  ;;  %v17870_v3 = vld [vmem:[#allocation16 + $0x3b8] ss:$208 sps:$4 sm:$0xff]  }
 0xe22   :  { %13120 = vmatpush1.bf16.msra.mxu1 %v17807_v4  ;;  %v17875_v4 = vld [vmem:[#allocation16 + $0x55c] ss:$208 sps:$4 sm:$0xff]  }
 0xe23   :  { %13121 = vmatprep.subr.bf16.mxu1 %v17812_v23  ;;  %v17873_v23 = vld [vmem:[#allocation16 + $0x558] ss:$208 sps:$4 sm:$0xff]  }
 0xe26   :  { %13122 = vmatpush1.bf16.msra.mxu1 %v17810_v5  ;;  %v17878_v5 = vld [vmem:[#allocation16 + $0x6fc] ss:$208 sps:$4 sm:$0xff]  }
 0xe27   :  { %13123 = vmatprep.subr.bf16.mxu1 %v17815_v6  ;;  %v17876_v6 = vld [vmem:[#allocation16 + $0x6f8] ss:$208 sps:$4 sm:$0xff]  }
 0xe2a   :  { %13124 = vmatpush1.bf16.msra.mxu1 %v17813_v7  ;;  %v17881_v7 = vld [vmem:[#allocation16 + $0x89c] ss:$208 sps:$4 sm:$0xff]  }
 0xe2b   :  { %13136 = vmatprep.subr.bf16.mxu1 %v17818_v9  ;;  %v8205_v9 = vrot.slane %v21814_v48, %v21771_v50 }
 0xe2d   :  { %13126 = vmatmul.mubr.bf16.vlgmr.msra.gmra.mrb[64].mxu1 %v21715_v35 }
 0xe2e   :  { %13137 = vmatpush1.bf16.msra.mxu1 %v17816_v11  ;;  %13168 = vmatprep.mubr.bf16.mxu1 %v21717_v36  ;;  %v8209_v11 = vrot.slane %v21814_v48, %v21774_v52  ;;  %v17885_v48 = vld [vmem:[#allocation16 + $0xbd8] ss:$208 sps:$4 sm:$0xff]  }
 0xe2f   :  { %13138 = vmatprep.subr.bf16.mxu1 %v17821_v12  ;;  %v17879_v12 = vld [vmem:[#allocation16 + $0x898] ss:$208 sps:$4 sm:$0xff]  }
 0xe32   :  { %13139 = vmatpush1.bf16.msra.mxu1 %v17819_v14  ;;  %v17884_v14 = vld [vmem:[#allocation16 + $0xa3c] ss:$208 sps:$4 sm:$0xff]  }
 0xe33   :  { %13140 = vmatprep.subr.bf16.mxu1 %v17824_v17 }
 0xe36   :  { %13141 = vmatpush1.bf16.msra.mxu1 %v17822_v39 }
 0xe37   :  { %13142 = vmatprep.subr.bf16.mxu1 %v17827_v19 }
 0xe3a   :  { %13143 = vmatpush1.bf16.msra.mxu1 %v17825_v20 }
 0xe3b   :  { %13144 = vmatprep.subr.bf16.mxu1 %v17830_v21 }
 0xe3e   :  { %13145 = vmatpush1.bf16.msra.mxu1 %v17828_v26  ;;  %v17882_v26 = vld [vmem:[#allocation16 + $0xa38] ss:$208 sps:$4 sm:$0xff]  }
 0xe3f   :  { %13146 = vmatprep.subr.bf16.mxu1 %v17833_v27 }
 0xe40   :  { %v12998_v25 = vpop.f32.mrb[52].mxu1 }
 0xe41   :  { %v12999_v31 = vadd.f32 %v12998_v25, %v8197_v28  ;;  %v13000_v32 = vpop.f32.mrb[53].mxu1  ;;  %v17888_v25 = vld [vmem:[#allocation16 + $0xd78] ss:$208 sps:$4 sm:$0xff]  }
 0xe42   :  { %v13001_v16 = vadd.f32 %v13000_v32, %v8201_v29  ;;  %v13002_v33 = vpop.f32.mrb[54].mxu1  ;;  %13147 = vmatpush1.bf16.msra.mxu1 %v17831_v30  ;;  %v17891_v32 = vld [vmem:[#allocation16 + $0xf18] ss:$208 sps:$4 sm:$0xff]  }
 0xe43   :  { %13672 = vst [vmem:[#allocation21 + $0xa0] sm:$0xff] %v12999_v31  ;;  %v13003_v37 = vadd.f32 %v13002_v33, %v8197_v28  ;;  %v13004_v24 = vpop.f32.mrb[55].mxu1  ;;  %13148 = vmatprep.subr.bf16.mxu1 %v17836_v22  ;;  %v17890_v22 = vld [vmem:[#allocation16 + $0xd7c] ss:$208 sps:$4 sm:$0xff]   ;;  %v17894_v33 = vld [vmem:[#allocation16 + $0x10b8] ss:$208 sps:$4 sm:$0xff]  }
 0xe44   :  { %13673 = vst [vmem:[#allocation21 + $0xa8] sm:$0xff] %v13001_v16  ;;  %v13005_v40 = vadd.f32 %v13004_v24, %v8201_v29  ;;  %v17887_v29 = vld [vmem:[#allocation16 + $0xbdc] ss:$208 sps:$4 sm:$0xff]  }
 0xe45   :  { %13725 = vst [vmem:[#allocation21 + $0x240] sm:$0xff] %v13003_v37  ;;  %v17893_v31 = vld [vmem:[#allocation16 + $0xf1c] ss:$208 sps:$4 sm:$0xff]   ;;  %v17897_v37 = vld [vmem:[#allocation16 + $0x1258] ss:$208 sps:$4 sm:$0xff]  }
 0xe46   :  { %13726 = vst [vmem:[#allocation21 + $0x248] sm:$0xff] %v13005_v40  ;;  %13149 = vmatpush1.bf16.msra.mxu1 %v17834_v34  ;;  %v17896_v16 = vld [vmem:[#allocation16 + $0x10bc] ss:$208 sps:$4 sm:$0xff]  }
 0xe47   :  { %13150 = vmatprep.subr.bf16.mxu1 %v17839_v38  ;;  %v17899_v34 = vld [vmem:[#allocation16 + $0x125c] ss:$208 sps:$4 sm:$0xff]   ;;  %v17900_v38 = vld [vmem:[#allocation16 + $0x13f8] ss:$208 sps:$4 sm:$0xff]  }
 0xe48   :  { %v17902_v24 = vld [vmem:[#allocation16 + $0x13fc] ss:$208 sps:$4 sm:$0xff]  }
 0xe49   :  { %v17905_v40 = vld [vmem:[#allocation16 + $0x159c] ss:$208 sps:$4 sm:$0xff]  }
 0xe4a   :  { %13151 = vmatpush1.bf16.msra.mxu1 %v17837_v41  ;;  %v17903_v41 = vld [vmem:[#allocation16 + $0x1598] ss:$208 sps:$4 sm:$0xff]  }
 0xe4b   :  { %13152 = vmatprep.subr.bf16.mxu1 %v17842_v42  ;;  %v17908_v42 = vld [vmem:[#allocation16 + $0x173c] ss:$208 sps:$4 sm:$0xff]  }
 0xe4e   :  { %13153 = vmatpush1.bf16.msra.mxu1 %v17840_v43  ;;  %v17906_v43 = vld [vmem:[#allocation16 + $0x1738] ss:$208 sps:$4 sm:$0xff]  }
 0xe4f   :  { %13154 = vmatprep.subr.bf16.mxu1 %v17845_v44  ;;  %v17911_v44 = vld [vmem:[#allocation16 + $0x18dc] ss:$208 sps:$4 sm:$0xff]  }
 0xe52   :  { %13155 = vmatpush1.bf16.msra.mxu1 %v17843_v45  ;;  %v17909_v45 = vld [vmem:[#allocation16 + $0x18d8] ss:$208 sps:$4 sm:$0xff]  }
 0xe53   :  { %13156 = vmatprep.subr.bf16.mxu1 %v17848_v46  ;;  %v17914_v46 = vld [vmem:[#allocation16 + $0x84] ss:$208 sps:$4 sm:$0xff]  }
 0xe56   :  { %13157 = vmatpush1.bf16.msra.mxu1 %v17846_v47  ;;  %v17912_v47 = vld [vmem:[#allocation16 + $0x80] ss:$208 sps:$4 sm:$0xff]  }
 0xe57   :  { %13158 = vmatprep.subr.bf16.mxu1 %v17851_v49  ;;  %v17917_v49 = vld [vmem:[#allocation16 + $0x224] ss:$208 sps:$4 sm:$0xff]  }
 0xe5a   :  { %13159 = vmatpush1.bf16.msra.mxu1 %v17849_v51  ;;  %v17915_v51 = vld [vmem:[#allocation16 + $0x220] ss:$208 sps:$4 sm:$0xff]  }
 0xe5b   :  { %13160 = vmatprep.subr.bf16.mxu1 %v17854_v53  ;;  %v17920_v53 = vld [vmem:[#allocation16 + $0x3c4] ss:$208 sps:$4 sm:$0xff]  }
 0xe5e   :  { %13161 = vmatpush1.bf16.msra.mxu1 %v17852_v54  ;;  %v17918_v54 = vld [vmem:[#allocation16 + $0x3c0] ss:$208 sps:$4 sm:$0xff]  }
 0xe5f   :  { %13162 = vmatprep.subr.bf16.mxu1 %v17857_v55  ;;  %v17923_v55 = vld [vmem:[#allocation16 + $0x564] ss:$208 sps:$4 sm:$0xff]  }
 0xe62   :  { %13163 = vmatpush1.bf16.msra.mxu1 %v17855_v56  ;;  %v17921_v56 = vld [vmem:[#allocation16 + $0x560] ss:$208 sps:$4 sm:$0xff]  }
 0xe63   :  { %13164 = vmatprep.subr.bf16.mxu1 %v17860_v57  ;;  %v17926_v57 = vld [vmem:[#allocation16 + $0x704] ss:$208 sps:$4 sm:$0xff]  }
 0xe66   :  { %13165 = vmatpush1.bf16.msra.mxu1 %v17858_v58  ;;  %v17924_v58 = vld [vmem:[#allocation16 + $0x700] ss:$208 sps:$4 sm:$0xff]  }
 0xe67   :  { %13166 = vmatprep.subr.bf16.mxu1 %v17863_v59  ;;  %v21843_v59 = vld [vmem:[%s21989_s13 + $0x18] sm:$0xff] }
 0xe6a   :  { %13167 = vmatpush1.bf16.msra.mxu1 %v17861_v60  ;;  %v17929_v60 = vld [vmem:[#allocation16 + $0x8a4] ss:$208 sps:$4 sm:$0xff]  }
 0xe6b   :  { %13179 = vmatprep.subr.bf16.mxu1 %v17866_v61  ;;  %v8213_v61 = vrot.slane %v21843_v59, %v21667_v8 }
 0xe6d   :  { %13169 = vmatmul.mubr.bf16.vlgmr.msra.gmra.mrb[68].mxu1 %v21715_v35 }
 0xe6e   :  { %13180 = vmatpush1.bf16.msra.mxu1 %v17864_v63  ;;  %13211 = vmatprep.mubr.bf16.mxu1 %v21717_v36  ;;  %v8217_v63 = vrot.slane %v21843_v59, %v21670_v10 }
 0xe6f   :  { %13181 = vmatprep.subr.bf16.mxu1 %v17869_v13  ;;  %v17927_v13 = vld [vmem:[#allocation16 + $0x8a0] ss:$208 sps:$4 sm:$0xff]  }
 0xe72   :  { %13182 = vmatpush1.bf16.msra.mxu1 %v17867_v1  ;;  %v17932_v1 = vld [vmem:[#allocation16 + $0xa44] ss:$208 sps:$4 sm:$0xff]  }
 0xe73   :  { %13183 = vmatprep.subr.bf16.mxu1 %v17872_v2 }
 0xe76   :  { %13184 = vmatpush1.bf16.msra.mxu1 %v17870_v3 }
 0xe77   :  { %13185 = vmatprep.subr.bf16.mxu1 %v17875_v4 }
 0xe7a   :  { %13186 = vmatpush1.bf16.msra.mxu1 %v17873_v23 }
 0xe7b   :  { %13187 = vmatprep.subr.bf16.mxu1 %v17878_v5 }
 0xe7e   :  { %13188 = vmatpush1.bf16.msra.mxu1 %v17876_v6  ;;  %v17930_v6 = vld [vmem:[#allocation16 + $0xa40] ss:$208 sps:$4 sm:$0xff]  }
 0xe7f   :  { %13189 = vmatprep.subr.bf16.mxu1 %v17881_v7 }
 0xe80   :  { %v13041_v17 = vpop.f32.mrb[56].mxu1 }
 0xe81   :  { %v13042_v39 = vadd.f32 %v13041_v17, %v8205_v9  ;;  %v13043_v19 = vpop.f32.mrb[57].mxu1  ;;  %v17938_v17 = vld [vmem:[#allocation16 + $0xd84] ss:$208 sps:$4 sm:$0xff]  }
 0xe82   :  { %v13044_v20 = vadd.f32 %v13043_v19, %v8209_v11  ;;  %v13045_v21 = vpop.f32.mrb[58].mxu1  ;;  %13190 = vmatpush1.bf16.msra.mxu1 %v17879_v12  ;;  %v17941_v19 = vld [vmem:[#allocation16 + $0xf24] ss:$208 sps:$4 sm:$0xff]  }
 0xe83   :  { %13674 = vst [vmem:[#allocation21 + $0xb0] sm:$0xff] %v13042_v39  ;;  %v13046_v27 = vadd.f32 %v13045_v21, %v8205_v9  ;;  %v13047_v28 = vpop.f32.mrb[59].mxu1  ;;  %13191 = vmatprep.subr.bf16.mxu1 %v17884_v14  ;;  %v17933_v14 = vld [vmem:[#allocation16 + $0xbe0] ss:$208 sps:$4 sm:$0xff]   ;;  %v17944_v21 = vld [vmem:[#allocation16 + $0x10c4] ss:$208 sps:$4 sm:$0xff]  }
 0xe84   :  { %13675 = vst [vmem:[#allocation21 + $0xb8] sm:$0xff] %v13044_v20  ;;  %v13048_v30 = vadd.f32 %v13047_v28, %v8209_v11  ;;  %v17935_v11 = vld [vmem:[#allocation16 + $0xbe4] ss:$208 sps:$4 sm:$0xff]   ;;  %v17936_v39 = vld [vmem:[#allocation16 + $0xd80] ss:$208 sps:$4 sm:$0xff]  }
 0xe85   :  { %13727 = vst [vmem:[#allocation21 + $0x250] sm:$0xff] %v13046_v27  ;;  %v17939_v20 = vld [vmem:[#allocation16 + $0xf20] ss:$208 sps:$4 sm:$0xff]   ;;  %v17947_v27 = vld [vmem:[#allocation16 + $0x1264] ss:$208 sps:$4 sm:$0xff]  }
 0xe86   :  { %13728 = vst [vmem:[#allocation21 + $0x258] sm:$0xff] %v13048_v30  ;;  %13192 = vmatpush1.bf16.msra.mxu1 %v17882_v26  ;;  %v17942_v26 = vld [vmem:[#allocation16 + $0x10c0] ss:$208 sps:$4 sm:$0xff]  }
 0xe87   :  { %13193 = vmatprep.subr.bf16.mxu1 %v17887_v29  ;;  %v17945_v28 = vld [vmem:[#allocation16 + $0x1260] ss:$208 sps:$4 sm:$0xff]   ;;  %v17950_v29 = vld [vmem:[#allocation16 + $0x1404] ss:$208 sps:$4 sm:$0xff]  }
 0xe88   :  { %v17948_v30 = vld [vmem:[#allocation16 + $0x1400] ss:$208 sps:$4 sm:$0xff]  }
 0xe8a   :  { %13194 = vmatpush1.bf16.msra.mxu1 %v17885_v48  ;;  %v17953_v48 = vld [vmem:[#allocation16 + $0x15a4] ss:$208 sps:$4 sm:$0xff]  }
 0xe8b   :  { %13195 = vmatprep.subr.bf16.mxu1 %v17890_v22  ;;  %v17951_v22 = vld [vmem:[#allocation16 + $0x15a0] ss:$208 sps:$4 sm:$0xff]  }
 0xe8e   :  { %13196 = vmatpush1.bf16.msra.mxu1 %v17888_v25  ;;  %v17956_v25 = vld [vmem:[#allocation16 + $0x1744] ss:$208 sps:$4 sm:$0xff]  }
 0xe8f   :  { %13197 = vmatprep.subr.bf16.mxu1 %v17893_v31  ;;  %v17954_v31 = vld [vmem:[#allocation16 + $0x1740] ss:$208 sps:$4 sm:$0xff]  }
 0xe92   :  { %13198 = vmatpush1.bf16.msra.mxu1 %v17891_v32  ;;  %v17959_v32 = vld [vmem:[#allocation16 + $0x18e4] ss:$208 sps:$4 sm:$0xff]  }
 0xe93   :  { %13199 = vmatprep.subr.bf16.mxu1 %v17896_v16  ;;  %v17957_v16 = vld [vmem:[#allocation16 + $0x18e0] ss:$208 sps:$4 sm:$0xff]  }
 0xe96   :  { %13200 = vmatpush1.bf16.msra.mxu1 %v17894_v33  ;;  %v17962_v33 = vld [vmem:[#allocation16 + $0x8c] ss:$208 sps:$4 sm:$0xff]  }
 0xe97   :  { %13201 = vmatprep.subr.bf16.mxu1 %v17899_v34  ;;  %v17960_v34 = vld [vmem:[#allocation16 + $0x88] ss:$208 sps:$4 sm:$0xff]  }
 0xe9a   :  { %13202 = vmatpush1.bf16.msra.mxu1 %v17897_v37  ;;  %v17965_v37 = vld [vmem:[#allocation16 + $0x22c] ss:$208 sps:$4 sm:$0xff]  }
 0xe9b   :  { %13203 = vmatprep.subr.bf16.mxu1 %v17902_v24  ;;  %v17963_v24 = vld [vmem:[#allocation16 + $0x228] ss:$208 sps:$4 sm:$0xff]  }
 0xe9e   :  { %13204 = vmatpush1.bf16.msra.mxu1 %v17900_v38  ;;  %v17968_v38 = vld [vmem:[#allocation16 + $0x3cc] ss:$208 sps:$4 sm:$0xff]  }
 0xe9f   :  { %13205 = vmatprep.subr.bf16.mxu1 %v17905_v40  ;;  %v17966_v40 = vld [vmem:[#allocation16 + $0x3c8] ss:$208 sps:$4 sm:$0xff]  }
 0xea2   :  { %13206 = vmatpush1.bf16.msra.mxu1 %v17903_v41  ;;  %v17971_v41 = vld [vmem:[#allocation16 + $0x56c] ss:$208 sps:$4 sm:$0xff]  }
 0xea3   :  { %13207 = vmatprep.subr.bf16.mxu1 %v17908_v42  ;;  %v17969_v42 = vld [vmem:[#allocation16 + $0x568] ss:$208 sps:$4 sm:$0xff]  }
 0xea6   :  { %13208 = vmatpush1.bf16.msra.mxu1 %v17906_v43  ;;  %v17974_v43 = vld [vmem:[#allocation16 + $0x70c] ss:$208 sps:$4 sm:$0xff]  }
 0xea7   :  { %13209 = vmatprep.subr.bf16.mxu1 %v17911_v44  ;;  %v17972_v44 = vld [vmem:[#allocation16 + $0x708] ss:$208 sps:$4 sm:$0xff]  }
 0xeaa   :  { %13210 = vmatpush1.bf16.msra.mxu1 %v17909_v45  ;;  %v17977_v45 = vld [vmem:[#allocation16 + $0x8ac] ss:$208 sps:$4 sm:$0xff]  }
 0xeab   :  { %13222 = vmatprep.subr.bf16.mxu1 %v17914_v46  ;;  %v8221_v46 = vrot.slane %v21843_v59, %v21747_v15 }
 0xead   :  { %13212 = vmatmul.mubr.bf16.vlgmr.msra.gmra.mrb[72].mxu1 %v21715_v35 }
 0xeae   :  { %13223 = vmatpush1.bf16.msra.mxu1 %v17912_v47  ;;  %13254 = vmatprep.mubr.bf16.mxu1 %v21717_v36  ;;  %v8225_v47 = vrot.slane %v21843_v59, %v21750_v18 }
 0xeaf   :  { %13224 = vmatprep.subr.bf16.mxu1 %v17917_v49  ;;  %v17975_v49 = vld [vmem:[#allocation16 + $0x8a8] ss:$208 sps:$4 sm:$0xff]  }
 0xeb2   :  { %13225 = vmatpush1.bf16.msra.mxu1 %v17915_v51  ;;  %v17980_v51 = vld [vmem:[#allocation16 + $0xa4c] ss:$208 sps:$4 sm:$0xff]  }
 0xeb3   :  { %13226 = vmatprep.subr.bf16.mxu1 %v17920_v53 }
 0xeb6   :  { %13227 = vmatpush1.bf16.msra.mxu1 %v17918_v54 }
 0xeb7   :  { %13228 = vmatprep.subr.bf16.mxu1 %v17923_v55 }
 0xeba   :  { %13229 = vmatpush1.bf16.msra.mxu1 %v17921_v56 }
 0xebb   :  { %13230 = vmatprep.subr.bf16.mxu1 %v17926_v57 }
 0xebe   :  { %13231 = vmatpush1.bf16.msra.mxu1 %v17924_v58  ;;  %v17978_v58 = vld [vmem:[#allocation16 + $0xa48] ss:$208 sps:$4 sm:$0xff]  }
 0xebf   :  { %13232 = vmatprep.subr.bf16.mxu1 %v17929_v60 }
 0xec0   :  { %v13084_v2 = vpop.f32.mrb[60].mxu1 }
 0xec1   :  { %v13085_v3 = vadd.f32 %v13084_v2, %v8213_v61  ;;  %v13086_v4 = vpop.f32.mrb[61].mxu1  ;;  %v17986_v2 = vld [vmem:[#allocation16 + $0xd8c] ss:$208 sps:$4 sm:$0xff]  }
 0xec2   :  { %v13087_v23 = vadd.f32 %v13086_v4, %v8217_v63  ;;  %v13088_v5 = vpop.f32.mrb[62].mxu1  ;;  %13233 = vmatpush1.bf16.msra.mxu1 %v17927_v13  ;;  %v17989_v4 = vld [vmem:[#allocation16 + $0xf2c] ss:$208 sps:$4 sm:$0xff]  }
 0xec3   :  { %13676 = vst [vmem:[#allocation21 + $0xc0] sm:$0xff] %v13085_v3  ;;  %v13089_v7 = vadd.f32 %v13088_v5, %v8213_v61  ;;  %v13090_v9 = vpop.f32.mrb[63].mxu1  ;;  %13234 = vmatprep.subr.bf16.mxu1 %v17932_v1  ;;  %v17981_v1 = vld [vmem:[#allocation16 + $0xbe8] ss:$208 sps:$4 sm:$0xff]   ;;  %v17992_v5 = vld [vmem:[#allocation16 + $0x10cc] ss:$208 sps:$4 sm:$0xff]  }
 0xec4   :  { %13677 = vst [vmem:[#allocation21 + $0xc8] sm:$0xff] %v13087_v23  ;;  %v13091_v12 = vadd.f32 %v13090_v9, %v8217_v63  ;;  %v17983_v63 = vld [vmem:[#allocation16 + $0xbec] ss:$208 sps:$4 sm:$0xff]   ;;  %v17984_v3 = vld [vmem:[#allocation16 + $0xd88] ss:$208 sps:$4 sm:$0xff]  }
 0xec5   :  { %13729 = vst [vmem:[#allocation21 + $0x260] sm:$0xff] %v13089_v7  ;;  %v17987_v23 = vld [vmem:[#allocation16 + $0xf28] ss:$208 sps:$4 sm:$0xff]   ;;  %v17995_v7 = vld [vmem:[#allocation16 + $0x126c] ss:$208 sps:$4 sm:$0xff]  }
 0xec6   :  { %13730 = vst [vmem:[#allocation21 + $0x268] sm:$0xff] %v13091_v12  ;;  %13235 = vmatpush1.bf16.msra.mxu1 %v17930_v6  ;;  %v17990_v6 = vld [vmem:[#allocation16 + $0x10c8] ss:$208 sps:$4 sm:$0xff]  }
 0xec7   :  { %13236 = vmatprep.subr.bf16.mxu1 %v17935_v11  ;;  %v17993_v9 = vld [vmem:[#allocation16 + $0x1268] ss:$208 sps:$4 sm:$0xff]   ;;  %v17998_v11 = vld [vmem:[#allocation16 + $0x140c] ss:$208 sps:$4 sm:$0xff]  }
 0xec8   :  { %v17996_v12 = vld [vmem:[#allocation16 + $0x1408] ss:$208 sps:$4 sm:$0xff]  }
 0xeca   :  { %13237 = vmatpush1.bf16.msra.mxu1 %v17933_v14  ;;  %v18001_v14 = vld [vmem:[#allocation16 + $0x15ac] ss:$208 sps:$4 sm:$0xff]  }
 0xecb   :  { %13238 = vmatprep.subr.bf16.mxu1 %v17938_v17  ;;  %v17999_v17 = vld [vmem:[#allocation16 + $0x15a8] ss:$208 sps:$4 sm:$0xff]  }
 0xece   :  { %13239 = vmatpush1.bf16.msra.mxu1 %v17936_v39  ;;  %v18004_v39 = vld [vmem:[#allocation16 + $0x174c] ss:$208 sps:$4 sm:$0xff]  }
 0xecf   :  { %13240 = vmatprep.subr.bf16.mxu1 %v17941_v19  ;;  %v18002_v19 = vld [vmem:[#allocation16 + $0x1748] ss:$208 sps:$4 sm:$0xff]  }
 0xed2   :  { %13241 = vmatpush1.bf16.msra.mxu1 %v17939_v20  ;;  %v18007_v20 = vld [vmem:[#allocation16 + $0x18ec] ss:$208 sps:$4 sm:$0xff]  }
 0xed3   :  { %13242 = vmatprep.subr.bf16.mxu1 %v17944_v21  ;;  %v18005_v21 = vld [vmem:[#allocation16 + $0x18e8] ss:$208 sps:$4 sm:$0xff]  }
 0xed6   :  { %13243 = vmatpush1.bf16.msra.mxu1 %v17942_v26  ;;  %v18010_v26 = vld [vmem:[#allocation16 + $0x94] ss:$208 sps:$4 sm:$0xff]  }
 0xed7   :  { %13244 = vmatprep.subr.bf16.mxu1 %v17947_v27  ;;  %v18008_v27 = vld [vmem:[#allocation16 + $0x90] ss:$208 sps:$4 sm:$0xff]  }
 0xeda   :  { %13245 = vmatpush1.bf16.msra.mxu1 %v17945_v28  ;;  %v18013_v28 = vld [vmem:[#allocation16 + $0x234] ss:$208 sps:$4 sm:$0xff]  }
 0xedb   :  { %13246 = vmatprep.subr.bf16.mxu1 %v17950_v29  ;;  %v18011_v29 = vld [vmem:[#allocation16 + $0x230] ss:$208 sps:$4 sm:$0xff]  }
 0xede   :  { %13247 = vmatpush1.bf16.msra.mxu1 %v17948_v30  ;;  %v18016_v30 = vld [vmem:[#allocation16 + $0x3d4] ss:$208 sps:$4 sm:$0xff]  }
 0xedf   :  { %13248 = vmatprep.subr.bf16.mxu1 %v17953_v48  ;;  %v18014_v48 = vld [vmem:[#allocation16 + $0x3d0] ss:$208 sps:$4 sm:$0xff]  }
 0xee2   :  { %13249 = vmatpush1.bf16.msra.mxu1 %v17951_v22  ;;  %v18019_v22 = vld [vmem:[#allocation16 + $0x574] ss:$208 sps:$4 sm:$0xff]  }
 0xee3   :  { %13250 = vmatprep.subr.bf16.mxu1 %v17956_v25  ;;  %v18017_v25 = vld [vmem:[#allocation16 + $0x570] ss:$208 sps:$4 sm:$0xff]  }
 0xee6   :  { %13251 = vmatpush1.bf16.msra.mxu1 %v17954_v31  ;;  %v18022_v31 = vld [vmem:[#allocation16 + $0x714] ss:$208 sps:$4 sm:$0xff]  }
 0xee7   :  { %13252 = vmatprep.subr.bf16.mxu1 %v17959_v32  ;;  %v18020_v32 = vld [vmem:[#allocation16 + $0x710] ss:$208 sps:$4 sm:$0xff]  }
 0xeea   :  { %13253 = vmatpush1.bf16.msra.mxu1 %v17957_v16  ;;  %v18025_v16 = vld [vmem:[#allocation16 + $0x8b4] ss:$208 sps:$4 sm:$0xff]  }
 0xeeb   :  { %13265 = vmatprep.subr.bf16.mxu1 %v17962_v33  ;;  %v8229_v33 = vrot.slane %v21843_v59, %v21759_v62 }
 0xeed   :  { %13255 = vmatmul.mubr.bf16.vlgmr.msra.gmra.mrb[76].mxu1 %v21715_v35 }
 0xeee   :  { %13266 = vmatpush1.bf16.msra.mxu1 %v17960_v34  ;;  %13297 = vmatprep.mubr.bf16.mxu1 %v21717_v36  ;;  %v8233_v34 = vrot.slane %v21843_v59, %v21762_v0 }
 0xeef   :  { %13267 = vmatprep.subr.bf16.mxu1 %v17965_v37  ;;  %v18023_v37 = vld [vmem:[#allocation16 + $0x8b0] ss:$208 sps:$4 sm:$0xff]  }
 0xef2   :  { %13268 = vmatpush1.bf16.msra.mxu1 %v17963_v24  ;;  %v18028_v24 = vld [vmem:[#allocation16 + $0xa54] ss:$208 sps:$4 sm:$0xff]  }
 0xef3   :  { %13269 = vmatprep.subr.bf16.mxu1 %v17968_v38 }
 0xef6   :  { %13270 = vmatpush1.bf16.msra.mxu1 %v17966_v40 }
 0xef7   :  { %13271 = vmatprep.subr.bf16.mxu1 %v17971_v41 }
 0xefa   :  { %13272 = vmatpush1.bf16.msra.mxu1 %v17969_v42 }
 0xefb   :  { %13273 = vmatprep.subr.bf16.mxu1 %v17974_v43 }
 0xefe   :  { %13274 = vmatpush1.bf16.msra.mxu1 %v17972_v44  ;;  %v18026_v44 = vld [vmem:[#allocation16 + $0xa50] ss:$208 sps:$4 sm:$0xff]  }
 0xeff   :  { %13275 = vmatprep.subr.bf16.mxu1 %v17977_v45 }
 0xf00   :  { %v13127_v53 = vpop.f32.mrb[64].mxu1 }
 0xf01   :  { %v13128_v54 = vadd.f32 %v13127_v53, %v8221_v46  ;;  %v13129_v55 = vpop.f32.mrb[65].mxu1  ;;  %v18034_v53 = vld [vmem:[#allocation16 + $0xd94] ss:$208 sps:$4 sm:$0xff]  }
 0xf02   :  { %v13130_v56 = vadd.f32 %v13129_v55, %v8225_v47  ;;  %v13131_v57 = vpop.f32.mrb[66].mxu1  ;;  %13276 = vmatpush1.bf16.msra.mxu1 %v17975_v49  ;;  %v18037_v55 = vld [vmem:[#allocation16 + $0xf34] ss:$208 sps:$4 sm:$0xff]  }
 0xf03   :  { %13678 = vst [vmem:[#allocation21 + $0xd0] sm:$0xff] %v13128_v54  ;;  %v13132_v60 = vadd.f32 %v13131_v57, %v8221_v46  ;;  %v13133_v61 = vpop.f32.mrb[67].mxu1  ;;  %13277 = vmatprep.subr.bf16.mxu1 %v17980_v51  ;;  %v18029_v51 = vld [vmem:[#allocation16 + $0xbf0] ss:$208 sps:$4 sm:$0xff]   ;;  %v18040_v57 = vld [vmem:[#allocation16 + $0x10d4] ss:$208 sps:$4 sm:$0xff]  }
 0xf04   :  { %13679 = vst [vmem:[#allocation21 + $0xd8] sm:$0xff] %v13130_v56  ;;  %v13134_v13 = vadd.f32 %v13133_v61, %v8225_v47  ;;  %v18031_v47 = vld [vmem:[#allocation16 + $0xbf4] ss:$208 sps:$4 sm:$0xff]   ;;  %v18032_v54 = vld [vmem:[#allocation16 + $0xd90] ss:$208 sps:$4 sm:$0xff]  }
 0xf05   :  { %13731 = vst [vmem:[#allocation21 + $0x270] sm:$0xff] %v13132_v60  ;;  %v18035_v56 = vld [vmem:[#allocation16 + $0xf30] ss:$208 sps:$4 sm:$0xff]   ;;  %v18043_v60 = vld [vmem:[#allocation16 + $0x1274] ss:$208 sps:$4 sm:$0xff]  }
 0xf06   :  { %13732 = vst [vmem:[#allocation21 + $0x278] sm:$0xff] %v13134_v13  ;;  %13278 = vmatpush1.bf16.msra.mxu1 %v17978_v58  ;;  %v18038_v58 = vld [vmem:[#allocation16 + $0x10d0] ss:$208 sps:$4 sm:$0xff]  }
 0xf07   :  { %13279 = vmatprep.subr.bf16.mxu1 %v17983_v63  ;;  %v18041_v61 = vld [vmem:[#allocation16 + $0x1270] ss:$208 sps:$4 sm:$0xff]   ;;  %v18046_v63 = vld [vmem:[#allocation16 + $0x1414] ss:$208 sps:$4 sm:$0xff]  }
 0xf08   :  { %v18044_v13 = vld [vmem:[#allocation16 + $0x1410] ss:$208 sps:$4 sm:$0xff]  }
 0xf0a   :  { %13280 = vmatpush1.bf16.msra.mxu1 %v17981_v1  ;;  %v18049_v1 = vld [vmem:[#allocation16 + $0x15b4] ss:$208 sps:$4 sm:$0xff]  }
 0xf0b   :  { %13281 = vmatprep.subr.bf16.mxu1 %v17986_v2  ;;  %v18047_v2 = vld [vmem:[#allocation16 + $0x15b0] ss:$208 sps:$4 sm:$0xff]  }
 0xf0e   :  { %13282 = vmatpush1.bf16.msra.mxu1 %v17984_v3  ;;  %v18052_v3 = vld [vmem:[#allocation16 + $0x1754] ss:$208 sps:$4 sm:$0xff]  }
 0xf0f   :  { %13283 = vmatprep.subr.bf16.mxu1 %v17989_v4  ;;  %v18050_v4 = vld [vmem:[#allocation16 + $0x1750] ss:$208 sps:$4 sm:$0xff]  }
 0xf12   :  { %13284 = vmatpush1.bf16.msra.mxu1 %v17987_v23  ;;  %v18055_v23 = vld [vmem:[#allocation16 + $0x18f4] ss:$208 sps:$4 sm:$0xff]  }
 0xf13   :  { %13285 = vmatprep.subr.bf16.mxu1 %v17992_v5  ;;  %v18053_v5 = vld [vmem:[#allocation16 + $0x18f0] ss:$208 sps:$4 sm:$0xff]  }
 0xf16   :  { %13286 = vmatpush1.bf16.msra.mxu1 %v17990_v6  ;;  %v18058_v6 = vld [vmem:[#allocation16 + $0x9c] ss:$208 sps:$4 sm:$0xff]  }
 0xf17   :  { %13287 = vmatprep.subr.bf16.mxu1 %v17995_v7  ;;  %v18056_v7 = vld [vmem:[#allocation16 + $0x98] ss:$208 sps:$4 sm:$0xff]  }
 0xf1a   :  { %13288 = vmatpush1.bf16.msra.mxu1 %v17993_v9  ;;  %v18061_v9 = vld [vmem:[#allocation16 + $0x23c] ss:$208 sps:$4 sm:$0xff]  }
 0xf1b   :  { %13289 = vmatprep.subr.bf16.mxu1 %v17998_v11  ;;  %v18059_v11 = vld [vmem:[#allocation16 + $0x238] ss:$208 sps:$4 sm:$0xff]  }
 0xf1e   :  { %13290 = vmatpush1.bf16.msra.mxu1 %v17996_v12  ;;  %v18064_v12 = vld [vmem:[#allocation16 + $0x3dc] ss:$208 sps:$4 sm:$0xff]  }
 0xf1f   :  { %13291 = vmatprep.subr.bf16.mxu1 %v18001_v14  ;;  %v18062_v14 = vld [vmem:[#allocation16 + $0x3d8] ss:$208 sps:$4 sm:$0xff]  }
 0xf22   :  { %13292 = vmatpush1.bf16.msra.mxu1 %v17999_v17  ;;  %v18067_v17 = vld [vmem:[#allocation16 + $0x57c] ss:$208 sps:$4 sm:$0xff]  }
 0xf23   :  { %13293 = vmatprep.subr.bf16.mxu1 %v18004_v39  ;;  %v18065_v39 = vld [vmem:[#allocation16 + $0x578] ss:$208 sps:$4 sm:$0xff]  }
 0xf26   :  { %13294 = vmatpush1.bf16.msra.mxu1 %v18002_v19  ;;  %v18070_v19 = vld [vmem:[#allocation16 + $0x71c] ss:$208 sps:$4 sm:$0xff]  }
 0xf27   :  { %13295 = vmatprep.subr.bf16.mxu1 %v18007_v20  ;;  %v18068_v20 = vld [vmem:[#allocation16 + $0x718] ss:$208 sps:$4 sm:$0xff]  }
 0xf2a   :  { %13296 = vmatpush1.bf16.msra.mxu1 %v18005_v21  ;;  %v18073_v21 = vld [vmem:[#allocation16 + $0x8bc] ss:$208 sps:$4 sm:$0xff]  }
 0xf2b   :  { %13308 = vmatprep.subr.bf16.mxu1 %v18010_v26  ;;  %v8237_v26 = vrot.slane %v21843_v59, %v21771_v50 }
 0xf2d   :  { %13298 = vmatmul.mubr.bf16.vlgmr.msra.gmra.mrb[80].mxu1 %v21715_v35 }
 0xf2e   :  { %13309 = vmatpush1.bf16.msra.mxu1 %v18008_v27  ;;  %13340 = vmatprep.mubr.bf16.mxu1 %v21717_v36  ;;  %v8241_v27 = vrot.slane %v21843_v59, %v21774_v52  ;;  %v18077_v59 = vld [vmem:[#allocation16 + $0xbf8] ss:$208 sps:$4 sm:$0xff]  }
 0xf2f   :  { %13310 = vmatprep.subr.bf16.mxu1 %v18013_v28  ;;  %v18071_v28 = vld [vmem:[#allocation16 + $0x8b8] ss:$208 sps:$4 sm:$0xff]  }
 0xf32   :  { %13311 = vmatpush1.bf16.msra.mxu1 %v18011_v29  ;;  %v18076_v29 = vld [vmem:[#allocation16 + $0xa5c] ss:$208 sps:$4 sm:$0xff]  }
 0xf33   :  { %13312 = vmatprep.subr.bf16.mxu1 %v18016_v30 }
 0xf36   :  { %13313 = vmatpush1.bf16.msra.mxu1 %v18014_v48 }
 0xf37   :  { %13314 = vmatprep.subr.bf16.mxu1 %v18019_v22 }
 0xf3a   :  { %13315 = vmatpush1.bf16.msra.mxu1 %v18017_v25 }
 0xf3b   :  { %13316 = vmatprep.subr.bf16.mxu1 %v18022_v31 }
 0xf3e   :  { %13317 = vmatpush1.bf16.msra.mxu1 %v18020_v32  ;;  %v18074_v32 = vld [vmem:[#allocation16 + $0xa58] ss:$208 sps:$4 sm:$0xff]  }
 0xf3f   :  { %13318 = vmatprep.subr.bf16.mxu1 %v18025_v16 }
 0xf40   :  { %v13170_v38 = vpop.f32.mrb[68].mxu1 }
 0xf41   :  { %v13171_v40 = vadd.f32 %v13170_v38, %v8229_v33  ;;  %v13172_v41 = vpop.f32.mrb[69].mxu1  ;;  %v18080_v38 = vld [vmem:[#allocation16 + $0xd98] ss:$208 sps:$4 sm:$0xff]  }
 0xf42   :  { %v13173_v42 = vadd.f32 %v13172_v41, %v8233_v34  ;;  %v13174_v43 = vpop.f32.mrb[70].mxu1  ;;  %13319 = vmatpush1.bf16.msra.mxu1 %v18023_v37  ;;  %v18083_v41 = vld [vmem:[#allocation16 + $0xf38] ss:$208 sps:$4 sm:$0xff]  }
 0xf43   :  { %13680 = vst [vmem:[#allocation21 + $0xe0] sm:$0xff] %v13171_v40  ;;  %v13175_v45 = vadd.f32 %v13174_v43, %v8229_v33  ;;  %v13176_v46 = vpop.f32.mrb[71].mxu1  ;;  %13320 = vmatprep.subr.bf16.mxu1 %v18028_v24  ;;  %v18082_v24 = vld [vmem:[#allocation16 + $0xd9c] ss:$208 sps:$4 sm:$0xff]   ;;  %v18086_v43 = vld [vmem:[#allocation16 + $0x10d8] ss:$208 sps:$4 sm:$0xff]  }
 0xf44   :  { %13681 = vst [vmem:[#allocation21 + $0xe8] sm:$0xff] %v13173_v42  ;;  %v13177_v49 = vadd.f32 %v13176_v46, %v8233_v34  ;;  %v18079_v34 = vld [vmem:[#allocation16 + $0xbfc] ss:$208 sps:$4 sm:$0xff]  }
 0xf45   :  { %13733 = vst [vmem:[#allocation21 + $0x280] sm:$0xff] %v13175_v45  ;;  %v18085_v40 = vld [vmem:[#allocation16 + $0xf3c] ss:$208 sps:$4 sm:$0xff]   ;;  %v18089_v45 = vld [vmem:[#allocation16 + $0x1278] ss:$208 sps:$4 sm:$0xff]  }
 0xf46   :  { %13734 = vst [vmem:[#allocation21 + $0x288] sm:$0xff] %v13177_v49  ;;  %13321 = vmatpush1.bf16.msra.mxu1 %v18026_v44  ;;  %v18088_v42 = vld [vmem:[#allocation16 + $0x10dc] ss:$208 sps:$4 sm:$0xff]  }
 0xf47   :  { %13322 = vmatprep.subr.bf16.mxu1 %v18031_v47  ;;  %v18091_v44 = vld [vmem:[#allocation16 + $0x127c] ss:$208 sps:$4 sm:$0xff]   ;;  %v18092_v47 = vld [vmem:[#allocation16 + $0x1418] ss:$208 sps:$4 sm:$0xff]  }
 0xf48   :  { %v18094_v46 = vld [vmem:[#allocation16 + $0x141c] ss:$208 sps:$4 sm:$0xff]  }
 0xf49   :  { %v18097_v49 = vld [vmem:[#allocation16 + $0x15bc] ss:$208 sps:$4 sm:$0xff]  }
 0xf4a   :  { %13323 = vmatpush1.bf16.msra.mxu1 %v18029_v51  ;;  %v18095_v51 = vld [vmem:[#allocation16 + $0x15b8] ss:$208 sps:$4 sm:$0xff]  }
 0xf4b   :  { %13324 = vmatprep.subr.bf16.mxu1 %v18034_v53  ;;  %v18100_v53 = vld [vmem:[#allocation16 + $0x175c] ss:$208 sps:$4 sm:$0xff]  }
 0xf4e   :  { %13325 = vmatpush1.bf16.msra.mxu1 %v18032_v54  ;;  %v18098_v54 = vld [vmem:[#allocation16 + $0x1758] ss:$208 sps:$4 sm:$0xff]  }
 0xf4f   :  { %13326 = vmatprep.subr.bf16.mxu1 %v18037_v55  ;;  %v18103_v55 = vld [vmem:[#allocation16 + $0x18fc] ss:$208 sps:$4 sm:$0xff]  }
 0xf52   :  { %13327 = vmatpush1.bf16.msra.mxu1 %v18035_v56  ;;  %v18101_v56 = vld [vmem:[#allocation16 + $0x18f8] ss:$208 sps:$4 sm:$0xff]  }
 0xf53   :  { %13328 = vmatprep.subr.bf16.mxu1 %v18040_v57  ;;  %v18106_v57 = vld [vmem:[#allocation16 + $0xa4] ss:$208 sps:$4 sm:$0xff]  }
 0xf56   :  { %13329 = vmatpush1.bf16.msra.mxu1 %v18038_v58  ;;  %v18104_v58 = vld [vmem:[#allocation16 + $0xa0] ss:$208 sps:$4 sm:$0xff]  }
 0xf57   :  { %13330 = vmatprep.subr.bf16.mxu1 %v18043_v60  ;;  %v18109_v60 = vld [vmem:[#allocation16 + $0x244] ss:$208 sps:$4 sm:$0xff]  }
 0xf5a   :  { %13331 = vmatpush1.bf16.msra.mxu1 %v18041_v61  ;;  %v18107_v61 = vld [vmem:[#allocation16 + $0x240] ss:$208 sps:$4 sm:$0xff]  }
 0xf5b   :  { %13332 = vmatprep.subr.bf16.mxu1 %v18046_v63  ;;  %v18112_v63 = vld [vmem:[#allocation16 + $0x3e4] ss:$208 sps:$4 sm:$0xff]  }
 0xf5e   :  { %13333 = vmatpush1.bf16.msra.mxu1 %v18044_v13  ;;  %v18110_v13 = vld [vmem:[#allocation16 + $0x3e0] ss:$208 sps:$4 sm:$0xff]  }
 0xf5f   :  { %13334 = vmatprep.subr.bf16.mxu1 %v18049_v1  ;;  %v18115_v1 = vld [vmem:[#allocation16 + $0x584] ss:$208 sps:$4 sm:$0xff]  }
 0xf62   :  { %13335 = vmatpush1.bf16.msra.mxu1 %v18047_v2  ;;  %v18113_v2 = vld [vmem:[#allocation16 + $0x580] ss:$208 sps:$4 sm:$0xff]  }
 0xf63   :  { %13336 = vmatprep.subr.bf16.mxu1 %v18052_v3  ;;  %v18118_v3 = vld [vmem:[#allocation16 + $0x724] ss:$208 sps:$4 sm:$0xff]  }
 0xf66   :  { %13337 = vmatpush1.bf16.msra.mxu1 %v18050_v4  ;;  %v18116_v4 = vld [vmem:[#allocation16 + $0x720] ss:$208 sps:$4 sm:$0xff]  }
 0xf67   :  { %13338 = vmatprep.subr.bf16.mxu1 %v18055_v23  ;;  %v21872_v23 = vld [vmem:[%s21989_s13 + $0x20] sm:$0xff] }
 0xf6a   :  { %13339 = vmatpush1.bf16.msra.mxu1 %v18053_v5  ;;  %v18121_v5 = vld [vmem:[#allocation16 + $0x8c4] ss:$208 sps:$4 sm:$0xff]  }
 0xf6b   :  { %13351 = vmatprep.subr.bf16.mxu1 %v18058_v6  ;;  %v8245_v6 = vrot.slane %v21872_v23, %v21667_v8 }
 0xf6d   :  { %13341 = vmatmul.mubr.bf16.vlgmr.msra.gmra.mrb[84].mxu1 %v21715_v35 }
 0xf6e   :  { %13352 = vmatpush1.bf16.msra.mxu1 %v18056_v7  ;;  %13383 = vmatprep.mubr.bf16.mxu1 %v21717_v36  ;;  %v8249_v7 = vrot.slane %v21872_v23, %v21670_v10 }
 0xf6f   :  { %13353 = vmatprep.subr.bf16.mxu1 %v18061_v9  ;;  %v18119_v9 = vld [vmem:[#allocation16 + $0x8c0] ss:$208 sps:$4 sm:$0xff]  }
 0xf72   :  { %13354 = vmatpush1.bf16.msra.mxu1 %v18059_v11  ;;  %v18124_v11 = vld [vmem:[#allocation16 + $0xa64] ss:$208 sps:$4 sm:$0xff]  }
 0xf73   :  { %13355 = vmatprep.subr.bf16.mxu1 %v18064_v12 }
 0xf76   :  { %13356 = vmatpush1.bf16.msra.mxu1 %v18062_v14 }
 0xf77   :  { %13357 = vmatprep.subr.bf16.mxu1 %v18067_v17 }
 0xf7a   :  { %13358 = vmatpush1.bf16.msra.mxu1 %v18065_v39 }
 0xf7b   :  { %13359 = vmatprep.subr.bf16.mxu1 %v18070_v19 }
 0xf7e   :  { %13360 = vmatpush1.bf16.msra.mxu1 %v18068_v20  ;;  %v18122_v20 = vld [vmem:[#allocation16 + $0xa60] ss:$208 sps:$4 sm:$0xff]  }
 0xf7f   :  { %13361 = vmatprep.subr.bf16.mxu1 %v18073_v21 }
 0xf80   :  { %v13213_v30 = vpop.f32.mrb[72].mxu1 }
 0xf81   :  { %v13214_v48 = vadd.f32 %v13213_v30, %v8237_v26  ;;  %v13215_v22 = vpop.f32.mrb[73].mxu1  ;;  %v18130_v30 = vld [vmem:[#allocation16 + $0xda4] ss:$208 sps:$4 sm:$0xff]  }
 0xf82   :  { %v13216_v25 = vadd.f32 %v13215_v22, %v8241_v27  ;;  %v13217_v31 = vpop.f32.mrb[74].mxu1  ;;  %13362 = vmatpush1.bf16.msra.mxu1 %v18071_v28  ;;  %v18133_v22 = vld [vmem:[#allocation16 + $0xf44] ss:$208 sps:$4 sm:$0xff]  }
 0xf83   :  { %13682 = vst [vmem:[#allocation21 + $0xf0] sm:$0xff] %v13214_v48  ;;  %v13218_v16 = vadd.f32 %v13217_v31, %v8237_v26  ;;  %v13219_v33 = vpop.f32.mrb[75].mxu1  ;;  %13363 = vmatprep.subr.bf16.mxu1 %v18076_v29  ;;  %v18125_v29 = vld [vmem:[#allocation16 + $0xc00] ss:$208 sps:$4 sm:$0xff]   ;;  %v18136_v31 = vld [vmem:[#allocation16 + $0x10e4] ss:$208 sps:$4 sm:$0xff]  }
 0xf84   :  { %13683 = vst [vmem:[#allocation21 + $0xf8] sm:$0xff] %v13216_v25  ;;  %v13220_v37 = vadd.f32 %v13219_v33, %v8241_v27  ;;  %v18127_v27 = vld [vmem:[#allocation16 + $0xc04] ss:$208 sps:$4 sm:$0xff]   ;;  %v18128_v48 = vld [vmem:[#allocation16 + $0xda0] ss:$208 sps:$4 sm:$0xff]  }
 0xf85   :  { %13735 = vst [vmem:[#allocation21 + $0x290] sm:$0xff] %v13218_v16  ;;  %v18131_v25 = vld [vmem:[#allocation16 + $0xf40] ss:$208 sps:$4 sm:$0xff]   ;;  %v18139_v16 = vld [vmem:[#allocation16 + $0x1284] ss:$208 sps:$4 sm:$0xff]  }
 0xf86   :  { %13736 = vst [vmem:[#allocation21 + $0x298] sm:$0xff] %v13220_v37  ;;  %13364 = vmatpush1.bf16.msra.mxu1 %v18074_v32  ;;  %v18134_v32 = vld [vmem:[#allocation16 + $0x10e0] ss:$208 sps:$4 sm:$0xff]  }
 0xf87   :  { %13365 = vmatprep.subr.bf16.mxu1 %v18079_v34  ;;  %v18137_v33 = vld [vmem:[#allocation16 + $0x1280] ss:$208 sps:$4 sm:$0xff]   ;;  %v18142_v34 = vld [vmem:[#allocation16 + $0x1424] ss:$208 sps:$4 sm:$0xff]  }
 0xf88   :  { %v18140_v37 = vld [vmem:[#allocation16 + $0x1420] ss:$208 sps:$4 sm:$0xff]  }
 0xf8a   :  { %13366 = vmatpush1.bf16.msra.mxu1 %v18077_v59  ;;  %v18145_v59 = vld [vmem:[#allocation16 + $0x15c4] ss:$208 sps:$4 sm:$0xff]  }
 0xf8b   :  { %13367 = vmatprep.subr.bf16.mxu1 %v18082_v24  ;;  %v18143_v24 = vld [vmem:[#allocation16 + $0x15c0] ss:$208 sps:$4 sm:$0xff]  }
 0xf8e   :  { %13368 = vmatpush1.bf16.msra.mxu1 %v18080_v38  ;;  %v18148_v38 = vld [vmem:[#allocation16 + $0x1764] ss:$208 sps:$4 sm:$0xff]  }
 0xf8f   :  { %13369 = vmatprep.subr.bf16.mxu1 %v18085_v40  ;;  %v18146_v40 = vld [vmem:[#allocation16 + $0x1760] ss:$208 sps:$4 sm:$0xff]  }
 0xf92   :  { %13370 = vmatpush1.bf16.msra.mxu1 %v18083_v41  ;;  %v18151_v41 = vld [vmem:[#allocation16 + $0x1904] ss:$208 sps:$4 sm:$0xff]  }
 0xf93   :  { %13371 = vmatprep.subr.bf16.mxu1 %v18088_v42  ;;  %v18149_v42 = vld [vmem:[#allocation16 + $0x1900] ss:$208 sps:$4 sm:$0xff]  }
 0xf96   :  { %13372 = vmatpush1.bf16.msra.mxu1 %v18086_v43  ;;  %v18154_v43 = vld [vmem:[#allocation16 + $0xac] ss:$208 sps:$4 sm:$0xff]  }
 0xf97   :  { %13373 = vmatprep.subr.bf16.mxu1 %v18091_v44  ;;  %v18152_v44 = vld [vmem:[#allocation16 + $0xa8] ss:$208 sps:$4 sm:$0xff]  }
 0xf9a   :  { %13374 = vmatpush1.bf16.msra.mxu1 %v18089_v45  ;;  %v18157_v45 = vld [vmem:[#allocation16 + $0x24c] ss:$208 sps:$4 sm:$0xff]  }
 0xf9b   :  { %13375 = vmatprep.subr.bf16.mxu1 %v18094_v46  ;;  %v18155_v46 = vld [vmem:[#allocation16 + $0x248] ss:$208 sps:$4 sm:$0xff]  }
 0xf9e   :  { %13376 = vmatpush1.bf16.msra.mxu1 %v18092_v47  ;;  %v18160_v47 = vld [vmem:[#allocation16 + $0x3ec] ss:$208 sps:$4 sm:$0xff]  }
 0xf9f   :  { %13377 = vmatprep.subr.bf16.mxu1 %v18097_v49  ;;  %v18158_v49 = vld [vmem:[#allocation16 + $0x3e8] ss:$208 sps:$4 sm:$0xff]  }
 0xfa2   :  { %13378 = vmatpush1.bf16.msra.mxu1 %v18095_v51  ;;  %v18163_v51 = vld [vmem:[#allocation16 + $0x58c] ss:$208 sps:$4 sm:$0xff]  }
 0xfa3   :  { %13379 = vmatprep.subr.bf16.mxu1 %v18100_v53  ;;  %v18161_v53 = vld [vmem:[#allocation16 + $0x588] ss:$208 sps:$4 sm:$0xff]  }
 0xfa6   :  { %13380 = vmatpush1.bf16.msra.mxu1 %v18098_v54  ;;  %v18166_v54 = vld [vmem:[#allocation16 + $0x72c] ss:$208 sps:$4 sm:$0xff]  }
 0xfa7   :  { %13381 = vmatprep.subr.bf16.mxu1 %v18103_v55  ;;  %v18164_v55 = vld [vmem:[#allocation16 + $0x728] ss:$208 sps:$4 sm:$0xff]  }
 0xfaa   :  { %13382 = vmatpush1.bf16.msra.mxu1 %v18101_v56  ;;  %v18169_v56 = vld [vmem:[#allocation16 + $0x8cc] ss:$208 sps:$4 sm:$0xff]  }
 0xfab   :  { %13394 = vmatprep.subr.bf16.mxu1 %v18106_v57  ;;  %v8253_v57 = vrot.slane %v21872_v23, %v21747_v15 }
 0xfad   :  { %13384 = vmatmul.mubr.bf16.vlgmr.msra.gmra.mrb[88].mxu1 %v21715_v35 }
 0xfae   :  { %13395 = vmatpush1.bf16.msra.mxu1 %v18104_v58  ;;  %13426 = vmatprep.mubr.bf16.mxu1 %v21717_v36  ;;  %v8257_v58 = vrot.slane %v21872_v23, %v21750_v18 }
 0xfaf   :  { %13396 = vmatprep.subr.bf16.mxu1 %v18109_v60  ;;  %v18167_v60 = vld [vmem:[#allocation16 + $0x8c8] ss:$208 sps:$4 sm:$0xff]  }
 0xfb2   :  { %13397 = vmatpush1.bf16.msra.mxu1 %v18107_v61  ;;  %v18172_v61 = vld [vmem:[#allocation16 + $0xa6c] ss:$208 sps:$4 sm:$0xff]  }
 0xfb3   :  { %13398 = vmatprep.subr.bf16.mxu1 %v18112_v63 }
 0xfb6   :  { %13399 = vmatpush1.bf16.msra.mxu1 %v18110_v13 }
 0xfb7   :  { %13400 = vmatprep.subr.bf16.mxu1 %v18115_v1 }
 0xfba   :  { %13401 = vmatpush1.bf16.msra.mxu1 %v18113_v2 }
 0xfbb   :  { %13402 = vmatprep.subr.bf16.mxu1 %v18118_v3 }
 0xfbe   :  { %13403 = vmatpush1.bf16.msra.mxu1 %v18116_v4  ;;  %v18170_v4 = vld [vmem:[#allocation16 + $0xa68] ss:$208 sps:$4 sm:$0xff]  }
 0xfbf   :  { %13404 = vmatprep.subr.bf16.mxu1 %v18121_v5 }
 0xfc0   :  { %v13256_v12 = vpop.f32.mrb[76].mxu1 }
 0xfc1   :  { %v13257_v14 = vadd.f32 %v13256_v12, %v8245_v6  ;;  %v13258_v17 = vpop.f32.mrb[77].mxu1  ;;  %v18178_v12 = vld [vmem:[#allocation16 + $0xdac] ss:$208 sps:$4 sm:$0xff]  }
 0xfc2   :  { %v13259_v39 = vadd.f32 %v13258_v17, %v8249_v7  ;;  %v13260_v19 = vpop.f32.mrb[78].mxu1  ;;  %13405 = vmatpush1.bf16.msra.mxu1 %v18119_v9  ;;  %v18181_v17 = vld [vmem:[#allocation16 + $0xf4c] ss:$208 sps:$4 sm:$0xff]  }
 0xfc3   :  { %13684 = vst [vmem:[#allocation21 + $0x100] sm:$0xff] %v13257_v14  ;;  %v13261_v21 = vadd.f32 %v13260_v19, %v8245_v6  ;;  %v13262_v26 = vpop.f32.mrb[79].mxu1  ;;  %13406 = vmatprep.subr.bf16.mxu1 %v18124_v11  ;;  %v18173_v11 = vld [vmem:[#allocation16 + $0xc08] ss:$208 sps:$4 sm:$0xff]   ;;  %v18184_v19 = vld [vmem:[#allocation16 + $0x10ec] ss:$208 sps:$4 sm:$0xff]  }
 0xfc4   :  { %13685 = vst [vmem:[#allocation21 + $0x108] sm:$0xff] %v13259_v39  ;;  %v13263_v28 = vadd.f32 %v13262_v26, %v8249_v7  ;;  %v18175_v7 = vld [vmem:[#allocation16 + $0xc0c] ss:$208 sps:$4 sm:$0xff]   ;;  %v18176_v14 = vld [vmem:[#allocation16 + $0xda8] ss:$208 sps:$4 sm:$0xff]  }
 0xfc5   :  { %13737 = vst [vmem:[#allocation21 + $0x2a0] sm:$0xff] %v13261_v21  ;;  %v18179_v39 = vld [vmem:[#allocation16 + $0xf48] ss:$208 sps:$4 sm:$0xff]   ;;  %v18187_v21 = vld [vmem:[#allocation16 + $0x128c] ss:$208 sps:$4 sm:$0xff]  }
 0xfc6   :  { %13738 = vst [vmem:[#allocation21 + $0x2a8] sm:$0xff] %v13263_v28  ;;  %13407 = vmatpush1.bf16.msra.mxu1 %v18122_v20  ;;  %v18182_v20 = vld [vmem:[#allocation16 + $0x10e8] ss:$208 sps:$4 sm:$0xff]  }
 0xfc7   :  { %13408 = vmatprep.subr.bf16.mxu1 %v18127_v27  ;;  %v18185_v26 = vld [vmem:[#allocation16 + $0x1288] ss:$208 sps:$4 sm:$0xff]   ;;  %v18190_v27 = vld [vmem:[#allocation16 + $0x142c] ss:$208 sps:$4 sm:$0xff]  }
 0xfc8   :  { %v18188_v28 = vld [vmem:[#allocation16 + $0x1428] ss:$208 sps:$4 sm:$0xff]  }
 0xfca   :  { %13409 = vmatpush1.bf16.msra.mxu1 %v18125_v29  ;;  %v18193_v29 = vld [vmem:[#allocation16 + $0x15cc] ss:$208 sps:$4 sm:$0xff]  }
 0xfcb   :  { %13410 = vmatprep.subr.bf16.mxu1 %v18130_v30  ;;  %v18191_v30 = vld [vmem:[#allocation16 + $0x15c8] ss:$208 sps:$4 sm:$0xff]  }
 0xfce   :  { %13411 = vmatpush1.bf16.msra.mxu1 %v18128_v48  ;;  %v18196_v48 = vld [vmem:[#allocation16 + $0x176c] ss:$208 sps:$4 sm:$0xff]  }
 0xfcf   :  { %13412 = vmatprep.subr.bf16.mxu1 %v18133_v22  ;;  %v18194_v22 = vld [vmem:[#allocation16 + $0x1768] ss:$208 sps:$4 sm:$0xff]  }
 0xfd2   :  { %13413 = vmatpush1.bf16.msra.mxu1 %v18131_v25  ;;  %v18199_v25 = vld [vmem:[#allocation16 + $0x190c] ss:$208 sps:$4 sm:$0xff]  }
 0xfd3   :  { %13414 = vmatprep.subr.bf16.mxu1 %v18136_v31  ;;  %v18197_v31 = vld [vmem:[#allocation16 + $0x1908] ss:$208 sps:$4 sm:$0xff]  }
 0xfd6   :  { %13415 = vmatpush1.bf16.msra.mxu1 %v18134_v32  ;;  %v18202_v32 = vld [vmem:[#allocation16 + $0xb4] ss:$208 sps:$4 sm:$0xff]  }
 0xfd7   :  { %13416 = vmatprep.subr.bf16.mxu1 %v18139_v16  ;;  %v18200_v16 = vld [vmem:[#allocation16 + $0xb0] ss:$208 sps:$4 sm:$0xff]  }
 0xfda   :  { %13417 = vmatpush1.bf16.msra.mxu1 %v18137_v33  ;;  %v18205_v33 = vld [vmem:[#allocation16 + $0x254] ss:$208 sps:$4 sm:$0xff]  }
 0xfdb   :  { %13418 = vmatprep.subr.bf16.mxu1 %v18142_v34  ;;  %v18203_v34 = vld [vmem:[#allocation16 + $0x250] ss:$208 sps:$4 sm:$0xff]  }
 0xfde   :  { %13419 = vmatpush1.bf16.msra.mxu1 %v18140_v37  ;;  %v18208_v37 = vld [vmem:[#allocation16 + $0x3f4] ss:$208 sps:$4 sm:$0xff]  }
 0xfdf   :  { %13420 = vmatprep.subr.bf16.mxu1 %v18145_v59  ;;  %v18206_v59 = vld [vmem:[#allocation16 + $0x3f0] ss:$208 sps:$4 sm:$0xff]  }
 0xfe2   :  { %13421 = vmatpush1.bf16.msra.mxu1 %v18143_v24  ;;  %v18211_v24 = vld [vmem:[#allocation16 + $0x594] ss:$208 sps:$4 sm:$0xff]  }
 0xfe3   :  { %13422 = vmatprep.subr.bf16.mxu1 %v18148_v38  ;;  %v18209_v38 = vld [vmem:[#allocation16 + $0x590] ss:$208 sps:$4 sm:$0xff]  }
 0xfe6   :  { %13423 = vmatpush1.bf16.msra.mxu1 %v18146_v40  ;;  %v18214_v40 = vld [vmem:[#allocation16 + $0x734] ss:$208 sps:$4 sm:$0xff]  }
 0xfe7   :  { %13424 = vmatprep.subr.bf16.mxu1 %v18151_v41  ;;  %v18212_v41 = vld [vmem:[#allocation16 + $0x730] ss:$208 sps:$4 sm:$0xff]  }
 0xfea   :  { %13425 = vmatpush1.bf16.msra.mxu1 %v18149_v42  ;;  %v18217_v42 = vld [vmem:[#allocation16 + $0x8d4] ss:$208 sps:$4 sm:$0xff]  }
 0xfeb   :  { %13437 = vmatprep.subr.bf16.mxu1 %v18154_v43  ;;  %v8261_v43 = vrot.slane %v21872_v23, %v21759_v62 }
 0xfed   :  { %13427 = vmatmul.mubr.bf16.vlgmr.msra.gmra.mrb[92].mxu1 %v21715_v35 }
 0xfee   :  { %13438 = vmatpush1.bf16.msra.mxu1 %v18152_v44  ;;  %13469 = vmatprep.mubr.bf16.mxu1 %v21717_v36  ;;  %v8265_v44 = vrot.slane %v21872_v23, %v21762_v0 }
 0xfef   :  { %13439 = vmatprep.subr.bf16.mxu1 %v18157_v45  ;;  %v18215_v45 = vld [vmem:[#allocation16 + $0x8d0] ss:$208 sps:$4 sm:$0xff]  }
 0xff2   :  { %13440 = vmatpush1.bf16.msra.mxu1 %v18155_v46  ;;  %v18220_v46 = vld [vmem:[#allocation16 + $0xa74] ss:$208 sps:$4 sm:$0xff]  }
 0xff3   :  { %13441 = vmatprep.subr.bf16.mxu1 %v18160_v47 }
 0xff6   :  { %13442 = vmatpush1.bf16.msra.mxu1 %v18158_v49 }
 0xff7   :  { %13443 = vmatprep.subr.bf16.mxu1 %v18163_v51 }
 0xffa   :  { %13444 = vmatpush1.bf16.msra.mxu1 %v18161_v53 }
 0xffb   :  { %13445 = vmatprep.subr.bf16.mxu1 %v18166_v54 }
 0xffe   :  { %13446 = vmatpush1.bf16.msra.mxu1 %v18164_v55  ;;  %v18218_v55 = vld [vmem:[#allocation16 + $0xa70] ss:$208 sps:$4 sm:$0xff]  }
 0xfff   :  { %13447 = vmatprep.subr.bf16.mxu1 %v18169_v56 }
0x1000   :  { %v13299_v63 = vpop.f32.mrb[80].mxu1 }
0x1001   :  { %v13300_v13 = vadd.f32 %v13299_v63, %v8253_v57  ;;  %v13301_v1 = vpop.f32.mrb[81].mxu1  ;;  %v18226_v63 = vld [vmem:[#allocation16 + $0xdb4] ss:$208 sps:$4 sm:$0xff]  }
0x1002   :  { %v13302_v2 = vadd.f32 %v13301_v1, %v8257_v58  ;;  %v13303_v3 = vpop.f32.mrb[82].mxu1  ;;  %13448 = vmatpush1.bf16.msra.mxu1 %v18167_v60  ;;  %v18229_v1 = vld [vmem:[#allocation16 + $0xf54] ss:$208 sps:$4 sm:$0xff]  }
0x1003   :  { %13686 = vst [vmem:[#allocation21 + $0x110] sm:$0xff] %v13300_v13  ;;  %v13304_v5 = vadd.f32 %v13303_v3, %v8253_v57  ;;  %v13305_v6 = vpop.f32.mrb[83].mxu1  ;;  %13449 = vmatprep.subr.bf16.mxu1 %v18172_v61  ;;  %v18221_v61 = vld [vmem:[#allocation16 + $0xc10] ss:$208 sps:$4 sm:$0xff]   ;;  %v18232_v3 = vld [vmem:[#allocation16 + $0x10f4] ss:$208 sps:$4 sm:$0xff]  }
0x1004   :  { %13687 = vst [vmem:[#allocation21 + $0x118] sm:$0xff] %v13302_v2  ;;  %v13306_v9 = vadd.f32 %v13305_v6, %v8257_v58  ;;  %v18223_v58 = vld [vmem:[#allocation16 + $0xc14] ss:$208 sps:$4 sm:$0xff]   ;;  %v18224_v13 = vld [vmem:[#allocation16 + $0xdb0] ss:$208 sps:$4 sm:$0xff]  }
0x1005   :  { %13739 = vst [vmem:[#allocation21 + $0x2b0] sm:$0xff] %v13304_v5  ;;  %v18227_v2 = vld [vmem:[#allocation16 + $0xf50] ss:$208 sps:$4 sm:$0xff]   ;;  %v18235_v5 = vld [vmem:[#allocation16 + $0x1294] ss:$208 sps:$4 sm:$0xff]  }
0x1006   :  { %13740 = vst [vmem:[#allocation21 + $0x2b8] sm:$0xff] %v13306_v9  ;;  %13450 = vmatpush1.bf16.msra.mxu1 %v18170_v4  ;;  %v18230_v4 = vld [vmem:[#allocation16 + $0x10f0] ss:$208 sps:$4 sm:$0xff]  }
0x1007   :  { %13451 = vmatprep.subr.bf16.mxu1 %v18175_v7  ;;  %v18233_v6 = vld [vmem:[#allocation16 + $0x1290] ss:$208 sps:$4 sm:$0xff]   ;;  %v18238_v7 = vld [vmem:[#allocation16 + $0x1434] ss:$208 sps:$4 sm:$0xff]  }
0x1008   :  { %v18236_v9 = vld [vmem:[#allocation16 + $0x1430] ss:$208 sps:$4 sm:$0xff]  }
0x100a   :  { %13452 = vmatpush1.bf16.msra.mxu1 %v18173_v11  ;;  %v18241_v11 = vld [vmem:[#allocation16 + $0x15d4] ss:$208 sps:$4 sm:$0xff]  }
0x100b   :  { %13453 = vmatprep.subr.bf16.mxu1 %v18178_v12  ;;  %v18239_v12 = vld [vmem:[#allocation16 + $0x15d0] ss:$208 sps:$4 sm:$0xff]  }
0x100e   :  { %13454 = vmatpush1.bf16.msra.mxu1 %v18176_v14  ;;  %v18244_v14 = vld [vmem:[#allocation16 + $0x1774] ss:$208 sps:$4 sm:$0xff]  }
0x100f   :  { %13455 = vmatprep.subr.bf16.mxu1 %v18181_v17  ;;  %v18242_v17 = vld [vmem:[#allocation16 + $0x1770] ss:$208 sps:$4 sm:$0xff]  }
0x1012   :  { %13456 = vmatpush1.bf16.msra.mxu1 %v18179_v39  ;;  %v18247_v39 = vld [vmem:[#allocation16 + $0x1914] ss:$208 sps:$4 sm:$0xff]  }
0x1013   :  { %13457 = vmatprep.subr.bf16.mxu1 %v18184_v19  ;;  %v18245_v19 = vld [vmem:[#allocation16 + $0x1910] ss:$208 sps:$4 sm:$0xff]  }
0x1016   :  { %13458 = vmatpush1.bf16.msra.mxu1 %v18182_v20  ;;  %v18250_v20 = vld [vmem:[#allocation16 + $0xbc] ss:$208 sps:$4 sm:$0xff]  }
0x1017   :  { %13459 = vmatprep.subr.bf16.mxu1 %v18187_v21  ;;  %v18248_v21 = vld [vmem:[#allocation16 + $0xb8] ss:$208 sps:$4 sm:$0xff]  }
0x101a   :  { %13460 = vmatpush1.bf16.msra.mxu1 %v18185_v26  ;;  %v18253_v26 = vld [vmem:[#allocation16 + $0x25c] ss:$208 sps:$4 sm:$0xff]  }
0x101b   :  { %13461 = vmatprep.subr.bf16.mxu1 %v18190_v27  ;;  %v18251_v27 = vld [vmem:[#allocation16 + $0x258] ss:$208 sps:$4 sm:$0xff]  }
0x101e   :  { %13462 = vmatpush1.bf16.msra.mxu1 %v18188_v28  ;;  %v18256_v28 = vld [vmem:[#allocation16 + $0x3fc] ss:$208 sps:$4 sm:$0xff]  }
0x101f   :  { %13463 = vmatprep.subr.bf16.mxu1 %v18193_v29  ;;  %v18254_v29 = vld [vmem:[#allocation16 + $0x3f8] ss:$208 sps:$4 sm:$0xff]  }
0x1022   :  { %13464 = vmatpush1.bf16.msra.mxu1 %v18191_v30  ;;  %v18259_v30 = vld [vmem:[#allocation16 + $0x59c] ss:$208 sps:$4 sm:$0xff]  }
0x1023   :  { %13465 = vmatprep.subr.bf16.mxu1 %v18196_v48  ;;  %v18257_v48 = vld [vmem:[#allocation16 + $0x598] ss:$208 sps:$4 sm:$0xff]  }
0x1026   :  { %13466 = vmatpush1.bf16.msra.mxu1 %v18194_v22  ;;  %v18262_v22 = vld [vmem:[#allocation16 + $0x73c] ss:$208 sps:$4 sm:$0xff]  }
0x1027   :  { %13467 = vmatprep.subr.bf16.mxu1 %v18199_v25  ;;  %v18260_v25 = vld [vmem:[#allocation16 + $0x738] ss:$208 sps:$4 sm:$0xff]  }
0x102a   :  { %13468 = vmatpush1.bf16.msra.mxu1 %v18197_v31  ;;  %v18265_v31 = vld [vmem:[#allocation16 + $0x8dc] ss:$208 sps:$4 sm:$0xff]  }
0x102b   :  { %13480 = vmatprep.subr.bf16.mxu1 %v18202_v32  ;;  %v8269_v32 = vrot.slane %v21872_v23, %v21771_v50 }
0x102d   :  { %13470 = vmatmul.mubr.bf16.vlgmr.msra.gmra.mrb[96].mxu1 %v21715_v35 }
0x102e   :  { %13481 = vmatpush1.bf16.msra.mxu1 %v18200_v16  ;;  %13512 = vmatprep.mubr.bf16.mxu1 %v21717_v36  ;;  %v8273_v16 = vrot.slane %v21872_v23, %v21774_v52  ;;  %v18269_v23 = vld [vmem:[#allocation16 + $0xc18] ss:$208 sps:$4 sm:$0xff]  }
0x102f   :  { %13482 = vmatprep.subr.bf16.mxu1 %v18205_v33  ;;  %v18263_v33 = vld [vmem:[#allocation16 + $0x8d8] ss:$208 sps:$4 sm:$0xff]  }
0x1032   :  { %13483 = vmatpush1.bf16.msra.mxu1 %v18203_v34  ;;  %v18268_v34 = vld [vmem:[#allocation16 + $0xa7c] ss:$208 sps:$4 sm:$0xff]  }
0x1033   :  { %13484 = vmatprep.subr.bf16.mxu1 %v18208_v37 }
0x1036   :  { %13485 = vmatpush1.bf16.msra.mxu1 %v18206_v59 }
0x1037   :  { %13486 = vmatprep.subr.bf16.mxu1 %v18211_v24 }
0x103a   :  { %13487 = vmatpush1.bf16.msra.mxu1 %v18209_v38 }
0x103b   :  { %13488 = vmatprep.subr.bf16.mxu1 %v18214_v40 }
0x103e   :  { %13489 = vmatpush1.bf16.msra.mxu1 %v18212_v41  ;;  %v18266_v41 = vld [vmem:[#allocation16 + $0xa78] ss:$208 sps:$4 sm:$0xff]  }
0x103f   :  { %13490 = vmatprep.subr.bf16.mxu1 %v18217_v42 }
0x1040   :  { %v13342_v47 = vpop.f32.mrb[84].mxu1 }
0x1041   :  { %v13343_v49 = vadd.f32 %v13342_v47, %v8261_v43  ;;  %v13344_v51 = vpop.f32.mrb[85].mxu1  ;;  %v18272_v47 = vld [vmem:[#allocation16 + $0xdb8] ss:$208 sps:$4 sm:$0xff]  }
0x1042   :  { %v13345_v53 = vadd.f32 %v13344_v51, %v8265_v44  ;;  %v13346_v54 = vpop.f32.mrb[86].mxu1  ;;  %13491 = vmatpush1.bf16.msra.mxu1 %v18215_v45  ;;  %v18275_v51 = vld [vmem:[#allocation16 + $0xf58] ss:$208 sps:$4 sm:$0xff]  }
0x1043   :  { %13688 = vst [vmem:[#allocation21 + $0x120] sm:$0xff] %v13343_v49  ;;  %v13347_v56 = vadd.f32 %v13346_v54, %v8261_v43  ;;  %v13348_v57 = vpop.f32.mrb[87].mxu1  ;;  %13492 = vmatprep.subr.bf16.mxu1 %v18220_v46  ;;  %v18274_v46 = vld [vmem:[#allocation16 + $0xdbc] ss:$208 sps:$4 sm:$0xff]   ;;  %v18278_v54 = vld [vmem:[#allocation16 + $0x10f8] ss:$208 sps:$4 sm:$0xff]  }
0x1044   :  { %13689 = vst [vmem:[#allocation21 + $0x128] sm:$0xff] %v13345_v53  ;;  %v13349_v60 = vadd.f32 %v13348_v57, %v8265_v44  ;;  %v18271_v44 = vld [vmem:[#allocation16 + $0xc1c] ss:$208 sps:$4 sm:$0xff]  }
0x1045   :  { %13741 = vst [vmem:[#allocation21 + $0x2c0] sm:$0xff] %v13347_v56  ;;  %v18277_v49 = vld [vmem:[#allocation16 + $0xf5c] ss:$208 sps:$4 sm:$0xff]   ;;  %v18281_v56 = vld [vmem:[#allocation16 + $0x1298] ss:$208 sps:$4 sm:$0xff]  }
0x1046   :  { %13742 = vst [vmem:[#allocation21 + $0x2c8] sm:$0xff] %v13349_v60  ;;  %13493 = vmatpush1.bf16.msra.mxu1 %v18218_v55  ;;  %v18280_v53 = vld [vmem:[#allocation16 + $0x10fc] ss:$208 sps:$4 sm:$0xff]  }
0x1047   :  { %13494 = vmatprep.subr.bf16.mxu1 %v18223_v58  ;;  %v18283_v55 = vld [vmem:[#allocation16 + $0x129c] ss:$208 sps:$4 sm:$0xff]   ;;  %v18284_v58 = vld [vmem:[#allocation16 + $0x1438] ss:$208 sps:$4 sm:$0xff]  }
0x1048   :  { %v18286_v57 = vld [vmem:[#allocation16 + $0x143c] ss:$208 sps:$4 sm:$0xff]  }
0x1049   :  { %v18289_v60 = vld [vmem:[#allocation16 + $0x15dc] ss:$208 sps:$4 sm:$0xff]  }
0x104a   :  { %13495 = vmatpush1.bf16.msra.mxu1 %v18221_v61  ;;  %v18287_v61 = vld [vmem:[#allocation16 + $0x15d8] ss:$208 sps:$4 sm:$0xff]  }
0x104b   :  { %13496 = vmatprep.subr.bf16.mxu1 %v18226_v63  ;;  %v18292_v63 = vld [vmem:[#allocation16 + $0x177c] ss:$208 sps:$4 sm:$0xff]  }
0x104e   :  { %13497 = vmatpush1.bf16.msra.mxu1 %v18224_v13  ;;  %v18290_v13 = vld [vmem:[#allocation16 + $0x1778] ss:$208 sps:$4 sm:$0xff]  }
0x104f   :  { %13498 = vmatprep.subr.bf16.mxu1 %v18229_v1  ;;  %v18295_v1 = vld [vmem:[#allocation16 + $0x191c] ss:$208 sps:$4 sm:$0xff]  }
0x1052   :  { %13499 = vmatpush1.bf16.msra.mxu1 %v18227_v2  ;;  %v18293_v2 = vld [vmem:[#allocation16 + $0x1918] ss:$208 sps:$4 sm:$0xff]  }
0x1053   :  { %13500 = vmatprep.subr.bf16.mxu1 %v18232_v3  ;;  %v18298_v3 = vld [vmem:[#allocation16 + $0xcc] ss:$208 sps:$4 sm:$0xff]  }
0x1056   :  { %13501 = vmatpush1.bf16.msra.mxu1 %v18230_v4  ;;  %v18296_v4 = vld [vmem:[#allocation16 + $0xc8] ss:$208 sps:$4 sm:$0xff]  }
0x1057   :  { %13502 = vmatprep.subr.bf16.mxu1 %v18235_v5  ;;  %v18301_v5 = vld [vmem:[#allocation16 + $0x26c] ss:$208 sps:$4 sm:$0xff]  }
0x105a   :  { %13503 = vmatpush1.bf16.msra.mxu1 %v18233_v6  ;;  %v18299_v6 = vld [vmem:[#allocation16 + $0x268] ss:$208 sps:$4 sm:$0xff]  }
0x105b   :  { %13504 = vmatprep.subr.bf16.mxu1 %v18238_v7  ;;  %v18304_v7 = vld [vmem:[#allocation16 + $0x40c] ss:$208 sps:$4 sm:$0xff]  }
0x105e   :  { %13505 = vmatpush1.bf16.msra.mxu1 %v18236_v9  ;;  %v18302_v9 = vld [vmem:[#allocation16 + $0x408] ss:$208 sps:$4 sm:$0xff]  }
0x105f   :  { %13506 = vmatprep.subr.bf16.mxu1 %v18241_v11  ;;  %v18307_v11 = vld [vmem:[#allocation16 + $0x5ac] ss:$208 sps:$4 sm:$0xff]  }
0x1062   :  { %13507 = vmatpush1.bf16.msra.mxu1 %v18239_v12  ;;  %v18305_v12 = vld [vmem:[#allocation16 + $0x5a8] ss:$208 sps:$4 sm:$0xff]  }
0x1063   :  { %13508 = vmatprep.subr.bf16.mxu1 %v18244_v14  ;;  %v18310_v14 = vld [vmem:[#allocation16 + $0x74c] ss:$208 sps:$4 sm:$0xff]  }
0x1066   :  { %13509 = vmatpush1.bf16.msra.mxu1 %v18242_v17  ;;  %v18308_v17 = vld [vmem:[#allocation16 + $0x748] ss:$208 sps:$4 sm:$0xff]  }
0x1067   :  { %13510 = vmatprep.subr.bf16.mxu1 %v18247_v39  ;;  %v21901_v39 = vld [vmem:[%s21989_s13 + $0x28] sm:$0xff] }
0x106a   :  { %13511 = vmatpush1.bf16.msra.mxu1 %v18245_v19  ;;  %v8277_v19 = vrot.slane %v21901_v39, %v21667_v8 }
0x106b   :  { %13523 = vmatprep.subr.bf16.mxu1 %v18250_v20  ;;  %v8281_v20 = vrot.slane %v21901_v39, %v21670_v10  ;;  %v18317_v10 = vld [vmem:[#allocation16 + $0xc28] ss:$208 sps:$4 sm:$0xff]  }
0x106d   :  { %13513 = vmatmul.mubr.bf16.vlgmr.msra.gmra.mrb[100].mxu1 %v21715_v35 }
0x106e   :  { %13524 = vmatpush1.bf16.msra.mxu1 %v18248_v21  ;;  %13555 = vmatprep.mubr.bf16.mxu1 %v21717_v36  ;;  %v18311_v21 = vld [vmem:[#allocation16 + $0x8e8] ss:$208 sps:$4 sm:$0xff]  }
0x106f   :  { %13525 = vmatprep.subr.bf16.mxu1 %v18253_v26  ;;  %v18316_v26 = vld [vmem:[#allocation16 + $0xa8c] ss:$208 sps:$4 sm:$0xff]  }
0x1072   :  { %13526 = vmatpush1.bf16.msra.mxu1 %v18251_v27 }
0x1073   :  { %13527 = vmatprep.subr.bf16.mxu1 %v18256_v28 }
0x1076   :  { %13528 = vmatpush1.bf16.msra.mxu1 %v18254_v29 }
0x1077   :  { %13529 = vmatprep.subr.bf16.mxu1 %v18259_v30 }
0x107a   :  { %13530 = vmatpush1.bf16.msra.mxu1 %v18257_v48 }
0x107b   :  { %13531 = vmatprep.subr.bf16.mxu1 %v18262_v22  ;;  %v18314_v22 = vld [vmem:[#allocation16 + $0xa88] ss:$208 sps:$4 sm:$0xff]  }
0x107e   :  { %13532 = vmatpush1.bf16.msra.mxu1 %v18260_v25 }
0x107f   :  { %13533 = vmatprep.subr.bf16.mxu1 %v18265_v31 }
0x1080   :  { %v13385_v37 = vpop.f32.mrb[88].mxu1 }
0x1081   :  { %v13386_v59 = vadd.f32 %v13385_v37, %v8269_v32  ;;  %v13387_v24 = vpop.f32.mrb[89].mxu1  ;;  %v18323_v37 = vld [vmem:[#allocation16 + $0xf68] ss:$208 sps:$4 sm:$0xff]  }
0x1082   :  { %v13388_v38 = vadd.f32 %v13387_v24, %v8273_v16  ;;  %v13389_v40 = vpop.f32.mrb[90].mxu1  ;;  %13534 = vmatpush1.bf16.msra.mxu1 %v18263_v33  ;;  %v18320_v33 = vld [vmem:[#allocation16 + $0xdc8] ss:$208 sps:$4 sm:$0xff]  }
0x1083   :  { %13690 = vst [vmem:[#allocation21 + $0x130] sm:$0xff] %v13386_v59  ;;  %v13390_v42 = vadd.f32 %v13389_v40, %v8269_v32  ;;  %v13391_v43 = vpop.f32.mrb[91].mxu1  ;;  %13535 = vmatprep.subr.bf16.mxu1 %v18268_v34  ;;  %v18319_v32 = vld [vmem:[#allocation16 + $0xc2c] ss:$208 sps:$4 sm:$0xff]   ;;  %v18326_v24 = vld [vmem:[#allocation16 + $0x1108] ss:$208 sps:$4 sm:$0xff]  }
0x1084   :  { %13691 = vst [vmem:[#allocation21 + $0x138] sm:$0xff] %v13388_v38  ;;  %v13392_v45 = vadd.f32 %v13391_v43, %v8273_v16  ;;  %v18322_v16 = vld [vmem:[#allocation16 + $0xdcc] ss:$208 sps:$4 sm:$0xff]   ;;  %v18329_v40 = vld [vmem:[#allocation16 + $0x12a8] ss:$208 sps:$4 sm:$0xff]  }
0x1085   :  { %13743 = vst [vmem:[#allocation21 + $0x2d0] sm:$0xff] %v13390_v42  ;;  %v18325_v34 = vld [vmem:[#allocation16 + $0xf6c] ss:$208 sps:$4 sm:$0xff]   ;;  %v18332_v42 = vld [vmem:[#allocation16 + $0x1448] ss:$208 sps:$4 sm:$0xff]  }
0x1086   :  { %13744 = vst [vmem:[#allocation21 + $0x2d8] sm:$0xff] %v13392_v45  ;;  %13536 = vmatpush1.bf16.msra.mxu1 %v18266_v41  ;;  %v18328_v59 = vld [vmem:[#allocation16 + $0x110c] ss:$208 sps:$4 sm:$0xff]  }
0x1087   :  { %13537 = vmatprep.subr.bf16.mxu1 %v18271_v44  ;;  %v18331_v38 = vld [vmem:[#allocation16 + $0x12ac] ss:$208 sps:$4 sm:$0xff]   ;;  %v18335_v44 = vld [vmem:[#allocation16 + $0x15e8] ss:$208 sps:$4 sm:$0xff]  }
0x1088   :  { %v18334_v41 = vld [vmem:[#allocation16 + $0x144c] ss:$208 sps:$4 sm:$0xff]  }
0x1089   :  { %v18337_v43 = vld [vmem:[#allocation16 + $0x15ec] ss:$208 sps:$4 sm:$0xff]  }
0x108a   :  { %13538 = vmatpush1.bf16.msra.mxu1 %v18269_v23  ;;  %v18340_v45 = vld [vmem:[#allocation16 + $0x178c] ss:$208 sps:$4 sm:$0xff]   ;;  %v18338_v23 = vld [vmem:[#allocation16 + $0x1788] ss:$208 sps:$4 sm:$0xff]  }
0x108b   :  { %13539 = vmatprep.subr.bf16.mxu1 %v18274_v46  ;;  %v18343_v46 = vld [vmem:[#allocation16 + $0x192c] ss:$208 sps:$4 sm:$0xff]  }
0x108e   :  { %13540 = vmatpush1.bf16.msra.mxu1 %v18272_v47  ;;  %v18341_v47 = vld [vmem:[#allocation16 + $0x1928] ss:$208 sps:$4 sm:$0xff]  }
0x108f   :  { %13541 = vmatprep.subr.bf16.mxu1 %v18277_v49  ;;  %v8285_v49 = vrot.slane %v21901_v39, %v21747_v15 }
0x1092   :  { %13542 = vmatpush1.bf16.msra.mxu1 %v18275_v51  ;;  %v8289_v51 = vrot.slane %v21901_v39, %v21750_v18 }
0x1093   :  { %13543 = vmatprep.subr.bf16.mxu1 %v18280_v53 }
0x1096   :  { %13544 = vmatpush1.bf16.msra.mxu1 %v18278_v54 }
0x1097   :  { %13545 = vmatprep.subr.bf16.mxu1 %v18283_v55 }
0x109a   :  { %13546 = vmatpush1.bf16.msra.mxu1 %v18281_v56 }
0x109b   :  { %13547 = vmatprep.subr.bf16.mxu1 %v18286_v57 }
0x109e   :  { %13548 = vmatpush1.bf16.msra.mxu1 %v18284_v58 }
0x109f   :  { %13549 = vmatprep.subr.bf16.mxu1 %v18289_v60 }
0x10a2   :  { %13550 = vmatpush1.bf16.msra.mxu1 %v18287_v61 }
0x10a3   :  { %13551 = vmatprep.subr.bf16.mxu1 %v18292_v63  ;;  %v8297_v63 = vrot.slane %v21901_v39, %v21762_v0 }
0x10a6   :  { %13552 = vmatpush1.bf16.msra.mxu1 %v18290_v13 }
0x10a7   :  { %13553 = vmatprep.subr.bf16.mxu1 %v18295_v1 }
0x10aa   :  { %13554 = vmatpush1.bf16.msra.mxu1 %v18293_v2 }
0x10ab   :  { %13609 = vmatprep.subr.bf16.mxu1 %v18298_v3 }
0x10ad   :  { %13556 = vmatmul.mubr.bf16.vlgmr.msra.gmra.mrb[104].mxu1 %v21715_v35 }
0x10ae   :  { %13610 = vmatpush1.bf16.msra.mxu1 %v18296_v4  ;;  %13641 = vmatprep.mubr.bf16.mxu1 %v21717_v36  ;;  %v18313_v36 = vld [vmem:[#allocation16 + $0x8ec] ss:$208 sps:$4 sm:$0xff]  }
0x10af   :  { %13611 = vmatprep.subr.bf16.mxu1 %v18301_v5 }
0x10b2   :  { %13612 = vmatpush1.bf16.msra.mxu1 %v18299_v6 }
0x10b3   :  { %13613 = vmatprep.subr.bf16.mxu1 %v18304_v7 }
0x10b6   :  { %13614 = vmatpush1.bf16.msra.mxu1 %v18302_v9 }
0x10b7   :  { %13615 = vmatprep.subr.bf16.mxu1 %v18307_v11 }
0x10ba   :  { %13616 = vmatpush1.bf16.msra.mxu1 %v18305_v12 }
0x10bb   :  { %13617 = vmatprep.subr.bf16.mxu1 %v18310_v14 }
0x10be   :  { %13618 = vmatpush1.bf16.msra.mxu1 %v18308_v17 }
0x10bf   :  { %13619 = vmatprep.subr.bf16.mxu1 %v18313_v36 }
0x10c0   :  { %v13428_v27 = vpop.f32.mrb[92].mxu1 }
0x10c1   :  { %v13429_v28 = vadd.f32 %v13428_v27, %v8277_v19  ;;  %v13430_v29 = vpop.f32.mrb[93].mxu1 }
0x10c2   :  { %v13431_v30 = vadd.f32 %v13430_v29, %v8281_v20  ;;  %v13432_v48 = vpop.f32.mrb[94].mxu1  ;;  %13620 = vmatpush1.bf16.msra.mxu1 %v18311_v21 }
0x10c3   :  { %13692 = vst [vmem:[#allocation21 + $0x140] sm:$0xff] %v13429_v28  ;;  %v13433_v25 = vadd.f32 %v13432_v48, %v8277_v19  ;;  %v13434_v31 = vpop.f32.mrb[95].mxu1  ;;  %13621 = vmatprep.subr.bf16.mxu1 %v18316_v26 }
0x10c4   :  { %13693 = vst [vmem:[#allocation21 + $0x148] sm:$0xff] %v13431_v30  ;;  %v13435_v8 = vadd.f32 %v13434_v31, %v8281_v20 }
0x10c5   :  { %13745 = vst [vmem:[#allocation21 + $0x2e0] sm:$0xff] %v13433_v25 }
0x10c6   :  { %13746 = vst [vmem:[#allocation21 + $0x2e8] sm:$0xff] %v13435_v8  ;;  %13622 = vmatpush1.bf16.msra.mxu1 %v18314_v22 }
0x10c7   :  { %13623 = vmatprep.subr.bf16.mxu1 %v18319_v32 }
0x10ca   :  { %13624 = vmatpush1.bf16.msra.mxu1 %v18317_v10 }
0x10cb   :  { %13625 = vmatprep.subr.bf16.mxu1 %v18322_v16 }
0x10ce   :  { %13626 = vmatpush1.bf16.msra.mxu1 %v18320_v33 }
0x10cf   :  { %13627 = vmatprep.subr.bf16.mxu1 %v18325_v34 }
0x10d2   :  { %13628 = vmatpush1.bf16.msra.mxu1 %v18323_v37 }
0x10d3   :  { %13629 = vmatprep.subr.bf16.mxu1 %v18328_v59 }
0x10d6   :  { %13630 = vmatpush1.bf16.msra.mxu1 %v18326_v24 }
0x10d7   :  { %13631 = vmatprep.subr.bf16.mxu1 %v18331_v38 }
0x10da   :  { %13632 = vmatpush1.bf16.msra.mxu1 %v18329_v40 }
0x10db   :  { %13633 = vmatprep.subr.bf16.mxu1 %v18334_v41 }
0x10de   :  { %13634 = vmatpush1.bf16.msra.mxu1 %v18332_v42 }
0x10df   :  { %13635 = vmatprep.subr.bf16.mxu1 %v18337_v43 }
0x10e2   :  { %13636 = vmatpush1.bf16.msra.mxu1 %v18335_v44 }
0x10e3   :  { %13637 = vmatprep.subr.bf16.mxu1 %v18340_v45 }
0x10e6   :  { %13638 = vmatpush1.bf16.msra.mxu1 %v18338_v23 }
0x10e7   :  { %13639 = vmatprep.subr.bf16.mxu1 %v18343_v46 }
0x10ea   :  { %13640 = vmatpush1.bf16.msra.mxu1 %v18341_v47 }
0x10ed   :  { %13642 = vmatmul.mubr.bf16.vlgmr.msra.gmra.mrb[108].mxu1 %v21715_v35  ;;  %v8293_v35 = vrot.slane %v21901_v39, %v21759_v62 }
0x1100   :  { %v13471_v53 = vpop.f32.mrb[96].mxu1 }
0x1101   :  { %v13472_v54 = vadd.f32 %v13471_v53, %v8285_v49  ;;  %v13473_v55 = vpop.f32.mrb[97].mxu1 }
0x1102   :  { %v13474_v56 = vadd.f32 %v13473_v55, %v8289_v51  ;;  %v13475_v57 = vpop.f32.mrb[98].mxu1 }
0x1103   :  { %13694 = vst [vmem:[#allocation21 + $0x150] sm:$0xff] %v13472_v54  ;;  %v13476_v58 = vadd.f32 %v13475_v57, %v8285_v49  ;;  %v13477_v60 = vpop.f32.mrb[99].mxu1 }
0x1104   :  { %13695 = vst [vmem:[#allocation21 + $0x158] sm:$0xff] %v13474_v56  ;;  %v13478_v61 = vadd.f32 %v13477_v60, %v8289_v51 }
0x1105   :  { %13747 = vst [vmem:[#allocation21 + $0x2f0] sm:$0xff] %v13476_v58 }
0x1106   :  { %13748 = vst [vmem:[#allocation21 + $0x2f8] sm:$0xff] %v13478_v61 }
0x1140   :  { %v13514_v13 = vpop.f32.mrb[100].mxu1 }
0x1141   :  { %v13515_v1 = vadd.f32 %v13514_v13, %v8293_v35  ;;  %v13516_v2 = vpop.f32.mrb[101].mxu1 }
0x1142   :  { %v13517_v3 = vadd.f32 %v13516_v2, %v8297_v63  ;;  %v13518_v4 = vpop.f32.mrb[102].mxu1 }
0x1143   :  { %13696 = vst [vmem:[#allocation21 + $0x160] sm:$0xff] %v13515_v1  ;;  %v13519_v5 = vadd.f32 %v13518_v4, %v8293_v35  ;;  %v13520_v6 = vpop.f32.mrb[103].mxu1 }
0x1144   :  { %13697 = vst [vmem:[#allocation21 + $0x168] sm:$0xff] %v13517_v3  ;;  %v13521_v7 = vadd.f32 %v13520_v6, %v8297_v63 }
0x1145   :  { %13749 = vst [vmem:[#allocation21 + $0x300] sm:$0xff] %v13519_v5 }
0x1146   :  { %13750 = vst [vmem:[#allocation21 + $0x308] sm:$0xff] %v13521_v7 }
0x1147   :  { %18568 = shalt.err (!%p18565_p6)
}
0x1148   :  { %s18569_s22 = scalar_lea.hbm %s21991_s15, 32 }
0x1149   :  { %p18570_p7 = scmp.ne.s32.totalorder %s21991_s15, %s18569_s22  ;;  %p18573_p8 = scmp.lt.u32.totalorder %s18569_s22, %s21991_s15 }
0x114b   :  { %p18575_p9 = pnand %p18573_p8, %p18570_p7 }
0x114d   :  { %18578 = shalt.err (!%p18575_p9)
}
0x114e   :  { %13776 = dma.vmem_to_hbm [thread:$0]  %s13774_s24, 32, %s21991_s15, [#allocation19]  }
0x114f   :  { %s18579_s23 = scalar_lea.vmem %s13764_s25, 32  ;;  %p18584_p11 = scmp.lt.s32.totalorder %s13764_s25, %s13764_s25 }
0x1150   :  { %p18580_p10 = scmp.ne.s32.totalorder %s13764_s25, %s18579_s23  ;;  %p18585_p12 = scmp.lt.s32.totalorder %s18579_s23, %s18579_s23 }
0x1152   :  { %p18586_p13 = por %p18585_p12, %p18584_p11 }
0x1154   :  { %p18587_p0 = pnand %p18586_p13, %p18580_p10 }
0x1156   :  { %18590 = shalt.err (!%p18587_p0)
}
0x1157   :  { %s18591_s8 = scalar_lea.hbm %s21990_s14, 32 }
0x1158   :  { %p18592_p1 = scmp.ne.s32.totalorder %s21990_s14, %s18591_s8  ;;  %p18595_p2 = scmp.lt.u32.totalorder %s18591_s8, %s21990_s14 }
0x115a   :  { %p18597_p3 = pnand %p18595_p2, %p18592_p1 }
0x115c   :  { %18600 = shalt.err (!%p18597_p3)
}
0x115d   :  { %13766 = dma.vmem_to_hbm [thread:$0]  %s13764_s25, 32, %s21990_s14, [#allocation4]  }
0x115e   :  { %s18679_s9 = smov [#allocation20]  }
0x115f   :  { %s13782_s30 = sshll.u32 %s18679_s9, 4  ;;  %s13783_s30 = int_to_ptr.vmem [resolvable:$true] %s13782_s30 }
0x1160   :  { %s18601_s18 = scalar_lea.vmem %s13783_s30, 256  ;;  %p18606_p5 = scmp.lt.s32.totalorder %s13783_s30, %s13783_s30 }
0x1161   :  { %p18602_p4 = scmp.ne.s32.totalorder %s13783_s30, %s18601_s18  ;;  %p18607_p6 = scmp.lt.s32.totalorder %s18601_s18, %s18601_s18 }
0x1163   :  { %p18608_p7 = por %p18607_p6, %p18606_p5 }
0x1165   :  { %p18609_p8 = pnand %p18608_p7, %p18602_p4 }
0x1167   :  { %18612 = shalt.err (!%p18609_p8)
}
0x1168   :  { %s18613_s4 = scalar_lea.hbm %s21992_s16, 256 }
0x1169   :  { %p18614_p9 = scmp.ne.s32.totalorder %s21992_s16, %s18613_s4  ;;  %p18617_p10 = scmp.lt.u32.totalorder %s18613_s4, %s21992_s16 }
0x116b   :  { %p18619_p11 = pnand %p18617_p10, %p18614_p9 }
0x116d   :  { %18622 = shalt.err (!%p18619_p11)
}
0x116e   :  { %13788 = dma.vmem_to_hbm [thread:$0]  %s13783_s30, 256, %s21992_s16, [#allocation19], %s18662_s1, %s18662_s1, %s18663_s20   ;;  %v8301_v62 = vrot.slane %v21901_v39, %v21771_v50  ;;  %v8305_v0 = vrot.slane %v21901_v39, %v21774_v52  ;;  %vm13703_vm2 = vcmask 269312  }
0x116f   :  { %v18358_v21 = vld [vmem:[%s21989_s13 + $0x30] sm:$0xf]  ;;  %s18680_s1 = smov [#allocation21]  }
0x1170   :  { %v8317_v50 = vrot.slane %v18358_v21, %v21747_v15  ;;  %v8321_v52 = vrot.slane %v18358_v21, %v21750_v18  ;;  %s13794_s20 = sshll.u32 %s18680_s1, 4  ;;  %s13795_s20 = int_to_ptr.vmem [resolvable:$true] %s13794_s20 }
0x1171   :  { %s18623_s13 = scalar_lea.vmem %s13795_s20, 13312  ;;  %p18628_p13 = scmp.lt.s32.totalorder %s13795_s20, %s13795_s20 }
0x1172   :  { %p18624_p12 = scmp.ne.s32.totalorder %s13795_s20, %s18623_s13  ;;  %p18629_p0 = scmp.lt.s32.totalorder %s18623_s13, %s18623_s13 }
0x1174   :  { %p18630_p1 = por %p18629_p0, %p18628_p13 }
0x1176   :  { %p18631_p2 = pnand %p18630_p1, %p18624_p12 }
0x1180   :  { %v13557_v9 = vpop.f32.mrb[104].mxu1 }
0x1181   :  { %v13558_v11 = vadd.f32 %v13557_v9, %v8301_v62  ;;  %v13559_v12 = vpop.f32.mrb[105].mxu1 }
0x1182   :  { %v13560_v14 = vadd.f32 %v13559_v12, %v8305_v0  ;;  %v13561_v17 = vpop.f32.mrb[106].mxu1 }
0x1183   :  { %13698 = vst [vmem:[#allocation21 + $0x170] sm:$0xff] %v13558_v11  ;;  %v13562_v36 = vadd.f32 %v13561_v17, %v8301_v62  ;;  %v13563_v19 = vpop.f32.mrb[107].mxu1 }
0x1184   :  { %13699 = vst [vmem:[#allocation21 + $0x178] sm:$0xff] %v13560_v14  ;;  %v13564_v20 = vadd.f32 %v13563_v19, %v8305_v0 }
0x1185   :  { %13751 = vst [vmem:[#allocation21 + $0x310] sm:$0xff] %v13562_v36 }
0x1186   :  { %13752 = vst [vmem:[#allocation21 + $0x318] sm:$0xff] %v13564_v20 }
0x11c0   :  { %v13643_v39 = vpop.f32.mrb[108].mxu1 }
0x11c1   :  { %v13644_v26 = vadd.f32 %v13643_v39, %v8317_v50  ;;  %v13645_v27 = vpop.f32.mrb[109].mxu1 }
0x11c2   :  { %v13646_v28 = vadd.f32 %v13645_v27, %v8321_v52  ;;  %v13647_v29 = vpop.f32.mrb[110].mxu1 }
0x11c3   :  { %13702 = vst [vmem:[#allocation21 + $0x190] sm:$0xff] %v13644_v26  ;;  %v13648_v30 = vadd.f32 %v13647_v29, %v8317_v50  ;;  %v13649_v48 = vpop.f32.mrb[111].mxu1 }
0x11c4   :  { %13704 = vst.msk [vmem:[#allocation21 + $0x198] sm:$0xff] %vm13703_vm2, %v13646_v28  ;;  %v13650_v22 = vadd.f32 %v13649_v48, %v8321_v52 }
0x11c5   :  { %13755 = vst [vmem:[#allocation21 + $0x330] sm:$0xff] %v13648_v30 }
0x11c6   :  { %13756 = vst.msk [vmem:[#allocation21 + $0x338] sm:$0xff] %vm13703_vm2, %v13650_v22 }
0x11c7   :  { %18634 = shalt.err (!%p18631_p2)
}
0x11c8   :  { %s22002_s11 = sld [smem:[#allocation33_spill]] }
0x11ce   :  { %s18635_s19 = scalar_lea.hbm %s22002_s11, 13312 }
0x11cf   :  { %p18636_p3 = scmp.ne.s32.totalorder %s22002_s11, %s18635_s19  ;;  %p18639_p4 = scmp.lt.u32.totalorder %s18635_s19, %s22002_s11 }
0x11d1   :  { %p18641_p5 = pnand %p18639_p4, %p18636_p3 }
0x11d3   :  { %18644 = shalt.err (!%p18641_p5)
}
0x11d4   :  { %s18681_s27 = smov 6656   ;;  %s18682_s5 = smov 416  }
0x11d5   :  { %13800 = dma.vmem_to_hbm [thread:$0]  %s13795_s20, 13312, %s22002_s11, [#allocation22], %s18681_s27, %s18681_s27, %s18682_s5  }
0x11d6   :  { %18655 = dma.done.wait [#allocation4], 32  }
0x11d7   :  { %18656 = vsyncadd [#allocation4], 4294967264 }
0x11d8   :  { %18657 = dma.done.wait [#allocation19], 288  }
0x11d9   :  { %18658 = vsyncadd [#allocation19], 4294967008 }
0x11da   :  { %18659 = dma.done.wait [#allocation22], 13312  }
0x11db   :  { %18660 = vsyncadd [#allocation22], 4294953984 }
0x11dc   :  { %13813 = vsyncpa [#allocation3], 1 }
0x11dd   :  { %13814 = vsyncpa [#allocation6], 1 }
0x11de   :  { %13815 = vsyncpa [#allocation9], 1 }
0x11df   :  { %13816 = vsyncpa [#allocation12], 1 }
0x11e0   :  { %13817 = vsyncpa [#allocation15], 1 }
0x11e1   :  { %13818 = vsyncpa [#allocation4], 1 }
0x11e2   :  { %13819 = vsyncpa [#allocation19], 1 }
0x11e3   :  { %13820 = vsyncpa [#allocation22], 1 }

</bundles_post_ra>
